<compile_context>
chip_gen: v6e
topology: v6e:2x2x1
jax: 0.10.0
libtpu: 0.0.40
codegen_flags: <defaults>
</compile_context>

<pallas_src>
import numpy as np
import jax
import jax.numpy as jnp
from jax import lax
from jax.experimental import pallas as pl
from jax.experimental.pallas import tpu as pltpu

# ----------------------- module hyper-parameters (small) --------------------
NUM_HEADS = 4
EMBED_DIM = 32
HEAD_DIM = EMBED_DIM // NUM_HEADS
NUM_REF_POINTS = 2
NUM_Z_REF_POINTS = 2
NUM_VIEWS = 2
NUM_LEVELS = 2
OFFSET_SCALE = 1.0
ALL_POINTS = NUM_REF_POINTS * NUM_Z_REF_POINTS
ATTN_OUT = NUM_VIEWS * NUM_HEADS * NUM_LEVELS * NUM_REF_POINTS * NUM_Z_REF_POINTS

# static multi-scale feature-map spatial shapes (value_spatial_shapes)
SPATIAL_SHAPES = ((8, 8), (4, 4))
LEVEL_SIZES = tuple(h * w for h, w in SPATIAL_SHAPES)
LEVEL_STARTS = tuple(int(sum(LEVEL_SIZES[:i])) for i in range(NUM_LEVELS))
VALUE_LEN = int(sum(LEVEL_SIZES))
K_TOTAL = NUM_VIEWS * VALUE_LEN                       # views folded into K

# packed per-sample field layout: [y0, y1, wy0, wy1, x0, x1, wx0, wx1]
#   wy0 = attn*(1-fy), wy1 = attn*fy   (attention folded into the row weights)
#   wx0 = (1-fx),      wx1 = fx
NFIELD = 8
NF_PACKED = NUM_VIEWS * NUM_LEVELS * NFIELD * ALL_POINTS    # = 128


# ------------------- deformable sampling / aggregation kernel ---------------
def _deform_kernel(fmap_ref, samp_ref, wout_ref, o_ref, s_ref):
    # fmap_ref : (1, H, HEAD_DIM, K_TOTAL)   projected value, view-concat on K
    # samp_ref : (1, H, NF_PACKED, Q)        packed bilinear fields, Q in lane
    # wout_ref : (E, E)                      out_fc weight (in, out)
    # o_ref    : (1, Q, E)                   final module output block
    # s_ref    : (H, K_TOTAL, Q) scratch     sparse sampling matrix S
    q_len = o_ref.shape[1]

    # ---- build S[h, k, q] with separable (row x col) weighted one-hots ----
    for v in range(NUM_VIEWS):
        for l in range(NUM_LEVELS):
            hl, wl = SPATIAL_SHAPES[l]
            hw = hl * wl
            base = (v * NUM_LEVELS + l) * NFIELD * ALL_POINTS

            def fld(f, _base=base):
                s = _base + f * ALL_POINTS
                return samp_ref[0, :, s:s + ALL_POINTS, :]        # (H, AP, Q)

            y0, y1, wy0, wy1 = fld(0), fld(1), fld(2), fld(3)
            x0, x1, wx0, wx1 = fld(4), fld(5), fld(6), fld(7)

            ioy = lax.broadcasted_iota(jnp.int32, (1, 1, hl, 1), 2)
            iox = lax.broadcasted_iota(jnp.int32, (1, 1, wl, 1), 2)
            ioy = ioy.astype(jnp.float32)
            iox = iox.astype(jnp.float32)

            # weighted row / column one-hots: (H, AP, hl, Q) / (H, AP, wl, Q)
            ry = (jnp.where(y0[:, :, None, :] == ioy, wy0[:, :, None, :], 0.0)
                  + jnp.where(y1[:, :, None, :] == ioy, wy1[:, :, None, :], 0.0))
            cx = (jnp.where(x0[:, :, None, :] == iox, wx0[:, :, None, :], 0.0)
                  + jnp.where(x1[:, :, None, :] == iox, wx1[:, :, None, :], 0.0))

            # outer product rows x cols, summed over the sample points
            blk = jnp.zeros((NUM_HEADS, hl, wl, q_len), jnp.float32)
            for p in range(ALL_POINTS):
                blk = blk + ry[:, p, :, None, :] * cx[:, p, None, :, :]

            kstart = v * VALUE_LEN + LEVEL_STARTS[l]
            s_ref[:, kstart:kstart + hw, :] = blk.reshape(NUM_HEADS, hw, q_len)

    # ---- single batched MXU contraction over K (views + levels + corners) --
    agg = lax.dot_general(
        fmap_ref[0], s_ref[...],
        dimension_numbers=(((2,), (1,)), ((0,), (0,))),
        preferred_element_type=jnp.float32)                    # (H, HEAD_DIM, Q)
    agg = agg.reshape(EMBED_DIM, q_len)                        # (E, Q)

    # ---- fused out_fc: (E, Q)^T @ (E, E) -> (Q, E), lane-dense store --------
    out = lax.dot_general(
        agg, wout_ref[...],
        dimension_numbers=(((0,), (0,)), ((), ())),
        preferred_element_type=jnp.float32)                    # (Q, E)
    o_ref[...] = out[None].astype(o_ref.dtype)


def deformable_aggregate(fmap, samp, out_w):
    """fmap: (N,H,HD,K), samp: (N,H,NF,Q), out_w: (E,E) -> (N, Q, E)."""
    n, _, _, k_total = fmap.shape
    q_len = samp.shape[3]
    nf = samp.shape[2]
    return pl.pallas_call(
        _deform_kernel,
        out_shape=jax.ShapeDtypeStruct((n, q_len, EMBED_DIM), jnp.float32),
        grid_spec=pltpu.PrefetchScalarGridSpec(
            num_scalar_prefetch=0,
            grid=(n,),
            in_specs=[
                pl.BlockSpec((1, NUM_HEADS, HEAD_DIM, k_total),
                             lambda b: (b, 0, 0, 0)),
                pl.BlockSpec((1, NUM_HEADS, nf, q_len),
                             lambda b: (b, 0, 0, 0)),
                pl.BlockSpec((EMBED_DIM, EMBED_DIM), lambda b: (0, 0)),
            ],
            out_specs=pl.BlockSpec((1, q_len, EMBED_DIM), lambda b: (b, 0, 0)),
            scratch_shapes=[pltpu.VMEM((NUM_HEADS, k_total, q_len), jnp.float32)],
        ),
        compiler_params=pltpu.CompilerParams(
            dimension_semantics=("parallel",)),
    )(fmap, samp, out_w)


# ------------------------------- parameters ---------------------------------
def init_params(key):
    ks = jax.random.split(key, 6)
    s = 0.02
    return {
        # weights stored as (in, out) so x @ w == x @ W_torch.T
        "v_w": jax.random.normal(ks[0], (EMBED_DIM, EMBED_DIM), jnp.float32) * s,
        "off_w": jax.random.normal(ks[1], (EMBED_DIM, ATTN_OUT * 2), jnp.float32) * s,
        "off_b": jax.random.normal(ks[2], (1, ATTN_OUT * 2), jnp.float32) * s,
        "attn_w": jax.random.normal(ks[3], (EMBED_DIM, ATTN_OUT), jnp.float32) * s,
        "attn_b": jax.random.normal(ks[4], (1, ATTN_OUT), jnp.float32) * s,
        "out_w": jax.random.normal(ks[5], (EMBED_DIM, EMBED_DIM), jnp.float32) * s,
    }


# --------------------- wrapper-side preprocessing (XLA) ----------------------
def _prepare_kernel_inputs(params, queries, ref_points, value):
    """Projections, softmax and bilinear-corner packing (all tiny, fused by XLA)."""
    n, q_len, _ = queries.shape
    v = value.shape[1]
    q2d = queries.reshape(n * q_len, EMBED_DIM)

    # offsets_fc + attn_fc fused into a single projection
    w_cat = jnp.concatenate([params["off_w"], params["attn_w"]], axis=1)
    b_cat = jnp.concatenate([params["off_b"], params["attn_b"]], axis=1)
    proj = q2d @ w_cat + b_cat
    offsets = OFFSET_SCALE * jnp.tanh(proj[:, :ATTN_OUT * 2])
    attn = proj[:, ATTN_OUT * 2:]

    offsets = offsets.reshape(n, q_len, v, NUM_HEADS, NUM_LEVELS,
                              NUM_REF_POINTS, NUM_Z_REF_POINTS, 2)
    attn = jax.nn.softmax(
        attn.reshape(n, q_len, v, NUM_HEADS, NUM_LEVELS * ALL_POINTS), axis=-1)
    attn = attn.reshape(n, q_len, v, NUM_HEADS, NUM_LEVELS,
                        NUM_REF_POINTS, NUM_Z_REF_POINTS)

    sample_locs = jnp.clip(ref_points[:, :, :, None, :, None, :, :] + offsets,
                           -1.0, 1.0)                     # (N,Q,V,H,L,P,Z,2)

    # V_fc + head-major / view-concatenated layout (N, H, HEAD_DIM, V*VALUE_LEN)
    value_proj = value.reshape(n * v * VALUE_LEN, EMBED_DIM) @ params["v_w"]
    value_proj = value_proj.reshape(n, v, VALUE_LEN, NUM_HEADS, HEAD_DIM)
    fmap = jnp.transpose(value_proj, (0, 3, 4, 1, 2)).reshape(
        n, NUM_HEADS, HEAD_DIM, v * VALUE_LEN)

    # pack per-sample bilinear fields with Q in the lane dim
    locs = jnp.transpose(sample_locs, (0, 3, 2, 4, 5, 6, 7, 1)).reshape(
        n, NUM_HEADS, v, NUM_LEVELS, ALL_POINTS, 2, q_len)
    attn_t = jnp.transpose(attn, (0, 3, 2, 4, 5, 6, 1)).reshape(
        n, NUM_HEADS, v, NUM_LEVELS, ALL_POINTS, q_len)
    lx = locs[..., 0, :]
    ly = locs[..., 1, :]

    per_level = []
    for l in range(NUM_LEVELS):
        hl, wl = SPATIAL_SHAPES[l]
        x = (lx[:, :, :, l] + 1.0) * 0.5 * float(wl - 1)   # align_corners=True
        y = (ly[:, :, :, l] + 1.0) * 0.5 * float(hl - 1)
        a = attn_t[:, :, :, l]
        x0 = jnp.floor(x)
        y0 = jnp.floor(y)
        fx = x - x0
        fy = y - y0
        # border clamp == zeros padding here because locs are clipped to [-1,1]
        x1 = jnp.minimum(x0 + 1.0, float(wl - 1))
        y1 = jnp.minimum(y0 + 1.0, float(hl - 1))
        per_level.append(jnp.stack(
            [y0, y1, a * (1.0 - fy), a * fy, x0, x1, 1.0 - fx, fx], axis=3))
    samp = jnp.stack(per_level, axis=3)                    # (N,H,V,L,8,AP,Q)
    samp = samp.reshape(n, NUM_HEADS, NF_PACKED, q_len)
    return fmap, samp


# ------------------------------ forward (Pallas) -----------------------------
@jax.jit
def multiview_deformable_attention(params, queries, ref_points, value):
    fmap, samp = _prepare_kernel_inputs(params, queries, ref_points, value)
    # kernel does sampling, aggregation over views/levels/points, head merge
    # and the final out_fc (dropout = identity at inference)
    return deformable_aggregate(fmap, samp, params["out_w"])


# --------------------------- pure-JAX reference ------------------------------
def reference_forward(params, queries, ref_points, value):
    n, q_len, _ = queries.shape
    v = value.shape[1]
    q2d = queries.reshape(n * q_len, EMBED_DIM)

    offsets = jnp.tanh(q2d @ params["off_w"] + params["off_b"])
    offsets = OFFSET_SCALE * offsets.reshape(
        n, q_len, v, NUM_HEADS, NUM_LEVELS, NUM_REF_POINTS, NUM_Z_REF_POINTS, 2)
    attn = q2d @ params["attn_w"] + params["attn_b"]
    attn = jax.nn.softmax(attn.reshape(n, q_len, v, NUM_HEADS,
                                       NUM_LEVELS * ALL_POINTS), axis=-1)
    attn = attn.reshape(n, q_len, v, NUM_HEADS, NUM_LEVELS,
                        NUM_REF_POINTS, NUM_Z_REF_POINTS)
    value_proj = (value.reshape(n * v * VALUE_LEN, EMBED_DIM) @ params["v_w"]
                  ).reshape(n, v, VALUE_LEN, NUM_HEADS, HEAD_DIM)
    sample_locs = jnp.clip(ref_points[:, :, :, None, :, None, :, :] + offsets,
                           -1.0, 1.0)

    value_bf = jnp.transpose(value_proj, (0, 1, 3, 4, 2))    # (N,V,H,D,S)
    attn_k = jnp.transpose(attn, (0, 2, 3, 4, 1, 5, 6)).reshape(
        n, v, NUM_HEADS, NUM_LEVELS, q_len, ALL_POINTS)
    locs_k = jnp.transpose(sample_locs, (0, 2, 3, 4, 1, 5, 6, 7)).reshape(
        n, v, NUM_HEADS, NUM_LEVELS, q_len, ALL_POINTS, 2)

    out = jnp.zeros((n, v, NUM_HEADS, HEAD_DIM, q_len), jnp.float32)
    for lvl in range(NUM_LEVELS):
        hl, wl = SPATIAL_SHAPES[lvl]
        start = LEVEL_STARTS[lvl]
        fmap = value_bf[..., start:start + hl * wl]
        lx = locs_k[:, :, :, lvl, :, :, 0]
        ly = locs_k[:, :, :, lvl, :, :, 1]
        aw = attn_k[:, :, :, lvl]
        x = (lx + 1.0) * 0.5 * (wl - 1)
        y = (ly + 1.0) * 0.5 * (hl - 1)
        x0 = jnp.floor(x); y0 = jnp.floor(y)
        fx = x - x0; fy = y - y0
        x0i = x0.astype(jnp.int32); y0i = y0.astype(jnp.int32)
        x1i = jnp.minimum(x0i + 1, wl - 1); y1i = jnp.minimum(y0i + 1, hl - 1)
        sampled = jnp.zeros((n, v, NUM_HEADS, HEAD_DIM, q_len, ALL_POINTS),
                            jnp.float32)
        for yi, xi, w in ((y0i, x0i, (1 - fy) * (1 - fx)),
                          (y0i, x1i, (1 - fy) * fx),
                          (y1i, x0i, fy * (1 - fx)),
                          (y1i, x1i, fy * fx)):
            flat = (yi * wl + xi).reshape(n, v, NUM_HEADS, 1, q_len * ALL_POINTS)
            flat = jnp.broadcast_to(flat, (n, v, NUM_HEADS, HEAD_DIM,
                                           q_len * ALL_POINTS))
            g = jnp.take_along_axis(fmap, flat, axis=-1)
            g = g.reshape(n, v, NUM_HEADS, HEAD_DIM, q_len, ALL_POINTS)
            sampled = sampled + g * w[:, :, :, None, :, :]
        out = out + jnp.sum(sampled * aw[:, :, :, None, :, :], axis=-1)
    out = jnp.sum(out, axis=1)                                 # sum over views
    out = out.reshape(n, EMBED_DIM, q_len).transpose(0, 2, 1)
    out = (out.reshape(n * q_len, EMBED_DIM) @ params["out_w"]
           ).reshape(n, q_len, EMBED_DIM)
    return out


# ------------------------------------ main -----------------------------------
if __name__ == "__main__":
    key = jax.random.PRNGKey(0)
    kp, kq, kr, kv = jax.random.split(key, 4)
    params = init_params(kp)

    N, Q = 2, 8
    queries = jax.random.normal(kq, (N, Q, EMBED_DIM), jnp.float32)
    ref_points = jax.random.uniform(
        kr, (N, Q, NUM_VIEWS, NUM_LEVELS, NUM_Z_REF_POINTS, 2),
        jnp.float32, minval=-1.0, maxval=1.0)
    value = jax.random.normal(kv, (N, NUM_VIEWS, VALUE_LEN, EMBED_DIM), jnp.float32)

    out = multiview_deformable_attention(params, queries, ref_points, value)
    out = jax.block_until_ready(out)
    assert out.shape == (N, Q, EMBED_DIM)

    ref = reference_forward(params, queries, ref_points, value)
    np.testing.assert_allclose(np.asarray(out), np.asarray(ref),
                               atol=1e-3, rtol=1e-2)
    print("KERNEL_OK")
</pallas_src>

<mosaic_0001>
module attributes {stable_mosaic.version = 11 : i64} {
  func.func @_deform_kernel(%arg0: i32, %arg1: memref<1x4x8x160xf32, #tpu.memory_space<vmem>>, %arg2: memref<1x4x128x8xf32, #tpu.memory_space<vmem>>, %arg3: memref<32x32xf32, #tpu.memory_space<vmem>>, %arg4: memref<1x8x32xf32, #tpu.memory_space<vmem>>, %arg5: memref<4x160x8xf32, #tpu.memory_space<vmem>>) attributes {dimension_semantics = [#tpu.dimension_semantics<parallel>], iteration_bounds = array<i64: 2>, scalar_prefetch = 0 : i64, scratch_operands = 1 : i64, tpu.core_type = #tpu.core_type<tc>, window_params = [{transform_indices = @transform_0, window_bounds = array<i64: 1, 4, 8, 160>}, {transform_indices = @transform_1, window_bounds = array<i64: 1, 4, 128, 8>}, {pipeline_mode = #tpu.pipeline_mode<synchronous>, transform_indices = @transform_2, window_bounds = array<i64: 32, 32>}, {transform_indices = @transform_3, window_bounds = array<i64: 1, 8, 32>}]} {
    %c0 = arith.constant 0 : index
    %c0_0 = arith.constant 0 : index
    %c0_1 = arith.constant 0 : index
    %c0_2 = arith.constant 0 : index
    %0 = vector.load %arg2[%c0, %c0_0, %c0_1, %c0_2] : memref<1x4x128x8xf32, #tpu.memory_space<vmem>>, vector<1x4x4x8xf32>
    %1 = vector.shape_cast %0 : vector<1x4x4x8xf32> to vector<4x4x8xf32>
    %c0_3 = arith.constant 0 : index
    %c0_4 = arith.constant 0 : index
    %c4 = arith.constant 4 : index
    %c0_5 = arith.constant 0 : index
    %2 = vector.load %arg2[%c0_3, %c0_4, %c4, %c0_5] : memref<1x4x128x8xf32, #tpu.memory_space<vmem>>, vector<1x4x4x8xf32>
    %3 = vector.shape_cast %2 : vector<1x4x4x8xf32> to vector<4x4x8xf32>
    %c0_6 = arith.constant 0 : index
    %c0_7 = arith.constant 0 : index
    %c8 = arith.constant 8 : index
    %c0_8 = arith.constant 0 : index
    %4 = vector.load %arg2[%c0_6, %c0_7, %c8, %c0_8] : memref<1x4x128x8xf32, #tpu.memory_space<vmem>>, vector<1x4x4x8xf32>
    %5 = vector.shape_cast %4 : vector<1x4x4x8xf32> to vector<4x4x8xf32>
    %c0_9 = arith.constant 0 : index
    %c0_10 = arith.constant 0 : index
    %c12 = arith.constant 12 : index
    %c0_11 = arith.constant 0 : index
    %6 = vector.load %arg2[%c0_9, %c0_10, %c12, %c0_11] : memref<1x4x128x8xf32, #tpu.memory_space<vmem>>, vector<1x4x4x8xf32>
    %7 = vector.shape_cast %6 : vector<1x4x4x8xf32> to vector<4x4x8xf32>
    %c0_12 = arith.constant 0 : index
    %c0_13 = arith.constant 0 : index
    %c16 = arith.constant 16 : index
    %c0_14 = arith.constant 0 : index
    %8 = vector.load %arg2[%c0_12, %c0_13, %c16, %c0_14] : memref<1x4x128x8xf32, #tpu.memory_space<vmem>>, vector<1x4x4x8xf32>
    %9 = vector.shape_cast %8 : vector<1x4x4x8xf32> to vector<4x4x8xf32>
    %c0_15 = arith.constant 0 : index
    %c0_16 = arith.constant 0 : index
    %c20 = arith.constant 20 : index
    %c0_17 = arith.constant 0 : index
    %10 = vector.load %arg2[%c0_15, %c0_16, %c20, %c0_17] : memref<1x4x128x8xf32, #tpu.memory_space<vmem>>, vector<1x4x4x8xf32>
    %11 = vector.shape_cast %10 : vector<1x4x4x8xf32> to vector<4x4x8xf32>
    %c0_18 = arith.constant 0 : index
    %c0_19 = arith.constant 0 : index
    %c24 = arith.constant 24 : index
    %c0_20 = arith.constant 0 : index
    %12 = vector.load %arg2[%c0_18, %c0_19, %c24, %c0_20] : memref<1x4x128x8xf32, #tpu.memory_space<vmem>>, vector<1x4x4x8xf32>
    %13 = vector.shape_cast %12 : vector<1x4x4x8xf32> to vector<4x4x8xf32>
    %c0_21 = arith.constant 0 : index
    %c0_22 = arith.constant 0 : index
    %c28 = arith.constant 28 : index
    %c0_23 = arith.constant 0 : index
    %14 = vector.load %arg2[%c0_21, %c0_22, %c28, %c0_23] : memref<1x4x128x8xf32, #tpu.memory_space<vmem>>, vector<1x4x4x8xf32>
    %15 = vector.shape_cast %14 : vector<1x4x4x8xf32> to vector<4x4x8xf32>
    %16 = tpu.iota {dimensions = array<i32: 2>} : vector<1x1x8x1xi32>
    %17 = tpu.iota {dimensions = array<i32: 2>} : vector<1x1x8x1xi32>
    %18 = arith.sitofp %16 : vector<1x1x8x1xi32> to vector<1x1x8x1xf32>
    %19 = arith.sitofp %17 : vector<1x1x8x1xi32> to vector<1x1x8x1xf32>
    %20 = vector.shape_cast %1 : vector<4x4x8xf32> to vector<4x4x1x8xf32>
    %21 = vector.broadcast %20 : vector<4x4x1x8xf32> to vector<4x4x8x8xf32>
    %22 = vector.broadcast %18 : vector<1x1x8x1xf32> to vector<4x4x8x8xf32>
    %23 = arith.cmpf oeq, %21, %22 : vector<4x4x8x8xf32>
    %24 = vector.shape_cast %5 : vector<4x4x8xf32> to vector<4x4x1x8xf32>
    %cst = arith.constant 0.000000e+00 : f32
    %25 = vector.shape_cast %24 : vector<4x4x1x8xf32> to vector<4x4x1x8xf32>
    %26 = vector.broadcast %25 : vector<4x4x1x8xf32> to vector<4x4x8x8xf32>
    %27 = vector.broadcast %cst : f32 to vector<4x4x8x8xf32>
    %28 = arith.select %23, %26, %27 : vector<4x4x8x8xi1>, vector<4x4x8x8xf32>
    %29 = vector.shape_cast %3 : vector<4x4x8xf32> to vector<4x4x1x8xf32>
    %30 = vector.broadcast %29 : vector<4x4x1x8xf32> to vector<4x4x8x8xf32>
    %31 = vector.broadcast %18 : vector<1x1x8x1xf32> to vector<4x4x8x8xf32>
    %32 = arith.cmpf oeq, %30, %31 : vector<4x4x8x8xf32>
    %33 = vector.shape_cast %7 : vector<4x4x8xf32> to vector<4x4x1x8xf32>
    %cst_24 = arith.constant 0.000000e+00 : f32
    %34 = vector.shape_cast %33 : vector<4x4x1x8xf32> to vector<4x4x1x8xf32>
    %35 = vector.broadcast %34 : vector<4x4x1x8xf32> to vector<4x4x8x8xf32>
    %36 = vector.broadcast %cst_24 : f32 to vector<4x4x8x8xf32>
    %37 = arith.select %32, %35, %36 : vector<4x4x8x8xi1>, vector<4x4x8x8xf32>
    %38 = arith.addf %28, %37 : vector<4x4x8x8xf32>
    %39 = vector.shape_cast %9 : vector<4x4x8xf32> to vector<4x4x1x8xf32>
    %40 = vector.broadcast %39 : vector<4x4x1x8xf32> to vector<4x4x8x8xf32>
    %41 = vector.broadcast %19 : vector<1x1x8x1xf32> to vector<4x4x8x8xf32>
    %42 = arith.cmpf oeq, %40, %41 : vector<4x4x8x8xf32>
    %43 = vector.shape_cast %13 : vector<4x4x8xf32> to vector<4x4x1x8xf32>
    %cst_25 = arith.constant 0.000000e+00 : f32
    %44 = vector.shape_cast %43 : vector<4x4x1x8xf32> to vector<4x4x1x8xf32>
    %45 = vector.broadcast %44 : vector<4x4x1x8xf32> to vector<4x4x8x8xf32>
    %46 = vector.broadcast %cst_25 : f32 to vector<4x4x8x8xf32>
    %47 = arith.select %42, %45, %46 : vector<4x4x8x8xi1>, vector<4x4x8x8xf32>
    %48 = vector.shape_cast %11 : vector<4x4x8xf32> to vector<4x4x1x8xf32>
    %49 = vector.broadcast %48 : vector<4x4x1x8xf32> to vector<4x4x8x8xf32>
    %50 = vector.broadcast %19 : vector<1x1x8x1xf32> to vector<4x4x8x8xf32>
    %51 = arith.cmpf oeq, %49, %50 : vector<4x4x8x8xf32>
    %52 = vector.shape_cast %15 : vector<4x4x8xf32> to vector<4x4x1x8xf32>
    %cst_26 = arith.constant 0.000000e+00 : f32
    %53 = vector.shape_cast %52 : vector<4x4x1x8xf32> to vector<4x4x1x8xf32>
    %54 = vector.broadcast %53 : vector<4x4x1x8xf32> to vector<4x4x8x8xf32>
    %55 = vector.broadcast %cst_26 : f32 to vector<4x4x8x8xf32>
    %56 = arith.select %51, %54, %55 : vector<4x4x8x8xi1>, vector<4x4x8x8xf32>
    %57 = arith.addf %47, %56 : vector<4x4x8x8xf32>
    %cst_27 = arith.constant 0.000000e+00 : f32
    %58 = vector.broadcast %cst_27 : f32 to vector<4x8x8x8xf32>
    %59 = vector.extract_strided_slice %38 {offsets = [0, 0, 0, 0], sizes = [4, 1, 8, 8], strides = [1, 1, 1, 1]} : vector<4x4x8x8xf32> to vector<4x1x8x8xf32>
    %60 = vector.shape_cast %59 : vector<4x1x8x8xf32> to vector<4x8x8xf32>
    %61 = vector.shape_cast %60 : vector<4x8x8xf32> to vector<4x8x1x8xf32>
    %62 = vector.extract_strided_slice %57 {offsets = [0, 0, 0, 0], sizes = [4, 1, 8, 8], strides = [1, 1, 1, 1]} : vector<4x4x8x8xf32> to vector<4x1x8x8xf32>
    %63 = vector.shape_cast %62 : vector<4x1x8x8xf32> to vector<4x8x8xf32>
    %64 = vector.shape_cast %63 : vector<4x8x8xf32> to vector<4x1x8x8xf32>
    %65 = vector.broadcast %61 : vector<4x8x1x8xf32> to vector<4x8x8x8xf32>
    %66 = vector.broadcast %64 : vector<4x1x8x8xf32> to vector<4x8x8x8xf32>
    %67 = arith.mulf %65, %66 : vector<4x8x8x8xf32>
    %68 = arith.addf %58, %67 : vector<4x8x8x8xf32>
    %69 = vector.extract_strided_slice %38 {offsets = [0, 1, 0, 0], sizes = [4, 1, 8, 8], strides = [1, 1, 1, 1]} : vector<4x4x8x8xf32> to vector<4x1x8x8xf32>
    %70 = vector.shape_cast %69 : vector<4x1x8x8xf32> to vector<4x8x8xf32>
    %71 = vector.shape_cast %70 : vector<4x8x8xf32> to vector<4x8x1x8xf32>
    %72 = vector.extract_strided_slice %57 {offsets = [0, 1, 0, 0], sizes = [4, 1, 8, 8], strides = [1, 1, 1, 1]} : vector<4x4x8x8xf32> to vector<4x1x8x8xf32>
    %73 = vector.shape_cast %72 : vector<4x1x8x8xf32> to vector<4x8x8xf32>
    %74 = vector.shape_cast %73 : vector<4x8x8xf32> to vector<4x1x8x8xf32>
    %75 = vector.broadcast %71 : vector<4x8x1x8xf32> to vector<4x8x8x8xf32>
    %76 = vector.broadcast %74 : vector<4x1x8x8xf32> to vector<4x8x8x8xf32>
    %77 = arith.mulf %75, %76 : vector<4x8x8x8xf32>
    %78 = arith.addf %68, %77 : vector<4x8x8x8xf32>
    %79 = vector.extract_strided_slice %38 {offsets = [0, 2, 0, 0], sizes = [4, 1, 8, 8], strides = [1, 1, 1, 1]} : vector<4x4x8x8xf32> to vector<4x1x8x8xf32>
    %80 = vector.shape_cast %79 : vector<4x1x8x8xf32> to vector<4x8x8xf32>
    %81 = vector.shape_cast %80 : vector<4x8x8xf32> to vector<4x8x1x8xf32>
    %82 = vector.extract_strided_slice %57 {offsets = [0, 2, 0, 0], sizes = [4, 1, 8, 8], strides = [1, 1, 1, 1]} : vector<4x4x8x8xf32> to vector<4x1x8x8xf32>
    %83 = vector.shape_cast %82 : vector<4x1x8x8xf32> to vector<4x8x8xf32>
    %84 = vector.shape_cast %83 : vector<4x8x8xf32> to vector<4x1x8x8xf32>
    %85 = vector.broadcast %81 : vector<4x8x1x8xf32> to vector<4x8x8x8xf32>
    %86 = vector.broadcast %84 : vector<4x1x8x8xf32> to vector<4x8x8x8xf32>
    %87 = arith.mulf %85, %86 : vector<4x8x8x8xf32>
    %88 = arith.addf %78, %87 : vector<4x8x8x8xf32>
    %89 = vector.extract_strided_slice %38 {offsets = [0, 3, 0, 0], sizes = [4, 1, 8, 8], strides = [1, 1, 1, 1]} : vector<4x4x8x8xf32> to vector<4x1x8x8xf32>
    %90 = vector.shape_cast %89 : vector<4x1x8x8xf32> to vector<4x8x8xf32>
    %91 = vector.shape_cast %90 : vector<4x8x8xf32> to vector<4x8x1x8xf32>
    %92 = vector.extract_strided_slice %57 {offsets = [0, 3, 0, 0], sizes = [4, 1, 8, 8], strides = [1, 1, 1, 1]} : vector<4x4x8x8xf32> to vector<4x1x8x8xf32>
    %93 = vector.shape_cast %92 : vector<4x1x8x8xf32> to vector<4x8x8xf32>
    %94 = vector.shape_cast %93 : vector<4x8x8xf32> to vector<4x1x8x8xf32>
    %95 = vector.broadcast %91 : vector<4x8x1x8xf32> to vector<4x8x8x8xf32>
    %96 = vector.broadcast %94 : vector<4x1x8x8xf32> to vector<4x8x8x8xf32>
    %97 = arith.mulf %95, %96 : vector<4x8x8x8xf32>
    %98 = arith.addf %88, %97 : vector<4x8x8x8xf32>
    %99 = vector.shape_cast %98 : vector<4x8x8x8xf32> to vector<4x64x8xf32>
    %c0_28 = arith.constant 0 : index
    %c0_29 = arith.constant 0 : index
    %c0_30 = arith.constant 0 : index
    %100 = vector.load %arg5[%c0_28, %c0_29, %c0_30] : memref<4x160x8xf32, #tpu.memory_space<vmem>>, vector<4x64x8xf32>
    tpu.vector_store %arg5[%c0_28, %c0_29, %c0_30], %99 {strides = array<i32>} : memref<4x160x8xf32, #tpu.memory_space<vmem>>, vector<4x64x8xf32>,
    %c0_31 = arith.constant 0 : index
    %c0_32 = arith.constant 0 : index
    %c32 = arith.constant 32 : index
    %c0_33 = arith.constant 0 : index
    %101 = vector.load %arg2[%c0_31, %c0_32, %c32, %c0_33] : memref<1x4x128x8xf32, #tpu.memory_space<vmem>>, vector<1x4x4x8xf32>
    %102 = vector.shape_cast %101 : vector<1x4x4x8xf32> to vector<4x4x8xf32>
    %c0_34 = arith.constant 0 : index
    %c0_35 = arith.constant 0 : index
    %c36 = arith.constant 36 : index
    %c0_36 = arith.constant 0 : index
    %103 = vector.load %arg2[%c0_34, %c0_35, %c36, %c0_36] : memref<1x4x128x8xf32, #tpu.memory_space<vmem>>, vector<1x4x4x8xf32>
    %104 = vector.shape_cast %103 : vector<1x4x4x8xf32> to vector<4x4x8xf32>
    %c0_37 = arith.constant 0 : index
    %c0_38 = arith.constant 0 : index
    %c40 = arith.constant 40 : index
    %c0_39 = arith.constant 0 : index
    %105 = vector.load %arg2[%c0_37, %c0_38, %c40, %c0_39] : memref<1x4x128x8xf32, #tpu.memory_space<vmem>>, vector<1x4x4x8xf32>
    %106 = vector.shape_cast %105 : vector<1x4x4x8xf32> to vector<4x4x8xf32>
    %c0_40 = arith.constant 0 : index
    %c0_41 = arith.constant 0 : index
    %c44 = arith.constant 44 : index
    %c0_42 = arith.constant 0 : index
    %107 = vector.load %arg2[%c0_40, %c0_41, %c44, %c0_42] : memref<1x4x128x8xf32, #tpu.memory_space<vmem>>, vector<1x4x4x8xf32>
    %108 = vector.shape_cast %107 : vector<1x4x4x8xf32> to vector<4x4x8xf32>
    %c0_43 = arith.constant 0 : index
    %c0_44 = arith.constant 0 : index
    %c48 = arith.constant 48 : index
    %c0_45 = arith.constant 0 : index
    %109 = vector.load %arg2[%c0_43, %c0_44, %c48, %c0_45] : memref<1x4x128x8xf32, #tpu.memory_space<vmem>>, vector<1x4x4x8xf32>
    %110 = vector.shape_cast %109 : vector<1x4x4x8xf32> to vector<4x4x8xf32>
    %c0_46 = arith.constant 0 : index
    %c0_47 = arith.constant 0 : index
    %c52 = arith.constant 52 : index
    %c0_48 = arith.constant 0 : index
    %111 = vector.load %arg2[%c0_46, %c0_47, %c52, %c0_48] : memref<1x4x128x8xf32, #tpu.memory_space<vmem>>, vector<1x4x4x8xf32>
    %112 = vector.shape_cast %111 : vector<1x4x4x8xf32> to vector<4x4x8xf32>
    %c0_49 = arith.constant 0 : index
    %c0_50 = arith.constant 0 : index
    %c56 = arith.constant 56 : index
    %c0_51 = arith.constant 0 : index
    %113 = vector.load %arg2[%c0_49, %c0_50, %c56, %c0_51] : memref<1x4x128x8xf32, #tpu.memory_space<vmem>>, vector<1x4x4x8xf32>
    %114 = vector.shape_cast %113 : vector<1x4x4x8xf32> to vector<4x4x8xf32>
    %c0_52 = arith.constant 0 : index
    %c0_53 = arith.constant 0 : index
    %c60 = arith.constant 60 : index
    %c0_54 = arith.constant 0 : index
    %115 = vector.load %arg2[%c0_52, %c0_53, %c60, %c0_54] : memref<1x4x128x8xf32, #tpu.memory_space<vmem>>, vector<1x4x4x8xf32>
    %116 = vector.shape_cast %115 : vector<1x4x4x8xf32> to vector<4x4x8xf32>
    %117 = tpu.iota {dimensions = array<i32: 2>} : vector<1x1x4x1xi32>
    %118 = tpu.iota {dimensions = array<i32: 2>} : vector<1x1x4x1xi32>
    %119 = arith.sitofp %117 : vector<1x1x4x1xi32> to vector<1x1x4x1xf32>
    %120 = arith.sitofp %118 : vector<1x1x4x1xi32> to vector<1x1x4x1xf32>
    %121 = vector.shape_cast %102 : vector<4x4x8xf32> to vector<4x4x1x8xf32>
    %122 = vector.broadcast %121 : vector<4x4x1x8xf32> to vector<4x4x4x8xf32>
    %123 = vector.broadcast %119 : vector<1x1x4x1xf32> to vector<4x4x4x8xf32>
    %124 = arith.cmpf oeq, %122, %123 : vector<4x4x4x8xf32>
    %125 = vector.shape_cast %106 : vector<4x4x8xf32> to vector<4x4x1x8xf32>
    %cst_55 = arith.constant 0.000000e+00 : f32
    %126 = vector.shape_cast %125 : vector<4x4x1x8xf32> to vector<4x4x1x8xf32>
    %127 = vector.broadcast %126 : vector<4x4x1x8xf32> to vector<4x4x4x8xf32>
    %128 = vector.broadcast %cst_55 : f32 to vector<4x4x4x8xf32>
    %129 = arith.select %124, %127, %128 : vector<4x4x4x8xi1>, vector<4x4x4x8xf32>
    %130 = vector.shape_cast %104 : vector<4x4x8xf32> to vector<4x4x1x8xf32>
    %131 = vector.broadcast %130 : vector<4x4x1x8xf32> to vector<4x4x4x8xf32>
    %132 = vector.broadcast %119 : vector<1x1x4x1xf32> to vector<4x4x4x8xf32>
    %133 = arith.cmpf oeq, %131, %132 : vector<4x4x4x8xf32>
    %134 = vector.shape_cast %108 : vector<4x4x8xf32> to vector<4x4x1x8xf32>
    %cst_56 = arith.constant 0.000000e+00 : f32
    %135 = vector.shape_cast %134 : vector<4x4x1x8xf32> to vector<4x4x1x8xf32>
    %136 = vector.broadcast %135 : vector<4x4x1x8xf32> to vector<4x4x4x8xf32>
    %137 = vector.broadcast %cst_56 : f32 to vector<4x4x4x8xf32>
    %138 = arith.select %133, %136, %137 : vector<4x4x4x8xi1>, vector<4x4x4x8xf32>
    %139 = arith.addf %129, %138 : vector<4x4x4x8xf32>
    %140 = vector.shape_cast %110 : vector<4x4x8xf32> to vector<4x4x1x8xf32>
    %141 = vector.broadcast %140 : vector<4x4x1x8xf32> to vector<4x4x4x8xf32>
    %142 = vector.broadcast %120 : vector<1x1x4x1xf32> to vector<4x4x4x8xf32>
    %143 = arith.cmpf oeq, %141, %142 : vector<4x4x4x8xf32>
    %144 = vector.shape_cast %114 : vector<4x4x8xf32> to vector<4x4x1x8xf32>
    %cst_57 = arith.constant 0.000000e+00 : f32
    %145 = vector.shape_cast %144 : vector<4x4x1x8xf32> to vector<4x4x1x8xf32>
    %146 = vector.broadcast %145 : vector<4x4x1x8xf32> to vector<4x4x4x8xf32>
    %147 = vector.broadcast %cst_57 : f32 to vector<4x4x4x8xf32>
    %148 = arith.select %143, %146, %147 : vector<4x4x4x8xi1>, vector<4x4x4x8xf32>
    %149 = vector.shape_cast %112 : vector<4x4x8xf32> to vector<4x4x1x8xf32>
    %150 = vector.broadcast %149 : vector<4x4x1x8xf32> to vector<4x4x4x8xf32>
    %151 = vector.broadcast %120 : vector<1x1x4x1xf32> to vector<4x4x4x8xf32>
    %152 = arith.cmpf oeq, %150, %151 : vector<4x4x4x8xf32>
    %153 = vector.shape_cast %116 : vector<4x4x8xf32> to vector<4x4x1x8xf32>
    %cst_58 = arith.constant 0.000000e+00 : f32
    %154 = vector.shape_cast %153 : vector<4x4x1x8xf32> to vector<4x4x1x8xf32>
    %155 = vector.broadcast %154 : vector<4x4x1x8xf32> to vector<4x4x4x8xf32>
    %156 = vector.broadcast %cst_58 : f32 to vector<4x4x4x8xf32>
    %157 = arith.select %152, %155, %156 : vector<4x4x4x8xi1>, vector<4x4x4x8xf32>
    %158 = arith.addf %148, %157 : vector<4x4x4x8xf32>
    %cst_59 = arith.constant 0.000000e+00 : f32
    %159 = vector.broadcast %cst_59 : f32 to vector<4x4x4x8xf32>
    %160 = vector.extract_strided_slice %139 {offsets = [0, 0, 0, 0], sizes = [4, 1, 4, 8], strides = [1, 1, 1, 1]} : vector<4x4x4x8xf32> to vector<4x1x4x8xf32>
    %161 = vector.shape_cast %160 : vector<4x1x4x8xf32> to vector<4x4x8xf32>
    %162 = vector.shape_cast %161 : vector<4x4x8xf32> to vector<4x4x1x8xf32>
    %163 = vector.extract_strided_slice %158 {offsets = [0, 0, 0, 0], sizes = [4, 1, 4, 8], strides = [1, 1, 1, 1]} : vector<4x4x4x8xf32> to vector<4x1x4x8xf32>
    %164 = vector.shape_cast %163 : vector<4x1x4x8xf32> to vector<4x4x8xf32>
    %165 = vector.shape_cast %164 : vector<4x4x8xf32> to vector<4x1x4x8xf32>
    %166 = vector.broadcast %162 : vector<4x4x1x8xf32> to vector<4x4x4x8xf32>
    %167 = vector.broadcast %165 : vector<4x1x4x8xf32> to vector<4x4x4x8xf32>
    %168 = arith.mulf %166, %167 : vector<4x4x4x8xf32>
    %169 = arith.addf %159, %168 : vector<4x4x4x8xf32>
    %170 = vector.extract_strided_slice %139 {offsets = [0, 1, 0, 0], sizes = [4, 1, 4, 8], strides = [1, 1, 1, 1]} : vector<4x4x4x8xf32> to vector<4x1x4x8xf32>
    %171 = vector.shape_cast %170 : vector<4x1x4x8xf32> to vector<4x4x8xf32>
    %172 = vector.shape_cast %171 : vector<4x4x8xf32> to vector<4x4x1x8xf32>
    %173 = vector.extract_strided_slice %158 {offsets = [0, 1, 0, 0], sizes = [4, 1, 4, 8], strides = [1, 1, 1, 1]} : vector<4x4x4x8xf32> to vector<4x1x4x8xf32>
    %174 = vector.shape_cast %173 : vector<4x1x4x8xf32> to vector<4x4x8xf32>
    %175 = vector.shape_cast %174 : vector<4x4x8xf32> to vector<4x1x4x8xf32>
    %176 = vector.broadcast %172 : vector<4x4x1x8xf32> to vector<4x4x4x8xf32>
    %177 = vector.broadcast %175 : vector<4x1x4x8xf32> to vector<4x4x4x8xf32>
    %178 = arith.mulf %176, %177 : vector<4x4x4x8xf32>
    %179 = arith.addf %169, %178 : vector<4x4x4x8xf32>
    %180 = vector.extract_strided_slice %139 {offsets = [0, 2, 0, 0], sizes = [4, 1, 4, 8], strides = [1, 1, 1, 1]} : vector<4x4x4x8xf32> to vector<4x1x4x8xf32>
    %181 = vector.shape_cast %180 : vector<4x1x4x8xf32> to vector<4x4x8xf32>
    %182 = vector.shape_cast %181 : vector<4x4x8xf32> to vector<4x4x1x8xf32>
    %183 = vector.extract_strided_slice %158 {offsets = [0, 2, 0, 0], sizes = [4, 1, 4, 8], strides = [1, 1, 1, 1]} : vector<4x4x4x8xf32> to vector<4x1x4x8xf32>
    %184 = vector.shape_cast %183 : vector<4x1x4x8xf32> to vector<4x4x8xf32>
    %185 = vector.shape_cast %184 : vector<4x4x8xf32> to vector<4x1x4x8xf32>
    %186 = vector.broadcast %182 : vector<4x4x1x8xf32> to vector<4x4x4x8xf32>
    %187 = vector.broadcast %185 : vector<4x1x4x8xf32> to vector<4x4x4x8xf32>
    %188 = arith.mulf %186, %187 : vector<4x4x4x8xf32>
    %189 = arith.addf %179, %188 : vector<4x4x4x8xf32>
    %190 = vector.extract_strided_slice %139 {offsets = [0, 3, 0, 0], sizes = [4, 1, 4, 8], strides = [1, 1, 1, 1]} : vector<4x4x4x8xf32> to vector<4x1x4x8xf32>
    %191 = vector.shape_cast %190 : vector<4x1x4x8xf32> to vector<4x4x8xf32>
    %192 = vector.shape_cast %191 : vector<4x4x8xf32> to vector<4x4x1x8xf32>
    %193 = vector.extract_strided_slice %158 {offsets = [0, 3, 0, 0], sizes = [4, 1, 4, 8], strides = [1, 1, 1, 1]} : vector<4x4x4x8xf32> to vector<4x1x4x8xf32>
    %194 = vector.shape_cast %193 : vector<4x1x4x8xf32> to vector<4x4x8xf32>
    %195 = vector.shape_cast %194 : vector<4x4x8xf32> to vector<4x1x4x8xf32>
    %196 = vector.broadcast %192 : vector<4x4x1x8xf32> to vector<4x4x4x8xf32>
    %197 = vector.broadcast %195 : vector<4x1x4x8xf32> to vector<4x4x4x8xf32>
    %198 = arith.mulf %196, %197 : vector<4x4x4x8xf32>
    %199 = arith.addf %189, %198 : vector<4x4x4x8xf32>
    %200 = vector.shape_cast %199 : vector<4x4x4x8xf32> to vector<4x16x8xf32>
    %c0_60 = arith.constant 0 : index
    %c64 = arith.constant 64 : index
    %c0_61 = arith.constant 0 : index
    %201 = vector.load %arg5[%c0_60, %c64, %c0_61] : memref<4x160x8xf32, #tpu.memory_space<vmem>>, vector<4x16x8xf32>
    tpu.vector_store %arg5[%c0_60, %c64, %c0_61], %200 {strides = array<i32>} : memref<4x160x8xf32, #tpu.memory_space<vmem>>, vector<4x16x8xf32>,
    %c0_62 = arith.constant 0 : index
    %c0_63 = arith.constant 0 : index
    %c64_64 = arith.constant 64 : index
    %c0_65 = arith.constant 0 : index
    %202 = vector.load %arg2[%c0_62, %c0_63, %c64_64, %c0_65] : memref<1x4x128x8xf32, #tpu.memory_space<vmem>>, vector<1x4x4x8xf32>
    %203 = vector.shape_cast %202 : vector<1x4x4x8xf32> to vector<4x4x8xf32>
    %c0_66 = arith.constant 0 : index
    %c0_67 = arith.constant 0 : index
    %c68 = arith.constant 68 : index
    %c0_68 = arith.constant 0 : index
    %204 = vector.load %arg2[%c0_66, %c0_67, %c68, %c0_68] : memref<1x4x128x8xf32, #tpu.memory_space<vmem>>, vector<1x4x4x8xf32>
    %205 = vector.shape_cast %204 : vector<1x4x4x8xf32> to vector<4x4x8xf32>
    %c0_69 = arith.constant 0 : index
    %c0_70 = arith.constant 0 : index
    %c72 = arith.constant 72 : index
    %c0_71 = arith.constant 0 : index
    %206 = vector.load %arg2[%c0_69, %c0_70, %c72, %c0_71] : memref<1x4x128x8xf32, #tpu.memory_space<vmem>>, vector<1x4x4x8xf32>
    %207 = vector.shape_cast %206 : vector<1x4x4x8xf32> to vector<4x4x8xf32>
    %c0_72 = arith.constant 0 : index
    %c0_73 = arith.constant 0 : index
    %c76 = arith.constant 76 : index
    %c0_74 = arith.constant 0 : index
    %208 = vector.load %arg2[%c0_72, %c0_73, %c76, %c0_74] : memref<1x4x128x8xf32, #tpu.memory_space<vmem>>, vector<1x4x4x8xf32>
    %209 = vector.shape_cast %208 : vector<1x4x4x8xf32> to vector<4x4x8xf32>
    %c0_75 = arith.constant 0 : index
    %c0_76 = arith.constant 0 : index
    %c80 = arith.constant 80 : index
    %c0_77 = arith.constant 0 : index
    %210 = vector.load %arg2[%c0_75, %c0_76, %c80, %c0_77] : memref<1x4x128x8xf32, #tpu.memory_space<vmem>>, vector<1x4x4x8xf32>
    %211 = vector.shape_cast %210 : vector<1x4x4x8xf32> to vector<4x4x8xf32>
    %c0_78 = arith.constant 0 : index
    %c0_79 = arith.constant 0 : index
    %c84 = arith.constant 84 : index
    %c0_80 = arith.constant 0 : index
    %212 = vector.load %arg2[%c0_78, %c0_79, %c84, %c0_80] : memref<1x4x128x8xf32, #tpu.memory_space<vmem>>, vector<1x4x4x8xf32>
    %213 = vector.shape_cast %212 : vector<1x4x4x8xf32> to vector<4x4x8xf32>
    %c0_81 = arith.constant 0 : index
    %c0_82 = arith.constant 0 : index
    %c88 = arith.constant 88 : index
    %c0_83 = arith.constant 0 : index
    %214 = vector.load %arg2[%c0_81, %c0_82, %c88, %c0_83] : memref<1x4x128x8xf32, #tpu.memory_space<vmem>>, vector<1x4x4x8xf32>
    %215 = vector.shape_cast %214 : vector<1x4x4x8xf32> to vector<4x4x8xf32>
    %c0_84 = arith.constant 0 : index
    %c0_85 = arith.constant 0 : index
    %c92 = arith.constant 92 : index
    %c0_86 = arith.constant 0 : index
    %216 = vector.load %arg2[%c0_84, %c0_85, %c92, %c0_86] : memref<1x4x128x8xf32, #tpu.memory_space<vmem>>, vector<1x4x4x8xf32>
    %217 = vector.shape_cast %216 : vector<1x4x4x8xf32> to vector<4x4x8xf32>
    %218 = tpu.iota {dimensions = array<i32: 2>} : vector<1x1x8x1xi32>
    %219 = tpu.iota {dimensions = array<i32: 2>} : vector<1x1x8x1xi32>
    %220 = arith.sitofp %218 : vector<1x1x8x1xi32> to vector<1x1x8x1xf32>
    %221 = arith.sitofp %219 : vector<1x1x8x1xi32> to vector<1x1x8x1xf32>
    %222 = vector.shape_cast %203 : vector<4x4x8xf32> to vector<4x4x1x8xf32>
    %223 = vector.broadcast %222 : vector<4x4x1x8xf32> to vector<4x4x8x8xf32>
    %224 = vector.broadcast %220 : vector<1x1x8x1xf32> to vector<4x4x8x8xf32>
    %225 = arith.cmpf oeq, %223, %224 : vector<4x4x8x8xf32>
    %226 = vector.shape_cast %207 : vector<4x4x8xf32> to vector<4x4x1x8xf32>
    %cst_87 = arith.constant 0.000000e+00 : f32
    %227 = vector.shape_cast %226 : vector<4x4x1x8xf32> to vector<4x4x1x8xf32>
    %228 = vector.broadcast %227 : vector<4x4x1x8xf32> to vector<4x4x8x8xf32>
    %229 = vector.broadcast %cst_87 : f32 to vector<4x4x8x8xf32>
    %230 = arith.select %225, %228, %229 : vector<4x4x8x8xi1>, vector<4x4x8x8xf32>
    %231 = vector.shape_cast %205 : vector<4x4x8xf32> to vector<4x4x1x8xf32>
    %232 = vector.broadcast %231 : vector<4x4x1x8xf32> to vector<4x4x8x8xf32>
    %233 = vector.broadcast %220 : vector<1x1x8x1xf32> to vector<4x4x8x8xf32>
    %234 = arith.cmpf oeq, %232, %233 : vector<4x4x8x8xf32>
    %235 = vector.shape_cast %209 : vector<4x4x8xf32> to vector<4x4x1x8xf32>
    %cst_88 = arith.constant 0.000000e+00 : f32
    %236 = vector.shape_cast %235 : vector<4x4x1x8xf32> to vector<4x4x1x8xf32>
    %237 = vector.broadcast %236 : vector<4x4x1x8xf32> to vector<4x4x8x8xf32>
    %238 = vector.broadcast %cst_88 : f32 to vector<4x4x8x8xf32>
    %239 = arith.select %234, %237, %238 : vector<4x4x8x8xi1>, vector<4x4x8x8xf32>
    %240 = arith.addf %230, %239 : vector<4x4x8x8xf32>
    %241 = vector.shape_cast %211 : vector<4x4x8xf32> to vector<4x4x1x8xf32>
    %242 = vector.broadcast %241 : vector<4x4x1x8xf32> to vector<4x4x8x8xf32>
    %243 = vector.broadcast %221 : vector<1x1x8x1xf32> to vector<4x4x8x8xf32>
    %244 = arith.cmpf oeq, %242, %243 : vector<4x4x8x8xf32>
    %245 = vector.shape_cast %215 : vector<4x4x8xf32> to vector<4x4x1x8xf32>
    %cst_89 = arith.constant 0.000000e+00 : f32
    %246 = vector.shape_cast %245 : vector<4x4x1x8xf32> to vector<4x4x1x8xf32>
    %247 = vector.broadcast %246 : vector<4x4x1x8xf32> to vector<4x4x8x8xf32>
    %248 = vector.broadcast %cst_89 : f32 to vector<4x4x8x8xf32>
    %249 = arith.select %244, %247, %248 : vector<4x4x8x8xi1>, vector<4x4x8x8xf32>
    %250 = vector.shape_cast %213 : vector<4x4x8xf32> to vector<4x4x1x8xf32>
    %251 = vector.broadcast %250 : vector<4x4x1x8xf32> to vector<4x4x8x8xf32>
    %252 = vector.broadcast %221 : vector<1x1x8x1xf32> to vector<4x4x8x8xf32>
    %253 = arith.cmpf oeq, %251, %252 : vector<4x4x8x8xf32>
    %254 = vector.shape_cast %217 : vector<4x4x8xf32> to vector<4x4x1x8xf32>
    %cst_90 = arith.constant 0.000000e+00 : f32
    %255 = vector.shape_cast %254 : vector<4x4x1x8xf32> to vector<4x4x1x8xf32>
    %256 = vector.broadcast %255 : vector<4x4x1x8xf32> to vector<4x4x8x8xf32>
    %257 = vector.broadcast %cst_90 : f32 to vector<4x4x8x8xf32>
    %258 = arith.select %253, %256, %257 : vector<4x4x8x8xi1>, vector<4x4x8x8xf32>
    %259 = arith.addf %249, %258 : vector<4x4x8x8xf32>
    %cst_91 = arith.constant 0.000000e+00 : f32
    %260 = vector.broadcast %cst_91 : f32 to vector<4x8x8x8xf32>
    %261 = vector.extract_strided_slice %240 {offsets = [0, 0, 0, 0], sizes = [4, 1, 8, 8], strides = [1, 1, 1, 1]} : vector<4x4x8x8xf32> to vector<4x1x8x8xf32>
    %262 = vector.shape_cast %261 : vector<4x1x8x8xf32> to vector<4x8x8xf32>
    %263 = vector.shape_cast %262 : vector<4x8x8xf32> to vector<4x8x1x8xf32>
    %264 = vector.extract_strided_slice %259 {offsets = [0, 0, 0, 0], sizes = [4, 1, 8, 8], strides = [1, 1, 1, 1]} : vector<4x4x8x8xf32> to vector<4x1x8x8xf32>
    %265 = vector.shape_cast %264 : vector<4x1x8x8xf32> to vector<4x8x8xf32>
    %266 = vector.shape_cast %265 : vector<4x8x8xf32> to vector<4x1x8x8xf32>
    %267 = vector.broadcast %263 : vector<4x8x1x8xf32> to vector<4x8x8x8xf32>
    %268 = vector.broadcast %266 : vector<4x1x8x8xf32> to vector<4x8x8x8xf32>
    %269 = arith.mulf %267, %268 : vector<4x8x8x8xf32>
    %270 = arith.addf %260, %269 : vector<4x8x8x8xf32>
    %271 = vector.extract_strided_slice %240 {offsets = [0, 1, 0, 0], sizes = [4, 1, 8, 8], strides = [1, 1, 1, 1]} : vector<4x4x8x8xf32> to vector<4x1x8x8xf32>
    %272 = vector.shape_cast %271 : vector<4x1x8x8xf32> to vector<4x8x8xf32>
    %273 = vector.shape_cast %272 : vector<4x8x8xf32> to vector<4x8x1x8xf32>
    %274 = vector.extract_strided_slice %259 {offsets = [0, 1, 0, 0], sizes = [4, 1, 8, 8], strides = [1, 1, 1, 1]} : vector<4x4x8x8xf32> to vector<4x1x8x8xf32>
    %275 = vector.shape_cast %274 : vector<4x1x8x8xf32> to vector<4x8x8xf32>
    %276 = vector.shape_cast %275 : vector<4x8x8xf32> to vector<4x1x8x8xf32>
    %277 = vector.broadcast %273 : vector<4x8x1x8xf32> to vector<4x8x8x8xf32>
    %278 = vector.broadcast %276 : vector<4x1x8x8xf32> to vector<4x8x8x8xf32>
    %279 = arith.mulf %277, %278 : vector<4x8x8x8xf32>
    %280 = arith.addf %270, %279 : vector<4x8x8x8xf32>
    %281 = vector.extract_strided_slice %240 {offsets = [0, 2, 0, 0], sizes = [4, 1, 8, 8], strides = [1, 1, 1, 1]} : vector<4x4x8x8xf32> to vector<4x1x8x8xf32>
    %282 = vector.shape_cast %281 : vector<4x1x8x8xf32> to vector<4x8x8xf32>
    %283 = vector.shape_cast %282 : vector<4x8x8xf32> to vector<4x8x1x8xf32>
    %284 = vector.extract_strided_slice %259 {offsets = [0, 2, 0, 0], sizes = [4, 1, 8, 8], strides = [1, 1, 1, 1]} : vector<4x4x8x8xf32> to vector<4x1x8x8xf32>
    %285 = vector.shape_cast %284 : vector<4x1x8x8xf32> to vector<4x8x8xf32>
    %286 = vector.shape_cast %285 : vector<4x8x8xf32> to vector<4x1x8x8xf32>
    %287 = vector.broadcast %283 : vector<4x8x1x8xf32> to vector<4x8x8x8xf32>
    %288 = vector.broadcast %286 : vector<4x1x8x8xf32> to vector<4x8x8x8xf32>
    %289 = arith.mulf %287, %288 : vector<4x8x8x8xf32>
    %290 = arith.addf %280, %289 : vector<4x8x8x8xf32>
    %291 = vector.extract_strided_slice %240 {offsets = [0, 3, 0, 0], sizes = [4, 1, 8, 8], strides = [1, 1, 1, 1]} : vector<4x4x8x8xf32> to vector<4x1x8x8xf32>
    %292 = vector.shape_cast %291 : vector<4x1x8x8xf32> to vector<4x8x8xf32>
    %293 = vector.shape_cast %292 : vector<4x8x8xf32> to vector<4x8x1x8xf32>
    %294 = vector.extract_strided_slice %259 {offsets = [0, 3, 0, 0], sizes = [4, 1, 8, 8], strides = [1, 1, 1, 1]} : vector<4x4x8x8xf32> to vector<4x1x8x8xf32>
    %295 = vector.shape_cast %294 : vector<4x1x8x8xf32> to vector<4x8x8xf32>
    %296 = vector.shape_cast %295 : vector<4x8x8xf32> to vector<4x1x8x8xf32>
    %297 = vector.broadcast %293 : vector<4x8x1x8xf32> to vector<4x8x8x8xf32>
    %298 = vector.broadcast %296 : vector<4x1x8x8xf32> to vector<4x8x8x8xf32>
    %299 = arith.mulf %297, %298 : vector<4x8x8x8xf32>
    %300 = arith.addf %290, %299 : vector<4x8x8x8xf32>
    %301 = vector.shape_cast %300 : vector<4x8x8x8xf32> to vector<4x64x8xf32>
    %c0_92 = arith.constant 0 : index
    %c80_93 = arith.constant 80 : index
    %c0_94 = arith.constant 0 : index
    %302 = vector.load %arg5[%c0_92, %c80_93, %c0_94] : memref<4x160x8xf32, #tpu.memory_space<vmem>>, vector<4x64x8xf32>
    tpu.vector_store %arg5[%c0_92, %c80_93, %c0_94], %301 {strides = array<i32>} : memref<4x160x8xf32, #tpu.memory_space<vmem>>, vector<4x64x8xf32>,
    %c0_95 = arith.constant 0 : index
    %c0_96 = arith.constant 0 : index
    %c96 = arith.constant 96 : index
    %c0_97 = arith.constant 0 : index
    %303 = vector.load %arg2[%c0_95, %c0_96, %c96, %c0_97] : memref<1x4x128x8xf32, #tpu.memory_space<vmem>>, vector<1x4x4x8xf32>
    %304 = vector.shape_cast %303 : vector<1x4x4x8xf32> to vector<4x4x8xf32>
    %c0_98 = arith.constant 0 : index
    %c0_99 = arith.constant 0 : index
    %c100 = arith.constant 100 : index
    %c0_100 = arith.constant 0 : index
    %305 = vector.load %arg2[%c0_98, %c0_99, %c100, %c0_100] : memref<1x4x128x8xf32, #tpu.memory_space<vmem>>, vector<1x4x4x8xf32>
    %306 = vector.shape_cast %305 : vector<1x4x4x8xf32> to vector<4x4x8xf32>
    %c0_101 = arith.constant 0 : index
    %c0_102 = arith.constant 0 : index
    %c104 = arith.constant 104 : index
    %c0_103 = arith.constant 0 : index
    %307 = vector.load %arg2[%c0_101, %c0_102, %c104, %c0_103] : memref<1x4x128x8xf32, #tpu.memory_space<vmem>>, vector<1x4x4x8xf32>
    %308 = vector.shape_cast %307 : vector<1x4x4x8xf32> to vector<4x4x8xf32>
    %c0_104 = arith.constant 0 : index
    %c0_105 = arith.constant 0 : index
    %c108 = arith.constant 108 : index
    %c0_106 = arith.constant 0 : index
    %309 = vector.load %arg2[%c0_104, %c0_105, %c108, %c0_106] : memref<1x4x128x8xf32, #tpu.memory_space<vmem>>, vector<1x4x4x8xf32>
    %310 = vector.shape_cast %309 : vector<1x4x4x8xf32> to vector<4x4x8xf32>
    %c0_107 = arith.constant 0 : index
    %c0_108 = arith.constant 0 : index
    %c112 = arith.constant 112 : index
    %c0_109 = arith.constant 0 : index
    %311 = vector.load %arg2[%c0_107, %c0_108, %c112, %c0_109] : memref<1x4x128x8xf32, #tpu.memory_space<vmem>>, vector<1x4x4x8xf32>
    %312 = vector.shape_cast %311 : vector<1x4x4x8xf32> to vector<4x4x8xf32>
    %c0_110 = arith.constant 0 : index
    %c0_111 = arith.constant 0 : index
    %c116 = arith.constant 116 : index
    %c0_112 = arith.constant 0 : index
    %313 = vector.load %arg2[%c0_110, %c0_111, %c116, %c0_112] : memref<1x4x128x8xf32, #tpu.memory_space<vmem>>, vector<1x4x4x8xf32>
    %314 = vector.shape_cast %313 : vector<1x4x4x8xf32> to vector<4x4x8xf32>
    %c0_113 = arith.constant 0 : index
    %c0_114 = arith.constant 0 : index
    %c120 = arith.constant 120 : index
    %c0_115 = arith.constant 0 : index
    %315 = vector.load %arg2[%c0_113, %c0_114, %c120, %c0_115] : memref<1x4x128x8xf32, #tpu.memory_space<vmem>>, vector<1x4x4x8xf32>
    %316 = vector.shape_cast %315 : vector<1x4x4x8xf32> to vector<4x4x8xf32>
    %c0_116 = arith.constant 0 : index
    %c0_117 = arith.constant 0 : index
    %c124 = arith.constant 124 : index
    %c0_118 = arith.constant 0 : index
    %317 = vector.load %arg2[%c0_116, %c0_117, %c124, %c0_118] : memref<1x4x128x8xf32, #tpu.memory_space<vmem>>, vector<1x4x4x8xf32>
    %318 = vector.shape_cast %317 : vector<1x4x4x8xf32> to vector<4x4x8xf32>
    %319 = tpu.iota {dimensions = array<i32: 2>} : vector<1x1x4x1xi32>
    %320 = tpu.iota {dimensions = array<i32: 2>} : vector<1x1x4x1xi32>
    %321 = arith.sitofp %319 : vector<1x1x4x1xi32> to vector<1x1x4x1xf32>
    %322 = arith.sitofp %320 : vector<1x1x4x1xi32> to vector<1x1x4x1xf32>
    %323 = vector.shape_cast %304 : vector<4x4x8xf32> to vector<4x4x1x8xf32>
    %324 = vector.broadcast %323 : vector<4x4x1x8xf32> to vector<4x4x4x8xf32>
    %325 = vector.broadcast %321 : vector<1x1x4x1xf32> to vector<4x4x4x8xf32>
    %326 = arith.cmpf oeq, %324, %325 : vector<4x4x4x8xf32>
    %327 = vector.shape_cast %308 : vector<4x4x8xf32> to vector<4x4x1x8xf32>
    %cst_119 = arith.constant 0.000000e+00 : f32
    %328 = vector.shape_cast %327 : vector<4x4x1x8xf32> to vector<4x4x1x8xf32>
    %329 = vector.broadcast %328 : vector<4x4x1x8xf32> to vector<4x4x4x8xf32>
    %330 = vector.broadcast %cst_119 : f32 to vector<4x4x4x8xf32>
    %331 = arith.select %326, %329, %330 : vector<4x4x4x8xi1>, vector<4x4x4x8xf32>
    %332 = vector.shape_cast %306 : vector<4x4x8xf32> to vector<4x4x1x8xf32>
    %333 = vector.broadcast %332 : vector<4x4x1x8xf32> to vector<4x4x4x8xf32>
    %334 = vector.broadcast %321 : vector<1x1x4x1xf32> to vector<4x4x4x8xf32>
    %335 = arith.cmpf oeq, %333, %334 : vector<4x4x4x8xf32>
    %336 = vector.shape_cast %310 : vector<4x4x8xf32> to vector<4x4x1x8xf32>
    %cst_120 = arith.constant 0.000000e+00 : f32
    %337 = vector.shape_cast %336 : vector<4x4x1x8xf32> to vector<4x4x1x8xf32>
    %338 = vector.broadcast %337 : vector<4x4x1x8xf32> to vector<4x4x4x8xf32>
    %339 = vector.broadcast %cst_120 : f32 to vector<4x4x4x8xf32>
    %340 = arith.select %335, %338, %339 : vector<4x4x4x8xi1>, vector<4x4x4x8xf32>
    %341 = arith.addf %331, %340 : vector<4x4x4x8xf32>
    %342 = vector.shape_cast %312 : vector<4x4x8xf32> to vector<4x4x1x8xf32>
    %343 = vector.broadcast %342 : vector<4x4x1x8xf32> to vector<4x4x4x8xf32>
    %344 = vector.broadcast %322 : vector<1x1x4x1xf32> to vector<4x4x4x8xf32>
    %345 = arith.cmpf oeq, %343, %344 : vector<4x4x4x8xf32>
    %346 = vector.shape_cast %316 : vector<4x4x8xf32> to vector<4x4x1x8xf32>
    %cst_121 = arith.constant 0.000000e+00 : f32
    %347 = vector.shape_cast %346 : vector<4x4x1x8xf32> to vector<4x4x1x8xf32>
    %348 = vector.broadcast %347 : vector<4x4x1x8xf32> to vector<4x4x4x8xf32>
    %349 = vector.broadcast %cst_121 : f32 to vector<4x4x4x8xf32>
    %350 = arith.select %345, %348, %349 : vector<4x4x4x8xi1>, vector<4x4x4x8xf32>
    %351 = vector.shape_cast %314 : vector<4x4x8xf32> to vector<4x4x1x8xf32>
    %352 = vector.broadcast %351 : vector<4x4x1x8xf32> to vector<4x4x4x8xf32>
    %353 = vector.broadcast %322 : vector<1x1x4x1xf32> to vector<4x4x4x8xf32>
    %354 = arith.cmpf oeq, %352, %353 : vector<4x4x4x8xf32>
    %355 = vector.shape_cast %318 : vector<4x4x8xf32> to vector<4x4x1x8xf32>
    %cst_122 = arith.constant 0.000000e+00 : f32
    %356 = vector.shape_cast %355 : vector<4x4x1x8xf32> to vector<4x4x1x8xf32>
    %357 = vector.broadcast %356 : vector<4x4x1x8xf32> to vector<4x4x4x8xf32>
    %358 = vector.broadcast %cst_122 : f32 to vector<4x4x4x8xf32>
    %359 = arith.select %354, %357, %358 : vector<4x4x4x8xi1>, vector<4x4x4x8xf32>
    %360 = arith.addf %350, %359 : vector<4x4x4x8xf32>
    %cst_123 = arith.constant 0.000000e+00 : f32
    %361 = vector.broadcast %cst_123 : f32 to vector<4x4x4x8xf32>
    %362 = vector.extract_strided_slice %341 {offsets = [0, 0, 0, 0], sizes = [4, 1, 4, 8], strides = [1, 1, 1, 1]} : vector<4x4x4x8xf32> to vector<4x1x4x8xf32>
    %363 = vector.shape_cast %362 : vector<4x1x4x8xf32> to vector<4x4x8xf32>
    %364 = vector.shape_cast %363 : vector<4x4x8xf32> to vector<4x4x1x8xf32>
    %365 = vector.extract_strided_slice %360 {offsets = [0, 0, 0, 0], sizes = [4, 1, 4, 8], strides = [1, 1, 1, 1]} : vector<4x4x4x8xf32> to vector<4x1x4x8xf32>
    %366 = vector.shape_cast %365 : vector<4x1x4x8xf32> to vector<4x4x8xf32>
    %367 = vector.shape_cast %366 : vector<4x4x8xf32> to vector<4x1x4x8xf32>
    %368 = vector.broadcast %364 : vector<4x4x1x8xf32> to vector<4x4x4x8xf32>
    %369 = vector.broadcast %367 : vector<4x1x4x8xf32> to vector<4x4x4x8xf32>
    %370 = arith.mulf %368, %369 : vector<4x4x4x8xf32>
    %371 = arith.addf %361, %370 : vector<4x4x4x8xf32>
    %372 = vector.extract_strided_slice %341 {offsets = [0, 1, 0, 0], sizes = [4, 1, 4, 8], strides = [1, 1, 1, 1]} : vector<4x4x4x8xf32> to vector<4x1x4x8xf32>
    %373 = vector.shape_cast %372 : vector<4x1x4x8xf32> to vector<4x4x8xf32>
    %374 = vector.shape_cast %373 : vector<4x4x8xf32> to vector<4x4x1x8xf32>
    %375 = vector.extract_strided_slice %360 {offsets = [0, 1, 0, 0], sizes = [4, 1, 4, 8], strides = [1, 1, 1, 1]} : vector<4x4x4x8xf32> to vector<4x1x4x8xf32>
    %376 = vector.shape_cast %375 : vector<4x1x4x8xf32> to vector<4x4x8xf32>
    %377 = vector.shape_cast %376 : vector<4x4x8xf32> to vector<4x1x4x8xf32>
    %378 = vector.broadcast %374 : vector<4x4x1x8xf32> to vector<4x4x4x8xf32>
    %379 = vector.broadcast %377 : vector<4x1x4x8xf32> to vector<4x4x4x8xf32>
    %380 = arith.mulf %378, %379 : vector<4x4x4x8xf32>
    %381 = arith.addf %371, %380 : vector<4x4x4x8xf32>
    %382 = vector.extract_strided_slice %341 {offsets = [0, 2, 0, 0], sizes = [4, 1, 4, 8], strides = [1, 1, 1, 1]} : vector<4x4x4x8xf32> to vector<4x1x4x8xf32>
    %383 = vector.shape_cast %382 : vector<4x1x4x8xf32> to vector<4x4x8xf32>
    %384 = vector.shape_cast %383 : vector<4x4x8xf32> to vector<4x4x1x8xf32>
    %385 = vector.extract_strided_slice %360 {offsets = [0, 2, 0, 0], sizes = [4, 1, 4, 8], strides = [1, 1, 1, 1]} : vector<4x4x4x8xf32> to vector<4x1x4x8xf32>
    %386 = vector.shape_cast %385 : vector<4x1x4x8xf32> to vector<4x4x8xf32>
    %387 = vector.shape_cast %386 : vector<4x4x8xf32> to vector<4x1x4x8xf32>
    %388 = vector.broadcast %384 : vector<4x4x1x8xf32> to vector<4x4x4x8xf32>
    %389 = vector.broadcast %387 : vector<4x1x4x8xf32> to vector<4x4x4x8xf32>
    %390 = arith.mulf %388, %389 : vector<4x4x4x8xf32>
    %391 = arith.addf %381, %390 : vector<4x4x4x8xf32>
    %392 = vector.extract_strided_slice %341 {offsets = [0, 3, 0, 0], sizes = [4, 1, 4, 8], strides = [1, 1, 1, 1]} : vector<4x4x4x8xf32> to vector<4x1x4x8xf32>
    %393 = vector.shape_cast %392 : vector<4x1x4x8xf32> to vector<4x4x8xf32>
    %394 = vector.shape_cast %393 : vector<4x4x8xf32> to vector<4x4x1x8xf32>
    %395 = vector.extract_strided_slice %360 {offsets = [0, 3, 0, 0], sizes = [4, 1, 4, 8], strides = [1, 1, 1, 1]} : vector<4x4x4x8xf32> to vector<4x1x4x8xf32>
    %396 = vector.shape_cast %395 : vector<4x1x4x8xf32> to vector<4x4x8xf32>
    %397 = vector.shape_cast %396 : vector<4x4x8xf32> to vector<4x1x4x8xf32>
    %398 = vector.broadcast %394 : vector<4x4x1x8xf32> to vector<4x4x4x8xf32>
    %399 = vector.broadcast %397 : vector<4x1x4x8xf32> to vector<4x4x4x8xf32>
    %400 = arith.mulf %398, %399 : vector<4x4x4x8xf32>
    %401 = arith.addf %391, %400 : vector<4x4x4x8xf32>
    %402 = vector.shape_cast %401 : vector<4x4x4x8xf32> to vector<4x16x8xf32>
    %c0_124 = arith.constant 0 : index
    %c144 = arith.constant 144 : index
    %c0_125 = arith.constant 0 : index
    %403 = vector.load %arg5[%c0_124, %c144, %c0_125] : memref<4x160x8xf32, #tpu.memory_space<vmem>>, vector<4x16x8xf32>
    tpu.vector_store %arg5[%c0_124, %c144, %c0_125], %402 {strides = array<i32>} : memref<4x160x8xf32, #tpu.memory_space<vmem>>, vector<4x16x8xf32>,
    %c0_126 = arith.constant 0 : index
    %c0_127 = arith.constant 0 : index
    %c0_128 = arith.constant 0 : index
    %c0_129 = arith.constant 0 : index
    %404 = vector.load %arg1[%c0_126, %c0_127, %c0_128, %c0_129] : memref<1x4x8x160xf32, #tpu.memory_space<vmem>>, vector<1x4x8x160xf32>
    %405 = vector.shape_cast %404 : vector<1x4x8x160xf32> to vector<4x8x160xf32>
    %c0_130 = arith.constant 0 : index
    %c0_131 = arith.constant 0 : index
    %c0_132 = arith.constant 0 : index
    %406 = vector.load %arg5[%c0_130, %c0_131, %c0_132] : memref<4x160x8xf32, #tpu.memory_space<vmem>>, vector<4x160x8xf32>
    %cst_133 = arith.constant dense<0.000000e+00> : vector<4x8x8xf32>
    %407 = tpu.matmul %405, %406, %cst_133 {dimension_numbers = #tpu.dot_dimension_numbers<[2], [1], [1], [2], [0, 0, 0, 1, 1, 2], [0], [0]>} : vector<4x8x160xf32>, vector<4x160x8xf32>, vector<4x8x8xf32> -> vector<4x8x8xf32>
    %408 = vector.shape_cast %407 : vector<4x8x8xf32> to vector<32x8xf32>
    %c0_134 = arith.constant 0 : index
    %c0_135 = arith.constant 0 : index
    %409 = vector.load %arg3[%c0_134, %c0_135] : memref<32x32xf32, #tpu.memory_space<vmem>>, vector<32x32xf32>
    %cst_136 = arith.constant dense<0.000000e+00> : vector<8x32xf32>
    %410 = tpu.matmul %408, %409, %cst_136 {dimension_numbers = #tpu.dot_dimension_numbers<[0], [0], [1], [1], [0, 1, 1, 1], [], []>} : vector<32x8xf32>, vector<32x32xf32>, vector<8x32xf32> -> vector<8x32xf32>
    %411 = vector.shape_cast %410 : vector<8x32xf32> to vector<1x8x32xf32>
    %c0_137 = arith.constant 0 : index
    %c0_138 = arith.constant 0 : index
    %c0_139 = arith.constant 0 : index
    %412 = vector.load %arg4[%c0_137, %c0_138, %c0_139] : memref<1x8x32xf32, #tpu.memory_space<vmem>>, vector<1x8x32xf32>
    tpu.vector_store %arg4[%c0_137, %c0_138, %c0_139], %411 {strides = array<i32>} : memref<1x8x32xf32, #tpu.memory_space<vmem>>, vector<1x8x32xf32>,
    return
  }
  func.func @transform_0(%arg0: i32) -> (i32, i32, i32, i32) {
    %c0_i32 = arith.constant 0 : i32
    %c0_i32_0 = arith.constant 0 : i32
    %c0_i32_1 = arith.constant 0 : i32
    %c0_i32_2 = arith.constant 0 : i32
    return %arg0, %c0_i32, %c0_i32_0, %c0_i32_1 : i32, i32, i32, i32
  }
  func.func @transform_1(%arg0: i32) -> (i32, i32, i32, i32) {
    %c0_i32 = arith.constant 0 : i32
    %c0_i32_0 = arith.constant 0 : i32
    %c0_i32_1 = arith.constant 0 : i32
    %c0_i32_2 = arith.constant 0 : i32
    return %arg0, %c0_i32, %c0_i32_0, %c0_i32_1 : i32, i32, i32, i32
  }
  func.func @transform_2(%arg0: i32) -> (i32, i32) {
    %c0_i32 = arith.constant 0 : i32
    %c0_i32_0 = arith.constant 0 : i32
    %c0_i32_1 = arith.constant 0 : i32
    return %c0_i32, %c0_i32_0 : i32, i32
  }
  func.func @transform_3(%arg0: i32) -> (i32, i32, i32) {
    %c0_i32 = arith.constant 0 : i32
    %c0_i32_0 = arith.constant 0 : i32
    %c0_i32_1 = arith.constant 0 : i32
    return %arg0, %c0_i32, %c0_i32_0 : i32, i32, i32
  }
}

</mosaic_0001>

<bundles_post_ra>
// kernel: multiview_deformable_attention.1
= control target key start
LH: loop header
LB: loop body
LE: loop exit
PB: predicated region body
PF: predicated region fallthrough
CT: control target
= control target key end

     0   :  { %8 = vsyncpa [#allocation4], 0  ;;  %s16868_s0 = inlined_call_operand.vmem [shape: f32[2,4,8,160], index: 0, kind: input, shape index: {}]   ;;  %s16869_s1 = inlined_call_operand.vmem [shape: f32[2,4,128,8], index: 1, kind: input, shape index: {}]   ;;  %s16870_s2 = inlined_call_operand.vmem [shape: f32[32,32], index: 2, kind: input, shape index: {}]   ;;  %s16871_s3 = inlined_call_operand.hbm [shape: f32[2,8,32], index: 3, kind: output, shape index: {}]  }
   0x1   :  { %10 = vsyncpa [#allocation4 + $0x1], 0  ;;  %s12821_s12 = smov 0   ;;  %s12823_s13 = smov 0  }
   0x2   :  { %s12825_s14 = smov 0   ;;  %s12827_s15 = smov 0  }
   0x3 LB: > { %s12842_s16 = sadd.s32 4294967295, %s12795_s15   ;;  %s12529_s17 = sadd.s32 4294967294, %s12795_s15   ;;  %s12795_s15 = sphi %s12827_s15, %s17069_s15   ;;  %s12791_s14 = sphi %s12825_s14, %s17068_s14   ;;  %s12787_s13 = sphi %s12823_s13, %s17067_s13   ;;  %s12783_s12 = sphi %s12821_s12, %s17066_s12  }
   0x4   : > { %s12846_s18 = sadd.s32 1, %s12795_s15   ;;  %s96_s19 = sadd.s32 1, %s12791_s14 }
   0x5   : > { %s93_s20 = ssub.s32 %s12795_s15, %s12846_s18  ;;  %p106_p0 = scmp.ne.s32.totalorder %s12791_s14, %s12787_s13 }
   0x6   : > { %p94_p1 = scmp.eq.s32.totalorder %s93_s20, 0  ;;  %p107_p2 = scmp.eq.s32.totalorder %s12842_s16, 1 }
   0x7   : > { %p112_p3 = scmp.ne.s32.totalorder %s12787_s13, %s12783_s12  ;;  %p113_p4 = scmp.eq.s32.totalorder %s12529_s17, 1 }
   0x8   : > { %s12857_s21 = scalar_select %p94_p1, %s12791_s14, %s96_s19  }
   0x9   : > { %p12859_p5 = por %p107_p2, %p106_p0  ;;  %p12863_p6 = por %p113_p4, %p112_p3 }
   0xa   : > { %p12532_p7 = scmp.ge.s32.totalorder %s12795_s15, 1  ;;  %p150_p8 = scmp.lt.s32.totalorder %s12795_s15, 3 }
   0xc   : > { %p151_p9 = pnand %p12532_p7, %p150_p8 }
   0xe   : > { %154 = sbr.rel (%p151_p9) target bundleno = 1432 (0x598), region = 32 }
  0x13   : > { %p179_p10 = scmp.lt.s32.totalorder %s12842_s16, 1  ;;  %v221_v0 = vlaneseq  ;;  %v16872_v1 = vmov 0.0   ;;  %v12798_v2 = vmov 1966171168   ;;  %s176_s20 = sand.u32 1, %s12787_s13  }
  0x14   : > { %12045 = vmatprep.subr.mxu0 %v16872_v1  ;;  %v237_v3 = vunpack.c.l.s4 %v12798_v2  ;;  %12118 = vmatprep.subr.mxu1 %v16872_v1  ;;  %s12445_s4 = scalar_lea.sflag [#allocation4], %s176_s20 }
  0x15   : > { %s12873_s24 = scalar_select %p179_p10, %s12842_s16, 1  ;;  %v222_v4 = vshrl.u32 %v221_v0, 7 }
  0x16   : > { %v238_v5 = vunpack.c.0.s8 %v237_v3 }
  0x17   : > { %s12676_s25 = sshll.u32 %s12873_s24, 9  ;;  %v12883_v7 = vsub.s32 0, %v222_v4  ;;  %v12886_v9 = vcvt.s32.f32 %v222_v4  ;;  %s12675_s29 = sshll.u32 %s12873_s24, 6 }
  0x18   : > { %s12879_s28 = scalar_lea.vmem %s16869_s1, %s12676_s25  ;;  %v12881_v6 = vsub.s32 %v238_v5, %v222_v4  ;;  %s14475_s5 = scalar_lea.vmem %s16868_s0, %s12675_s29 }
  0x19   : > { %v12602_v8 = vld.sshfl [vmem:[%s12879_s28 + $0x40] sm:$0x33 pattern:$0x75316420]  ;;  %s12533_s24 = sshll.u32 %s176_s20, 3  ;;  %s12672_s25 = sshll.u32 %s12842_s16, 7 }
  0x1a   : > { %v12610_v10 = vld.sshfl [vmem:[%s12879_s28 + $0x44] sm:$0x33 pattern:$0x75316420]  ;;  %v6116_v11 = vcombine.high %v12602_v8, %v12602_v8  ;;  %v6123_v12 = vrot.slane %v12602_v8, %v12881_v6  ;;  %s178_s26 = scalar_lea.vmem [#allocation3], %s12533_s24  ;;  %s16826_s30 = scalar_lea.hbm %s16871_s3, %s12672_s25 }
  0x1b   : > { %v12606_v13 = vld.sshfl [vmem:[%s12879_s28 + $0x48] sm:$0x33 pattern:$0x75316420]  ;;  %v6508_v14 = vcombine.high %v12610_v10, %v12610_v10  ;;  %v6515_v15 = vrot.slane %v12610_v10, %v12881_v6  ;;  %s12458_s27 = sshll.u32 %s178_s26, 4  ;;  %s12800_s16 = smov [#allocation3]   ;;  %s16828_s27 = int_to_ptr.vmem [resolvable:$true] %s12458_s27 }
  0x1c   : > { %v6130_v16 = vrot.slane %v6116_v11, %v12881_v6  ;;  %v6131_v17 = vcombine.high %v6123_v12, %v6123_v12  ;;  %v6208_v18 = vrot.slane %v6123_v12, %v12883_v7  ;;  %v6312_v19 = vcombine.high %v12606_v13, %v12606_v13  ;;  %v12614_v31 = vld.sshfl [vmem:[%s12879_s28 + $0x4c] sm:$0x33 pattern:$0x75316420]  ;;  %s12739_s6 = sshll.u32 %s12800_s16, 4  ;;  %s12740_s6 = int_to_ptr.vmem [resolvable:$false] %s12739_s6 }
  0x1d   : > { %v6319_v20 = vrot.slane %v12606_v13, %v12881_v6  ;;  %v6522_v21 = vrot.slane %v6508_v14, %v12881_v6  ;;  %v6523_v22 = vcombine.high %v6515_v15, %v6515_v15  ;;  %v6600_v23 = vrot.slane %v6515_v15, %v12883_v7  ;;  %v12618_v34 = vld.sshfl [vmem:[%s12879_s28 + $0x50] sm:$0x33 pattern:$0x75316420]  ;;  %s12741_s7 = scalar_lea.vmem %s12740_s6, 256  ;;  %p12742_p0 = scmp.lt.s32.totalorder %s16828_s27, %s12740_s6 }
  0x1e   : > { %v6132_v24 = vcombine.high %v6130_v16, %v6130_v16  ;;  %v6212_v25 = vrot.slane %v6130_v16, %v12883_v7  ;;  %v6216_v26 = vrot.slane %v6131_v17, %v12883_v7  ;;  %vm6285_vm0 = vcmp.eq.f32.partialorder %v6208_v18, %v12886_v9  ;;  %v12622_v39 = vld.sshfl [vmem:[%s12879_s28 + $0x58] sm:$0x33 pattern:$0x75316420] }
  0x1f   : > { %v6326_v27 = vrot.slane %v6312_v19, %v12881_v6  ;;  %v6327_v28 = vcombine.high %v6319_v20, %v6319_v20  ;;  %v6404_v29 = vrot.slane %v6319_v20, %v12883_v7  ;;  %v6524_v30 = vcombine.high %v6522_v21, %v6522_v21  ;;  %v12626_v13 = vld.sshfl [vmem:[%s12879_s28 + $0x54] sm:$0x33 pattern:$0x75316420] }
  0x20   : > { %v6220_v32 = vrot.slane %v6132_v24, %v12883_v7  ;;  %vm6286_vm1 = vcmp.eq.f32.partialorder %v6212_v25, %v12886_v9  ;;  %vm6287_vm2 = vcmp.eq.f32.partialorder %v6216_v26, %v12886_v9  ;;  %v6604_v33 = vrot.slane %v6522_v21, %v12883_v7  ;;  %v12630_v17 = vld.sshfl [vmem:[%s12879_s28 + $0x5c] sm:$0x33 pattern:$0x75316420] }
  0x21   : > { %v6328_v35 = vcombine.high %v6326_v27, %v6326_v27  ;;  %v6408_v36 = vrot.slane %v6326_v27, %v12883_v7  ;;  %v6412_v37 = vrot.slane %v6327_v28, %v12883_v7  ;;  %v6481_v38 = vsel %vm6285_vm0, %v6404_v29, 0.0 }
  0x22   : > { %vm6288_vm3 = vcmp.eq.f32.partialorder %v6220_v32, %v12886_v9  ;;  %v6608_v40 = vrot.slane %v6523_v22, %v12883_v7  ;;  %v6612_v41 = vrot.slane %v6524_v30, %v12883_v7  ;;  %vm12915_vm4 = vcmp.eq.f32.partialorder %v6600_v23, %v12886_v9 }
  0x23   : > { %v6416_v43 = vrot.slane %v6328_v35, %v12883_v7  ;;  %v6482_v44 = vsel %vm6286_vm1, %v6408_v36, 0.0  ;;  %v6483_v45 = vsel %vm6287_vm2, %v6412_v37, 0.0  ;;  %vm12921_vm5 = vcmp.eq.f32.partialorder %v6604_v33, %v12886_v9 }
  0x24   : > { %vm6679_vm6 = vcmp.eq.f32.partialorder %v6608_v40, %v12886_v9  ;;  %vm6680_vm7 = vcmp.eq.f32.partialorder %v6612_v41, %v12886_v9  ;;  %v6704_v47 = vcombine.high %v12614_v31, %v12614_v31  ;;  %v6711_v48 = vrot.slane %v12614_v31, %v12881_v6 }
  0x25   : > { %v6484_v49 = vsel %vm6288_vm3, %v6416_v43, 0.0  ;;  %v6916_v50 = vcombine.high %v12618_v34, %v12618_v34  ;;  %v6923_v51 = vrot.slane %v12618_v34, %v12881_v6  ;;  %v7112_v52 = vcombine.high %v12622_v39, %v12622_v39 }
  0x26   : > { %v6718_v53 = vrot.slane %v6704_v47, %v12881_v6  ;;  %v6719_v54 = vcombine.high %v6711_v48, %v6711_v48  ;;  %v6796_v55 = vrot.slane %v6711_v48, %v12883_v7  ;;  %v7119_v56 = vrot.slane %v12622_v39, %v12881_v6 }
  0x27   : > { %v6930_v57 = vrot.slane %v6916_v50, %v12881_v6  ;;  %v6931_v58 = vcombine.high %v6923_v51, %v6923_v51  ;;  %v7008_v59 = vrot.slane %v6923_v51, %v12883_v7  ;;  %v7126_v60 = vrot.slane %v7112_v52, %v12881_v6 }
  0x28   : > { %v6720_v61 = vcombine.high %v6718_v53, %v6718_v53  ;;  %v6800_v62 = vrot.slane %v6718_v53, %v12883_v7  ;;  %v6804_v63 = vrot.slane %v6719_v54, %v12883_v7  ;;  %v6873_v0 = vsel %vm12915_vm4, %v6796_v55, 0.0  ;;  %v12603_v53 = vld.sshfl [vmem:[%s12879_s28 + $0xc0] sm:$0x33 pattern:$0x75316420] }
  0x29   : > { %v12939_v2 = vadd.f32 %v6873_v0, %v6481_v38  ;;  %v6932_v3 = vcombine.high %v6930_v57, %v6930_v57  ;;  %v7012_v4 = vrot.slane %v6930_v57, %v12883_v7  ;;  %v7016_v5 = vrot.slane %v6931_v58, %v12883_v7 }
  0x2a   : > { %v6808_v8 = vrot.slane %v6720_v61, %v12883_v7  ;;  %v6874_v10 = vsel %vm12921_vm5, %v6800_v62, 0.0  ;;  %v6875_v11 = vsel %vm6679_vm6, %v6804_v63, 0.0  ;;  %vm12949_vm8 = vcmp.eq.f32.partialorder %v7008_v59, %v12886_v9  ;;  %v12607_v61 = vld.sshfl [vmem:[%s12879_s28 + $0xc8] sm:$0x33 pattern:$0x75316420] }
  0x2b   : > { %v12954_v14 = vadd.f32 %v6874_v10, %v6482_v44  ;;  %v12956_v15 = vadd.f32 %v6875_v11, %v6483_v45  ;;  %v7020_v16 = vrot.slane %v6932_v3, %v12883_v7  ;;  %vm7086_vm9 = vcmp.eq.f32.partialorder %v7012_v4, %v12886_v9 }
  0x2c   : > { %v6876_v18 = vsel %vm6680_vm7, %v6808_v8, 0.0  ;;  %vm7087_vm10 = vcmp.eq.f32.partialorder %v7016_v5, %v12886_v9  ;;  %v7127_v19 = vcombine.high %v7119_v56, %v7119_v56  ;;  %v7128_v20 = vcombine.high %v7126_v60, %v7126_v60 }
  0x2d   : > { %v12964_v21 = vadd.f32 %v6876_v18, %v6484_v49  ;;  %vm7088_vm11 = vcmp.eq.f32.partialorder %v7020_v16, %v12886_v9  ;;  %v7204_v22 = vrot.slane %v7119_v56, %v12883_v7  ;;  %v7208_v23 = vrot.slane %v7126_v60, %v12883_v7 }
  0x2e   : > { %v7212_v24 = vrot.slane %v7127_v19, %v12883_v7  ;;  %v7216_v25 = vrot.slane %v7128_v20, %v12883_v7  ;;  %v7308_v26 = vcombine.high %v12626_v13, %v12626_v13  ;;  %v7315_v27 = vrot.slane %v12626_v13, %v12881_v6 }
  0x2f   : > { %v7281_v28 = vsel %vm12949_vm8, %v7204_v22, 0.0  ;;  %v7282_v29 = vsel %vm7086_vm9, %v7208_v23, 0.0  ;;  %v7504_v30 = vcombine.high %v12630_v17, %v12630_v17  ;;  %v7511_v31 = vrot.slane %v12630_v17, %v12881_v6 }
  0x30   : > { %v7283_v32 = vsel %vm7087_vm10, %v7212_v24, 0.0  ;;  %v7284_v33 = vsel %vm7088_vm11, %v7216_v25, 0.0  ;;  %v7322_v34 = vrot.slane %v7308_v26, %v12881_v6  ;;  %v7323_v35 = vcombine.high %v7315_v27, %v7315_v27 }
  0x31   : > { %v7400_v36 = vrot.slane %v7315_v27, %v12883_v7  ;;  %v7518_v37 = vrot.slane %v7504_v30, %v12881_v6  ;;  %v7519_v38 = vcombine.high %v7511_v31, %v7511_v31  ;;  %v7596_v39 = vrot.slane %v7511_v31, %v12883_v7 }
  0x32   : > { %v7324_v40 = vcombine.high %v7322_v34, %v7322_v34  ;;  %v7404_v41 = vrot.slane %v7322_v34, %v12883_v7  ;;  %v7408_v42 = vrot.slane %v7323_v35, %v12883_v7  ;;  %v7709_v43 = vcombine.high %v12939_v2, %v12939_v2 }
  0x33   : > { %vm7477_vm12 = vcmp.eq.f32.partialorder %v7400_v36, %v12886_v9  ;;  %v7520_v44 = vcombine.high %v7518_v37, %v7518_v37  ;;  %v7600_v45 = vrot.slane %v7518_v37, %v12883_v7  ;;  %v7604_v46 = vrot.slane %v7519_v38, %v12883_v7 }
  0x34   : > { %v7412_v47 = vrot.slane %v7324_v40, %v12883_v7  ;;  %vm7478_vm13 = vcmp.eq.f32.partialorder %v7404_v41, %v12886_v9  ;;  %vm7479_vm14 = vcmp.eq.f32.partialorder %v7408_v42, %v12886_v9  ;;  %v7673_v48 = vsel %vm7477_vm12, %v7596_v39, 0.0 }
  0x35   : > { %v7608_v49 = vrot.slane %v7520_v44, %v12883_v7  ;;  %v7674_v50 = vsel %vm7478_vm13, %v7600_v45, 0.0  ;;  %v7675_v51 = vsel %vm7479_vm14, %v7604_v46, 0.0  ;;  %v12990_v52 = vadd.f32 %v7673_v48, %v7281_v28  ;;  %v12611_v46 = vld.sshfl [vmem:[%s12879_s28 + $0xc4] sm:$0x33 pattern:$0x75316420] }
  0x36   : > { %vm7480_vm15 = vcmp.eq.f32.partialorder %v7412_v47, %v12886_v9  ;;  %v12994_v54 = vadd.f32 %v7674_v50, %v7282_v29  ;;  %v12996_v55 = vadd.f32 %v7675_v51, %v7283_v32  ;;  %v7723_v56 = vrot.slane %v7709_v43, %v12881_v6 }
  0x37   : > { %v7676_v57 = vsel %vm7480_vm15, %v7608_v49, 0.0  ;;  %v8133_v58 = vcombine.high %v12954_v14, %v12954_v14  ;;  %v8557_v59 = vcombine.high %v12956_v15, %v12956_v15  ;;  %v8981_v60 = vcombine.high %v12964_v21, %v12964_v21 }
  0x38   : > { %v13006_v62 = vadd.f32 %v7676_v57, %v7284_v33  ;;  %v7725_v63 = vcombine.high %v7723_v56, %v7723_v56  ;;  %v13009_v0 = vrot.slane %v7723_v56, %v12881_v6  ;;  %v6140_v3 = vcombine.high %v12603_v53, %v12603_v53 }
  0x39   : > { %v8147_v4 = vrot.slane %v8133_v58, %v12881_v6  ;;  %v8571_v5 = vrot.slane %v8557_v59, %v12881_v6  ;;  %v8995_v8 = vrot.slane %v8981_v60, %v12881_v6  ;;  %v6147_v10 = vrot.slane %v12603_v53, %v12881_v6  ;;  %v12615_v58 = vld.sshfl [vmem:[%s12879_s28 + $0xcc] sm:$0x33 pattern:$0x75316420] }
  0x3a   : > { %v13016_v11 = vrot.slane %v7725_v63, %v12881_v6  ;;  %v7924_v12 = vrot.slane %v13009_v0, %v12883_v7  ;;  %v6154_v13 = vrot.slane %v6140_v3, %v12881_v6  ;;  %v6336_v16 = vcombine.high %v12607_v61, %v12607_v61 }
  0x3b   : > { %v8149_v17 = vcombine.high %v8147_v4, %v8147_v4  ;;  %v8573_v18 = vcombine.high %v8571_v5, %v8571_v5  ;;  %v8997_v19 = vcombine.high %v8995_v8, %v8995_v8  ;;  %v13022_v20 = vrot.slane %v8147_v4, %v12881_v6 }
  0x3c   : > { %v7928_v22 = vrot.slane %v13016_v11, %v12883_v7  ;;  %v8069_v23 = vmul.f32 %v7924_v12, %v12990_v52  ;;  %v13028_v24 = vrot.slane %v8571_v5, %v12881_v6  ;;  %v13031_v25 = vrot.slane %v8995_v8, %v12881_v6 }
  0x3d   : > { %v13034_v26 = vrot.slane %v8149_v17, %v12881_v6  ;;  %v13037_v27 = vrot.slane %v8573_v18, %v12881_v6  ;;  %v13040_v28 = vrot.slane %v8997_v19, %v12881_v6  ;;  %v8348_v29 = vrot.slane %v13022_v20, %v12883_v7  ;;  %v12619_v19 = vld.sshfl [vmem:[%s12879_s28 + $0xd0] sm:$0x33 pattern:$0x75316420] }
  0x3e   : > { %vm3520_vm0 = vcmask 64512   ;;  %v8070_v30 = vmul.f32 %v7928_v22, %v12990_v52  ;;  %v8772_v31 = vrot.slane %v13028_v24, %v12883_v7  ;;  %v9196_v32 = vrot.slane %v13031_v25, %v12883_v7 }
  0x3f   : > { %v6155_v33 = vcombine.high %v6147_v10, %v6147_v10  ;;  %v8352_v34 = vrot.slane %v13034_v26, %v12883_v7  ;;  %v8776_v35 = vrot.slane %v13037_v27, %v12883_v7  ;;  %v9200_v36 = vrot.slane %v13040_v28, %v12883_v7 }
  0x40   : > { %v8493_v37 = vmul.f32 %v8348_v29, %v12994_v54  ;;  %v8917_v38 = vmul.f32 %v8772_v31, %v12996_v55  ;;  %v9341_v39 = vmul.f32 %v9196_v32, %v13006_v62  ;;  %v6156_v40 = vcombine.high %v6154_v13, %v6154_v13 }
  0x41   : > { %v6224_v41 = vrot.slane %v6147_v10, %v12883_v7  ;;  %v8494_v42 = vmul.f32 %v8352_v34, %v12994_v54  ;;  %v8918_v43 = vmul.f32 %v8776_v35, %v12996_v55  ;;  %v9342_v44 = vmul.f32 %v9200_v36, %v13006_v62 }
  0x42   : > { %v8525_v45 = vadd.f32 %v8493_v37, %v8069_v23  ;;  %v6228_v47 = vrot.slane %v6154_v13, %v12883_v7  ;;  %v6232_v48 = vrot.slane %v6155_v33, %v12883_v7  ;;  %v6236_v49 = vrot.slane %v6156_v40, %v12883_v7 }
  0x43   : > { %vm13067_vm1 = vcmp.eq.f32.partialorder %v6224_v41, %v12886_v9  ;;  %v8526_v51 = vadd.f32 %v8494_v42, %v8070_v30  ;;  %v6343_v56 = vrot.slane %v12607_v61, %v12881_v6  ;;  %v6350_v57 = vrot.slane %v6336_v16, %v12881_v6 }
  0x44   : > { %v8949_v53 = vadd.f32 %v8917_v38, %v8525_v45  ;;  %vm13075_vm2 = vcmp.eq.f32.partialorder %v6228_v47, %v12886_v9  ;;  %vm6291_vm3 = vcmp.eq.f32.partialorder %v6232_v48, %v12886_v9  ;;  %vm6292_vm4 = vcmp.eq.f32.partialorder %v6236_v49, %v12886_v9 }
  0x45   : > { %v6532_v60 = vcombine.high %v12611_v46, %v12611_v46  ;;  %v8950_v63 = vadd.f32 %v8918_v43, %v8526_v51  ;;  %v6351_v4 = vcombine.high %v6343_v56, %v6343_v56  ;;  %v6352_v5 = vcombine.high %v6350_v57, %v6350_v57 }
  0x46   : > { %v9373_v3 = vadd.f32 %v9341_v39, %v8949_v53  ;;  %v6420_v61 = vrot.slane %v6343_v56, %v12883_v7  ;;  %v6424_v8 = vrot.slane %v6350_v57, %v12883_v7  ;;  %v6539_v10 = vrot.slane %v12611_v46, %v12881_v6  ;;  %v12623_v39 = vld.sshfl [vmem:[%s12879_s28 + $0xd8] sm:$0x33 pattern:$0x75316420] }
  0x47   : > { %v6546_v12 = vrot.slane %v6532_v60, %v12881_v6  ;;  %v9374_v13 = vadd.f32 %v9342_v44, %v8950_v63  ;;  %v6428_v16 = vrot.slane %v6351_v4, %v12883_v7  ;;  %v6432_v17 = vrot.slane %v6352_v5, %v12883_v7  ;;  %v12627_v57 = vld.sshfl [vmem:[%s12879_s28 + $0xd4] sm:$0x33 pattern:$0x75316420] }
  0x48   : > { %9405 = vst.msk [vmem:[#allocation2 + $0x70] sm:$0xff] %vm3520_vm0, %v9373_v3  ;;  %v6728_v18 = vcombine.high %v12615_v58, %v12615_v58  ;;  %v6485_v22 = vsel %vm13067_vm1, %v6420_v61, 0.0  ;;  %v6486_v23 = vsel %vm13075_vm2, %v6424_v8, 0.0  ;;  %v6547_v29 = vcombine.high %v6539_v10, %v6539_v10 }
  0x49   : > { %v6548_v30 = vcombine.high %v6546_v12, %v6546_v12  ;;  %9406 = vst.msk [vmem:[#allocation2 + $0x78] sm:$0xff] %vm3520_vm0, %v9374_v13  ;;  %v6487_v31 = vsel %vm6291_vm3, %v6428_v16, 0.0  ;;  %v6488_v32 = vsel %vm6292_vm4, %v6432_v17, 0.0  ;;  %v6616_v33 = vrot.slane %v6539_v10, %v12883_v7 }
  0x4a   : > { %v6620_v34 = vrot.slane %v6546_v12, %v12883_v7  ;;  %v6624_v35 = vrot.slane %v6547_v29, %v12883_v7  ;;  %v6735_v37 = vrot.slane %v12615_v58, %v12881_v6  ;;  %v6742_v38 = vrot.slane %v6728_v18, %v12881_v6  ;;  %v12631_v18 = vld.sshfl [vmem:[%s12879_s28 + $0xdc] sm:$0x33 pattern:$0x75316420] }
  0x4b   : > { %v6628_v36 = vrot.slane %v6548_v30, %v12883_v7  ;;  %vm13106_vm5 = vcmp.eq.f32.partialorder %v6616_v33, %v12886_v9  ;;  %v6940_v42 = vcombine.high %v12619_v19, %v12619_v19  ;;  %v6947_v43 = vrot.slane %v12619_v19, %v12881_v6 }
  0x4c   : > { %vm13111_vm6 = vcmp.eq.f32.partialorder %v6620_v34, %v12886_v9  ;;  %vm6683_vm7 = vcmp.eq.f32.partialorder %v6624_v35, %v12886_v9  ;;  %v6743_v44 = vcombine.high %v6735_v37, %v6735_v37  ;;  %v6744_v45 = vcombine.high %v6742_v38, %v6742_v38 }
  0x4d   : > { %vm6684_vm8 = vcmp.eq.f32.partialorder %v6628_v36, %v12886_v9  ;;  %v6812_v46 = vrot.slane %v6735_v37, %v12883_v7  ;;  %v6816_v47 = vrot.slane %v6742_v38, %v12883_v7  ;;  %v6954_v48 = vrot.slane %v6940_v42, %v12881_v6 }
  0x4e   : > { %v6955_v49 = vcombine.high %v6947_v43, %v6947_v43  ;;  %v6820_v50 = vrot.slane %v6743_v44, %v12883_v7  ;;  %v6824_v51 = vrot.slane %v6744_v45, %v12883_v7  ;;  %v7024_v53 = vrot.slane %v6947_v43, %v12883_v7 }
  0x4f   : > { %v7136_v56 = vcombine.high %v12623_v39, %v12623_v39  ;;  %v6877_v58 = vsel %vm13106_vm5, %v6812_v46, 0.0  ;;  %v6878_v59 = vsel %vm13111_vm6, %v6816_v47, 0.0  ;;  %v6956_v60 = vcombine.high %v6954_v48, %v6954_v48  ;;  %v11975_v4 = vld [vmem:[#allocation2 + $0x70] sm:$0xff] }
  0x50   : > { %v7028_v63 = vrot.slane %v6954_v48, %v12883_v7  ;;  %v11976_v3 = vld [vmem:[#allocation2 + $0x78] sm:$0xff]  ;;  %v6879_v5 = vsel %vm6683_vm7, %v6820_v50, 0.0  ;;  %v6880_v61 = vsel %vm6684_vm8, %v6824_v51, 0.0  ;;  %v13134_v8 = vadd.f32 %v6877_v58, %v6485_v22 }
  0x51   : > { %v13136_v10 = vadd.f32 %v6878_v59, %v6486_v23  ;;  %12046 = vmatpush1.msra.mxu0 %v11976_v3  ;;  %v13138_v12 = vadd.f32 %v6879_v5, %v6487_v31  ;;  %v13140_v13 = vadd.f32 %v6880_v61, %v6488_v32  ;;  %v7032_v16 = vrot.slane %v6955_v49, %v12883_v7 }
  0x52   : > { %v7036_v17 = vrot.slane %v6956_v60, %v12883_v7  ;;  %12047 = vmatprep.subr.mxu0 %v16872_v1  ;;  %vm13147_vm9 = vcmp.eq.f32.partialorder %v7024_v53, %v12886_v9  ;;  %vm13152_vm10 = vcmp.eq.f32.partialorder %v7028_v63, %v12886_v9  ;;  %v7143_v23 = vrot.slane %v12623_v39, %v12881_v6 }
  0x53   : > { %v7150_v29 = vrot.slane %v7136_v56, %v12881_v6  ;;  %12048 = vmatpush1.msra.mxu0 %v11975_v4  ;;  %vm7091_vm11 = vcmp.eq.f32.partialorder %v7032_v16, %v12886_v9  ;;  %v7332_v30 = vcombine.high %v12627_v57, %v12627_v57  ;;  %v7339_v31 = vrot.slane %v12627_v57, %v12881_v6 }
  0x54   : > { %vm7092_vm12 = vcmp.eq.f32.partialorder %v7036_v17, %v12886_v9  ;;  %v7151_v32 = vcombine.high %v7143_v23, %v7143_v23  ;;  %v7220_v34 = vrot.slane %v7143_v23, %v12883_v7  ;;  %12049 = vmatprep.subr.mxu0 %v16872_v1  ;;  %v7528_v39 = vcombine.high %v12631_v18, %v12631_v18 }
  0x55   : > { %v7152_v33 = vcombine.high %v7150_v29, %v7150_v29  ;;  %v7224_v35 = vrot.slane %v7150_v29, %v12883_v7  ;;  %v7346_v36 = vrot.slane %v7332_v30, %v12881_v6  ;;  %v7347_v37 = vcombine.high %v7339_v31, %v7339_v31 }
  0x56   : > { %v7416_v38 = vrot.slane %v7339_v31, %v12883_v7  ;;  %v7228_v40 = vrot.slane %v7151_v32, %v12883_v7  ;;  %v7285_v42 = vsel %vm13147_vm9, %v7220_v34, 0.0  ;;  %v7535_v50 = vrot.slane %v12631_v18, %v12881_v6 }
  0x57   : > { %v7232_v41 = vrot.slane %v7152_v33, %v12883_v7  ;;  %v7286_v43 = vsel %vm13152_vm10, %v7224_v35, 0.0  ;;  %v7348_v44 = vcombine.high %v7346_v36, %v7346_v36  ;;  %v7420_v45 = vrot.slane %v7346_v36, %v12883_v7 }
  0x58   : > { %v7424_v46 = vrot.slane %v7347_v37, %v12883_v7  ;;  %vm13175_vm13 = vcmp.eq.f32.partialorder %v7416_v38, %v12886_v9  ;;  %v7287_v48 = vsel %vm7091_vm11, %v7228_v40, 0.0  ;;  %v7542_v51 = vrot.slane %v7528_v39, %v12881_v6 }
  0x59   : > { %v7288_v49 = vsel %vm7092_vm12, %v7232_v41, 0.0  ;;  %v7428_v53 = vrot.slane %v7348_v44, %v12883_v7  ;;  %vm7482_vm14 = vcmp.eq.f32.partialorder %v7420_v45, %v12886_v9  ;;  %v7758_v56 = vcombine.high %v13134_v8, %v13134_v8 }
  0x5a   : > { %vm7483_vm15 = vcmp.eq.f32.partialorder %v7424_v46, %v12886_v9  ;;  %v7543_v57 = vcombine.high %v7535_v50, %v7535_v50  ;;  %v7544_v58 = vcombine.high %v7542_v51, %v7542_v51  ;;  %v7612_v59 = vrot.slane %v7535_v50, %v12883_v7 }
  0x5b   : > { %v7616_v60 = vrot.slane %v7542_v51, %v12883_v7  ;;  %vm7484_vm1 = vcmp.eq.f32.partialorder %v7428_v53, %v12886_v9  ;;  %v7772_v63 = vrot.slane %v7758_v56, %v12881_v6  ;;  %v8182_v3 = vcombine.high %v13136_v10, %v13136_v10 }
  0x5c   : > { %v8606_v4 = vcombine.high %v13138_v12, %v13138_v12  ;;  %v7620_v5 = vrot.slane %v7543_v57, %v12883_v7  ;;  %v7624_v61 = vrot.slane %v7544_v58, %v12883_v7  ;;  %v7677_v16 = vsel %vm13175_vm13, %v7612_v59, 0.0 }
  0x5d   : > { %v7678_v17 = vsel %vm7482_vm14, %v7616_v60, 0.0  ;;  %v13202_v18 = vadd.f32 %v7677_v16, %v7285_v42  ;;  %v7774_v22 = vcombine.high %v7772_v63, %v7772_v63  ;;  %v8196_v23 = vrot.slane %v8182_v3, %v12881_v6 }
  0x5e   : > { %v13204_v19 = vadd.f32 %v7678_v17, %v7286_v43  ;;  %v7679_v29 = vsel %vm7483_vm15, %v7620_v5, 0.0  ;;  %v7680_v30 = vsel %vm7484_vm1, %v7624_v61, 0.0  ;;  %v8620_v31 = vrot.slane %v8606_v4, %v12881_v6 }
  0x5f   : > { %16925 = vst [vmem:[#allocation6_spill] sm:$0xff] %v13202_v18  ;;  %v9030_v32 = vcombine.high %v13140_v13, %v13140_v13  ;;  %v13212_v33 = vadd.f32 %v7679_v29, %v7287_v48  ;;  %v13214_v34 = vadd.f32 %v7680_v30, %v7288_v49  ;;  %v13217_v35 = vrot.slane %v7774_v22, %v12881_v6 }
  0x60   : > { %16926 = vst [vmem:[#allocation7_spill] sm:$0xff] %v13204_v19  ;;  %v8198_v36 = vcombine.high %v8196_v23, %v8196_v23  ;;  %v8622_v37 = vcombine.high %v8620_v31, %v8620_v31  ;;  %v7716_v39 = vrot.slane %v12939_v2, %v12881_v6  ;;  %v8140_v40 = vrot.slane %v12954_v14, %v12881_v6 }
  0x61   : > { %16927 = vst [vmem:[#allocation8_spill] sm:$0xff] %v13212_v33  ;;  %16928 = vst [vmem:[#allocation9_spill] sm:$0xff] %v13214_v34  ;;  %v9044_v38 = vrot.slane %v9030_v32, %v12881_v6  ;;  %v7960_v41 = vrot.slane %v13217_v35, %v12883_v7  ;;  %v8564_v43 = vrot.slane %v12956_v15, %v12881_v6 }
  0x62   : > { %v13227_v42 = vrot.slane %v8198_v36, %v12881_v6  ;;  %v8988_v44 = vrot.slane %v12964_v21, %v12881_v6  ;;  %v13234_v45 = vrot.slane %v8622_v37, %v12881_v6  ;;  %v7724_v2 = vcombine.high %v7716_v39, %v7716_v39 }
  0x63   : > { %v9046_v46 = vcombine.high %v9044_v38, %v9044_v38  ;;  %v8148_v47 = vcombine.high %v8140_v40, %v8140_v40  ;;  %v8078_v14 = vmul.f32 %v7960_v41, %v13202_v18  ;;  %v8572_v49 = vcombine.high %v8564_v43, %v8564_v43 }
  0x64   : > { %16929 = vst [vmem:[#allocation10_spill] sm:$0xff] %v13227_v42  ;;  %16930 = vst [vmem:[#allocation11_spill] sm:$0xff] %v13234_v45  ;;  %v8384_v48 = vrot.slane %v13227_v42, %v12883_v7  ;;  %v8996_v50 = vcombine.high %v8988_v44, %v8988_v44  ;;  %v8808_v51 = vrot.slane %v13234_v45, %v12883_v7 }
  0x65   : > { %v13242_v15 = vrot.slane %v9046_v46, %v12881_v6  ;;  %v13245_v21 = vrot.slane %v7724_v2, %v12881_v6  ;;  %v13248_v53 = vrot.slane %v8148_v47, %v12881_v6  ;;  %v13252_v57 = vrot.slane %v8572_v49, %v12881_v6 }
  0x66   : > { %v8502_v56 = vmul.f32 %v8384_v48, %v13204_v19  ;;  %v13255_v58 = vrot.slane %v8996_v50, %v12881_v6  ;;  %v13258_v59 = vrot.slane %v7772_v63, %v12881_v6  ;;  %v8926_v60 = vmul.f32 %v8808_v51, %v13212_v33 }
  0x67   : > { %16931 = vst [vmem:[#allocation12_spill] sm:$0xff] %v13242_v15  ;;  %v9232_v3 = vrot.slane %v13242_v15, %v12883_v7  ;;  %v7756_v4 = vcombine.high %v13245_v21, %v13245_v21  ;;  %v8180_v5 = vcombine.high %v13248_v53, %v13248_v53  ;;  %v8604_v16 = vcombine.high %v13252_v57, %v13252_v57 }
  0x68   : > { %16932 = vst [vmem:[#allocation13_spill] sm:$0xff] %v13258_v59  ;;  %v8534_v61 = vadd.f32 %v8502_v56, %v8078_v14  ;;  %v9028_v17 = vcombine.high %v13255_v58, %v13255_v58  ;;  %v7956_v63 = vrot.slane %v13258_v59, %v12883_v7  ;;  %v13277_v32 = vrot.slane %v8196_v23, %v12881_v6 }
  0x69   : > { %v9350_v22 = vmul.f32 %v9232_v3, %v13214_v34  ;;  %v7920_v29 = vrot.slane %v7756_v4, %v12883_v7  ;;  %v8344_v30 = vrot.slane %v8180_v5, %v12883_v7  ;;  %v8768_v37 = vrot.slane %v8604_v16, %v12883_v7 }
  0x6a   : > { %16933 = vst [vmem:[#allocation14_spill] sm:$0xff] %v13277_v32  ;;  %v8958_v36 = vadd.f32 %v8926_v60, %v8534_v61  ;;  %v9192_v41 = vrot.slane %v9028_v17, %v12883_v7  ;;  %v8077_v46 = vmul.f32 %v7956_v63, %v13202_v18  ;;  %v8380_v14 = vrot.slane %v13277_v32, %v12883_v7 }
  0x6b   : > { %v8068_v2 = vmul.f32 %v7920_v29, %v12990_v52  ;;  %v8492_v47 = vmul.f32 %v8344_v30, %v12994_v54  ;;  %v13287_v48 = vrot.slane %v8620_v31, %v12881_v6  ;;  %v8916_v23 = vmul.f32 %v8768_v37, %v12996_v55 }
  0x6c   : > { %v9382_v49 = vadd.f32 %v9350_v22, %v8958_v36  ;;  %v9340_v50 = vmul.f32 %v9192_v41, %v13006_v62  ;;  %v13292_v51 = vrot.slane %v9044_v38, %v12881_v6  ;;  %v8501_v60 = vmul.f32 %v8380_v14, %v13204_v19 }
  0x6d   : > { %16934 = vst [vmem:[#allocation15_spill] sm:$0xff] %v13287_v48  ;;  %v8524_v56 = vadd.f32 %v8492_v47, %v8068_v2  ;;  %v8804_v3 = vrot.slane %v13287_v48, %v12883_v7  ;;  %v13298_v4 = vrot.slane %v7716_v39, %v12881_v6  ;;  %v13304_v5 = vrot.slane %v8140_v40, %v12881_v6 }
  0x6e   : > { %16935 = vst [vmem:[#allocation16_spill] sm:$0xff] %v13292_v51  ;;  %9414 = vst.msk [vmem:[#allocation2 + $0x118] sm:$0xff] %vm3520_vm0, %v9382_v49  ;;  %v9228_v31 = vrot.slane %v13292_v51, %v12883_v7  ;;  %v13307_v38 = vrot.slane %v8564_v43, %v12881_v6  ;;  %v13310_v61 = vrot.slane %v8988_v44, %v12881_v6 }
  0x6f   : > { %v8948_v16 = vadd.f32 %v8916_v23, %v8524_v56  ;;  %v8533_v17 = vadd.f32 %v8501_v60, %v8077_v46  ;;  %v8925_v63 = vmul.f32 %v8804_v3, %v13212_v33  ;;  %v7754_v39 = vcombine.high %v13298_v4, %v13298_v4 }
  0x70   : > { %v9349_v22 = vmul.f32 %v9228_v31, %v13214_v34  ;;  %v8178_v29 = vcombine.high %v13304_v5, %v13304_v5  ;;  %v8602_v40 = vcombine.high %v13307_v38, %v13307_v38  ;;  %v9026_v43 = vcombine.high %v13310_v61, %v13310_v61 }
  0x71   : > { %v9372_v44 = vadd.f32 %v9340_v50, %v8948_v16  ;;  %v8957_v30 = vadd.f32 %v8925_v63, %v8533_v17  ;;  %v7916_v36 = vrot.slane %v7754_v39, %v12883_v7  ;;  %v7765_v37 = vrot.slane %v13134_v8, %v12881_v6 }
  0x72   : > { %v8340_v41 = vrot.slane %v8178_v29, %v12883_v7  ;;  %v8764_v46 = vrot.slane %v8602_v40, %v12883_v7  ;;  %v9188_v2 = vrot.slane %v9026_v43, %v12883_v7  ;;  %v8189_v47 = vrot.slane %v13136_v10, %v12881_v6 }
  0x73   : > { %9404 = vst.msk [vmem:[#allocation2 + $0x68] sm:$0xff] %vm3520_vm0, %v9372_v44  ;;  %v9381_v14 = vadd.f32 %v9349_v22, %v8957_v30  ;;  %v8067_v49 = vmul.f32 %v7916_v36, %v12990_v52  ;;  %v7773_v23 = vcombine.high %v7765_v37, %v7765_v37  ;;  %v8613_v50 = vrot.slane %v13138_v12, %v12881_v6 }
  0x74   : > { %v8491_v8 = vmul.f32 %v8340_v41, %v12994_v54  ;;  %v8915_v56 = vmul.f32 %v8764_v46, %v12996_v55  ;;  %v9339_v60 = vmul.f32 %v9188_v2, %v13006_v62  ;;  %v8197_v3 = vcombine.high %v8189_v47, %v8189_v47 }
  0x75   : > { %v11996_v31 = vld [vmem:[#allocation2 + $0x118] sm:$0xff]  ;;  %9413 = vst.msk [vmem:[#allocation2 + $0x110] sm:$0xff] %vm3520_vm0, %v9381_v14  ;;  %v13339_v10 = vrot.slane %v7773_v23, %v12881_v6  ;;  %v8621_v16 = vcombine.high %v8613_v50, %v8613_v50  ;;  %v9037_v17 = vrot.slane %v13140_v13, %v12881_v6  ;;  %v7912_v12 = vrot.slane %v13245_v21, %v12883_v7 }
  0x76   : > { %12119 = vmatpush1.msra.mxu1 %v11996_v31  ;;  %v8523_v63 = vadd.f32 %v8491_v8, %v8067_v49  ;;  %v13346_v39 = vrot.slane %v8197_v3, %v12881_v6  ;;  %v8336_v22 = vrot.slane %v13248_v53, %v12883_v7  ;;  %v8760_v29 = vrot.slane %v13252_v57, %v12883_v7 }
  0x77   : > { %12120 = vmatprep.subr.mxu1 %v16872_v1  ;;  %v7805_v40 = vcombine.high %v13339_v10, %v13339_v10  ;;  %v13356_v13 = vrot.slane %v8621_v16, %v12881_v6  ;;  %v9045_v21 = vcombine.high %v9037_v17, %v9037_v17  ;;  %v8066_v43 = vmul.f32 %v7912_v12, %v12990_v52 }
  0x78   : > { %v8947_v44 = vadd.f32 %v8915_v56, %v8523_v63  ;;  %v8229_v30 = vcombine.high %v13346_v39, %v13346_v39  ;;  %v8490_v53 = vmul.f32 %v8336_v22, %v12994_v54  ;;  %v8914_v36 = vmul.f32 %v8760_v29, %v12996_v55 }
  0x79   : > { %v7952_v57 = vrot.slane %v7805_v40, %v12883_v7  ;;  %v8653_v41 = vcombine.high %v13356_v13, %v13356_v13  ;;  %v13367_v46 = vrot.slane %v9045_v21, %v12881_v6  ;;  %v9184_v2 = vrot.slane %v13255_v58, %v12883_v7 }
  0x7a   : > { %v11974_v14 = vld [vmem:[#allocation2 + $0x68] sm:$0xff]  ;;  %v9371_v49 = vadd.f32 %v9339_v60, %v8947_v44  ;;  %v8376_v23 = vrot.slane %v8229_v30, %v12883_v7  ;;  %v8522_v8 = vadd.f32 %v8490_v53, %v8066_v43  ;;  %v13373_v56 = vrot.slane %v7765_v37, %v12881_v6 }
  0x7b   : > { %12050 = vmatpush1.msra.mxu0 %v11974_v14  ;;  %v8076_v3 = vmul.f32 %v7952_v57, %v13202_v18  ;;  %v8800_v31 = vrot.slane %v8653_v41, %v12883_v7  ;;  %v9077_v16 = vcombine.high %v13367_v46, %v13367_v46  ;;  %v9338_v12 = vmul.f32 %v9184_v2, %v13006_v62 }
  0x7c   : > { %v11995_v63 = vld [vmem:[#allocation2 + $0x110] sm:$0xff]  ;;  %12051 = vmatprep.subr.mxu0 %v16872_v1  ;;  %9403 = vst.msk [vmem:[#allocation2 + $0x60] sm:$0xff] %vm3520_vm0, %v9371_v49  ;;  %v8500_v58 = vmul.f32 %v8376_v23, %v13204_v19  ;;  %v8946_v60 = vadd.f32 %v8914_v36, %v8522_v8  ;;  %v7803_v37 = vcombine.high %v13373_v56, %v13373_v56 }
  0x7d   : > { %v13386_v22 = vrot.slane %v8189_v47, %v12881_v6  ;;  %12121 = vmatpush1.msra.mxu1 %v11995_v63  ;;  %v8924_v29 = vmul.f32 %v8800_v31, %v13212_v33  ;;  %v9224_v40 = vrot.slane %v9077_v16, %v12883_v7  ;;  %v13391_v21 = vrot.slane %v8613_v50, %v12881_v6 }
  0x7e   : > { %v13394_v43 = vrot.slane %v9037_v17, %v12881_v6  ;;  %12122 = vmatprep.subr.mxu1 %v16872_v1  ;;  %v8532_v44 = vadd.f32 %v8500_v58, %v8076_v3  ;;  %v9370_v30 = vadd.f32 %v9338_v12, %v8946_v60  ;;  %v7948_v53 = vrot.slane %v7803_v37, %v12883_v7  ;;  %v12570_v58 = vld.sshfl [vmem:[%s12879_s28 + $0x20] sm:$0x33 pattern:$0x75316420] }
  0x7f   : > { %v8227_v47 = vcombine.high %v13386_v22, %v13386_v22  ;;  %v9348_v36 = vmul.f32 %v9224_v40, %v13214_v34  ;;  %v8651_v57 = vcombine.high %v13391_v21, %v13391_v21  ;;  %v7908_v17 = vrot.slane %v13298_v4, %v12883_v7 }
  0x80   : > { %v9075_v50 = vcombine.high %v13394_v43, %v13394_v43  ;;  %v8956_v41 = vadd.f32 %v8924_v29, %v8532_v44  ;;  %9402 = vst.msk [vmem:[#allocation2 + $0x58] sm:$0xff] %vm3520_vm0, %v9370_v30  ;;  %v8075_v2 = vmul.f32 %v7948_v53, %v13202_v18  ;;  %v8332_v49 = vrot.slane %v13304_v5, %v12883_v7  ;;  %v12574_v53 = vld.sshfl [vmem:[%s12879_s28 + $0x28] sm:$0x33 pattern:$0x75316420] }
  0x81   : > { %v8372_v14 = vrot.slane %v8227_v47, %v12883_v7  ;;  %v8796_v23 = vrot.slane %v8651_v57, %v12883_v7  ;;  %v8065_v3 = vmul.f32 %v7908_v17, %v12990_v52  ;;  %v8756_v31 = vrot.slane %v13307_v38, %v12883_v7 }
  0x82   : > { %v9220_v8 = vrot.slane %v9075_v50, %v12883_v7  ;;  %v9380_v4 = vadd.f32 %v9348_v36, %v8956_v41  ;;  %v8489_v12 = vmul.f32 %v8332_v49, %v12994_v54  ;;  %v9180_v63 = vrot.slane %v13310_v61, %v12883_v7 }
  0x83   : > { %v8499_v16 = vmul.f32 %v8372_v14, %v13204_v19  ;;  %v11973_v5 = vld [vmem:[#allocation2 + $0x60] sm:$0xff]  ;;  %v8923_v60 = vmul.f32 %v8796_v23, %v13212_v33  ;;  %v8913_v29 = vmul.f32 %v8756_v31, %v12996_v55  ;;  %v7944_v38 = vrot.slane %v13339_v10, %v12883_v7 }
  0x84   : > { %v9347_v37 = vmul.f32 %v9220_v8, %v13214_v34  ;;  %12052 = vmatpush1.msra.mxu0 %v11973_v5  ;;  %9412 = vst.msk [vmem:[#allocation2 + $0x108] sm:$0xff] %vm3520_vm0, %v9380_v4  ;;  %v8521_v44 = vadd.f32 %v8489_v12, %v8065_v3  ;;  %v9337_v30 = vmul.f32 %v9180_v63, %v13006_v62  ;;  %v12578_v23 = vld.sshfl [vmem:[%s12879_s28 + $0x24] sm:$0x33 pattern:$0x75316420] }
  0x85   : > { %v8531_v40 = vadd.f32 %v8499_v16, %v8075_v2  ;;  %v8368_v61 = vrot.slane %v13346_v39, %v12883_v7  ;;  %12053 = vmatprep.subr.mxu0 %v16872_v1  ;;  %v8074_v47 = vmul.f32 %v7944_v38, %v13202_v18  ;;  %v8792_v36 = vrot.slane %v13356_v13, %v12883_v7 }
  0x86   : > { %v9216_v10 = vrot.slane %v13367_v46, %v12883_v7  ;;  %v3596_v57 = vcombine.high %v12570_v58, %v12570_v58  ;;  %v8945_v17 = vadd.f32 %v8913_v29, %v8521_v44  ;;  %v3603_v2 = vrot.slane %v12570_v58, %v12881_v6 }
  0x87   : > { %v8955_v50 = vadd.f32 %v8923_v60, %v8531_v40  ;;  %v8498_v41 = vmul.f32 %v8368_v61, %v13204_v19  ;;  %v11972_v14 = vld [vmem:[#allocation2 + $0x58] sm:$0xff]  ;;  %v8922_v39 = vmul.f32 %v8792_v36, %v13212_v33  ;;  %v3792_v3 = vcombine.high %v12574_v53, %v12574_v53  ;;  %v12582_v40 = vld.sshfl [vmem:[%s12879_s28 + $0x2c] sm:$0x33 pattern:$0x75316420] }
  0x88   : > { %v9346_v49 = vmul.f32 %v9216_v10, %v13214_v34  ;;  %v3610_v8 = vrot.slane %v3596_v57, %v12881_v6  ;;  %12054 = vmatpush1.msra.mxu0 %v11972_v14  ;;  %v9369_v46 = vadd.f32 %v9337_v30, %v8945_v17  ;;  %v3611_v4 = vcombine.high %v3603_v2, %v3603_v2  ;;  %v12586_v57 = vld.sshfl [vmem:[%s12879_s28 + $0x30] sm:$0x33 pattern:$0x75316420] }
  0x89   : > { %v9379_v13 = vadd.f32 %v9347_v37, %v8955_v50  ;;  %v8530_v31 = vadd.f32 %v8498_v41, %v8074_v47  ;;  %12055 = vmatprep.subr.mxu0 %v16872_v1  ;;  %v3688_v12 = vrot.slane %v3603_v2, %v12883_v7  ;;  %v3799_v58 = vrot.slane %v12574_v53, %v12881_v6 }
  0x8a   : > { %v3612_v16 = vcombine.high %v3610_v8, %v3610_v8  ;;  %v3692_v63 = vrot.slane %v3610_v8, %v12883_v7  ;;  %9401 = vst.msk [vmem:[#allocation2 + $0x50] sm:$0xff] %vm3520_vm0, %v9369_v46  ;;  %v3696_v60 = vrot.slane %v3611_v4, %v12883_v7  ;;  %v3806_v37 = vrot.slane %v3792_v3, %v12881_v6 }
  0x8b   : > { %9411 = vst.msk [vmem:[#allocation2 + $0x100] sm:$0xff] %vm3520_vm0, %v9379_v13  ;;  %v8954_v5 = vadd.f32 %v8922_v39, %v8530_v31  ;;  %v3988_v29 = vcombine.high %v12578_v23, %v12578_v23  ;;  %v11994_v38 = vld [vmem:[#allocation2 + $0x108] sm:$0xff]  ;;  %v3807_v30 = vcombine.high %v3799_v58, %v3799_v58  ;;  %vm3765_vm2 = vcmp.eq.f32.partialorder %v3688_v12, %v12886_v9 }
  0x8c   : > { %v3700_v44 = vrot.slane %v3612_v16, %v12883_v7  ;;  %12123 = vmatpush1.msra.mxu1 %v11994_v38  ;;  %v3808_v53 = vcombine.high %v3806_v37, %v3806_v37  ;;  %v3884_v47 = vrot.slane %v3799_v58, %v12883_v7  ;;  %vm3766_vm3 = vcmp.eq.f32.partialorder %v3692_v63, %v12886_v9  ;;  %v12590_v58 = vld.sshfl [vmem:[%s12879_s28 + $0x38] sm:$0x33 pattern:$0x75316420] }
  0x8d   : > { %v9378_v61 = vadd.f32 %v9346_v49, %v8954_v5  ;;  %12124 = vmatprep.subr.mxu1 %v16872_v1  ;;  %vm3767_vm4 = vcmp.eq.f32.partialorder %v3696_v60, %v12886_v9  ;;  %v3888_v36 = vrot.slane %v3806_v37, %v12883_v7  ;;  %v3995_v10 = vrot.slane %v12578_v23, %v12881_v6 }
  0x8e   : > { %vm3768_vm5 = vcmp.eq.f32.partialorder %v3700_v44, %v12886_v9  ;;  %v3892_v50 = vrot.slane %v3807_v30, %v12883_v7  ;;  %v4002_v17 = vrot.slane %v3988_v29, %v12881_v6  ;;  %v4184_v41 = vcombine.high %v12582_v40, %v12582_v40 }
  0x8f   : > { %9410 = vst.msk [vmem:[#allocation2 + $0xf8] sm:$0xff] %vm3520_vm0, %v9378_v61  ;;  %v3896_v2 = vrot.slane %v3808_v53, %v12883_v7  ;;  %v3961_v14 = vsel %vm3765_vm2, %v3884_v47, 0.0  ;;  %v4003_v39 = vcombine.high %v3995_v10, %v3995_v10  ;;  %v4080_v49 = vrot.slane %v3995_v10, %v12883_v7 }
  0x90   : > { %v3962_v8 = vsel %vm3766_vm3, %v3888_v36, 0.0  ;;  %v4004_v3 = vcombine.high %v4002_v17, %v4002_v17  ;;  %v4084_v23 = vrot.slane %v4002_v17, %v12883_v7  ;;  %v4191_v13 = vrot.slane %v12582_v40, %v12881_v6 }
  0x91   : > { %v11971_v31 = vld [vmem:[#allocation2 + $0x50] sm:$0xff]  ;;  %v4088_v4 = vrot.slane %v4003_v39, %v12883_v7  ;;  %vm13472_vm6 = vcmp.eq.f32.partialorder %v4080_v49, %v12886_v9  ;;  %v4198_v12 = vrot.slane %v4184_v41, %v12881_v6  ;;  %v4396_v63 = vcombine.high %v12586_v57, %v12586_v57 }
  0x92   : > { %v11993_v46 = vld [vmem:[#allocation2 + $0x100] sm:$0xff]  ;;  %12056 = vmatpush1.msra.mxu0 %v11971_v31  ;;  %v3963_v5 = vsel %vm3767_vm4, %v3892_v50, 0.0  ;;  %v4092_v37 = vrot.slane %v4004_v3, %v12883_v7  ;;  %vm13482_vm7 = vcmp.eq.f32.partialorder %v4084_v23, %v12886_v9  ;;  %v4199_v38 = vcombine.high %v4191_v13, %v4191_v13  ;;  %v12594_v41 = vld.sshfl [vmem:[%s12879_s28 + $0x34] sm:$0x33 pattern:$0x75316420] }
  0x93   : > { %12125 = vmatpush1.msra.mxu1 %v11993_v46  ;;  %12057 = vmatprep.subr.mxu0 %v16872_v1  ;;  %v3964_v40 = vsel %vm3768_vm5, %v3896_v2, 0.0  ;;  %vm4159_vm8 = vcmp.eq.f32.partialorder %v4088_v4, %v12886_v9  ;;  %v4200_v60 = vcombine.high %v4198_v12, %v4198_v12  ;;  %v4276_v30 = vrot.slane %v4191_v13, %v12883_v7 }
  0x94   : > { %12126 = vmatprep.subr.mxu1 %v16872_v1  ;;  %vm4160_vm9 = vcmp.eq.f32.partialorder %v4092_v37, %v12886_v9  ;;  %v4280_v61 = vrot.slane %v4198_v12, %v12883_v7  ;;  %v4284_v53 = vrot.slane %v4199_v38, %v12883_v7  ;;  %v4403_v47 = vrot.slane %v12586_v57, %v12881_v6  ;;  %v12598_v37 = vld.sshfl [vmem:[%s12879_s28 + $0x3c] sm:$0x33 pattern:$0x75316420] }
  0x95   : > { %v4288_v10 = vrot.slane %v4200_v60, %v12883_v7  ;;  %v4353_v44 = vsel %vm13472_vm6, %v4276_v30, 0.0  ;;  %v4410_v50 = vrot.slane %v4396_v63, %v12881_v6  ;;  %v4592_v17 = vcombine.high %v12590_v58, %v12590_v58 }
  0x96   : > { %v11992_v36 = vld [vmem:[#allocation2 + $0xf8] sm:$0xff]  ;;  %v4354_v2 = vsel %vm13482_vm7, %v4280_v61, 0.0  ;;  %v4355_v39 = vsel %vm4159_vm8, %v4284_v53, 0.0  ;;  %v4369_v49 = vadd.f32 %v4353_v44, %v3961_v14  ;;  %v4411_v3 = vcombine.high %v4403_v47, %v4403_v47 }
  0x97   : > { %12127 = vmatpush1.msra.mxu1 %v11992_v36  ;;  %v4356_v57 = vsel %vm4160_vm9, %v4288_v10, 0.0  ;;  %v4370_v23 = vadd.f32 %v4354_v2, %v3962_v8  ;;  %v4371_v13 = vadd.f32 %v4355_v39, %v3963_v5  ;;  %v4412_v46 = vcombine.high %v4410_v50, %v4410_v50 }
  0x98   : > { %12128 = vmatprep.subr.mxu1 %v16872_v1  ;;  %v13506_v31 = vadd.f32 %v4356_v57, %v3964_v40  ;;  %v4488_v4 = vrot.slane %v4403_v47, %v12883_v7  ;;  %v4492_v16 = vrot.slane %v4410_v50, %v12883_v7  ;;  %v4496_v12 = vrot.slane %v4411_v3, %v12883_v7 }
  0x99   : > { %v4500_v63 = vrot.slane %v4412_v46, %v12883_v7  ;;  %v4599_v14 = vrot.slane %v12590_v58, %v12881_v6  ;;  %v4606_v29 = vrot.slane %v4592_v17, %v12881_v6  ;;  %v4788_v38 = vcombine.high %v12594_v41, %v12594_v41 }
  0x9a   : > { %vm4565_vm10 = vcmp.eq.f32.partialorder %v4488_v4, %v12886_v9  ;;  %vm4566_vm11 = vcmp.eq.f32.partialorder %v4492_v16, %v12886_v9  ;;  %vm4567_vm12 = vcmp.eq.f32.partialorder %v4496_v12, %v12886_v9  ;;  %v4795_v8 = vrot.slane %v12594_v41, %v12881_v6 }
  0x9b   : > { %vm4568_vm13 = vcmp.eq.f32.partialorder %v4500_v63, %v12886_v9  ;;  %v4607_v5 = vcombine.high %v4599_v14, %v4599_v14  ;;  %v4608_v40 = vcombine.high %v4606_v29, %v4606_v29  ;;  %v4684_v60 = vrot.slane %v4599_v14, %v12883_v7 }
  0x9c   : > { %v4688_v58 = vrot.slane %v4606_v29, %v12883_v7  ;;  %v4802_v30 = vrot.slane %v4788_v38, %v12881_v6  ;;  %v4803_v61 = vcombine.high %v4795_v8, %v4795_v8  ;;  %v4880_v53 = vrot.slane %v4795_v8, %v12883_v7 }
  0x9d   : > { %v4692_v47 = vrot.slane %v4607_v5, %v12883_v7  ;;  %v4696_v36 = vrot.slane %v4608_v40, %v12883_v7  ;;  %v4761_v10 = vsel %vm4565_vm10, %v4684_v60, 0.0  ;;  %v4984_v44 = vcombine.high %v12598_v37, %v12598_v37 }
  0x9e   : > { %v4762_v50 = vsel %vm4566_vm11, %v4688_v58, 0.0  ;;  %v4804_v17 = vcombine.high %v4802_v30, %v4802_v30  ;;  %v4884_v41 = vrot.slane %v4802_v30, %v12883_v7  ;;  %v4888_v2 = vrot.slane %v4803_v61, %v12883_v7 }
  0x9f   : > { %v4763_v39 = vsel %vm4567_vm12, %v4692_v47, 0.0  ;;  %v4764_v3 = vsel %vm4568_vm13, %v4696_v36, 0.0  ;;  %vm4957_vm14 = vcmp.eq.f32.partialorder %v4880_v53, %v12886_v9  ;;  %v4991_v57 = vrot.slane %v12598_v37, %v12881_v6 }
  0xa0   : > { %v4892_v46 = vrot.slane %v4804_v17, %v12883_v7  ;;  %vm13536_vm15 = vcmp.eq.f32.partialorder %v4884_v41, %v12886_v9  ;;  %vm4959_vm1 = vcmp.eq.f32.partialorder %v4888_v2, %v12886_v9  ;;  %v4998_v16 = vrot.slane %v4984_v44, %v12881_v6 }
  0xa1   : > { %v4999_v12 = vcombine.high %v4991_v57, %v4991_v57  ;;  %v5076_v14 = vrot.slane %v4991_v57, %v12883_v7  ;;  %v5195_v63 = vrot.slane %v4369_v49, %v12881_v6  ;;  %v5407_v29 = vrot.slane %v4370_v23, %v12881_v6 }
  0xa2   : > { %vm4960_vm2 = vcmp.eq.f32.partialorder %v4892_v46, %v12886_v9  ;;  %v5000_v38 = vcombine.high %v4998_v16, %v4998_v16  ;;  %v5080_v37 = vrot.slane %v4998_v16, %v12883_v7  ;;  %v5619_v8 = vrot.slane %v4371_v13, %v12881_v6 }
  0xa3   : > { %v5084_v5 = vrot.slane %v4999_v12, %v12883_v7  ;;  %v5153_v40 = vsel %vm4957_vm14, %v5076_v14, 0.0  ;;  %v5196_v60 = vcombine.high %v5195_v63, %v5195_v63  ;;  %v5203_v58 = vrot.slane %v5195_v63, %v12881_v6 }
  0xa4   : > { %v5088_v30 = vrot.slane %v5000_v38, %v12883_v7  ;;  %v5154_v49 = vsel %vm13536_vm15, %v5080_v37, 0.0  ;;  %v5169_v61 = vadd.f32 %v5153_v40, %v4761_v10  ;;  %v5408_v23 = vcombine.high %v5407_v29, %v5407_v29 }
  0xa5   : > { %v5155_v53 = vsel %vm4959_vm1, %v5084_v5, 0.0  ;;  %v13555_v47 = vadd.f32 %v5154_v49, %v4762_v50  ;;  %v5210_v13 = vrot.slane %v5196_v60, %v12881_v6  ;;  %v5211_v36 = vcombine.high %v5203_v58, %v5203_v58 }
  0xa6   : > { %v5156_v44 = vsel %vm4960_vm2, %v5088_v30, 0.0  ;;  %v13560_v17 = vadd.f32 %v5155_v53, %v4763_v39  ;;  %v5415_v41 = vrot.slane %v5407_v29, %v12881_v6  ;;  %v5422_v57 = vrot.slane %v5408_v23, %v12881_v6 }
  0xa7   : > { %v13564_v4 = vadd.f32 %v5156_v44, %v4764_v3  ;;  %v5212_v10 = vcombine.high %v5210_v13, %v5210_v13  ;;  %v5296_v2 = vrot.slane %v5211_v36, %v12883_v7  ;;  %v5620_v16 = vcombine.high %v5619_v8, %v5619_v8 }
  0xa8   : > { %v5423_v50 = vcombine.high %v5415_v41, %v5415_v41  ;;  %v5424_v12 = vcombine.high %v5422_v57, %v5422_v57  ;;  %v5627_v14 = vrot.slane %v5619_v8, %v12881_v6  ;;  %v5831_v46 = vrot.slane %v13506_v31, %v12881_v6 }
  0xa9   : > { %v5300_v39 = vrot.slane %v5212_v10, %v12883_v7  ;;  %v5367_v63 = vmul.f32 %v5296_v2, %v5169_v61  ;;  %v5634_v29 = vrot.slane %v5620_v16, %v12881_v6  ;;  %v7940_v3 = vrot.slane %v13373_v56, %v12883_v7 }
  0xaa   : > { %v5508_v38 = vrot.slane %v5423_v50, %v12883_v7  ;;  %v5512_v37 = vrot.slane %v5424_v12, %v12883_v7  ;;  %v5635_v5 = vcombine.high %v5627_v14, %v5627_v14  ;;  %v5832_v40 = vcombine.high %v5831_v46, %v5831_v46 }
  0xab   : > { %v5368_v60 = vmul.f32 %v5300_v39, %v5169_v61  ;;  %v5636_v30 = vcombine.high %v5634_v29, %v5634_v29  ;;  %v5839_v8 = vrot.slane %v5831_v46, %v12881_v6  ;;  %v8073_v31 = vmul.f32 %v7940_v3, %v13202_v18 }
  0xac   : > { %v5579_v49 = vmul.f32 %v5508_v38, %v13555_v47  ;;  %v5580_v23 = vmul.f32 %v5512_v37, %v13555_v47  ;;  %v5720_v53 = vrot.slane %v5635_v5, %v12883_v7  ;;  %v5846_v56 = vrot.slane %v5832_v40, %v12881_v6 }
  0xad   : > { %v5724_v36 = vrot.slane %v5636_v30, %v12883_v7  ;;  %v5847_v44 = vcombine.high %v5839_v8, %v5839_v8  ;;  %v8364_v10 = vrot.slane %v13386_v22, %v12883_v7  ;;  %v8788_v2 = vrot.slane %v13391_v21, %v12883_v7 }
  0xae   : > { %v5595_v16 = vadd.f32 %v5579_v49, %v5367_v63  ;;  %v5596_v50 = vadd.f32 %v5580_v23, %v5368_v60  ;;  %v5791_v12 = vmul.f32 %v5720_v53, %v13560_v17  ;;  %v5848_v46 = vcombine.high %v5846_v56, %v5846_v56 }
  0xaf   : > { %v5792_v39 = vmul.f32 %v5724_v36, %v13560_v17  ;;  %v5932_v3 = vrot.slane %v5847_v44, %v12883_v7  ;;  %v8497_v38 = vmul.f32 %v8364_v10, %v13204_v19  ;;  %v8921_v37 = vmul.f32 %v8788_v2, %v13212_v33 }
  0xb0   : > { %v5807_v5 = vadd.f32 %v5791_v12, %v5595_v16  ;;  %v5936_v40 = vrot.slane %v5848_v46, %v12883_v7  ;;  %v9212_v22 = vrot.slane %v13394_v43, %v12883_v7  ;;  %v5288_v21 = vrot.slane %v5203_v58, %v12883_v7  ;;  %v12571_v12 = vld.sshfl [vmem:[%s12879_s28 + $0xa0] sm:$0x33 pattern:$0x75316420] }
  0xb1   : > { %v5808_v63 = vadd.f32 %v5792_v39, %v5596_v50  ;;  %v6003_v60 = vmul.f32 %v5932_v3, %v13564_v4  ;;  %v8529_v30 = vadd.f32 %v8497_v38, %v8073_v31  ;;  %v5292_v49 = vrot.slane %v5210_v13, %v12883_v7  ;;  %v12575_v38 = vld.sshfl [vmem:[%s12879_s28 + $0xa8] sm:$0x33 pattern:$0x75316420] }
  0xb2   : > { %v6004_v23 = vmul.f32 %v5936_v40, %v13564_v4  ;;  %v9345_v53 = vmul.f32 %v9212_v22, %v13214_v34  ;;  %v5365_v36 = vmul.f32 %v5288_v21, %v5169_v61  ;;  %v5500_v44 = vrot.slane %v5415_v41, %v12883_v7  ;;  %v12579_v40 = vld.sshfl [vmem:[%s12879_s28 + $0xa4] sm:$0x33 pattern:$0x75316420] }
  0xb3   : > { %v6019_v10 = vadd.f32 %v6003_v60, %v5807_v5  ;;  %v8953_v2 = vadd.f32 %v8921_v37, %v8529_v30  ;;  %v5366_v43 = vmul.f32 %v5292_v49, %v5169_v61  ;;  %v5504_v58 = vrot.slane %v5422_v57, %v12883_v7 }
  0xb4   : > { %v6020_v16 = vadd.f32 %v6004_v23, %v5808_v63  ;;  %v5577_v50 = vmul.f32 %v5500_v44, %v13555_v47  ;;  %v5712_v31 = vrot.slane %v5627_v14, %v12883_v7  ;;  %v5716_v13 = vrot.slane %v5634_v29, %v12883_v7 }
  0xb5   : > { %v9377_v46 = vadd.f32 %v9345_v53, %v8953_v2  ;;  %v5578_v39 = vmul.f32 %v5504_v58, %v13555_v47  ;;  %v5924_v3 = vrot.slane %v5839_v8, %v12883_v7  ;;  %v5928_v41 = vrot.slane %v5846_v56, %v12883_v7 }
  0xb6   : > { %v6050_v61 = vcombine.low %v6019_v10, %v6020_v16  ;;  %v5593_v37 = vadd.f32 %v5577_v50, %v5365_v36  ;;  %v5789_v57 = vmul.f32 %v5712_v31, %v13560_v17  ;;  %v5790_v5 = vmul.f32 %v5716_v13, %v13560_v17  ;;  %v12583_v13 = vld.sshfl [vmem:[%s12879_s28 + $0xac] sm:$0x33 pattern:$0x75316420] }
  0xb7   : > { %9409 = vst.msk [vmem:[#allocation2 + $0xf0] sm:$0xff] %vm3520_vm0, %v9377_v46  ;;  %v5594_v14 = vadd.f32 %v5578_v39, %v5366_v43  ;;  %v6001_v29 = vmul.f32 %v5924_v3, %v13564_v4  ;;  %v6002_v22 = vmul.f32 %v5928_v41, %v13564_v4  ;;  %v3620_v47 = vcombine.high %v12571_v12, %v12571_v12 }
  0xb8   : > { %6066 = vst.msk [vmem:[#allocation2 + $0x48] sm:$0xff] %vm3520_vm0, %v6050_v61  ;;  %v5805_v8 = vadd.f32 %v5789_v57, %v5593_v37  ;;  %v3627_v56 = vrot.slane %v12571_v12, %v12881_v6  ;;  %v3816_v21 = vcombine.high %v12575_v38, %v12575_v38  ;;  %v3823_v63 = vrot.slane %v12575_v38, %v12881_v6  ;;  %v12587_v37 = vld.sshfl [vmem:[%s12879_s28 + $0xb0] sm:$0x33 pattern:$0x75316420] }
  0xb9   : > { %v5806_v60 = vadd.f32 %v5790_v5, %v5594_v14  ;;  %v3634_v17 = vrot.slane %v3620_v47, %v12881_v6  ;;  %v4012_v30 = vcombine.high %v12579_v40, %v12579_v40  ;;  %v4019_v49 = vrot.slane %v12579_v40, %v12881_v6 }
  0xba   : > { %v6017_v23 = vadd.f32 %v6001_v29, %v5805_v8  ;;  %v3635_v53 = vcombine.high %v3627_v56, %v3627_v56  ;;  %v3704_v4 = vrot.slane %v3627_v56, %v12883_v7  ;;  %v3830_v36 = vrot.slane %v3816_v21, %v12881_v6 }
  0xbb   : > { %v6018_v44 = vadd.f32 %v6002_v22, %v5806_v60  ;;  %v3636_v10 = vcombine.high %v3634_v17, %v3634_v17  ;;  %v3708_v2 = vrot.slane %v3634_v17, %v12883_v7  ;;  %v3831_v43 = vcombine.high %v3823_v63, %v3823_v63 }
  0xbc   : > { %v3712_v58 = vrot.slane %v3635_v53, %v12883_v7  ;;  %vm3769_vm3 = vcmp.eq.f32.partialorder %v3704_v4, %v12886_v9  ;;  %v3832_v16 = vcombine.high %v3830_v36, %v3830_v36  ;;  %v3900_v50 = vrot.slane %v3823_v63, %v12883_v7 }
  0xbd   : > { %v6049_v31 = vcombine.low %v6017_v23, %v6018_v44  ;;  %v3716_v12 = vrot.slane %v3636_v10, %v12883_v7  ;;  %vm3770_vm4 = vcmp.eq.f32.partialorder %v3708_v2, %v12886_v9  ;;  %v3904_v46 = vrot.slane %v3830_v36, %v12883_v7  ;;  %v12591_v2 = vld.sshfl [vmem:[%s12879_s28 + $0xb8] sm:$0x33 pattern:$0x75316420] }
  0xbe   : > { %v11991_v39 = vld [vmem:[#allocation2 + $0xf0] sm:$0xff]  ;;  %vm3771_vm5 = vcmp.eq.f32.partialorder %v3712_v58, %v12886_v9  ;;  %v3908_v3 = vrot.slane %v3831_v43, %v12883_v7  ;;  %v3912_v41 = vrot.slane %v3832_v16, %v12883_v7  ;;  %v3965_v38 = vsel %vm3769_vm3, %v3900_v50, 0.0 }
  0xbf   : > { %v11970_v61 = vld [vmem:[#allocation2 + $0x48] sm:$0xff]  ;;  %12129 = vmatpush1.msra.mxu1 %v11991_v39  ;;  %6065 = vst.msk [vmem:[#allocation2 + $0x40] sm:$0xff] %vm3520_vm0, %v6049_v31  ;;  %vm3772_vm6 = vcmp.eq.f32.partialorder %v3716_v12, %v12886_v9  ;;  %v3966_v57 = vsel %vm3770_vm4, %v3904_v46, 0.0  ;;  %v4026_v5 = vrot.slane %v4012_v30, %v12881_v6  ;;  %v4027_v40 = vcombine.high %v4019_v49, %v4019_v49 }
  0xc0   : > { %12058 = vmatpush1.msra.mxu0 %v11970_v61  ;;  %12130 = vmatprep.subr.mxu1 %v16872_v1  ;;  %v3967_v14 = vsel %vm3771_vm5, %v3908_v3, 0.0  ;;  %v3968_v29 = vsel %vm3772_vm6, %v3912_v41, 0.0  ;;  %v4096_v22 = vrot.slane %v4019_v49, %v12883_v7  ;;  %v4208_v47 = vcombine.high %v12583_v13, %v12583_v13  ;;  %v12595_v39 = vld.sshfl [vmem:[%s12879_s28 + $0xb4] sm:$0x33 pattern:$0x75316420] }
  0xc1   : > { %12059 = vmatprep.subr.mxu0 %v16872_v1  ;;  %v4028_v8 = vcombine.high %v4026_v5, %v4026_v5  ;;  %v4100_v56 = vrot.slane %v4026_v5, %v12883_v7  ;;  %v4104_v21 = vrot.slane %v4027_v40, %v12883_v7  ;;  %v4215_v63 = vrot.slane %v12583_v13, %v12881_v6  ;;  %v12599_v5 = vld.sshfl [vmem:[%s12879_s28 + $0xbc] sm:$0x33 pattern:$0x75316420] }
  0xc2   : > { %vm13645_vm7 = vcmp.eq.f32.partialorder %v4096_v22, %v12886_v9  ;;  %v4222_v17 = vrot.slane %v4208_v47, %v12881_v6  ;;  %v4420_v30 = vcombine.high %v12587_v37, %v12587_v37  ;;  %v4427_v49 = vrot.slane %v12587_v37, %v12881_v6 }
  0xc3   : > { %v4108_v23 = vrot.slane %v4028_v8, %v12883_v7  ;;  %vm4162_vm8 = vcmp.eq.f32.partialorder %v4100_v56, %v12886_v9  ;;  %vm4163_vm9 = vcmp.eq.f32.partialorder %v4104_v21, %v12886_v9  ;;  %v4223_v53 = vcombine.high %v4215_v63, %v4215_v63 }
  0xc4   : > { %v4224_v4 = vcombine.high %v4222_v17, %v4222_v17  ;;  %v4292_v36 = vrot.slane %v4215_v63, %v12883_v7  ;;  %v4296_v44 = vrot.slane %v4222_v17, %v12883_v7  ;;  %v4434_v10 = vrot.slane %v4420_v30, %v12881_v6 }
  0xc5   : > { %vm4164_vm10 = vcmp.eq.f32.partialorder %v4108_v23, %v12886_v9  ;;  %v4300_v43 = vrot.slane %v4223_v53, %v12883_v7  ;;  %v4435_v58 = vcombine.high %v4427_v49, %v4427_v49  ;;  %v4504_v16 = vrot.slane %v4427_v49, %v12883_v7 }
  0xc6   : > { %v11969_v50 = vld [vmem:[#allocation2 + $0x40] sm:$0xff]  ;;  %v4304_v31 = vrot.slane %v4224_v4, %v12883_v7  ;;  %v4357_v13 = vsel %vm13645_vm7, %v4292_v36, 0.0  ;;  %v4358_v12 = vsel %vm4162_vm8, %v4296_v44, 0.0  ;;  %v4436_v46 = vcombine.high %v4434_v10, %v4434_v10 }
  0xc7   : > { %12060 = vmatpush1.msra.mxu0 %v11969_v50  ;;  %v4359_v3 = vsel %vm4163_vm9, %v4300_v43, 0.0  ;;  %v4373_v41 = vadd.f32 %v4357_v13, %v3965_v38  ;;  %v4374_v61 = vadd.f32 %v4358_v12, %v3966_v57  ;;  %v4508_v37 = vrot.slane %v4434_v10, %v12883_v7 }
  0xc8   : > { %v4360_v40 = vsel %vm4164_vm10, %v4304_v31, 0.0  ;;  %v13671_v22 = vadd.f32 %v4359_v3, %v3967_v14  ;;  %v4512_v47 = vrot.slane %v4435_v58, %v12883_v7  ;;  %v4516_v8 = vrot.slane %v4436_v46, %v12883_v7  ;;  %12061 = vmatprep.subr.mxu0 %v16872_v1 }
  0xc9   : > { %v13676_v56 = vadd.f32 %v4360_v40, %v3968_v29  ;;  %vm13679_vm11 = vcmp.eq.f32.partialorder %v4504_v16, %v12886_v9  ;;  %vm13684_vm12 = vcmp.eq.f32.partialorder %v4508_v37, %v12886_v9  ;;  %v4616_v14 = vcombine.high %v12591_v2, %v12591_v2 }
  0xca   : > { %vm4571_vm13 = vcmp.eq.f32.partialorder %v4512_v47, %v12886_v9  ;;  %vm4572_vm14 = vcmp.eq.f32.partialorder %v4516_v8, %v12886_v9  ;;  %v4623_v21 = vrot.slane %v12591_v2, %v12881_v6  ;;  %v4812_v63 = vcombine.high %v12595_v39, %v12595_v39 }
  0xcb   : > { %v4630_v29 = vrot.slane %v4616_v14, %v12881_v6  ;;  %v4819_v60 = vrot.slane %v12595_v39, %v12881_v6  ;;  %v5008_v17 = vcombine.high %v12599_v5, %v12599_v5  ;;  %v5015_v30 = vrot.slane %v12599_v5, %v12881_v6 }
  0xcc   : > { %v4631_v49 = vcombine.high %v4623_v21, %v4623_v21  ;;  %v4700_v23 = vrot.slane %v4623_v21, %v12883_v7  ;;  %v4826_v53 = vrot.slane %v4812_v63, %v12881_v6  ;;  %v5219_v4 = vrot.slane %v4373_v41, %v12881_v6 }
  0xcd   : > { %v4632_v36 = vcombine.high %v4630_v29, %v4630_v29  ;;  %v4704_v44 = vrot.slane %v4630_v29, %v12883_v7  ;;  %v4827_v10 = vcombine.high %v4819_v60, %v4819_v60  ;;  %v4896_v2 = vrot.slane %v4819_v60, %v12883_v7 }
  0xce   : > { %v4708_v43 = vrot.slane %v4631_v49, %v12883_v7  ;;  %v4765_v58 = vsel %vm13679_vm11, %v4700_v23, 0.0  ;;  %v4828_v16 = vcombine.high %v4826_v53, %v4826_v53  ;;  %v4900_v50 = vrot.slane %v4826_v53, %v12883_v7 }
  0xcf   : > { %v4712_v31 = vrot.slane %v4632_v36, %v12883_v7  ;;  %v4766_v13 = vsel %vm13684_vm12, %v4704_v44, 0.0  ;;  %v4904_v12 = vrot.slane %v4827_v10, %v12883_v7  ;;  %vm4961_vm15 = vcmp.eq.f32.partialorder %v4896_v2, %v12886_v9  ;;  %v12538_v36 = vld.sshfl [vmem:[%s12879_s28] sm:$0x33 pattern:$0x75316420] }
  0xd0   : > { %v4767_v46 = vsel %vm4571_vm13, %v4708_v43, 0.0  ;;  %v4908_v39 = vrot.slane %v4828_v16, %v12883_v7  ;;  %vm4962_vm1 = vcmp.eq.f32.partialorder %v4900_v50, %v12886_v9  ;;  %v5022_v3 = vrot.slane %v5008_v17, %v12881_v6 }
  0xd1   : > { %v4768_v41 = vsel %vm4572_vm14, %v4712_v31, 0.0  ;;  %vm4963_vm2 = vcmp.eq.f32.partialorder %v4904_v12, %v12886_v9  ;;  %v5023_v37 = vcombine.high %v5015_v30, %v5015_v30  ;;  %v5092_v5 = vrot.slane %v5015_v30, %v12883_v7 }
  0xd2   : > { %vm4964_vm3 = vcmp.eq.f32.partialorder %v4908_v39, %v12886_v9  ;;  %v5024_v40 = vcombine.high %v5022_v3, %v5022_v3  ;;  %v5096_v47 = vrot.slane %v5022_v3, %v12883_v7  ;;  %v5220_v38 = vcombine.high %v5219_v4, %v5219_v4 }
  0xd3   : > { %v5100_v57 = vrot.slane %v5023_v37, %v12883_v7  ;;  %v5157_v14 = vsel %vm4961_vm15, %v5092_v5, 0.0  ;;  %v13721_v21 = vrot.slane %v5219_v4, %v12881_v6  ;;  %v5431_v8 = vrot.slane %v4374_v61, %v12881_v6 }
  0xd4   : > { %v5104_v63 = vrot.slane %v5024_v40, %v12883_v7  ;;  %v5158_v29 = vsel %vm4962_vm1, %v5096_v47, 0.0  ;;  %v13725_v60 = vadd.f32 %v5157_v14, %v4765_v58  ;;  %v13728_v17 = vrot.slane %v5220_v38, %v12881_v6 }
  0xd5   : > { %v5159_v30 = vsel %vm4963_vm2, %v5100_v57, 0.0  ;;  %v13730_v49 = vadd.f32 %v5158_v29, %v4766_v13  ;;  %v5235_v23 = vcombine.high %v13721_v21, %v13721_v21  ;;  %v5432_v53 = vcombine.high %v5431_v8, %v5431_v8 }
  0xd6   : > { %v5160_v4 = vsel %vm4964_vm3, %v5104_v63, 0.0  ;;  %v13737_v61 = vadd.f32 %v5159_v30, %v4767_v46  ;;  %v5236_v44 = vcombine.high %v13728_v17, %v13728_v17  ;;  %v13742_v10 = vrot.slane %v5431_v8, %v12881_v6 }
  0xd7   : > { %v13744_v2 = vadd.f32 %v5160_v4, %v4768_v41  ;;  %v5312_v43 = vrot.slane %v5235_v23, %v12883_v7  ;;  %v13748_v58 = vrot.slane %v5432_v53, %v12881_v6  ;;  %v5643_v16 = vrot.slane %v13671_v22, %v12881_v6 }
  0xd8   : > { %v5316_v50 = vrot.slane %v5236_v44, %v12883_v7  ;;  %v5447_v31 = vcombine.high %v13742_v10, %v13742_v10  ;;  %v5855_v13 = vrot.slane %v13676_v56, %v12881_v6  ;;  %v235_v12 = vcombine.high %v12538_v36, %v12538_v36 }
  0xd9   : > { %v5371_v46 = vmul.f32 %v5312_v43, %v13725_v60  ;;  %v5448_v39 = vcombine.high %v13748_v58, %v13748_v58  ;;  %v5644_v3 = vcombine.high %v5643_v16, %v5643_v16  ;;  %v13761_v41 = vrot.slane %v5643_v16, %v12881_v6 }
  0xda   : > { %v5372_v22 = vmul.f32 %v5316_v50, %v13725_v60  ;;  %v5524_v37 = vrot.slane %v5447_v31, %v12883_v7  ;;  %v5856_v5 = vcombine.high %v5855_v13, %v5855_v13  ;;  %v13766_v40 = vrot.slane %v5855_v13, %v12881_v6 }
  0xdb   : > { %v5528_v56 = vrot.slane %v5448_v39, %v12883_v7  ;;  %v13770_v47 = vrot.slane %v5644_v3, %v12881_v6  ;;  %v5659_v38 = vcombine.high %v13761_v41, %v13761_v41  ;;  %v242_v57 = vrot.slane %v12538_v36, %v12881_v6 }
  0xdc   : > { %v5583_v14 = vmul.f32 %v5524_v37, %v13730_v49  ;;  %v13777_v8 = vrot.slane %v5856_v5, %v12881_v6  ;;  %v5871_v63 = vcombine.high %v13766_v40, %v13766_v40  ;;  %v249_v29 = vrot.slane %v235_v12, %v12881_v6  ;;  %v12542_v12 = vld.sshfl [vmem:[%s12879_s28 + $0x8] sm:$0x33 pattern:$0x75316420] }
  0xdd   : > { %v5584_v30 = vmul.f32 %v5528_v56, %v13730_v49  ;;  %v5660_v23 = vcombine.high %v13770_v47, %v13770_v47  ;;  %v5736_v53 = vrot.slane %v5659_v38, %v12883_v7  ;;  %v250_v36 = vcombine.high %v242_v57, %v242_v57 }
  0xde   : > { %v5599_v4 = vadd.f32 %v5583_v14, %v5371_v46  ;;  %v5872_v44 = vcombine.high %v13777_v8, %v13777_v8  ;;  %v5948_v43 = vrot.slane %v5871_v63, %v12883_v7  ;;  %v251_v16 = vcombine.high %v249_v29, %v249_v29  ;;  %v12546_v46 = vld.sshfl [vmem:[%s12879_s28 + $0x4] sm:$0x33 pattern:$0x75316420] }
  0xdf   : > { %v5600_v50 = vadd.f32 %v5584_v30, %v5372_v22  ;;  %v5740_v31 = vrot.slane %v5660_v23, %v12883_v7  ;;  %v5795_v13 = vmul.f32 %v5736_v53, %v13737_v61  ;;  %v327_v39 = vrot.slane %v242_v57, %v12883_v7  ;;  %v12550_v22 = vld.sshfl [vmem:[%s12879_s28 + $0xc] sm:$0x33 pattern:$0x75316420] }
  0xe0   : > { %v5952_v3 = vrot.slane %v5872_v44, %v12883_v7  ;;  %v6007_v37 = vmul.f32 %v5948_v43, %v13744_v2  ;;  %v331_v5 = vrot.slane %v249_v29, %v12883_v7  ;;  %v335_v56 = vrot.slane %v250_v36, %v12883_v7  ;;  %v12558_v23 = vld.sshfl [vmem:[%s12879_s28 + $0x18] sm:$0x33 pattern:$0x75316420] }
  0xe1   : > { %v5796_v38 = vmul.f32 %v5740_v31, %v13737_v61  ;;  %v5811_v14 = vadd.f32 %v5795_v13, %v5599_v4  ;;  %v339_v63 = vrot.slane %v251_v16, %v12883_v7  ;;  %vm13802_vm4 = vcmp.eq.f32.partialorder %v327_v39, %v12886_v9 }
  0xe2   : > { %v6008_v57 = vmul.f32 %v5952_v3, %v13744_v2  ;;  %vm13808_vm5 = vcmp.eq.f32.partialorder %v331_v5, %v12886_v9  ;;  %vm406_vm6 = vcmp.eq.f32.partialorder %v335_v56, %v12886_v9  ;;  %v431_v29 = vcombine.high %v12542_v12, %v12542_v12 }
  0xe3   : > { %v5812_v53 = vadd.f32 %v5796_v38, %v5600_v50  ;;  %v6023_v36 = vadd.f32 %v6007_v37, %v5811_v14  ;;  %vm407_vm7 = vcmp.eq.f32.partialorder %v339_v63, %v12886_v9  ;;  %v438_v4 = vrot.slane %v12542_v12, %v12881_v6 }
  0xe4   : > { %v445_v44 = vrot.slane %v431_v29, %v12881_v6  ;;  %v627_v43 = vcombine.high %v12546_v46, %v12546_v46  ;;  %v634_v16 = vrot.slane %v12546_v46, %v12881_v6  ;;  %v823_v31 = vcombine.high %v12550_v22, %v12550_v22 }
  0xe5   : > { %v6024_v13 = vadd.f32 %v6008_v57, %v5812_v53  ;;  %v446_v39 = vcombine.high %v438_v4, %v438_v4  ;;  %v523_v3 = vrot.slane %v438_v4, %v12883_v7  ;;  %v830_v5 = vrot.slane %v12550_v22, %v12881_v6 }
  0xe6   : > { %v447_v1 = vcombine.high %v445_v44, %v445_v44  ;;  %v527_v50 = vrot.slane %v445_v44, %v12883_v7  ;;  %v641_v37 = vrot.slane %v627_v43, %v12881_v6  ;;  %v642_v12 = vcombine.high %v634_v16, %v634_v16  ;;  %v12554_v44 = vld.sshfl [vmem:[%s12879_s28 + $0x10] sm:$0x33 pattern:$0x75316420] }
  0xe7   : > { %v6052_v38 = vcombine.low %v6023_v36, %v6024_v13  ;;  %v531_v14 = vrot.slane %v446_v39, %v12883_v7  ;;  %v600_v46 = vsel %vm13802_vm4, %v523_v3, 0.0  ;;  %v719_v57 = vrot.slane %v634_v16, %v12883_v7 }
  0xe8   : > { %v535_v29 = vrot.slane %v447_v1, %v12883_v7  ;;  %v601_v22 = vsel %vm13808_vm5, %v527_v50, 0.0  ;;  %v643_v53 = vcombine.high %v641_v37, %v641_v37  ;;  %v723_v4 = vrot.slane %v641_v37, %v12883_v7 }
  0xe9   : > { %6068 = vst.msk [vmem:[#allocation2 + $0xe8] sm:$0xff] %vm3520_vm0, %v6052_v38  ;;  %v602_v36 = vsel %vm406_vm6, %v531_v14, 0.0  ;;  %v727_v43 = vrot.slane %v642_v12, %v12883_v7  ;;  %vm13835_vm8 = vcmp.eq.f32.partialorder %v719_v57, %v12886_v9  ;;  %v837_v1 = vrot.slane %v823_v31, %v12881_v6 }
  0xea   : > { %v603_v16 = vsel %vm407_vm7, %v535_v29, 0.0  ;;  %v731_v13 = vrot.slane %v643_v53, %v12883_v7  ;;  %vm797_vm9 = vcmp.eq.f32.partialorder %v723_v4, %v12886_v9  ;;  %v838_v56 = vcombine.high %v830_v5, %v830_v5  ;;  %v12562_v29 = vld.sshfl [vmem:[%s12879_s28 + $0x14] sm:$0x33 pattern:$0x75316420] }
  0xeb   : > { %vm798_vm10 = vcmp.eq.f32.partialorder %v727_v43, %v12886_v9  ;;  %v839_v39 = vcombine.high %v837_v1, %v837_v1  ;;  %v915_v3 = vrot.slane %v830_v5, %v12883_v7  ;;  %v919_v50 = vrot.slane %v837_v1, %v12883_v7 }
  0xec   : > { %vm799_vm11 = vcmp.eq.f32.partialorder %v731_v13, %v12886_v9  ;;  %v923_v31 = vrot.slane %v838_v56, %v12883_v7  ;;  %v1035_v37 = vcombine.high %v12554_v44, %v12554_v44  ;;  %v1042_v63 = vrot.slane %v12554_v44, %v12881_v6 }
  0xed   : > { %v927_v12 = vrot.slane %v839_v39, %v12883_v7  ;;  %v992_v38 = vsel %vm13835_vm8, %v915_v3, 0.0  ;;  %v993_v14 = vsel %vm797_vm9, %v919_v50, 0.0  ;;  %v1231_v57 = vcombine.high %v12558_v23, %v12558_v23 }
  0xee   : > { %v994_v53 = vsel %vm798_vm10, %v923_v31, 0.0  ;;  %v13855_v4 = vadd.f32 %v992_v38, %v600_v46  ;;  %v13857_v5 = vadd.f32 %v993_v14, %v601_v22  ;;  %v1049_v43 = vrot.slane %v1035_v37, %v12881_v6  ;;  %v12566_v38 = vld.sshfl [vmem:[%s12879_s28 + $0x1c] sm:$0x33 pattern:$0x75316420] }
  0xef   : > { %v995_v1 = vsel %vm799_vm11, %v927_v12, 0.0  ;;  %v13860_v13 = vadd.f32 %v994_v53, %v602_v36  ;;  %v1050_v56 = vcombine.high %v1042_v63, %v1042_v63  ;;  %v1127_v44 = vrot.slane %v1042_v63, %v12883_v7 }
  0xf0   : > { %v11990_v39 = vld [vmem:[#allocation2 + $0xe8] sm:$0xff]  ;;  %v13863_v30 = vadd.f32 %v995_v1, %v603_v16  ;;  %v1051_v3 = vcombine.high %v1049_v43, %v1049_v43  ;;  %v1131_v50 = vrot.slane %v1049_v43, %v12883_v7  ;;  %v1238_v46 = vrot.slane %v12558_v23, %v12881_v6 }
  0xf1   : > { %12131 = vmatpush1.msra.mxu1 %v11990_v39  ;;  %v1135_v22 = vrot.slane %v1050_v56, %v12883_v7  ;;  %vm1204_vm12 = vcmp.eq.f32.partialorder %v1127_v44, %v12886_v9  ;;  %v1245_v36 = vrot.slane %v1231_v57, %v12881_v6  ;;  %v1427_v31 = vcombine.high %v12562_v29, %v12562_v29 }
  0xf2   : > { %v16954_v37 = vmov 0.0   ;;  %v1139_v63 = vrot.slane %v1051_v3, %v12883_v7  ;;  %vm1205_vm13 = vcmp.eq.f32.partialorder %v1131_v50, %v12886_v9  ;;  %v1246_v16 = vcombine.high %v1238_v46, %v1238_v46 }
  0xf3   : > { %12132 = vmatprep.subr.mxu1 %v16954_v37  ;;  %v1323_v12 = vrot.slane %v1238_v46, %v12883_v7  ;;  %vm1206_vm14 = vcmp.eq.f32.partialorder %v1135_v22, %v12886_v9  ;;  %v1247_v23 = vcombine.high %v1245_v36, %v1245_v36  ;;  %v1327_v14 = vrot.slane %v1245_v36, %v12883_v7 }
  0xf4   : > { %v1434_v53 = vrot.slane %v12562_v29, %v12881_v6  ;;  %vm1207_vm15 = vcmp.eq.f32.partialorder %v1139_v63, %v12886_v9  ;;  %v1331_v57 = vrot.slane %v1246_v16, %v12883_v7  ;;  %v1441_v1 = vrot.slane %v1427_v31, %v12881_v6 }
  0xf5   : > { %v1400_v43 = vsel %vm1204_vm12, %v1323_v12, 0.0  ;;  %v1335_v56 = vrot.slane %v1247_v23, %v12883_v7  ;;  %v1401_v44 = vsel %vm1205_vm13, %v1327_v14, 0.0  ;;  %v1623_v36 = vcombine.high %v12566_v38, %v12566_v38 }
  0xf6   : > { %v1442_v39 = vcombine.high %v1434_v53, %v1434_v53  ;;  %v1519_v3 = vrot.slane %v1434_v53, %v12883_v7  ;;  %v1402_v50 = vsel %vm1206_vm14, %v1331_v57, 0.0  ;;  %v1443_v46 = vcombine.high %v1441_v1, %v1441_v1 }
  0xf7   : > { %v1523_v22 = vrot.slane %v1441_v1, %v12883_v7  ;;  %v1403_v34 = vsel %vm1207_vm15, %v1335_v56, 0.0  ;;  %v1630_v63 = vrot.slane %v12566_v38, %v12881_v6  ;;  %v1637_v12 = vrot.slane %v1623_v36, %v12881_v6 }
  0xf8   : > { %v1527_v29 = vrot.slane %v1442_v39, %v12883_v7  ;;  %vm1596_vm1 = vcmp.eq.f32.partialorder %v1519_v3, %v12886_v9  ;;  %v1531_v31 = vrot.slane %v1443_v46, %v12883_v7  ;;  %v1828_v23 = vcombine.high %v13855_v4, %v13855_v4 }
  0xf9   : > { %vm13889_vm2 = vcmp.eq.f32.partialorder %v1523_v22, %v12886_v9  ;;  %v1638_v14 = vcombine.high %v1630_v63, %v1630_v63  ;;  %v1715_v53 = vrot.slane %v1630_v63, %v12883_v7  ;;  %v2252_v38 = vcombine.high %v13857_v5, %v13857_v5 }
  0xfa   : > { %vm1598_vm3 = vcmp.eq.f32.partialorder %v1527_v29, %v12886_v9  ;;  %vm1599_vm4 = vcmp.eq.f32.partialorder %v1531_v31, %v12886_v9  ;;  %v1639_v57 = vcombine.high %v1637_v12, %v1637_v12  ;;  %v1719_v1 = vrot.slane %v1637_v12, %v12883_v7 }
  0xfb   : > { %v1842_v56 = vrot.slane %v1828_v23, %v12881_v6  ;;  %v1723_v39 = vrot.slane %v1638_v14, %v12883_v7  ;;  %v1792_v3 = vsel %vm1596_vm1, %v1715_v53, 0.0  ;;  %v2266_v46 = vrot.slane %v2252_v38, %v12881_v6 }
  0xfc   : > { %v2676_v22 = vcombine.high %v13860_v13, %v13860_v13  ;;  %v1727_v36 = vrot.slane %v1639_v57, %v12883_v7  ;;  %v1793_v63 = vsel %vm13889_vm2, %v1719_v1, 0.0  ;;  %v13910_v33 = vadd.f32 %v1792_v3, %v1400_v43 }
  0xfd   : > { %v1844_v51 = vcombine.high %v1842_v56, %v1842_v56  ;;  %v1794_v12 = vsel %vm1598_vm3, %v1723_v39, 0.0  ;;  %v13914_v23 = vadd.f32 %v1793_v63, %v1401_v44  ;;  %v2268_v14 = vcombine.high %v2266_v46, %v2266_v46 }
  0xfe   : > { %v2690_v53 = vrot.slane %v2676_v22, %v12881_v6  ;;  %v1795_v38 = vsel %vm1599_vm4, %v1727_v36, 0.0  ;;  %v13919_v48 = vadd.f32 %v1794_v12, %v1402_v50  ;;  %v3100_v43 = vcombine.high %v13863_v30, %v13863_v30 }
  0xff   : > { %v13922_v57 = vrot.slane %v1844_v51, %v12881_v6  ;;  %v13926_v16 = vadd.f32 %v1795_v38, %v1403_v34  ;;  %v13929_v29 = vrot.slane %v2268_v14, %v12881_v6  ;;  %v5304_v1 = vrot.slane %v13721_v21, %v12883_v7 }
 0x100   : > { %v2692_v44 = vcombine.high %v2690_v53, %v2690_v53  ;;  %v3114_v50 = vrot.slane %v3100_v43, %v12881_v6  ;;  %v5308_v51 = vrot.slane %v13728_v17, %v12883_v7  ;;  %v5516_v39 = vrot.slane %v13742_v10, %v12883_v7 }
 0x101   : > { %v1876_v31 = vcombine.high %v13922_v57, %v13922_v57  ;;  %v2300_v34 = vcombine.high %v13929_v29, %v13929_v29  ;;  %v5369_v22 = vmul.f32 %v5304_v1, %v13725_v60  ;;  %v5520_v21 = vrot.slane %v13748_v58, %v12883_v7 }
 0x102   : > { %v13943_v3 = vrot.slane %v2692_v44, %v12881_v6  ;;  %v3116_v63 = vcombine.high %v3114_v50, %v3114_v50  ;;  %v5370_v12 = vmul.f32 %v5308_v51, %v13725_v60  ;;  %v5581_v17 = vmul.f32 %v5516_v39, %v13730_v49 }
 0x103   : > { %v2055_v36 = vrot.slane %v1876_v31, %v12883_v7  ;;  %v2479_v10 = vrot.slane %v2300_v34, %v12883_v7  ;;  %v5582_v38 = vmul.f32 %v5520_v21, %v13730_v49  ;;  %v5728_v43 = vrot.slane %v13761_v41, %v12883_v7 }
 0x104   : > { %v2724_v14 = vcombine.high %v13943_v3, %v13943_v3  ;;  %v13959_v58 = vrot.slane %v3116_v63, %v12881_v6  ;;  %v5597_v1 = vadd.f32 %v5581_v17, %v5369_v22  ;;  %v5732_v60 = vrot.slane %v13770_v47, %v12883_v7 }
 0x105   : > { %v2191_v44 = vmul.f32 %v2055_v36, %v13910_v33  ;;  %v2615_v31 = vmul.f32 %v2479_v10, %v13914_v23  ;;  %v5598_v39 = vadd.f32 %v5582_v38, %v5370_v12  ;;  %v5793_v49 = vmul.f32 %v5728_v43, %v13737_v61  ;;  %v12539_v38 = vld.sshfl [vmem:[%s12879_s28 + $0x80] sm:$0x33 pattern:$0x75316420] }
 0x106   : > { %v2903_v51 = vrot.slane %v2724_v14, %v12883_v7  ;;  %v3148_v41 = vcombine.high %v13959_v58, %v13959_v58  ;;  %v5794_v34 = vmul.f32 %v5732_v60, %v13737_v61  ;;  %v5940_v21 = vrot.slane %v13766_v40, %v12883_v7 }
 0x107   : > { %v5944_v22 = vrot.slane %v13777_v8, %v12883_v7  ;;  %v2647_v47 = vadd.f32 %v2615_v31, %v2191_v44  ;;  %v5809_v63 = vadd.f32 %v5793_v49, %v5597_v1  ;;  %v13975_v17 = vrot.slane %v1842_v56, %v12881_v6 }
 0x108   : > { %v3039_v36 = vmul.f32 %v2903_v51, %v13919_v48  ;;  %v3327_v12 = vrot.slane %v3148_v41, %v12883_v7  ;;  %v5810_v10 = vadd.f32 %v5794_v34, %v5598_v39  ;;  %v6005_v14 = vmul.f32 %v5940_v21, %v13744_v2 }
 0x109   : > { %v6006_v61 = vmul.f32 %v5944_v22, %v13744_v2  ;;  %v1874_v8 = vcombine.high %v13975_v17, %v13975_v17  ;;  %v13984_v43 = vrot.slane %v2266_v46, %v12881_v6  ;;  %v13987_v44 = vrot.slane %v2690_v53, %v12881_v6  ;;  %v12543_v46 = vld.sshfl [vmem:[%s12879_s28 + $0x88] sm:$0x33 pattern:$0x75316420] }
 0x10a   : > { %v3071_v40 = vadd.f32 %v3039_v36, %v2647_v47  ;;  %v3463_v56 = vmul.f32 %v3327_v12, %v13926_v16  ;;  %v6021_v1 = vadd.f32 %v6005_v14, %v5809_v63  ;;  %v13991_v31 = vrot.slane %v3114_v50, %v12881_v6 }
 0x10b   : > { %v6022_v60 = vadd.f32 %v6006_v61, %v5810_v10  ;;  %v2051_v2 = vrot.slane %v1874_v8, %v12883_v7  ;;  %v2298_v51 = vcombine.high %v13984_v43, %v13984_v43  ;;  %v2722_v39 = vcombine.high %v13987_v44, %v13987_v44 }
 0x10c   : > { %v259_v49 = vcombine.high %v12539_v38, %v12539_v38  ;;  %v3495_v41 = vadd.f32 %v3463_v56, %v3071_v40  ;;  %v3146_v34 = vcombine.high %v13991_v31, %v13991_v31  ;;  %v266_v21 = vrot.slane %v12539_v38, %v12881_v6  ;;  %v12547_v40 = vld.sshfl [vmem:[%s12879_s28 + $0x84] sm:$0x33 pattern:$0x75316420] }
 0x10d   : > { %v6051_v53 = vcombine.low %v6021_v1, %v6022_v60  ;;  %v2190_v50 = vmul.f32 %v2051_v2, %v13910_v33  ;;  %v2475_v22 = vrot.slane %v2298_v51, %v12883_v7  ;;  %v2899_v47 = vrot.slane %v2722_v39, %v12883_v7 }
 0x10e   : > { %v273_v36 = vrot.slane %v259_v49, %v12881_v6  ;;  %3528 = vst.msk [vmem:[#allocation2 + $0x38] sm:$0xff] %vm3520_vm0, %v3495_v41  ;;  %v3323_v63 = vrot.slane %v3146_v34, %v12883_v7  ;;  %v274_v12 = vcombine.high %v266_v21, %v266_v21  ;;  %v343_v10 = vrot.slane %v266_v21, %v12883_v7  ;;  %v12551_v34 = vld.sshfl [vmem:[%s12879_s28 + $0x8c] sm:$0x33 pattern:$0x75316420] }
 0x10f   : > { %6067 = vst.msk [vmem:[#allocation2 + $0xe0] sm:$0xff] %vm3520_vm0, %v6051_v53  ;;  %v455_v14 = vcombine.high %v12543_v46, %v12543_v46  ;;  %v2614_v61 = vmul.f32 %v2475_v22, %v13914_v23  ;;  %v3038_v38 = vmul.f32 %v2899_v47, %v13919_v48  ;;  %v462_v51 = vrot.slane %v12543_v46, %v12881_v6 }
 0x110   : > { %v275_v8 = vcombine.high %v273_v36, %v273_v36  ;;  %v347_v56 = vrot.slane %v273_v36, %v12883_v7  ;;  %v3462_v1 = vmul.f32 %v3323_v63, %v13926_v16  ;;  %v351_v60 = vrot.slane %v274_v12, %v12883_v7  ;;  %v12555_v63 = vld.sshfl [vmem:[%s12879_s28 + $0x90] sm:$0x33 pattern:$0x75316420] }
 0x111   : > { %vm14017_vm5 = vcmp.eq.f32.partialorder %v343_v10, %v12886_v9  ;;  %v2646_v39 = vadd.f32 %v2614_v61, %v2190_v50  ;;  %v469_v53 = vrot.slane %v455_v14, %v12881_v6  ;;  %v470_v21 = vcombine.high %v462_v51, %v462_v51 }
 0x112   : > { %v355_v49 = vrot.slane %v275_v8, %v12883_v7  ;;  %vm14024_vm6 = vcmp.eq.f32.partialorder %v347_v56, %v12886_v9  ;;  %vm410_vm7 = vcmp.eq.f32.partialorder %v351_v60, %v12886_v9  ;;  %v539_v22 = vrot.slane %v462_v51, %v12883_v7 }
 0x113   : > { %v651_v47 = vcombine.high %v12547_v40, %v12547_v40  ;;  %v3070_v36 = vadd.f32 %v3038_v38, %v2646_v39  ;;  %v471_v46 = vcombine.high %v469_v53, %v469_v53  ;;  %v543_v50 = vrot.slane %v469_v53, %v12883_v7 }
 0x114   : > { %vm411_vm8 = vcmp.eq.f32.partialorder %v355_v49, %v12886_v9  ;;  %v547_v12 = vrot.slane %v470_v21, %v12883_v7  ;;  %v604_v10 = vsel %vm14017_vm5, %v539_v22, 0.0  ;;  %v658_v14 = vrot.slane %v12547_v40, %v12881_v6 }
 0x115   : > { %v665_v61 = vrot.slane %v651_v47, %v12881_v6  ;;  %v11968_v8 = vld [vmem:[#allocation2 + $0x38] sm:$0xff]  ;;  %v3494_v51 = vadd.f32 %v3462_v1, %v3070_v36  ;;  %v551_v38 = vrot.slane %v471_v46, %v12883_v7  ;;  %v605_v39 = vsel %vm14024_vm6, %v543_v50, 0.0 }
 0x116   : > { %v11989_v56 = vld [vmem:[#allocation2 + $0xe0] sm:$0xff]  ;;  %v847_v32 = vcombine.high %v12551_v34, %v12551_v34  ;;  %12062 = vmatpush1.msra.mxu0 %v11968_v8  ;;  %v606_v53 = vsel %vm410_vm7, %v547_v12, 0.0  ;;  %v666_v2 = vcombine.high %v658_v14, %v658_v14  ;;  %v735_v40 = vrot.slane %v658_v14, %v12883_v7 }
 0x117   : > { %12133 = vmatpush1.msra.mxu1 %v11989_v56  ;;  %v667_v21 = vcombine.high %v665_v61, %v665_v61  ;;  %12063 = vmatprep.subr.mxu0 %v16954_v37  ;;  %3527 = vst.msk [vmem:[#allocation2 + $0x30] sm:$0xff] %vm3520_vm0, %v3494_v51  ;;  %v607_v1 = vsel %vm411_vm8, %v551_v38, 0.0  ;;  %v739_v41 = vrot.slane %v665_v61, %v12883_v7  ;;  %v12559_v51 = vld.sshfl [vmem:[%s12879_s28 + $0x98] sm:$0x33 pattern:$0x75316420] }
 0x118   : > { %12134 = vmatprep.subr.mxu1 %v16954_v37  ;;  %v854_v22 = vrot.slane %v12551_v34, %v12881_v6  ;;  %v861_v60 = vrot.slane %v847_v32, %v12881_v6  ;;  %v743_v47 = vrot.slane %v666_v2, %v12883_v7  ;;  %vm800_vm9 = vcmp.eq.f32.partialorder %v735_v40, %v12886_v9 }
 0x119   : > { %v747_v36 = vrot.slane %v667_v21, %v12883_v7  ;;  %v1059_v46 = vcombine.high %v12555_v63, %v12555_v63  ;;  %vm801_vm10 = vcmp.eq.f32.partialorder %v739_v41, %v12886_v9  ;;  %v1066_v34 = vrot.slane %v12555_v63, %v12881_v6  ;;  %v12563_v41 = vld.sshfl [vmem:[%s12879_s28 + $0x94] sm:$0x33 pattern:$0x75316420] }
 0x11a   : > { %v862_v50 = vcombine.high %v854_v22, %v854_v22  ;;  %v863_v49 = vcombine.high %v861_v60, %v861_v60  ;;  %v931_v12 = vrot.slane %v854_v22, %v12883_v7  ;;  %vm802_vm11 = vcmp.eq.f32.partialorder %v743_v47, %v12886_v9 }
 0x11b   : > { %vm803_vm12 = vcmp.eq.f32.partialorder %v747_v36, %v12886_v9  ;;  %v935_v32 = vrot.slane %v861_v60, %v12883_v7  ;;  %v1073_v56 = vrot.slane %v1059_v46, %v12881_v6  ;;  %v1074_v21 = vcombine.high %v1066_v34, %v1066_v34 }
 0x11c   : > { %v939_v14 = vrot.slane %v862_v50, %v12883_v7  ;;  %v943_v61 = vrot.slane %v863_v49, %v12883_v7  ;;  %v996_v8 = vsel %vm800_vm9, %v931_v12, 0.0  ;;  %v1143_v40 = vrot.slane %v1066_v34, %v12883_v7 }
 0x11d   : > { %v997_v38 = vsel %vm801_vm10, %v935_v32, 0.0  ;;  %v14067_v2 = vadd.f32 %v996_v8, %v604_v10  ;;  %v1075_v63 = vcombine.high %v1073_v56, %v1073_v56  ;;  %v1147_v46 = vrot.slane %v1073_v56, %v12883_v7  ;;  %v12567_v10 = vld.sshfl [vmem:[%s12879_s28 + $0x9c] sm:$0x33 pattern:$0x75316420] }
 0x11e   : > { %v998_v22 = vsel %vm802_vm11, %v939_v14, 0.0  ;;  %v999_v60 = vsel %vm803_vm12, %v943_v61, 0.0  ;;  %v14071_v47 = vadd.f32 %v997_v38, %v605_v39  ;;  %v11967_v36 = vld [vmem:[#allocation2 + $0x30] sm:$0xff]  ;;  %v1151_v12 = vrot.slane %v1074_v21, %v12883_v7 }
 0x11f   : > { %v14073_v50 = vadd.f32 %v998_v22, %v606_v53  ;;  %v14075_v49 = vadd.f32 %v999_v60, %v607_v1  ;;  %12064 = vmatpush1.msra.mxu0 %v11967_v36  ;;  %v1155_v32 = vrot.slane %v1075_v63, %v12883_v7  ;;  %vm14082_vm13 = vcmp.eq.f32.partialorder %v1143_v40, %v12886_v9 }
 0x120   : > { %v1255_v39 = vcombine.high %v12559_v51, %v12559_v51  ;;  %v1262_v14 = vrot.slane %v12559_v51, %v12881_v6  ;;  %vm14088_vm14 = vcmp.eq.f32.partialorder %v1147_v46, %v12886_v9  ;;  %vm1210_vm15 = vcmp.eq.f32.partialorder %v1151_v12, %v12886_v9  ;;  %12065 = vmatprep.subr.mxu0 %v16954_v37 }
 0x121   : > { %v1451_v1 = vcombine.high %v12563_v41, %v12563_v41  ;;  %v1458_v61 = vrot.slane %v12563_v41, %v12881_v6  ;;  %vm1211_vm1 = vcmp.eq.f32.partialorder %v1155_v32, %v12886_v9  ;;  %v1647_v22 = vcombine.high %v12567_v10, %v12567_v10 }
 0x122   : > { %v1269_v8 = vrot.slane %v1255_v39, %v12881_v6  ;;  %v1270_v56 = vcombine.high %v1262_v14, %v1262_v14  ;;  %v1339_v38 = vrot.slane %v1262_v14, %v12883_v7  ;;  %v1654_v34 = vrot.slane %v12567_v10, %v12881_v6 }
 0x123   : > { %v1465_v51 = vrot.slane %v1451_v1, %v12881_v6  ;;  %v1466_v21 = vcombine.high %v1458_v61, %v1458_v61  ;;  %v1535_v40 = vrot.slane %v1458_v61, %v12883_v7  ;;  %v1877_v10 = vcombine.high %v14067_v2, %v14067_v2 }
 0x124   : > { %v1271_v60 = vcombine.high %v1269_v8, %v1269_v8  ;;  %v1343_v63 = vrot.slane %v1269_v8, %v12883_v7  ;;  %v1347_v41 = vrot.slane %v1270_v56, %v12883_v7  ;;  %v1404_v36 = vsel %vm14082_vm13, %v1339_v38, 0.0 }
 0x125   : > { %v1467_v46 = vcombine.high %v1465_v51, %v1465_v51  ;;  %v1539_v39 = vrot.slane %v1465_v51, %v12883_v7  ;;  %v1543_v59 = vrot.slane %v1466_v21, %v12883_v7  ;;  %vm14107_vm2 = vcmp.eq.f32.partialorder %v1535_v40, %v12886_v9 }
 0x126   : > { %v1351_v1 = vrot.slane %v1271_v60, %v12883_v7  ;;  %v1405_v61 = vsel %vm14088_vm14, %v1343_v63, 0.0  ;;  %v1406_v8 = vsel %vm1210_vm15, %v1347_v41, 0.0  ;;  %v1661_v51 = vrot.slane %v1647_v22, %v12881_v6 }
 0x127   : > { %v1547_v56 = vrot.slane %v1467_v46, %v12883_v7  ;;  %vm14119_vm3 = vcmp.eq.f32.partialorder %v1539_v39, %v12886_v9  ;;  %vm1602_vm4 = vcmp.eq.f32.partialorder %v1543_v59, %v12886_v9  ;;  %v1662_v21 = vcombine.high %v1654_v34, %v1654_v34 }
 0x128   : > { %v1407_v53 = vsel %vm1211_vm1, %v1351_v1, 0.0  ;;  %v1731_v12 = vrot.slane %v1654_v34, %v12883_v7  ;;  %v1663_v40 = vcombine.high %v1661_v51, %v1661_v51  ;;  %v1735_v60 = vrot.slane %v1661_v51, %v12883_v7 }
 0x129   : > { %vm1603_vm5 = vcmp.eq.f32.partialorder %v1547_v56, %v12886_v9  ;;  %v2301_v63 = vcombine.high %v14071_v47, %v14071_v47  ;;  %v1739_v41 = vrot.slane %v1662_v21, %v12883_v7  ;;  %v1891_v22 = vrot.slane %v1877_v10, %v12881_v6 }
 0x12a   : > { %v1796_v32 = vsel %vm14107_vm2, %v1731_v12, 0.0  ;;  %v2725_v46 = vcombine.high %v14073_v50, %v14073_v50  ;;  %v1743_v39 = vrot.slane %v1663_v40, %v12883_v7  ;;  %v1797_v1 = vsel %vm14119_vm3, %v1735_v60, 0.0 }
 0x12b   : > { %v14143_v34 = vadd.f32 %v1796_v32, %v1404_v36  ;;  %v2315_v51 = vrot.slane %v2301_v63, %v12881_v6  ;;  %v1798_v21 = vsel %vm1602_vm4, %v1739_v41, 0.0  ;;  %v14148_v19 = vadd.f32 %v1797_v1, %v1405_v61 }
 0x12c   : > { %v1893_v14 = vcombine.high %v1891_v22, %v1891_v22  ;;  %v2739_v12 = vrot.slane %v2725_v46, %v12881_v6  ;;  %v1799_v10 = vsel %vm1603_vm5, %v1743_v39, 0.0  ;;  %v14153_v18 = vadd.f32 %v1798_v21, %v1406_v8 }
 0x12d   : > { %v2317_v40 = vcombine.high %v2315_v51, %v2315_v51  ;;  %v3149_v36 = vcombine.high %v14075_v49, %v14075_v49  ;;  %v14157_v38 = vadd.f32 %v1799_v10, %v1407_v53  ;;  %v2047_v61 = vrot.slane %v13922_v57, %v12883_v7 }
 0x12e   : > { %v14160_v60 = vrot.slane %v1893_v14, %v12881_v6  ;;  %v2741_v59 = vcombine.high %v2739_v12, %v2739_v12  ;;  %v2471_v8 = vrot.slane %v13929_v29, %v12883_v7  ;;  %v2895_v41 = vrot.slane %v13943_v3, %v12883_v7 }
 0x12f   : > { %v14165_v63 = vrot.slane %v2317_v40, %v12881_v6  ;;  %v3163_v56 = vrot.slane %v3149_v36, %v12881_v6  ;;  %v2189_v46 = vmul.f32 %v2047_v61, %v13910_v33  ;;  %v3319_v57 = vrot.slane %v13959_v58, %v12883_v7 }
 0x130   : > { %v1925_v53 = vcombine.high %v14160_v60, %v14160_v60  ;;  %v14175_v32 = vrot.slane %v2741_v59, %v12881_v6  ;;  %v2613_v29 = vmul.f32 %v2471_v8, %v13914_v23  ;;  %v3037_v21 = vmul.f32 %v2895_v41, %v13919_v48 }
 0x131   : > { %v2349_v39 = vcombine.high %v14165_v63, %v14165_v63  ;;  %v3165_v1 = vcombine.high %v3163_v56, %v3163_v56  ;;  %v3461_v10 = vmul.f32 %v3319_v57, %v13926_v16  ;;  %v14189_v40 = vrot.slane %v1891_v22, %v12881_v6 }
 0x132   : > { %v2087_v3 = vrot.slane %v1925_v53, %v12883_v7  ;;  %v2773_v14 = vcombine.high %v14175_v32, %v14175_v32  ;;  %v2645_v59 = vadd.f32 %v2613_v29, %v2189_v46  ;;  %v14194_v61 = vrot.slane %v2315_v51, %v12881_v6 }
 0x133   : > { %v2511_v58 = vrot.slane %v2349_v39, %v12883_v7  ;;  %v3193_v36 = vrot.slane %v3165_v1, %v12881_v6  ;;  %v1923_v53 = vcombine.high %v14189_v40, %v14189_v40  ;;  %v14201_v57 = vrot.slane %v2739_v12, %v12881_v6 }
 0x134   : > { %v2199_v8 = vmul.f32 %v2087_v3, %v14143_v34  ;;  %v2935_v41 = vrot.slane %v2773_v14, %v12883_v7  ;;  %v3069_v39 = vadd.f32 %v3037_v21, %v2645_v59  ;;  %v2347_v46 = vcombine.high %v14194_v61, %v14194_v61 }
 0x135   : > { %v2623_v22 = vmul.f32 %v2511_v58, %v14148_v19  ;;  %v3197_v15 = vcombine.high %v3193_v36, %v3193_v36  ;;  %v2083_v1 = vrot.slane %v1923_v53, %v12883_v7  ;;  %v2771_v29 = vcombine.high %v14201_v57, %v14201_v57 }
 0x136   : > { %v3047_v51 = vmul.f32 %v2935_v41, %v14153_v18  ;;  %v14211_v3 = vrot.slane %v3163_v56, %v12881_v6  ;;  %v3493_v45 = vadd.f32 %v3461_v10, %v3069_v39  ;;  %v2507_v58 = vrot.slane %v2347_v46, %v12883_v7 }
 0x137   : > { %v2655_v14 = vadd.f32 %v2623_v22, %v2199_v8  ;;  %v3359_v12 = vrot.slane %v3197_v15, %v12883_v7  ;;  %v2198_v21 = vmul.f32 %v2083_v1, %v14143_v34  ;;  %v2931_v59 = vrot.slane %v2771_v29, %v12883_v7 }
 0x138   : > { %v3195_v41 = vcombine.high %v14211_v3, %v14211_v3  ;;  %v2043_v53 = vrot.slane %v13975_v17, %v12883_v7  ;;  %3526 = vst.msk [vmem:[#allocation2 + $0x28] sm:$0xff] %vm3520_vm0, %v3493_v45  ;;  %v2622_v15 = vmul.f32 %v2507_v58, %v14148_v19  ;;  %v2467_v10 = vrot.slane %v13984_v43, %v12883_v7 }
 0x139   : > { %v3079_v42 = vadd.f32 %v3047_v51, %v2655_v14  ;;  %v3471_v56 = vmul.f32 %v3359_v12, %v14157_v38  ;;  %v3046_v8 = vmul.f32 %v2931_v59, %v14153_v18  ;;  %v2891_v46 = vrot.slane %v13987_v44, %v12883_v7 }
 0x13a   : > { %v3355_v22 = vrot.slane %v3195_v41, %v12883_v7  ;;  %v2188_v39 = vmul.f32 %v2043_v53, %v13910_v33  ;;  %v2654_v51 = vadd.f32 %v2622_v15, %v2198_v21  ;;  %v2612_v1 = vmul.f32 %v2467_v10, %v13914_v23 }
 0x13b   : > { %v3503_v17 = vadd.f32 %v3471_v56, %v3079_v42  ;;  %v3315_v45 = vrot.slane %v13991_v31, %v12883_v7  ;;  %v3036_v43 = vmul.f32 %v2891_v46, %v13919_v48  ;;  %v2079_v14 = vrot.slane %v14160_v60, %v12883_v7 }
 0x13c   : > { %v3470_v29 = vmul.f32 %v3355_v22, %v14157_v38  ;;  %v2503_v12 = vrot.slane %v14165_v63, %v12883_v7  ;;  %v3078_v44 = vadd.f32 %v3046_v8, %v2654_v51  ;;  %v2644_v42 = vadd.f32 %v2612_v1, %v2188_v39 }
 0x13d   : > { %3536 = vst.msk [vmem:[#allocation2 + $0xd8] sm:$0xff] %vm3520_vm0, %v3503_v17  ;;  %v3460_v58 = vmul.f32 %v3315_v45, %v13926_v16  ;;  %v2927_v21 = vrot.slane %v14175_v32, %v12883_v7  ;;  %v2197_v31 = vmul.f32 %v2079_v14, %v14143_v34  ;;  %v3351_v41 = vrot.slane %v3193_v36, %v12883_v7 }
 0x13e   : > { %v2621_v59 = vmul.f32 %v2503_v12, %v14148_v19  ;;  %v1835_v60 = vrot.slane %v13855_v4, %v12881_v6  ;;  %v3502_v53 = vadd.f32 %v3470_v29, %v3078_v44  ;;  %v3068_v63 = vadd.f32 %v3036_v43, %v2644_v42 }
 0x13f   : > { %v3045_v56 = vmul.f32 %v2927_v21, %v14153_v18  ;;  %v2259_v15 = vrot.slane %v13857_v5, %v12881_v6  ;;  %v11966_v10 = vld [vmem:[#allocation2 + $0x28] sm:$0xff]  ;;  %v3469_v32 = vmul.f32 %v3351_v41, %v14157_v38  ;;  %v2683_v39 = vrot.slane %v13860_v13, %v12881_v6 }
 0x140   : > { %v2653_v8 = vadd.f32 %v2621_v59, %v2197_v31  ;;  %v1843_v22 = vcombine.high %v1835_v60, %v1835_v60  ;;  %12066 = vmatpush1.msra.mxu0 %v11966_v10  ;;  %3535 = vst.msk [vmem:[#allocation2 + $0xd0] sm:$0xff] %vm3520_vm0, %v3502_v53  ;;  %v3492_v36 = vadd.f32 %v3460_v58, %v3068_v63  ;;  %vm12041_vm12 = vcmask 261120  }
 0x141   : > { %v2267_v4 = vcombine.high %v2259_v15, %v2259_v15  ;;  %v3107_v46 = vrot.slane %v13863_v30, %v12881_v6  ;;  %v2075_v17 = vrot.slane %v14189_v40, %v12883_v7  ;;  %12067 = vmatprep.subr.mxu0 %v16954_v37  ;;  %v2691_v1 = vcombine.high %v2683_v39, %v2683_v39 }
 0x142   : > { %v3077_v5 = vadd.f32 %v3045_v56, %v2653_v8  ;;  %v14262_v51 = vrot.slane %v1843_v22, %v12881_v6  ;;  %v2499_v13 = vrot.slane %v14194_v61, %v12883_v7  ;;  %3525 = vst.msk [vmem:[#allocation2 + $0x20] sm:$0xff] %vm3520_vm0, %v3492_v36  ;;  %v2923_v40 = vrot.slane %v14201_v57, %v12883_v7 }
 0x143   : > { %v14268_v45 = vrot.slane %v2267_v4, %v12881_v6  ;;  %v3115_v29 = vcombine.high %v3107_v46, %v3107_v46  ;;  %v2196_v30 = vmul.f32 %v2075_v17, %v14143_v34  ;;  %v14276_v44 = vrot.slane %v2691_v1, %v12881_v6 }
 0x144   : > { %v11988_v43 = vld [vmem:[#allocation2 + $0xd8] sm:$0xff]  ;;  %v3501_v14 = vadd.f32 %v3469_v32, %v3077_v5  ;;  %v1875_v12 = vcombine.high %v14262_v51, %v14262_v51  ;;  %v2620_v61 = vmul.f32 %v2499_v13, %v14148_v19  ;;  %v3044_v21 = vmul.f32 %v2923_v40, %v14153_v18 }
 0x145   : > { %12135 = vmatpush1.msra.mxu1 %v11988_v43  ;;  %v2299_v42 = vcombine.high %v14268_v45, %v14268_v45  ;;  %v14282_v58 = vrot.slane %v3115_v29, %v12881_v6  ;;  %v3347_v57 = vrot.slane %v14211_v3, %v12883_v7  ;;  %v2723_v59 = vcombine.high %v14276_v44, %v14276_v44 }
 0x146   : > { %12136 = vmatprep.subr.mxu1 %v16954_v37  ;;  %3534 = vst.msk [vmem:[#allocation2 + $0xc8] sm:$0xff] %vm3520_vm0, %v3501_v14  ;;  %v2039_v31 = vrot.slane %v1875_v12, %v12883_v7  ;;  %v2652_v41 = vadd.f32 %v2620_v61, %v2196_v30  ;;  %v14293_v53 = vrot.slane %v1835_v60, %v12881_v6 }
 0x147   : > { %v2463_v63 = vrot.slane %v2299_v42, %v12883_v7  ;;  %v3147_v56 = vcombine.high %v14282_v58, %v14282_v58  ;;  %v3468_v3 = vmul.f32 %v3347_v57, %v14157_v38  ;;  %v14300_v10 = vrot.slane %v2259_v15, %v12881_v6  ;;  %v11987_v8 = vld [vmem:[#allocation2 + $0xd0] sm:$0xff] }
 0x148   : > { %v2187_v32 = vmul.f32 %v2039_v31, %v13910_v33  ;;  %v2887_v22 = vrot.slane %v2723_v59, %v12883_v7  ;;  %v3076_v36 = vadd.f32 %v3044_v21, %v2652_v41  ;;  %v1873_v60 = vcombine.high %v14293_v53, %v14293_v53  ;;  %12137 = vmatpush1.msra.mxu1 %v11987_v8 }
 0x149   : > { %v2611_v4 = vmul.f32 %v2463_v63, %v13914_v23  ;;  %v3311_v17 = vrot.slane %v3147_v56, %v12883_v7  ;;  %v2297_v5 = vcombine.high %v14300_v10, %v14300_v10  ;;  %v14311_v15 = vrot.slane %v2683_v39, %v12881_v6  ;;  %12138 = vmatprep.subr.mxu1 %v16954_v37  ;;  %v11965_v1 = vld [vmem:[#allocation2 + $0x20] sm:$0xff] }
 0x14a   : > { %v3035_v13 = vmul.f32 %v2887_v22, %v13919_v48  ;;  %v3500_v29 = vadd.f32 %v3468_v3, %v3076_v36  ;;  %v2035_v30 = vrot.slane %v1873_v60, %v12883_v7  ;;  %v14317_v40 = vrot.slane %v3107_v46, %v12881_v6  ;;  %12068 = vmatpush1.msra.mxu0 %v11965_v1 }
 0x14b   : > { %v2643_v43 = vadd.f32 %v2611_v4, %v2187_v32  ;;  %v3459_v14 = vmul.f32 %v3311_v17, %v13926_v16  ;;  %v2459_v12 = vrot.slane %v2297_v5, %v12883_v7  ;;  %v2721_v39 = vcombine.high %v14311_v15, %v14311_v15  ;;  %12069 = vmatprep.subr.mxu0 %v16954_v37 }
 0x14c   : > { %3533 = vst.msk [vmem:[#allocation2 + $0xc0] sm:$0xff] %vm3520_vm0, %v3500_v29  ;;  %v2186_v61 = vmul.f32 %v2035_v30, %v13910_v33  ;;  %v3145_v42 = vcombine.high %v14317_v40, %v14317_v40  ;;  %v1884_v46 = vrot.slane %v14067_v2, %v12881_v6  ;;  %v2308_v21 = vrot.slane %v14071_v47, %v12881_v6 }
 0x14d   : > { %v11986_v57 = vld [vmem:[#allocation2 + $0xc8] sm:$0xff]  ;;  %v3067_v31 = vadd.f32 %v3035_v13, %v2643_v43  ;;  %v2610_v59 = vmul.f32 %v2459_v12, %v13914_v23  ;;  %v2883_v41 = vrot.slane %v2721_v39, %v12883_v7  ;;  %v2732_v63 = vrot.slane %v14073_v50, %v12881_v6 }
 0x14e   : > { %12139 = vmatpush1.msra.mxu1 %v11986_v57  ;;  %v3307_v56 = vrot.slane %v3145_v42, %v12883_v7  ;;  %v1892_v3 = vcombine.high %v1884_v46, %v1884_v46  ;;  %v2316_v8 = vcombine.high %v2308_v21, %v2308_v21  ;;  %v3156_v2 = vrot.slane %v14075_v49, %v12881_v6 }
 0x14f   : > { %12140 = vmatprep.subr.mxu1 %v16954_v37  ;;  %v3491_v47 = vadd.f32 %v3459_v14, %v3067_v31  ;;  %v2642_v32 = vadd.f32 %v2610_v59, %v2186_v61  ;;  %v3034_v22 = vmul.f32 %v2883_v41, %v13919_v48  ;;  %v2740_v36 = vcombine.high %v2732_v63, %v2732_v63 }
 0x150   : > { %v3458_v60 = vmul.f32 %v3307_v56, %v13926_v16  ;;  %v14343_v4 = vrot.slane %v1892_v3, %v12881_v6  ;;  %v14346_v50 = vrot.slane %v2316_v8, %v12881_v6  ;;  %v3164_v17 = vcombine.high %v3156_v2, %v3156_v2 }
 0x151   : > { %3524 = vst.msk [vmem:[#allocation2 + $0x18] sm:$0xff] %vm3520_vm0, %v3491_v47  ;;  %v3066_v5 = vadd.f32 %v3034_v22, %v2642_v32  ;;  %v14350_v49 = vrot.slane %v2740_v36, %v12881_v6  ;;  %v2031_v1 = vrot.slane %v14262_v51, %v12883_v7  ;;  %v2455_v13 = vrot.slane %v14268_v45, %v12883_v7 }
 0x152   : > { %v1924_v29 = vcombine.high %v14343_v4, %v14343_v4  ;;  %v2348_v30 = vcombine.high %v14346_v50, %v14346_v50  ;;  %v14361_v43 = vrot.slane %v3164_v17, %v12881_v6  ;;  %v2879_v14 = vrot.slane %v14276_v44, %v12883_v7 }
 0x153   : > { %v11985_v12 = vld [vmem:[#allocation2 + $0xc0] sm:$0xff]  ;;  %v3490_v39 = vadd.f32 %v3458_v60, %v3066_v5  ;;  %v2772_v51 = vcombine.high %v14350_v49, %v14350_v49  ;;  %v2185_v61 = vmul.f32 %v2031_v1, %v13910_v33  ;;  %v2609_v45 = vmul.f32 %v2455_v13, %v13914_v23 }
 0x154   : > { %12141 = vmatpush1.msra.mxu1 %v11985_v12  ;;  %v2071_v42 = vrot.slane %v1924_v29, %v12883_v7  ;;  %v2495_v57 = vrot.slane %v2348_v30, %v12883_v7  ;;  %v3196_v31 = vcombine.high %v14361_v43, %v14361_v43  ;;  %v3033_v59 = vmul.f32 %v2879_v14, %v13919_v48 }
 0x155   : > { %12142 = vmatprep.subr.mxu1 %v16954_v37  ;;  %3523 = vst.msk [vmem:[#allocation2 + $0x10] sm:$0xff] %vm3520_vm0, %v3490_v39  ;;  %v2919_v44 = vrot.slane %v2772_v51, %v12883_v7  ;;  %v2641_v41 = vadd.f32 %v2609_v45, %v2185_v61  ;;  %v3303_v56 = vrot.slane %v14282_v58, %v12883_v7 }
 0x156   : > { %v14380_v3 = vrot.slane %v1884_v46, %v12881_v6  ;;  %v2195_v8 = vmul.f32 %v2071_v42, %v14143_v34  ;;  %v2619_v47 = vmul.f32 %v2495_v57, %v14148_v19  ;;  %v3343_v32 = vrot.slane %v3196_v31, %v12883_v7 }
 0x157   : > { %v14386_v22 = vrot.slane %v2308_v21, %v12881_v6  ;;  %v3043_v36 = vmul.f32 %v2919_v44, %v14153_v18  ;;  %v3065_v60 = vadd.f32 %v3033_v59, %v2641_v41  ;;  %v3457_v17 = vmul.f32 %v3303_v56, %v13926_v16 }
 0x158   : > { %v1922_v58 = vcombine.high %v14380_v3, %v14380_v3  ;;  %v11964_v5 = vld [vmem:[#allocation2 + $0x18] sm:$0xff]  ;;  %v2651_v46 = vadd.f32 %v2619_v47, %v2195_v8  ;;  %v3467_v1 = vmul.f32 %v3343_v32, %v14157_v38  ;;  %v14396_v29 = vrot.slane %v2732_v63, %v12881_v6  ;;  %v12634_v8 = vld.sshfl [vmem:[%s12879_s28 + $0x60] sm:$0x33 pattern:$0x75316420] }
 0x159   : > { %v2346_v13 = vcombine.high %v14386_v22, %v14386_v22  ;;  %12070 = vmatpush1.msra.mxu0 %v11964_v5  ;;  %v3489_v21 = vadd.f32 %v3457_v17, %v3065_v60  ;;  %v14400_v14 = vrot.slane %v3156_v2, %v12881_v6  ;;  %v2027_v12 = vrot.slane %v14293_v53, %v12883_v7 }
 0x15a   : > { %v2067_v30 = vrot.slane %v1922_v58, %v12883_v7  ;;  %12071 = vmatprep.subr.mxu0 %v16954_v37  ;;  %v3075_v39 = vadd.f32 %v3043_v36, %v2651_v46  ;;  %v2770_v61 = vcombine.high %v14396_v29, %v14396_v29  ;;  %v2451_v63 = vrot.slane %v14300_v10, %v12883_v7 }
 0x15b   : > { %v2491_v51 = vrot.slane %v2346_v13, %v12883_v7  ;;  %3522 = vst.msk [vmem:[#allocation2 + $0x8] sm:$0xff] %vm3520_vm0, %v3489_v21  ;;  %v3194_v45 = vcombine.high %v14400_v14, %v14400_v14  ;;  %v2184_v53 = vmul.f32 %v2027_v12, %v13910_v33  ;;  %v2875_v42 = vrot.slane %v14311_v15, %v12883_v7 }
 0x15c   : > { %v2194_v2 = vmul.f32 %v2067_v30, %v14143_v34  ;;  %v11963_v57 = vld [vmem:[#allocation2 + $0x10] sm:$0xff]  ;;  %v3499_v31 = vadd.f32 %v3467_v1, %v3075_v39  ;;  %v2915_v10 = vrot.slane %v2770_v61, %v12883_v7  ;;  %v2608_v44 = vmul.f32 %v2451_v63, %v13914_v23 }
 0x15d   : > { %v2618_v59 = vmul.f32 %v2491_v51, %v14148_v19  ;;  %12072 = vmatpush1.msra.mxu0 %v11963_v57  ;;  %v3339_v41 = vrot.slane %v3194_v45, %v12883_v7  ;;  %v3032_v56 = vmul.f32 %v2875_v42, %v13919_v48  ;;  %v3299_v33 = vrot.slane %v14317_v40, %v12883_v7  ;;  %v12638_v48 = vld.sshfl [vmem:[%s12879_s28 + $0x68] sm:$0x33 pattern:$0x75316420] }
 0x15e   : > { %v2063_v15 = vrot.slane %v14343_v4, %v12883_v7  ;;  %3532 = vst.msk [vmem:[#allocation2 + $0xb8] sm:$0xff] %vm3520_vm0, %v3499_v31  ;;  %12073 = vmatprep.subr.mxu0 %v16954_v37  ;;  %v3042_v23 = vmul.f32 %v2915_v10, %v14153_v18  ;;  %v2640_v32 = vadd.f32 %v2608_v44, %v2184_v53 }
 0x15f   : > { %v2650_v47 = vadd.f32 %v2618_v59, %v2194_v2  ;;  %v2487_v36 = vrot.slane %v14346_v50, %v12883_v7  ;;  %v3466_v60 = vmul.f32 %v3339_v41, %v14157_v38  ;;  %v3456_v40 = vmul.f32 %v3299_v33, %v13926_v16  ;;  %v12642_v50 = vld.sshfl [vmem:[%s12879_s28 + $0x64] sm:$0x33 pattern:$0x75316420] }
 0x160   : > { %v2193_v4 = vmul.f32 %v2063_v15, %v14143_v34  ;;  %v2911_v17 = vrot.slane %v14350_v49, %v12883_v7  ;;  %v3064_v5 = vadd.f32 %v3032_v56, %v2640_v32  ;;  %v3335_v1 = vrot.slane %v14361_v43, %v12883_v7 }
 0x161   : > { %v3074_v58 = vadd.f32 %v3042_v23, %v2650_v47  ;;  %v2617_v46 = vmul.f32 %v2487_v36, %v14148_v19  ;;  %v9476_v21 = vcombine.high %v12634_v8, %v12634_v8  ;;  %v9483_v30 = vrot.slane %v12634_v8, %v12881_v6  ;;  %v12646_v36 = vld.sshfl [vmem:[%s12879_s28 + $0x6c] sm:$0x33 pattern:$0x75316420] }
 0x162   : > { %v3041_v13 = vmul.f32 %v2911_v17, %v14153_v18  ;;  %v9672_v12 = vcombine.high %v12638_v48, %v12638_v48  ;;  %v11962_v16 = vld [vmem:[#allocation2 + $0x8] sm:$0xff]  ;;  %v3488_v51 = vadd.f32 %v3456_v40, %v3064_v5  ;;  %v3465_v49 = vmul.f32 %v3335_v1, %v14157_v38 }
 0x163   : > { %v3498_v39 = vadd.f32 %v3466_v60, %v3074_v58  ;;  %v2649_v61 = vadd.f32 %v2617_v46, %v2193_v4  ;;  %12074 = vmatpush1.msra.mxu0 %v11962_v16  ;;  %v9490_v63 = vrot.slane %v9476_v21, %v12881_v6  ;;  %v9491_v2 = vcombine.high %v9483_v30, %v9483_v30  ;;  %v12650_v4 = vld.sshfl [vmem:[%s12879_s28 + $0x70] sm:$0x33 pattern:$0x75316420] }
 0x164   : > { %v9568_v43 = vrot.slane %v9483_v30, %v12883_v7  ;;  %v9679_v45 = vrot.slane %v12638_v48, %v12881_v6  ;;  %12075 = vmatprep.subr.mxu0 %v16954_v37  ;;  %3521 = vst.msk [vmem:[#allocation2] sm:$0xff] %vm3520_vm0, %v3488_v51  ;;  %v9686_v42 = vrot.slane %v9672_v12, %v12881_v6 }
 0x165   : > { %3531 = vst.msk [vmem:[#allocation2 + $0xb0] sm:$0xff] %vm3520_vm0, %v3498_v39  ;;  %v3073_v53 = vadd.f32 %v3041_v13, %v2649_v61  ;;  %v9868_v57 = vcombine.high %v12642_v50, %v12642_v50  ;;  %v9875_v31 = vrot.slane %v12642_v50, %v12881_v6  ;;  %v11984_v59 = vld [vmem:[#allocation2 + $0xb8] sm:$0xff]  ;;  %v9492_v10 = vcombine.high %v9490_v63, %v9490_v63  ;;  %v11954_v61 = vld [vmem:[%s14475_s5 + $0x8] sm:$0xff] }
 0x166   : > { %v9572_v44 = vrot.slane %v9490_v63, %v12883_v7  ;;  %v9576_v41 = vrot.slane %v9491_v2, %v12883_v7  ;;  %vm14456_vm6 = vcmp.eq.f32.partialorder %v9568_v43, %v12886_v9  ;;  %12143 = vmatpush1.msra.mxu1 %v11984_v59  ;;  %v9687_v15 = vcombine.high %v9679_v45, %v9679_v45 }
 0x167   : > { %v3497_v33 = vadd.f32 %v3465_v49, %v3073_v53  ;;  %v9688_v8 = vcombine.high %v9686_v42, %v9686_v42  ;;  %v9764_v47 = vrot.slane %v9679_v45, %v12883_v7  ;;  %12144 = vmatprep.subr.mxu1 %v16954_v37  ;;  %v9580_v23 = vrot.slane %v9492_v10, %v12883_v7  ;;  %v12654_v49 = vld.sshfl [vmem:[%s12879_s28 + $0x78] sm:$0x33 pattern:$0x75316420] }
 0x168   : > { %vm9646_vm7 = vcmp.eq.f32.partialorder %v9572_v44, %v12886_v9  ;;  %vm9647_vm8 = vcmp.eq.f32.partialorder %v9576_v41, %v12886_v9  ;;  %v9768_v32 = vrot.slane %v9686_v42, %v12883_v7  ;;  %v9772_v48 = vrot.slane %v9687_v15, %v12883_v7  ;;  %12666 = vmatprep.mubr.msk.f32.mxu0 %vm12041_vm12, %v11954_v61 }
 0x169   : > { %3530 = vst.msk [vmem:[#allocation2 + $0xa8] sm:$0xff] %vm3520_vm0, %v3497_v33  ;;  %v9776_v60 = vrot.slane %v9688_v8, %v12883_v7  ;;  %v9882_v40 = vrot.slane %v9868_v57, %v12881_v6  ;;  %vm9648_vm9 = vcmp.eq.f32.partialorder %v9580_v23, %v12886_v9  ;;  %v9841_v17 = vsel %vm14456_vm6, %v9764_v47, 0.0 }
 0x16a   : > { %v9883_v58 = vcombine.high %v9875_v31, %v9875_v31  ;;  %v9960_v5 = vrot.slane %v9875_v31, %v12883_v7  ;;  %v9842_v46 = vsel %vm9646_vm7, %v9768_v32, 0.0  ;;  %v9843_v1 = vsel %vm9647_vm8, %v9772_v48, 0.0 }
 0x16b   : > { %v9884_v13 = vcombine.high %v9882_v40, %v9882_v40  ;;  %v9964_v50 = vrot.slane %v9882_v40, %v12883_v7  ;;  %v11961_v30 = vld [vmem:[#allocation2] sm:$0xff]  ;;  %v10064_v39 = vcombine.high %v12646_v36, %v12646_v36  ;;  %v10071_v51 = vrot.slane %v12646_v36, %v12881_v6  ;;  %v12658_v40 = vld.sshfl [vmem:[%s12879_s28 + $0x74] sm:$0x33 pattern:$0x75316420] }
 0x16c   : > { %v11983_v21 = vld [vmem:[#allocation2 + $0xb0] sm:$0xff]  ;;  %v9968_v12 = vrot.slane %v9883_v58, %v12883_v7  ;;  %vm14485_vm10 = vcmp.eq.f32.partialorder %v9960_v5, %v12886_v9  ;;  %12076 = vmatpush1.msra.mxu0 %v11961_v30  ;;  %v10276_v43 = vcombine.high %v12650_v4, %v12650_v4  ;;  %v9844_v45 = vsel %vm9648_vm9, %v9776_v60, 0.0 }
 0x16d   : > { %12145 = vmatpush1.msra.mxu1 %v11983_v21  ;;  %v9972_v63 = vrot.slane %v9884_v13, %v12883_v7  ;;  %vm14494_vm11 = vcmp.eq.f32.partialorder %v9964_v50, %v12886_v9  ;;  %12101 = vmatprep.subr.mxu0 %v16954_v37  ;;  %v10078_v53 = vrot.slane %v10064_v39, %v12881_v6  ;;  %v12662_v50 = vld.sshfl [vmem:[%s12879_s28 + $0x7c] sm:$0x33 pattern:$0x75316420] }
 0x16e   : > { %12146 = vmatprep.subr.mxu1 %v16954_v37  ;;  %vm10039_vm13 = vcmp.eq.f32.partialorder %v9968_v12, %v12886_v9  ;;  %v10079_v42 = vcombine.high %v10071_v51, %v10071_v51  ;;  %v10156_v57 = vrot.slane %v10071_v51, %v12883_v7  ;;  %v10283_v31 = vrot.slane %v12650_v4, %v12881_v6 }
 0x16f   : > { %vm10040_vm14 = vcmp.eq.f32.partialorder %v9972_v63, %v12886_v9  ;;  %v10290_v59 = vrot.slane %v10276_v43, %v12881_v6  ;;  %v10080_v44 = vcombine.high %v10078_v53, %v10078_v53  ;;  %v10160_v41 = vrot.slane %v10078_v53, %v12883_v7 }
 0x170   : > { %v11982_v10 = vld [vmem:[#allocation2 + $0xa8] sm:$0xff]  ;;  %v10164_v56 = vrot.slane %v10079_v42, %v12883_v7  ;;  %v10472_v33 = vcombine.high %v12654_v49, %v12654_v49  ;;  %v10233_v15 = vsel %vm14485_vm10, %v10156_v57, 0.0  ;;  %v10291_v8 = vcombine.high %v10283_v31, %v10283_v31 }
 0x171   : > { %12147 = vmatpush1.msra.mxu1 %v11982_v10  ;;  %v10292_v47 = vcombine.high %v10290_v59, %v10290_v59  ;;  %v10368_v23 = vrot.slane %v10283_v31, %v12883_v7  ;;  %v10168_v32 = vrot.slane %v10080_v44, %v12883_v7  ;;  %v10234_v36 = vsel %vm14494_vm11, %v10160_v41, 0.0 }
 0x172   : > { %12148 = vmatprep.subr.mxu1 %v16954_v37  ;;  %v10235_v48 = vsel %vm10039_vm13, %v10164_v56, 0.0  ;;  %v10249_v60 = vadd.f32 %v10233_v15, %v9841_v17  ;;  %v10250_v4 = vadd.f32 %v10234_v36, %v9842_v46  ;;  %v10372_v5 = vrot.slane %v10290_v59, %v12883_v7 }
 0x173   : > { %v10251_v58 = vadd.f32 %v10235_v48, %v9843_v1  ;;  %v10376_v13 = vrot.slane %v10291_v8, %v12883_v7  ;;  %v10236_v21 = vsel %vm10040_vm14, %v10168_v32, 0.0  ;;  %v10380_v30 = vrot.slane %v10292_v47, %v12883_v7 }
 0x174   : > { %vm10445_vm15 = vcmp.eq.f32.partialorder %v10368_v23, %v12886_v9  ;;  %v10479_v16 = vrot.slane %v12654_v49, %v12881_v6  ;;  %v10252_v12 = vadd.f32 %v10236_v21, %v9844_v45  ;;  %vm14530_vm1 = vcmp.eq.f32.partialorder %v10372_v5, %v12886_v9 }
 0x175   : > { %vm10447_vm2 = vcmp.eq.f32.partialorder %v10376_v13, %v12886_v9  ;;  %v10486_v46 = vrot.slane %v10472_v33, %v12881_v6  ;;  %vm10448_vm3 = vcmp.eq.f32.partialorder %v10380_v30, %v12886_v9  ;;  %v10668_v51 = vcombine.high %v12658_v40, %v12658_v40 }
 0x176   : > { %v10487_v1 = vcombine.high %v10479_v16, %v10479_v16  ;;  %v10564_v39 = vrot.slane %v10479_v16, %v12883_v7  ;;  %v10675_v49 = vrot.slane %v12658_v40, %v12881_v6  ;;  %v10864_v2 = vcombine.high %v12662_v50, %v12662_v50 }
 0x177   : > { %v10488_v61 = vcombine.high %v10486_v46, %v10486_v46  ;;  %v10568_v63 = vrot.slane %v10486_v46, %v12883_v7  ;;  %v10682_v53 = vrot.slane %v10668_v51, %v12881_v6  ;;  %v10871_v42 = vrot.slane %v12662_v50, %v12881_v6 }
 0x178   : > { %v10572_v43 = vrot.slane %v10487_v1, %v12883_v7  ;;  %v10641_v45 = vsel %vm10445_vm15, %v10564_v39, 0.0  ;;  %v10683_v59 = vcombine.high %v10675_v49, %v10675_v49  ;;  %v10760_v10 = vrot.slane %v10675_v49, %v12883_v7 }
 0x179   : > { %v10576_v57 = vrot.slane %v10488_v61, %v12883_v7  ;;  %v10642_v31 = vsel %vm14530_vm1, %v10568_v63, 0.0  ;;  %v10684_v41 = vcombine.high %v10682_v53, %v10682_v53  ;;  %v10764_v56 = vrot.slane %v10682_v53, %v12883_v7 }
 0x17a   : > { %v10643_v44 = vsel %vm10447_vm2, %v10572_v43, 0.0  ;;  %v10878_v33 = vrot.slane %v10864_v2, %v12881_v6  ;;  %v10768_v8 = vrot.slane %v10683_v59, %v12883_v7  ;;  %vm10837_vm4 = vcmp.eq.f32.partialorder %v10760_v10, %v12886_v9 }
 0x17b   : > { %v10644_v15 = vsel %vm10448_vm3, %v10576_v57, 0.0  ;;  %v10879_v47 = vcombine.high %v10871_v42, %v10871_v42  ;;  %v10772_v23 = vrot.slane %v10684_v41, %v12883_v7  ;;  %vm10838_vm5 = vcmp.eq.f32.partialorder %v10764_v56, %v12886_v9 }
 0x17c   : > { %v10880_v32 = vcombine.high %v10878_v33, %v10878_v33  ;;  %v10956_v36 = vrot.slane %v10871_v42, %v12883_v7  ;;  %vm10839_vm6 = vcmp.eq.f32.partialorder %v10768_v8, %v12886_v9  ;;  %v10960_v48 = vrot.slane %v10878_v33, %v12883_v7 }
 0x17d   : > { %v10964_v40 = vrot.slane %v10879_v47, %v12883_v7  ;;  %v11075_v5 = vrot.slane %v10249_v60, %v12881_v6  ;;  %vm10840_vm7 = vcmp.eq.f32.partialorder %v10772_v23, %v12886_v9  ;;  %v11287_v21 = vrot.slane %v10250_v4, %v12881_v6 }
 0x17e   : > { %v10968_v13 = vrot.slane %v10880_v32, %v12883_v7  ;;  %v11033_v50 = vsel %vm10837_vm4, %v10956_v36, 0.0  ;;  %v11034_v30 = vsel %vm10838_vm5, %v10960_v48, 0.0  ;;  %v11499_v43 = vrot.slane %v10251_v58, %v12881_v6 }
 0x17f   : > { %v11035_v16 = vsel %vm10839_vm6, %v10964_v40, 0.0  ;;  %v14565_v17 = vadd.f32 %v11033_v50, %v10641_v45  ;;  %v11076_v46 = vcombine.high %v11075_v5, %v11075_v5  ;;  %v14567_v39 = vadd.f32 %v11034_v30, %v10642_v31 }
 0x180   : > { %v11036_v1 = vsel %vm10840_vm7, %v10968_v13, 0.0  ;;  %v14569_v51 = vadd.f32 %v11035_v16, %v10643_v44  ;;  %v11083_v61 = vrot.slane %v11075_v5, %v12881_v6  ;;  %v11288_v49 = vcombine.high %v11287_v21, %v11287_v21 }
 0x181   : > { %v14572_v60 = vadd.f32 %v11036_v1, %v10644_v15  ;;  %v11090_v63 = vrot.slane %v11076_v46, %v12881_v6  ;;  %v11295_v2 = vrot.slane %v11287_v21, %v12881_v6  ;;  %v11711_v45 = vrot.slane %v10252_v12, %v12881_v6  ;;  %v11956_v15 = vld [vmem:[%s14475_s5 + $0x18] sm:$0xff] }
 0x182   : > { %v11091_v4 = vcombine.high %v11083_v61, %v11083_v61  ;;  %v2059_v53 = vrot.slane %v14380_v3, %v12883_v7  ;;  %v11302_v57 = vrot.slane %v11288_v49, %v12881_v6  ;;  %v2483_v59 = vrot.slane %v14386_v22, %v12883_v7  ;;  %12667 = vmatprep.mubr.msk.f32.mxu1 %vm12041_vm12, %v11956_v15 }
 0x183   : > { %v11092_v42 = vcombine.high %v11090_v63, %v11090_v63  ;;  %v11303_v31 = vcombine.high %v11295_v2, %v11295_v2  ;;  %v11500_v44 = vcombine.high %v11499_v43, %v11499_v43  ;;  %v11507_v41 = vrot.slane %v11499_v43, %v12881_v6 }
 0x184   : > { %v11176_v10 = vrot.slane %v11091_v4, %v12883_v7  ;;  %v11712_v56 = vcombine.high %v11711_v45, %v11711_v45  ;;  %v11304_v33 = vcombine.high %v11302_v57, %v11302_v57  ;;  %v11719_v3 = vrot.slane %v11711_v45, %v12881_v6 }
 0x185   : > { %v11180_v58 = vrot.slane %v11092_v42, %v12883_v7  ;;  %v11388_v12 = vrot.slane %v11303_v31, %v12883_v7  ;;  %v11514_v47 = vrot.slane %v11500_v44, %v12881_v6  ;;  %v11515_v23 = vcombine.high %v11507_v41, %v11507_v41 }
 0x186   : > { %v11247_v8 = vmul.f32 %v11176_v10, %v14565_v17  ;;  %v11726_v22 = vrot.slane %v11712_v56, %v12881_v6  ;;  %v11392_v36 = vrot.slane %v11304_v33, %v12883_v7  ;;  %v11727_v40 = vcombine.high %v11719_v3, %v11719_v3 }
 0x187   : > { %v11248_v32 = vmul.f32 %v11180_v58, %v14565_v17  ;;  %v11459_v48 = vmul.f32 %v11388_v12, %v14567_v39  ;;  %v11516_v5 = vcombine.high %v11514_v47, %v11514_v47  ;;  %v11600_v13 = vrot.slane %v11515_v23, %v12883_v7 }
 0x188   : > { %v11728_v50 = vcombine.high %v11726_v22, %v11726_v22  ;;  %v2192_v21 = vmul.f32 %v2059_v53, %v14143_v34  ;;  %v11460_v30 = vmul.f32 %v11392_v36, %v14567_v39  ;;  %v11812_v46 = vrot.slane %v11727_v40, %v12883_v7 }
 0x189   : > { %v11475_v16 = vadd.f32 %v11459_v48, %v11247_v8  ;;  %v2616_v1 = vmul.f32 %v2483_v59, %v14148_v19  ;;  %v11604_v49 = vrot.slane %v11516_v5, %v12883_v7  ;;  %v11671_v4 = vmul.f32 %v11600_v13, %v14569_v51 }
 0x18a   : > { %v11816_v43 = vrot.slane %v11728_v50, %v12883_v7  ;;  %v2907_v45 = vrot.slane %v14396_v29, %v12883_v7  ;;  %v11476_v42 = vadd.f32 %v11460_v30, %v11248_v32  ;;  %v11883_v31 = vmul.f32 %v11812_v46, %v14572_v60  ;;  %v12643_v30 = vld.sshfl [vmem:[%s12879_s28 + $0xe4] sm:$0x33 pattern:$0x75316420] }
 0x18b   : > { %v2648_v34 = vadd.f32 %v2616_v1, %v2192_v21  ;;  %v3331_v53 = vrot.slane %v14400_v14, %v12883_v7  ;;  %v11672_v10 = vmul.f32 %v11604_v49, %v14569_v51  ;;  %v11687_v19 = vadd.f32 %v11671_v4, %v11475_v16 }
 0x18c   : > { %v11884_v59 = vmul.f32 %v11816_v43, %v14572_v60  ;;  %v3040_v44 = vmul.f32 %v2907_v45, %v14153_v18  ;;  %v11168_v58 = vrot.slane %v11083_v61, %v12883_v7  ;;  %v11172_v29 = vrot.slane %v11090_v63, %v12883_v7  ;;  %v12635_v61 = vld.sshfl [vmem:[%s12879_s28 + $0xe0] sm:$0x33 pattern:$0x75316420] }
 0x18d   : > { %v3464_v56 = vmul.f32 %v3331_v53, %v14157_v38  ;;  %v11380_v33 = vrot.slane %v11295_v2, %v12883_v7  ;;  %v11688_v12 = vadd.f32 %v11672_v10, %v11476_v42  ;;  %v11899_v15 = vadd.f32 %v11883_v31, %v11687_v19 }
 0x18e   : > { %v3072_v14 = vadd.f32 %v3040_v44, %v2648_v34  ;;  %v11384_v8 = vrot.slane %v11302_v57, %v12883_v7  ;;  %v11245_v23 = vmul.f32 %v11168_v58, %v14565_v17  ;;  %v11246_v32 = vmul.f32 %v11172_v29, %v14565_v17  ;;  %v12639_v17 = vld.sshfl [vmem:[%s12879_s28 + $0xe8] sm:$0x33 pattern:$0x75316420] }
 0x18f   : > { %v11457_v18 = vmul.f32 %v11380_v33, %v14567_v39  ;;  %v11592_v38 = vrot.slane %v11507_v41, %v12883_v7  ;;  %v11900_v36 = vadd.f32 %v11884_v59, %v11688_v12  ;;  %v11596_v48 = vrot.slane %v11514_v47, %v12883_v7 }
 0x190   : > { %v3496_v63 = vadd.f32 %v3464_v56, %v3072_v14  ;;  %v11458_v2 = vmul.f32 %v11384_v8, %v14567_v39  ;;  %v11804_v57 = vrot.slane %v11719_v3, %v12883_v7  ;;  %v11808_v13 = vrot.slane %v11726_v22, %v12883_v7  ;;  %v12647_v56 = vld.sshfl [vmem:[%s12879_s28 + $0xec] sm:$0x33 pattern:$0x75316420] }
 0x191   : > { %v11473_v40 = vadd.f32 %v11457_v18, %v11245_v23  ;;  %v11669_v5 = vmul.f32 %v11592_v38, %v14569_v51  ;;  %v11930_v50 = vcombine.low %v11899_v15, %v11900_v36  ;;  %v11670_v41 = vmul.f32 %v11596_v48, %v14569_v51  ;;  %v12651_v23 = vld.sshfl [vmem:[%s12879_s28 + $0xf0] sm:$0x33 pattern:$0x75316420] }
 0x192   : > { %3529 = vst.msk [vmem:[#allocation2 + $0xa0] sm:$0xff] %vm3520_vm0, %v3496_v63  ;;  %v11474_v21 = vadd.f32 %v11458_v2, %v11246_v32  ;;  %v9500_v16 = vcombine.high %v12635_v61, %v12635_v61  ;;  %v11881_v39 = vmul.f32 %v11804_v57, %v14572_v60  ;;  %v11882_v47 = vmul.f32 %v11808_v13, %v14572_v60 }
 0x193   : > { %v11685_v46 = vadd.f32 %v11669_v5, %v11473_v40  ;;  %v9507_v1 = vrot.slane %v12635_v61, %v12881_v6  ;;  %11946 = vst.msk [vmem:[#allocation2 + $0x98] sm:$0xff] %vm3520_vm0, %v11930_v50  ;;  %v9696_v49 = vcombine.high %v12639_v17, %v12639_v17  ;;  %v9703_v4 = vrot.slane %v12639_v17, %v12881_v6 }
 0x194   : > { %v11686_v3 = vadd.f32 %v11670_v41, %v11474_v21  ;;  %v9514_v22 = vrot.slane %v9500_v16, %v12881_v6  ;;  %v9892_v42 = vcombine.high %v12643_v30, %v12643_v30  ;;  %v9899_v18 = vrot.slane %v12643_v30, %v12881_v6 }
 0x195   : > { %v11897_v43 = vadd.f32 %v11881_v39, %v11685_v46  ;;  %v9515_v51 = vcombine.high %v9507_v1, %v9507_v1  ;;  %v9584_v45 = vrot.slane %v9507_v1, %v12883_v7  ;;  %v9710_v53 = vrot.slane %v9696_v49, %v12881_v6 }
 0x196   : > { %v11898_v31 = vadd.f32 %v11882_v47, %v11686_v3  ;;  %v9516_v34 = vcombine.high %v9514_v22, %v9514_v22  ;;  %v9588_v60 = vrot.slane %v9514_v22, %v12883_v7  ;;  %v9711_v19 = vcombine.high %v9703_v4, %v9703_v4  ;;  %v12655_v3 = vld.sshfl [vmem:[%s12879_s28 + $0xf8] sm:$0x33 pattern:$0x75316420] }
 0x197   : > { %v9592_v10 = vrot.slane %v9515_v51, %v12883_v7  ;;  %vm9649_vm8 = vcmp.eq.f32.partialorder %v9584_v45, %v12886_v9  ;;  %v9780_v59 = vrot.slane %v9703_v4, %v12883_v7  ;;  %v9712_v33 = vcombine.high %v9710_v53, %v9710_v53 }
 0x198   : > { %v11929_v44 = vcombine.low %v11897_v43, %v11898_v31  ;;  %v9596_v58 = vrot.slane %v9516_v34, %v12883_v7  ;;  %vm14646_vm9 = vcmp.eq.f32.partialorder %v9588_v60, %v12886_v9  ;;  %v9784_v15 = vrot.slane %v9710_v53, %v12883_v7 }
 0x199   : > { %v11981_v12 = vld [vmem:[#allocation2 + $0xa0] sm:$0xff]  ;;  %vm9651_vm10 = vcmp.eq.f32.partialorder %v9592_v10, %v12886_v9  ;;  %v9788_v14 = vrot.slane %v9711_v19, %v12883_v7  ;;  %v9845_v8 = vsel %vm9649_vm8, %v9780_v59, 0.0  ;;  %v9792_v32 = vrot.slane %v9712_v33, %v12883_v7  ;;  %v12659_v10 = vld.sshfl [vmem:[%s12879_s28 + $0xf4] sm:$0x33 pattern:$0x75316420] }
 0x19a   : > { %12149 = vmatpush1.msra.mxu1 %v11981_v12  ;;  %11945 = vst.msk [vmem:[#allocation2 + $0x90] sm:$0xff] %vm3520_vm0, %v11929_v44  ;;  %vm9652_vm11 = vcmp.eq.f32.partialorder %v9596_v58, %v12886_v9  ;;  %v9906_v38 = vrot.slane %v9892_v42, %v12881_v6  ;;  %v11980_v61 = vld [vmem:[#allocation2 + $0x98] sm:$0xff]  ;;  %v9846_v36 = vsel %vm14646_vm9, %v9784_v15, 0.0  ;;  %v10088_v2 = vcombine.high %v12647_v56, %v12647_v56 }
 0x19b   : > { %12174 = vmatprep.subr.mxu1 %v16954_v37  ;;  %v9847_v63 = vsel %vm9651_vm10, %v9788_v14, 0.0  ;;  %v10095_v48 = vrot.slane %v12647_v56, %v12881_v6  ;;  %12102 = vmatpush2.msra.mxu0 %v11980_v61  ;;  %v9848_v40 = vsel %vm9652_vm11, %v9792_v32, 0.0  ;;  %v9907_v5 = vcombine.high %v9899_v18, %v9899_v18  ;;  %v12663_v15 = vld.sshfl [vmem:[%s12879_s28 + $0xfc] sm:$0x33 pattern:$0x75316420] }
 0x19c   : > { %v9908_v57 = vcombine.high %v9906_v38, %v9906_v38  ;;  %v9976_v13 = vrot.slane %v9899_v18, %v12883_v7  ;;  %12103 = vmatprep.subr.mxu0 %v16954_v37  ;;  %v9980_v17 = vrot.slane %v9906_v38, %v12883_v7  ;;  %v10102_v50 = vrot.slane %v10088_v2, %v12881_v6 }
 0x19d   : > { %v10103_v21 = vcombine.high %v10095_v48, %v10095_v48  ;;  %v10172_v41 = vrot.slane %v10095_v48, %v12883_v7  ;;  %v9984_v30 = vrot.slane %v9907_v5, %v12883_v7  ;;  %v10300_v46 = vcombine.high %v12651_v23, %v12651_v23 }
 0x19e   : > { %v9988_v16 = vrot.slane %v9908_v57, %v12883_v7  ;;  %vm10041_vm13 = vcmp.eq.f32.partialorder %v9976_v13, %v12886_v9  ;;  %vm10042_vm14 = vcmp.eq.f32.partialorder %v9980_v17, %v12886_v9  ;;  %v10104_v39 = vcombine.high %v10102_v50, %v10102_v50 }
 0x19f   : > { %v10176_v47 = vrot.slane %v10102_v50, %v12883_v7  ;;  %v10180_v1 = vrot.slane %v10103_v21, %v12883_v7  ;;  %vm10043_vm15 = vcmp.eq.f32.partialorder %v9984_v30, %v12886_v9  ;;  %v10237_v22 = vsel %vm10041_vm13, %v10172_v41, 0.0 }
 0x1a0   : > { %vm10044_vm1 = vcmp.eq.f32.partialorder %v9988_v16, %v12886_v9  ;;  %v10307_v49 = vrot.slane %v12651_v23, %v12881_v6  ;;  %v10184_v43 = vrot.slane %v10104_v39, %v12883_v7  ;;  %v10253_v42 = vadd.f32 %v10237_v22, %v9845_v8 }
 0x1a1   : > { %v11979_v4 = vld [vmem:[#allocation2 + $0x90] sm:$0xff]  ;;  %v10238_v51 = vsel %vm10042_vm14, %v10176_v47, 0.0  ;;  %v10239_v45 = vsel %vm10043_vm15, %v10180_v1, 0.0  ;;  %v10314_v60 = vrot.slane %v10300_v46, %v12881_v6  ;;  %v10496_v44 = vcombine.high %v12655_v3, %v12655_v3 }
 0x1a2   : > { %12104 = vmatpush2.msra.mxu0 %v11979_v4  ;;  %v10254_v31 = vadd.f32 %v10238_v51, %v9846_v36  ;;  %v14679_v34 = vadd.f32 %v10239_v45, %v9847_v63  ;;  %v10315_v53 = vcombine.high %v10307_v49, %v10307_v49  ;;  %v10240_v19 = vsel %vm10044_vm1, %v10184_v43, 0.0 }
 0x1a3   : > { %v10384_v59 = vrot.slane %v10307_v49, %v12883_v7  ;;  %v10503_v56 = vrot.slane %v12655_v3, %v12881_v6  ;;  %12105 = vmatprep.subr.mxu0 %v16954_v37  ;;  %v10256_v58 = vadd.f32 %v10240_v19, %v9848_v40  ;;  %v10316_v29 = vcombine.high %v10314_v60, %v10314_v60 }
 0x1a4   : > { %v10388_v33 = vrot.slane %v10314_v60, %v12883_v7  ;;  %v10392_v12 = vrot.slane %v10315_v53, %v12883_v7  ;;  %v10510_v14 = vrot.slane %v10496_v44, %v12881_v6  ;;  %v10692_v18 = vcombine.high %v12659_v10, %v12659_v10 }
 0x1a5   : > { %vm10449_vm2 = vcmp.eq.f32.partialorder %v10384_v59, %v12886_v9  ;;  %v10511_v8 = vcombine.high %v10503_v56, %v10503_v56  ;;  %v10580_v23 = vrot.slane %v10503_v56, %v12883_v7  ;;  %v10396_v32 = vrot.slane %v10316_v29, %v12883_v7 }
 0x1a6   : > { %vm10450_vm3 = vcmp.eq.f32.partialorder %v10388_v33, %v12886_v9  ;;  %vm10451_vm4 = vcmp.eq.f32.partialorder %v10392_v12, %v12886_v9  ;;  %v10512_v38 = vcombine.high %v10510_v14, %v10510_v14  ;;  %v10584_v61 = vrot.slane %v10510_v14, %v12883_v7 }
 0x1a7   : > { %v10588_v36 = vrot.slane %v10511_v8, %v12883_v7  ;;  %v10645_v63 = vsel %vm10449_vm2, %v10580_v23, 0.0  ;;  %vm10452_vm5 = vcmp.eq.f32.partialorder %v10396_v32, %v12886_v9  ;;  %v10699_v2 = vrot.slane %v12659_v10, %v12881_v6 }
 0x1a8   : > { %v10706_v48 = vrot.slane %v10692_v18, %v12881_v6  ;;  %v10888_v40 = vcombine.high %v12663_v15, %v12663_v15  ;;  %v10592_v5 = vrot.slane %v10512_v38, %v12883_v7  ;;  %v10646_v57 = vsel %vm10450_vm3, %v10584_v61, 0.0 }
 0x1a9   : > { %v10647_v13 = vsel %vm10451_vm4, %v10588_v36, 0.0  ;;  %v10895_v17 = vrot.slane %v12663_v15, %v12881_v6  ;;  %v10707_v50 = vcombine.high %v10699_v2, %v10699_v2  ;;  %v10776_v41 = vrot.slane %v10699_v2, %v12883_v7 }
 0x1aa   : > { %v10708_v21 = vcombine.high %v10706_v48, %v10706_v48  ;;  %v10780_v30 = vrot.slane %v10706_v48, %v12883_v7  ;;  %v10648_v16 = vsel %vm10452_vm5, %v10592_v5, 0.0  ;;  %v10902_v46 = vrot.slane %v10888_v40, %v12881_v6 }
 0x1ab   : > { %v10903_v39 = vcombine.high %v10895_v17, %v10895_v17  ;;  %v10972_v47 = vrot.slane %v10895_v17, %v12883_v7  ;;  %v10784_v1 = vrot.slane %v10707_v50, %v12883_v7  ;;  %vm10841_vm6 = vcmp.eq.f32.partialorder %v10776_v41, %v12886_v9 }
 0x1ac   : > { %v10788_v3 = vrot.slane %v10708_v21, %v12883_v7  ;;  %vm10842_vm7 = vcmp.eq.f32.partialorder %v10780_v30, %v12886_v9  ;;  %v10904_v22 = vcombine.high %v10902_v46, %v10902_v46  ;;  %v10976_v49 = vrot.slane %v10902_v46, %v12883_v7 }
 0x1ad   : > { %v10980_v4 = vrot.slane %v10903_v39, %v12883_v7  ;;  %v11037_v43 = vsel %vm10841_vm6, %v10972_v47, 0.0  ;;  %vm10843_vm8 = vcmp.eq.f32.partialorder %v10784_v1, %v12886_v9  ;;  %v11099_v45 = vrot.slane %v10253_v42, %v12881_v6 }
 0x1ae   : > { %vm10844_vm9 = vcmp.eq.f32.partialorder %v10788_v3, %v12886_v9  ;;  %v14714_v51 = vadd.f32 %v11037_v43, %v10645_v63  ;;  %v10984_v60 = vrot.slane %v10904_v22, %v12883_v7  ;;  %v11038_v53 = vsel %vm10842_vm7, %v10976_v49, 0.0 }
 0x1af   : > { %v11039_v10 = vsel %vm10843_vm8, %v10980_v4, 0.0  ;;  %v11311_v19 = vrot.slane %v10254_v31, %v12881_v6  ;;  %v14719_v59 = vadd.f32 %v11038_v53, %v10646_v57  ;;  %v11100_v56 = vcombine.high %v11099_v45, %v11099_v45 }
 0x1b0   : > { %v14721_v44 = vadd.f32 %v11039_v10, %v10647_v13  ;;  %v11107_v29 = vrot.slane %v11099_v45, %v12881_v6  ;;  %v11040_v33 = vsel %vm10844_vm9, %v10984_v60, 0.0  ;;  %v11523_v42 = vrot.slane %v14679_v34, %v12881_v6 }
 0x1b1   : > { %v11312_v12 = vcombine.high %v11311_v19, %v11311_v19  ;;  %v11319_v15 = vrot.slane %v11311_v19, %v12881_v6  ;;  %v14727_v14 = vadd.f32 %v11040_v33, %v10648_v16  ;;  %v11114_v8 = vrot.slane %v11100_v56, %v12881_v6 }
 0x1b2   : > { %v11115_v23 = vcombine.high %v11107_v29, %v11107_v29  ;;  %v11735_v31 = vrot.slane %v10256_v58, %v12881_v6  ;;  %v11524_v38 = vcombine.high %v11523_v42, %v11523_v42  ;;  %v14733_v61 = vrot.slane %v11523_v42, %v12881_v6 }
 0x1b3   : > { %v11326_v32 = vrot.slane %v11312_v12, %v12881_v6  ;;  %v11327_v18 = vcombine.high %v11319_v15, %v11319_v15  ;;  %v11116_v36 = vcombine.high %v11114_v8, %v11114_v8  ;;  %v7757_v1 = vcombine.high %v13016_v11, %v13016_v11 }
 0x1b4   : > { %v11192_v63 = vrot.slane %v11115_v23, %v12883_v7  ;;  %v11736_v2 = vcombine.high %v11735_v31, %v11735_v31  ;;  %v14737_v34 = vrot.slane %v11735_v31, %v12881_v6  ;;  %v11538_v5 = vrot.slane %v11524_v38, %v12881_v6 }
 0x1b5   : > { %v11328_v48 = vcombine.high %v11326_v32, %v11326_v32  ;;  %v11404_v40 = vrot.slane %v11327_v18, %v12883_v7  ;;  %v11539_v58 = vcombine.high %v14733_v61, %v14733_v61  ;;  %v11196_v57 = vrot.slane %v11116_v36, %v12883_v7 }
 0x1b6   : > { %v11251_v13 = vmul.f32 %v11192_v63, %v14714_v51  ;;  %v11750_v17 = vrot.slane %v11736_v2, %v12881_v6  ;;  %v11751_v50 = vcombine.high %v14737_v34, %v14737_v34  ;;  %v11540_v30 = vcombine.high %v11538_v5, %v11538_v5 }
 0x1b7   : > { %v11408_v21 = vrot.slane %v11328_v48, %v12883_v7  ;;  %v11463_v41 = vmul.f32 %v11404_v40, %v14719_v59  ;;  %v11616_v16 = vrot.slane %v11539_v58, %v12883_v7  ;;  %v11252_v46 = vmul.f32 %v11196_v57, %v14714_v51 }
 0x1b8   : > { %v11752_v39 = vcombine.high %v11750_v17, %v11750_v17  ;;  %v11828_v47 = vrot.slane %v11751_v50, %v12883_v7  ;;  %v11620_v49 = vrot.slane %v11540_v30, %v12883_v7  ;;  %v7936_v60 = vrot.slane %v7757_v1, %v12883_v7 }
 0x1b9   : > { %v11464_v3 = vmul.f32 %v11408_v21, %v14719_v59  ;;  %v11479_v22 = vadd.f32 %v11463_v41, %v11251_v13  ;;  %v11675_v4 = vmul.f32 %v11616_v16, %v14721_v44  ;;  %v8181_v53 = vcombine.high %v13034_v26, %v13034_v26 }
 0x1ba   : > { %v11832_v43 = vrot.slane %v11752_v39, %v12883_v7  ;;  %v11887_v45 = vmul.f32 %v11828_v47, %v14727_v14  ;;  %v11676_v19 = vmul.f32 %v11620_v49, %v14721_v44  ;;  %v8605_v56 = vcombine.high %v13037_v27, %v13037_v27 }
 0x1bb   : > { %v11480_v10 = vadd.f32 %v11464_v3, %v11252_v46  ;;  %v11691_v11 = vadd.f32 %v11675_v4, %v11479_v22  ;;  %v8072_v12 = vmul.f32 %v7936_v60, %v12990_v52  ;;  %v8360_v42 = vrot.slane %v8181_v53, %v12883_v7  ;;  %v16979_v4 = vld [vmem:[#allocation10_spill] sm:$0xff] }
 0x1bc   : > { %v11888_v33 = vmul.f32 %v11832_v43, %v14727_v14  ;;  %v9029_v23 = vcombine.high %v13040_v28, %v13040_v28  ;;  %v8784_v26 = vrot.slane %v8605_v56, %v12883_v7  ;;  %v11184_v38 = vrot.slane %v11107_v29, %v12883_v7  ;;  %v16980_v56 = vld [vmem:[#allocation11_spill] sm:$0xff] }
 0x1bd   : > { %v11692_v31 = vadd.f32 %v11676_v19, %v11480_v10  ;;  %v11903_v18 = vadd.f32 %v11887_v45, %v11691_v11  ;;  %v8496_v36 = vmul.f32 %v8360_v42, %v12994_v54  ;;  %v11188_v27 = vrot.slane %v11114_v8, %v12883_v7 }
 0x1be   : > { %v9208_v63 = vrot.slane %v9029_v23, %v12883_v7  ;;  %v11396_v2 = vrot.slane %v11319_v15, %v12883_v7  ;;  %v8920_v40 = vmul.f32 %v8784_v26, %v12996_v55  ;;  %v11249_v58 = vmul.f32 %v11184_v38, %v14714_v51  ;;  %v16983_v26 = vld [vmem:[#allocation7_spill] sm:$0xff] }
 0x1bf   : > { %v11904_v48 = vadd.f32 %v11888_v33, %v11692_v31  ;;  %v11400_v28 = vrot.slane %v11326_v32, %v12883_v7  ;;  %v8528_v57 = vadd.f32 %v8496_v36, %v8072_v12  ;;  %v11250_v29 = vmul.f32 %v11188_v27, %v14714_v51  ;;  %v16981_v12 = vld [vmem:[#allocation12_spill] sm:$0xff]  ;;  %v16982_v31 = vld [vmem:[#allocation6_spill] sm:$0xff] }
 0x1c0   : > { %v9344_v13 = vmul.f32 %v9208_v63, %v13006_v62  ;;  %v11461_v50 = vmul.f32 %v11396_v2, %v14719_v59  ;;  %v11608_v15 = vrot.slane %v14733_v61, %v12883_v7  ;;  %v11612_v8 = vrot.slane %v11538_v5, %v12883_v7  ;;  %v16984_v63 = vld [vmem:[#allocation13_spill] sm:$0xff]  ;;  %v16985_v2 = vld [vmem:[#allocation14_spill] sm:$0xff] }
 0x1c1   : > { %v11932_v21 = vcombine.low %v11903_v18, %v11904_v48  ;;  %v11462_v41 = vmul.f32 %v11400_v28, %v14719_v59  ;;  %v8952_v30 = vadd.f32 %v8920_v40, %v8528_v57  ;;  %v11820_v32 = vrot.slane %v14737_v34, %v12883_v7  ;;  %v12604_v40 = vld.sshfl [vmem:[%s12879_s28 + $0x140] sm:$0x33 pattern:$0x75316420]  ;;  %v16986_v28 = vld [vmem:[#allocation15_spill] sm:$0xff] }
 0x1c2   : > { %v11477_v16 = vadd.f32 %v11461_v50, %v11249_v58  ;;  %v11824_v46 = vrot.slane %v11750_v17, %v12883_v7  ;;  %v11673_v39 = vmul.f32 %v11608_v15, %v14721_v44  ;;  %v11674_v47 = vmul.f32 %v11612_v8, %v14721_v44  ;;  %v16989_v15 = vld [vmem:[#allocation9_spill] sm:$0xff] }
 0x1c3   : > { %11948 = vst.msk [vmem:[#allocation2 + $0x138] sm:$0xff] %vm3520_vm0, %v11932_v21  ;;  %v11478_v51 = vadd.f32 %v11462_v41, %v11250_v29  ;;  %v7755_v59 = vcombine.high %v13009_v0, %v13009_v0  ;;  %v9376_v61 = vadd.f32 %v9344_v13, %v8952_v30  ;;  %v11885_v5 = vmul.f32 %v11820_v32, %v14727_v14  ;;  %v16987_v13 = vld [vmem:[#allocation16_spill] sm:$0xff]  ;;  %v12608_v32 = vld.sshfl [vmem:[%s12879_s28 + $0x148] sm:$0x33 pattern:$0x75316420] }
 0x1c4   : > { %v11886_v1 = vmul.f32 %v11824_v46, %v14727_v14  ;;  %v8179_v34 = vcombine.high %v13022_v20, %v13022_v20  ;;  %v11689_v3 = vadd.f32 %v11673_v39, %v11477_v16  ;;  %v8603_v49 = vcombine.high %v13028_v24, %v13028_v24  ;;  %v16988_v21 = vld [vmem:[#allocation8_spill] sm:$0xff] }
 0x1c5   : > { %v11690_v17 = vadd.f32 %v11674_v47, %v11478_v51  ;;  %v7932_v22 = vrot.slane %v7755_v59, %v12883_v7  ;;  %9408 = vst.msk [vmem:[#allocation2 + $0x88] sm:$0xff] %vm3520_vm0, %v9376_v61  ;;  %v9027_v0 = vcombine.high %v13031_v25, %v13031_v25  ;;  %v7806_v14 = vcombine.high %v13217_v35, %v13217_v35 }
 0x1c6   : > { %v8356_v44 = vrot.slane %v8179_v34, %v12883_v7  ;;  %v8230_v20 = vcombine.high %v16979_v4, %v16979_v4  ;;  %v11901_v43 = vadd.f32 %v11885_v5, %v11689_v3  ;;  %v8780_v53 = vrot.slane %v8603_v49, %v12883_v7 }
 0x1c7   : > { %v11902_v45 = vadd.f32 %v11886_v1, %v11690_v17  ;;  %v8071_v60 = vmul.f32 %v7932_v22, %v12990_v52  ;;  %v9204_v10 = vrot.slane %v9027_v0, %v12883_v7  ;;  %v7968_v19 = vrot.slane %v7806_v14, %v12883_v7  ;;  %v12612_v17 = vld.sshfl [vmem:[%s12879_s28 + $0x144] sm:$0x33 pattern:$0x75316420] }
 0x1c8   : > { %v8495_v24 = vmul.f32 %v8356_v44, %v12994_v54  ;;  %v8392_v25 = vrot.slane %v8230_v20, %v12883_v7  ;;  %v8919_v35 = vmul.f32 %v8780_v53, %v12996_v55  ;;  %v8654_v33 = vcombine.high %v16980_v56, %v16980_v56 }
 0x1c9   : > { %v11931_v11 = vcombine.low %v11901_v43, %v11902_v45  ;;  %v9078_v52 = vcombine.high %v16981_v12, %v16981_v12  ;;  %v9343_v54 = vmul.f32 %v9204_v10, %v13006_v62  ;;  %v8080_v18 = vmul.f32 %v7968_v19, %v16982_v31 }
 0x1ca   : > { %v12000_v42 = vld [vmem:[#allocation2 + $0x138] sm:$0xff]  ;;  %v8527_v23 = vadd.f32 %v8495_v24, %v8071_v60  ;;  %v8504_v38 = vmul.f32 %v8392_v25, %v16983_v26  ;;  %v8816_v55 = vrot.slane %v8654_v33, %v12883_v7  ;;  %v7804_v27 = vcombine.high %v16984_v63, %v16984_v63 }
 0x1cb   : > { %12175 = vmatpush2.msra.mxu1 %v12000_v42  ;;  %11947 = vst.msk [vmem:[#allocation2 + $0x130] sm:$0xff] %vm3520_vm0, %v11931_v11  ;;  %v9240_v36 = vrot.slane %v9078_v52, %v12883_v7  ;;  %v8228_v48 = vcombine.high %v16985_v2, %v16985_v2  ;;  %v8652_v57 = vcombine.high %v16986_v28, %v16986_v28  ;;  %v12616_v11 = vld.sshfl [vmem:[%s12879_s28 + $0x14c] sm:$0x33 pattern:$0x75316420] }
 0x1cc   : > { %12176 = vmatprep.subr.mxu1 %v16954_v37  ;;  %v8951_v62 = vadd.f32 %v8919_v35, %v8527_v23  ;;  %v8536_v58 = vadd.f32 %v8504_v38, %v8080_v18  ;;  %v9076_v29 = vcombine.high %v16987_v13, %v16987_v13  ;;  %v11978_v50 = vld [vmem:[#allocation2 + $0x88] sm:$0xff]  ;;  %v8928_v41 = vmul.f32 %v8816_v55, %v16988_v21  ;;  %v12620_v55 = vld.sshfl [vmem:[%s12879_s28 + $0x150] sm:$0x33 pattern:$0x75316420] }
 0x1cd   : > { %v9352_v8 = vmul.f32 %v9240_v36, %v16989_v15  ;;  %v7964_v30 = vrot.slane %v7804_v27, %v12883_v7  ;;  %v8388_v16 = vrot.slane %v8228_v48, %v12883_v7  ;;  %12106 = vmatpush2.msra.mxu0 %v11978_v50  ;;  %v8812_v51 = vrot.slane %v8652_v57, %v12883_v7 }
 0x1ce   : > { %v9375_v46 = vadd.f32 %v9343_v54, %v8951_v62  ;;  %v9236_v39 = vrot.slane %v9076_v29, %v12883_v7  ;;  %v6164_v47 = vcombine.high %v12604_v40, %v12604_v40  ;;  %12107 = vmatprep.subr.mxu0 %v16954_v37  ;;  %v8960_v59 = vadd.f32 %v8928_v41, %v8536_v58  ;;  %v11953_v54 = vld [vmem:[%s14475_s5] sm:$0xff] }
 0x1cf   : > { %v8079_v61 = vmul.f32 %v7964_v30, %v16982_v31  ;;  %v8503_v5 = vmul.f32 %v8388_v16, %v16983_v26  ;;  %v6171_v1 = vrot.slane %v12604_v40, %v12881_v6  ;;  %v8927_v34 = vmul.f32 %v8812_v51, %v16988_v21 }
 0x1d0   : > { %9407 = vst.msk [vmem:[#allocation2 + $0x80] sm:$0xff] %vm3520_vm0, %v9375_v46  ;;  %v9351_v3 = vmul.f32 %v9236_v39, %v16989_v15  ;;  %v6178_v22 = vrot.slane %v6164_v47, %v12881_v6  ;;  %v6360_v49 = vcombine.high %v12608_v32, %v12608_v32  ;;  %v9384_v44 = vadd.f32 %v9352_v8, %v8960_v59 }
 0x1d1   : > { %v8535_v0 = vadd.f32 %v8503_v5, %v8079_v61  ;;  %v6179_v14 = vcombine.high %v6171_v1, %v6171_v1  ;;  %v6240_v4 = vrot.slane %v6171_v1, %v12883_v7  ;;  %v6367_v60 = vrot.slane %v12608_v32, %v12881_v6  ;;  %v11955_v61 = vld [vmem:[%s14475_s5 + $0x10] sm:$0xff]  ;;  %v12624_v1 = vld.sshfl [vmem:[%s12879_s28 + $0x158] sm:$0x33 pattern:$0x75316420] }
 0x1d2   : > { %v11999_v20 = vld [vmem:[#allocation2 + $0x130] sm:$0xff]  ;;  %v6180_v43 = vcombine.high %v6178_v22, %v6178_v22  ;;  %v6244_v45 = vrot.slane %v6178_v22, %v12883_v7  ;;  %v6374_v53 = vrot.slane %v6360_v49, %v12881_v6  ;;  %9416 = vst.msk [vmem:[#allocation2 + $0x128] sm:$0xff] %vm3520_vm0, %v9384_v44  ;;  %v6556_v25 = vcombine.high %v12612_v17, %v12612_v17 }
 0x1d3   : > { %12177 = vmatpush2.msra.mxu1 %v11999_v20  ;;  %v8959_v24 = vadd.f32 %v8927_v34, %v8535_v0  ;;  %v6248_v10 = vrot.slane %v6179_v14, %v12883_v7  ;;  %vm14860_vm10 = vcmp.eq.f32.partialorder %v6240_v4, %v12886_v9  ;;  %v6375_v33 = vcombine.high %v6367_v60, %v6367_v60  ;;  %v12628_v49 = vld.sshfl [vmem:[%s12879_s28 + $0x154] sm:$0x33 pattern:$0x75316420] }
 0x1d4   : > { %12178 = vmatprep.subr.mxu1 %v16954_v37  ;;  %v6252_v35 = vrot.slane %v6180_v43, %v12883_v7  ;;  %vm14868_vm11 = vcmp.eq.f32.partialorder %v6244_v45, %v12886_v9  ;;  %v6376_v12 = vcombine.high %v6374_v53, %v6374_v53  ;;  %v6436_v42 = vrot.slane %v6367_v60, %v12883_v7  ;;  %v12632_v20 = vld.sshfl [vmem:[%s12879_s28 + $0x15c] sm:$0x33 pattern:$0x75316420] }
 0x1d5   : > { %v9383_v52 = vadd.f32 %v9351_v3, %v8959_v24  ;;  %vm6295_vm13 = vcmp.eq.f32.partialorder %v6248_v10, %v12886_v9  ;;  %v6440_v23 = vrot.slane %v6374_v53, %v12883_v7  ;;  %v6444_v31 = vrot.slane %v6375_v33, %v12883_v7 }
 0x1d6   : > { %vm6296_vm14 = vcmp.eq.f32.partialorder %v6252_v35, %v12886_v9  ;;  %v6448_v18 = vrot.slane %v6376_v12, %v12883_v7  ;;  %v6563_v26 = vrot.slane %v12612_v17, %v12881_v6  ;;  %v6489_v36 = vsel %vm14860_vm10, %v6436_v42, 0.0 }
 0x1d7   : > { %v11977_v38 = vld [vmem:[#allocation2 + $0x80] sm:$0xff]  ;;  %9415 = vst.msk [vmem:[#allocation2 + $0x120] sm:$0xff] %vm3520_vm0, %v9383_v52  ;;  %v6570_v63 = vrot.slane %v6556_v25, %v12881_v6  ;;  %v6752_v27 = vcombine.high %v12616_v11, %v12616_v11  ;;  %v6490_v2 = vsel %vm14868_vm11, %v6440_v23, 0.0  ;;  %v6491_v48 = vsel %vm6295_vm13, %v6444_v31, 0.0 }
 0x1d8   : > { %12108 = vmatpush2.msra.mxu0 %v11977_v38  ;;  %v6571_v40 = vcombine.high %v6563_v26, %v6563_v26  ;;  %v6632_v62 = vrot.slane %v6563_v26, %v12883_v7  ;;  %v6492_v58 = vsel %vm6296_vm14, %v6448_v18, 0.0  ;;  %v6759_v13 = vrot.slane %v12616_v11, %v12881_v6 }
 0x1d9   : > { %12110 = vmatmul.mubr.f32.vlgmr.msra.gmra.mxu0 %v11953_v54  ;;  %12191 = vmatprep.subr.mxu0 %v16954_v37  ;;  %v6572_v28 = vcombine.high %v6570_v63, %v6570_v63  ;;  %v6636_v57 = vrot.slane %v6570_v63, %v12883_v7  ;;  %v11998_v29 = vld [vmem:[#allocation2 + $0x128] sm:$0xff]  ;;  %v6766_v21 = vrot.slane %v6752_v27, %v12881_v6 }
 0x1da   : > { %v6640_v50 = vrot.slane %v6571_v40, %v12883_v7  ;;  %vm6685_vm15 = vcmp.eq.f32.partialorder %v6632_v62, %v12886_v9  ;;  %v6964_v41 = vcombine.high %v12620_v55, %v12620_v55  ;;  %12179 = vmatpush2.msra.mxu1 %v11998_v29  ;;  %v6767_v30 = vcombine.high %v6759_v13, %v6759_v13 }
 0x1db   : > { %v6644_v15 = vrot.slane %v6572_v28, %v12883_v7  ;;  %vm14900_vm1 = vcmp.eq.f32.partialorder %v6636_v57, %v12886_v9  ;;  %v6828_v16 = vrot.slane %v6759_v13, %v12883_v7  ;;  %12180 = vmatprep.subr.mxu1 %v16954_v37  ;;  %v6768_v32 = vcombine.high %v6766_v21, %v6766_v21 }
 0x1dc   : > { %vm6687_vm2 = vcmp.eq.f32.partialorder %v6640_v50, %v12886_v9  ;;  %v6832_v46 = vrot.slane %v6766_v21, %v12883_v7  ;;  %v6971_v51 = vrot.slane %v12620_v55, %v12881_v6  ;;  %v6836_v39 = vrot.slane %v6767_v30, %v12883_v7 }
 0x1dd   : > { %vm6688_vm3 = vcmp.eq.f32.partialorder %v6644_v15, %v12886_v9  ;;  %v6881_v47 = vsel %vm6685_vm15, %v6828_v16, 0.0  ;;  %v6978_v59 = vrot.slane %v6964_v41, %v12881_v6  ;;  %v6840_v34 = vrot.slane %v6768_v32, %v12883_v7 }
 0x1de   : > { %v11997_v5 = vld [vmem:[#allocation2 + $0x120] sm:$0xff]  ;;  %v6882_v3 = vsel %vm14900_vm1, %v6832_v46, 0.0  ;;  %v14917_v17 = vadd.f32 %v6881_v47, %v6489_v36  ;;  %v6979_v22 = vcombine.high %v6971_v51, %v6971_v51  ;;  %v6883_v44 = vsel %vm6687_vm2, %v6836_v39, 0.0 }
 0x1df   : > { %12181 = vmatpush2.msra.mxu1 %v11997_v5  ;;  %v14922_v0 = vadd.f32 %v6882_v3, %v6490_v2  ;;  %v6980_v14 = vcombine.high %v6978_v59, %v6978_v59  ;;  %v7040_v4 = vrot.slane %v6971_v51, %v12883_v7  ;;  %v6884_v43 = vsel %vm6688_vm3, %v6840_v34, 0.0 }
 0x1e0   : > { %v14928_v45 = vadd.f32 %v6883_v44, %v6491_v48  ;;  %v7044_v60 = vrot.slane %v6978_v59, %v12883_v7  ;;  %v7048_v53 = vrot.slane %v6979_v22, %v12883_v7  ;;  %12264 = vmatprep.subr.mxu1 %v16954_v37  ;;  %12183 = vmatmul.mubr.f32.vlgmr.msra.gmra.mxu1 %v11955_v61  ;;  %v12605_v44 = vld.sshfl [vmem:[%s12879_s28 + $0x1c0] sm:$0x33 pattern:$0x75316420] }
 0x1e1   : > { %v14933_v24 = vadd.f32 %v6884_v43, %v6492_v58  ;;  %v7052_v10 = vrot.slane %v6980_v14, %v12883_v7  ;;  %vm14937_vm4 = vcmp.eq.f32.partialorder %v7040_v4, %v12886_v9  ;;  %v7160_v25 = vcombine.high %v12624_v1, %v12624_v1 }
 0x1e2   : > { %vm14942_vm5 = vcmp.eq.f32.partialorder %v7044_v60, %v12886_v9  ;;  %vm7095_vm6 = vcmp.eq.f32.partialorder %v7048_v53, %v12886_v9  ;;  %v7167_v35 = vrot.slane %v12624_v1, %v12881_v6  ;;  %v7356_v56 = vcombine.high %v12628_v49, %v12628_v49 }
 0x1e3   : > { %vm7096_vm7 = vcmp.eq.f32.partialorder %v7052_v10, %v12886_v9  ;;  %v7174_v33 = vrot.slane %v7160_v25, %v12881_v6  ;;  %v7363_v12 = vrot.slane %v12628_v49, %v12881_v6  ;;  %v7552_v52 = vcombine.high %v12632_v20, %v12632_v20 }
 0x1e4   : > { %v7175_v42 = vcombine.high %v7167_v35, %v7167_v35  ;;  %v7236_v23 = vrot.slane %v7167_v35, %v12883_v7  ;;  %v7370_v54 = vrot.slane %v7356_v56, %v12881_v6  ;;  %v7559_v31 = vrot.slane %v12632_v20, %v12881_v6 }
 0x1e5   : > { %v7176_v18 = vcombine.high %v7174_v33, %v7174_v33  ;;  %v7240_v26 = vrot.slane %v7174_v33, %v12883_v7  ;;  %v7371_v38 = vcombine.high %v7363_v12, %v7363_v12  ;;  %v7432_v55 = vrot.slane %v7363_v12, %v12883_v7 }
 0x1e6   : > { %v7244_v36 = vrot.slane %v7175_v42, %v12883_v7  ;;  %v7289_v63 = vsel %vm14937_vm4, %v7236_v23, 0.0  ;;  %v7372_v27 = vcombine.high %v7370_v54, %v7370_v54  ;;  %v7436_v2 = vrot.slane %v7370_v54, %v12883_v7 }
 0x1e7   : > { %v7248_v48 = vrot.slane %v7176_v18, %v12883_v7  ;;  %v7290_v40 = vsel %vm14942_vm5, %v7240_v26, 0.0  ;;  %v7440_v62 = vrot.slane %v7371_v38, %v12883_v7  ;;  %vm7485_vm8 = vcmp.eq.f32.partialorder %v7432_v55, %v12886_v9  ;;  %v12609_v26 = vld.sshfl [vmem:[%s12879_s28 + $0x1c8] sm:$0x33 pattern:$0x75316420] }
 0x1e8   : > { %v7291_v58 = vsel %vm7095_vm6, %v7244_v36, 0.0  ;;  %v7444_v28 = vrot.slane %v7372_v27, %v12883_v7  ;;  %vm7486_vm9 = vcmp.eq.f32.partialorder %v7436_v2, %v12886_v9  ;;  %v7566_v57 = vrot.slane %v7552_v52, %v12881_v6 }
 0x1e9   : > { %v7292_v13 = vsel %vm7096_vm7, %v7248_v48, 0.0  ;;  %vm7487_vm10 = vcmp.eq.f32.partialorder %v7440_v62, %v12886_v9  ;;  %v7567_v29 = vcombine.high %v7559_v31, %v7559_v31  ;;  %v7628_v50 = vrot.slane %v7559_v31, %v12883_v7 }
 0x1ea   : > { %vm7488_vm11 = vcmp.eq.f32.partialorder %v7444_v28, %v12886_v9  ;;  %v7568_v21 = vcombine.high %v7566_v57, %v7566_v57  ;;  %v7632_v41 = vrot.slane %v7566_v57, %v12883_v7  ;;  %v7807_v15 = vcombine.high %v14917_v17, %v14917_v17 }
 0x1eb   : > { %v7636_v8 = vrot.slane %v7567_v29, %v12883_v7  ;;  %v7681_v30 = vsel %vm7485_vm8, %v7628_v50, 0.0  ;;  %v8231_v16 = vcombine.high %v14922_v0, %v14922_v0  ;;  %v8655_v32 = vcombine.high %v14928_v45, %v14928_v45 }
 0x1ec   : > { %v7640_v46 = vrot.slane %v7568_v21, %v12883_v7  ;;  %v7682_v51 = vsel %vm7486_vm9, %v7632_v41, 0.0  ;;  %v14984_v39 = vadd.f32 %v7681_v30, %v7289_v63  ;;  %v7821_v47 = vrot.slane %v7807_v15, %v12881_v6 }
 0x1ed   : > { %v7683_v59 = vsel %vm7487_vm10, %v7636_v8, 0.0  ;;  %v14987_v61 = vadd.f32 %v7682_v51, %v7290_v40  ;;  %v8245_v5 = vrot.slane %v8231_v16, %v12881_v6  ;;  %v8669_v1 = vrot.slane %v8655_v32, %v12881_v6  ;;  %v12613_v32 = vld.sshfl [vmem:[%s12879_s28 + $0x1c4] sm:$0x33 pattern:$0x75316420] }
 0x1ee   : > { %v7684_v34 = vsel %vm7488_vm11, %v7640_v46, 0.0  ;;  %v14993_v3 = vadd.f32 %v7683_v59, %v7291_v58  ;;  %v7823_v22 = vcombine.high %v7821_v47, %v7821_v47  ;;  %v9079_v49 = vcombine.high %v14933_v24, %v14933_v24 }
 0x1ef   : > { %v14998_v14 = vadd.f32 %v7684_v34, %v7292_v13  ;;  %v8247_v4 = vcombine.high %v8245_v5, %v8245_v5  ;;  %v8671_v20 = vcombine.high %v8669_v1, %v8669_v1  ;;  %v15001_v43 = vrot.slane %v7821_v47, %v12881_v6 }
 0x1f0   : > { %v15004_v60 = vrot.slane %v7823_v22, %v12881_v6  ;;  %v9093_v53 = vrot.slane %v9079_v49, %v12881_v6  ;;  %v15008_v10 = vrot.slane %v8245_v5, %v12881_v6  ;;  %v15011_v19 = vrot.slane %v8669_v1, %v12881_v6  ;;  %v12617_v5 = vld.sshfl [vmem:[%s12879_s28 + $0x1cc] sm:$0x33 pattern:$0x75316420] }
 0x1f1   : > { %v15014_v25 = vrot.slane %v8247_v4, %v12881_v6  ;;  %v15017_v11 = vrot.slane %v8671_v20, %v12881_v6  ;;  %v7988_v35 = vrot.slane %v15001_v43, %v12883_v7  ;;  %v6188_v56 = vcombine.high %v12605_v44, %v12605_v44 }
 0x1f2   : > { %v7992_v33 = vrot.slane %v15004_v60, %v12883_v7  ;;  %v9095_v12 = vcombine.high %v9093_v53, %v9093_v53  ;;  %v8412_v52 = vrot.slane %v15008_v10, %v12883_v7  ;;  %v8836_v42 = vrot.slane %v15011_v19, %v12883_v7 }
 0x1f3   : > { %v8416_v23 = vrot.slane %v15014_v25, %v12883_v7  ;;  %v8840_v54 = vrot.slane %v15017_v11, %v12883_v7  ;;  %v8085_v31 = vmul.f32 %v7988_v35, %v14984_v39  ;;  %v15033_v18 = vrot.slane %v9093_v53, %v12881_v6 }
 0x1f4   : > { %v8086_v38 = vmul.f32 %v7992_v33, %v14984_v39  ;;  %v15038_v55 = vrot.slane %v9095_v12, %v12881_v6  ;;  %v8509_v36 = vmul.f32 %v8412_v52, %v14987_v61  ;;  %v8933_v63 = vmul.f32 %v8836_v42, %v14993_v3 }
 0x1f5   : > { %v8510_v27 = vmul.f32 %v8416_v23, %v14987_v61  ;;  %v8934_v2 = vmul.f32 %v8840_v54, %v14993_v3  ;;  %v9260_v48 = vrot.slane %v15033_v18, %v12883_v7  ;;  %v6195_v40 = vrot.slane %v12605_v44, %v12881_v6 }
 0x1f6   : > { %v9264_v62 = vrot.slane %v15038_v55, %v12883_v7  ;;  %v8541_v58 = vadd.f32 %v8509_v36, %v8085_v31  ;;  %v6202_v28 = vrot.slane %v6188_v56, %v12881_v6  ;;  %v6384_v57 = vcombine.high %v12609_v26, %v12609_v26 }
 0x1f7   : > { %v8542_v13 = vadd.f32 %v8510_v27, %v8086_v38  ;;  %v9357_v29 = vmul.f32 %v9260_v48, %v14998_v14  ;;  %v6203_v50 = vcombine.high %v6195_v40, %v6195_v40  ;;  %v6256_v21 = vrot.slane %v6195_v40, %v12883_v7  ;;  %v12621_v27 = vld.sshfl [vmem:[%s12879_s28 + $0x1d0] sm:$0x33 pattern:$0x75316420] }
 0x1f8   : > { %v9358_v41 = vmul.f32 %v9264_v62, %v14998_v14  ;;  %v8965_v15 = vadd.f32 %v8933_v63, %v8541_v58  ;;  %v6204_v8 = vcombine.high %v6202_v28, %v6202_v28  ;;  %v6260_v30 = vrot.slane %v6202_v28, %v12883_v7 }
 0x1f9   : > { %v8966_v16 = vadd.f32 %v8934_v2, %v8542_v13  ;;  %v6264_v46 = vrot.slane %v6203_v50, %v12883_v7  ;;  %vm15057_vm13 = vcmp.eq.f32.partialorder %v6256_v21, %v12886_v9  ;;  %v6391_v47 = vrot.slane %v12609_v26, %v12881_v6  ;;  %v12629_v13 = vld.sshfl [vmem:[%s12879_s28 + $0x1d4] sm:$0x33 pattern:$0x75316420] }
 0x1fa   : > { %v9389_v59 = vadd.f32 %v9357_v29, %v8965_v15  ;;  %v6268_v1 = vrot.slane %v6204_v8, %v12883_v7  ;;  %vm15065_vm14 = vcmp.eq.f32.partialorder %v6260_v30, %v12886_v9  ;;  %v6398_v22 = vrot.slane %v6384_v57, %v12881_v6 }
 0x1fb   : > { %v9390_v49 = vadd.f32 %v9358_v41, %v8966_v16  ;;  %vm6299_vm15 = vcmp.eq.f32.partialorder %v6264_v46, %v12886_v9  ;;  %v6399_v44 = vcombine.high %v6391_v47, %v6391_v47  ;;  %v6452_v4 = vrot.slane %v6391_v47, %v12883_v7  ;;  %v12625_v41 = vld.sshfl [vmem:[%s12879_s28 + $0x1d8] sm:$0x33 pattern:$0x75316420] }
 0x1fc   : > { %9421 = vst.msk [vmem:[#allocation2 + $0x1b0] sm:$0xff] %vm3520_vm0, %v9389_v59  ;;  %vm6300_vm1 = vcmp.eq.f32.partialorder %v6268_v1, %v12886_v9  ;;  %v6400_v20 = vcombine.high %v6398_v22, %v6398_v22  ;;  %v6456_v53 = vrot.slane %v6398_v22, %v12883_v7  ;;  %v6580_v35 = vcombine.high %v12613_v32, %v12613_v32 }
 0x1fd   : > { %9422 = vst.msk [vmem:[#allocation2 + $0x1b8] sm:$0xff] %vm3520_vm0, %v9390_v49  ;;  %v6460_v56 = vrot.slane %v6399_v44, %v12883_v7  ;;  %v6493_v33 = vsel %vm15057_vm13, %v6452_v4, 0.0  ;;  %v6587_v12 = vrot.slane %v12613_v32, %v12881_v6  ;;  %v6776_v52 = vcombine.high %v12617_v5, %v12617_v5 }
 0x1fe   : > { %v6464_v42 = vrot.slane %v6400_v20, %v12883_v7  ;;  %v6494_v23 = vsel %vm15065_vm14, %v6456_v53, 0.0  ;;  %v6594_v54 = vrot.slane %v6580_v35, %v12881_v6  ;;  %v6783_v31 = vrot.slane %v12617_v5, %v12881_v6 }
 0x1ff   : > { %v6495_v26 = vsel %vm6299_vm15, %v6460_v56, 0.0  ;;  %v6595_v38 = vcombine.high %v6587_v12, %v6587_v12  ;;  %v6648_v36 = vrot.slane %v6587_v12, %v12883_v7  ;;  %v6790_v63 = vrot.slane %v6776_v52, %v12881_v6 }
 0x200   : > { %v6496_v2 = vsel %vm6300_vm1, %v6464_v42, 0.0  ;;  %v6596_v48 = vcombine.high %v6594_v54, %v6594_v54  ;;  %v6652_v40 = vrot.slane %v6594_v54, %v12883_v7  ;;  %v6791_v62 = vcombine.high %v6783_v31, %v6783_v31 }
 0x201   : > { %v6656_v58 = vrot.slane %v6595_v38, %v12883_v7  ;;  %vm6689_vm2 = vcmp.eq.f32.partialorder %v6648_v36, %v12886_v9  ;;  %v6792_v28 = vcombine.high %v6790_v63, %v6790_v63  ;;  %v6844_v57 = vrot.slane %v6783_v31, %v12883_v7 }
 0x202   : > { %v6660_v29 = vrot.slane %v6596_v48, %v12883_v7  ;;  %vm6690_vm3 = vcmp.eq.f32.partialorder %v6652_v40, %v12886_v9  ;;  %v6848_v50 = vrot.slane %v6790_v63, %v12883_v7  ;;  %v6852_v21 = vrot.slane %v6791_v62, %v12883_v7  ;;  %v12633_v63 = vld.sshfl [vmem:[%s12879_s28 + $0x1dc] sm:$0x33 pattern:$0x75316420] }
 0x203   : > { %vm6691_vm4 = vcmp.eq.f32.partialorder %v6656_v58, %v12886_v9  ;;  %v6856_v15 = vrot.slane %v6792_v28, %v12883_v7  ;;  %v6885_v8 = vsel %vm6689_vm2, %v6844_v57, 0.0  ;;  %v6988_v30 = vcombine.high %v12621_v27, %v12621_v27  ;;  %v12015_v32 = vld [vmem:[#allocation2 + $0x1b0] sm:$0xff] }
 0x204   : > { %v12016_v16 = vld [vmem:[#allocation2 + $0x1b8] sm:$0xff]  ;;  %vm6692_vm5 = vcmp.eq.f32.partialorder %v6660_v29, %v12886_v9  ;;  %v6886_v46 = vsel %vm6690_vm3, %v6848_v50, 0.0  ;;  %v6887_v51 = vsel %vm6691_vm4, %v6852_v21, 0.0  ;;  %v15105_v47 = vadd.f32 %v6885_v8, %v6493_v33 }
 0x205   : > { %12192 = vmatpush1.msra.mxu0 %v12016_v16  ;;  %v6888_v59 = vsel %vm6692_vm5, %v6856_v15, 0.0  ;;  %v15107_v5 = vadd.f32 %v6886_v46, %v6494_v23  ;;  %v15109_v1 = vadd.f32 %v6887_v51, %v6495_v26  ;;  %v6995_v34 = vrot.slane %v12621_v27, %v12881_v6 }
 0x206   : > { %12193 = vmatprep.subr.mxu0 %v16954_v37  ;;  %v15113_v22 = vadd.f32 %v6888_v59, %v6496_v2  ;;  %v7002_v49 = vrot.slane %v6988_v30, %v12881_v6  ;;  %v7184_v44 = vcombine.high %v12625_v41, %v12625_v41  ;;  %v7191_v4 = vrot.slane %v12625_v41, %v12881_v6 }
 0x207   : > { %12194 = vmatpush1.msra.mxu0 %v12015_v32  ;;  %v7003_v20 = vcombine.high %v6995_v34, %v6995_v34  ;;  %v7056_v53 = vrot.slane %v6995_v34, %v12883_v7  ;;  %v7380_v35 = vcombine.high %v12629_v13, %v12629_v13  ;;  %v7387_v56 = vrot.slane %v12629_v13, %v12881_v6 }
 0x208   : > { %v7004_v33 = vcombine.high %v7002_v49, %v7002_v49  ;;  %v7060_v12 = vrot.slane %v7002_v49, %v12883_v7  ;;  %v7198_v52 = vrot.slane %v7184_v44, %v12881_v6  ;;  %v7199_v42 = vcombine.high %v7191_v4, %v7191_v4  ;;  %12195 = vmatprep.subr.mxu0 %v16954_v37 }
 0x209   : > { %v7064_v23 = vrot.slane %v7003_v20, %v12883_v7  ;;  %vm7097_vm6 = vcmp.eq.f32.partialorder %v7056_v53, %v12886_v9  ;;  %v7252_v54 = vrot.slane %v7191_v4, %v12883_v7  ;;  %v7394_v31 = vrot.slane %v7380_v35, %v12881_v6 }
 0x20a   : > { %v7068_v26 = vrot.slane %v7004_v33, %v12883_v7  ;;  %vm7098_vm7 = vcmp.eq.f32.partialorder %v7060_v12, %v12886_v9  ;;  %v7200_v38 = vcombine.high %v7198_v52, %v7198_v52  ;;  %v7256_v36 = vrot.slane %v7198_v52, %v12883_v7 }
 0x20b   : > { %vm7099_vm8 = vcmp.eq.f32.partialorder %v7064_v23, %v12886_v9  ;;  %v7260_v27 = vrot.slane %v7199_v42, %v12883_v7  ;;  %v7293_v2 = vsel %vm7097_vm6, %v7252_v54, 0.0  ;;  %v7395_v48 = vcombine.high %v7387_v56, %v7387_v56 }
 0x20c   : > { %vm7100_vm9 = vcmp.eq.f32.partialorder %v7068_v26, %v12886_v9  ;;  %v7264_v40 = vrot.slane %v7200_v38, %v12883_v7  ;;  %v7294_v62 = vsel %vm7098_vm7, %v7256_v36, 0.0  ;;  %v7396_v58 = vcombine.high %v7394_v31, %v7394_v31 }
 0x20d   : > { %v7295_v28 = vsel %vm7099_vm8, %v7260_v27, 0.0  ;;  %v7448_v57 = vrot.slane %v7387_v56, %v12883_v7  ;;  %v7452_v13 = vrot.slane %v7394_v31, %v12883_v7  ;;  %v7456_v29 = vrot.slane %v7395_v48, %v12883_v7 }
 0x20e   : > { %v7296_v50 = vsel %vm7100_vm9, %v7264_v40, 0.0  ;;  %v7460_v21 = vrot.slane %v7396_v58, %v12883_v7  ;;  %v7576_v41 = vcombine.high %v12633_v63, %v12633_v63  ;;  %v7583_v15 = vrot.slane %v12633_v63, %v12881_v6 }
 0x20f   : > { %vm7489_vm10 = vcmp.eq.f32.partialorder %v7448_v57, %v12886_v9  ;;  %vm15141_vm11 = vcmp.eq.f32.partialorder %v7452_v13, %v12886_v9  ;;  %vm7491_vm13 = vcmp.eq.f32.partialorder %v7456_v29, %v12886_v9  ;;  %v7856_v30 = vcombine.high %v15105_v47, %v15105_v47 }
 0x210   : > { %vm7492_vm14 = vcmp.eq.f32.partialorder %v7460_v21, %v12886_v9  ;;  %v7590_v16 = vrot.slane %v7576_v41, %v12881_v6  ;;  %v7591_v32 = vcombine.high %v7583_v15, %v7583_v15  ;;  %v7644_v46 = vrot.slane %v7583_v15, %v12883_v7 }
 0x211   : > { %v7870_v51 = vrot.slane %v7856_v30, %v12881_v6  ;;  %v8280_v59 = vcombine.high %v15107_v5, %v15107_v5  ;;  %v8704_v34 = vcombine.high %v15109_v1, %v15109_v1  ;;  %v9128_v49 = vcombine.high %v15113_v22, %v15113_v22 }
 0x212   : > { %v7592_v44 = vcombine.high %v7590_v16, %v7590_v16  ;;  %v7648_v4 = vrot.slane %v7590_v16, %v12883_v7  ;;  %v7652_v20 = vrot.slane %v7591_v32, %v12883_v7  ;;  %v7685_v53 = vsel %vm7489_vm10, %v7644_v46, 0.0 }
 0x213   : > { %v15160_v35 = vadd.f32 %v7685_v53, %v7293_v2  ;;  %v7872_v56 = vcombine.high %v7870_v51, %v7870_v51  ;;  %v8294_v33 = vrot.slane %v8280_v59, %v12881_v6  ;;  %v8718_v12 = vrot.slane %v8704_v34, %v12881_v6 }
 0x214   : > { %v7656_v52 = vrot.slane %v7592_v44, %v12883_v7  ;;  %v7686_v42 = vsel %vm15141_vm11, %v7648_v4, 0.0  ;;  %v7687_v23 = vsel %vm7491_vm13, %v7652_v20, 0.0  ;;  %v9142_v54 = vrot.slane %v9128_v49, %v12881_v6 }
 0x215   : > { %17006 = vst [vmem:[#allocation10_spill] sm:$0xff] %v15160_v35  ;;  %v15170_v31 = vadd.f32 %v7686_v42, %v7294_v62  ;;  %v15172_v26 = vadd.f32 %v7687_v23, %v7295_v28  ;;  %v15175_v38 = vrot.slane %v7872_v56, %v12881_v6  ;;  %v8296_v36 = vcombine.high %v8294_v33, %v8294_v33 }
 0x216   : > { %v7688_v63 = vsel %vm7492_vm14, %v7656_v52, 0.0  ;;  %v8720_v27 = vcombine.high %v8718_v12, %v8718_v12  ;;  %v9144_v2 = vcombine.high %v9142_v54, %v9142_v54  ;;  %v7814_v48 = vrot.slane %v14917_v17, %v12881_v6 }
 0x217   : > { %17007 = vst [vmem:[#allocation11_spill] sm:$0xff] %v15170_v31  ;;  %17008 = vst [vmem:[#allocation12_spill] sm:$0xff] %v15172_v26  ;;  %v15181_v40 = vadd.f32 %v7688_v63, %v7296_v50  ;;  %v8024_v62 = vrot.slane %v15175_v38, %v12883_v7  ;;  %v15186_v58 = vrot.slane %v8296_v36, %v12881_v6 }
 0x218   : > { %v8238_v28 = vrot.slane %v14922_v0, %v12881_v6  ;;  %v15191_v57 = vrot.slane %v8720_v27, %v12881_v6  ;;  %v15194_v13 = vrot.slane %v9144_v2, %v12881_v6  ;;  %v7822_v29 = vcombine.high %v7814_v48, %v7814_v48 }
 0x219   : > { %17009 = vst [vmem:[#allocation6_spill] sm:$0xff] %v15181_v40  ;;  %v8662_v17 = vrot.slane %v14928_v45, %v12881_v6  ;;  %v8094_v50 = vmul.f32 %v8024_v62, %v15160_v35  ;;  %v8448_v21 = vrot.slane %v15186_v58, %v12883_v7  ;;  %v9086_v15 = vrot.slane %v14933_v24, %v12881_v6 }
 0x21a   : > { %17010 = vst [vmem:[#allocation7_spill] sm:$0xff] %v15191_v57  ;;  %17011 = vst [vmem:[#allocation13_spill] sm:$0xff] %v15194_v13  ;;  %v8246_v41 = vcombine.high %v8238_v28, %v8238_v28  ;;  %v8872_v0 = vrot.slane %v15191_v57, %v12883_v7  ;;  %v9296_v8 = vrot.slane %v15194_v13, %v12883_v7 }
 0x21b   : > { %v15208_v30 = vrot.slane %v7822_v29, %v12881_v6  ;;  %v8670_v16 = vcombine.high %v8662_v17, %v8662_v17  ;;  %v8518_v45 = vmul.f32 %v8448_v21, %v15170_v31  ;;  %v9094_v46 = vcombine.high %v9086_v15, %v9086_v15 }
 0x21c   : > { %v15212_v32 = vrot.slane %v8246_v41, %v12881_v6  ;;  %v15215_v59 = vrot.slane %v7870_v51, %v12881_v6  ;;  %v8942_v24 = vmul.f32 %v8872_v0, %v15172_v26  ;;  %v9366_v34 = vmul.f32 %v9296_v8, %v15181_v40 }
 0x21d   : > { %v7854_v49 = vcombine.high %v15208_v30, %v15208_v30  ;;  %v15222_v44 = vrot.slane %v8670_v16, %v12881_v6  ;;  %v8550_v4 = vadd.f32 %v8518_v45, %v8094_v50  ;;  %v15227_v53 = vrot.slane %v9094_v46, %v12881_v6 }
 0x21e   : > { %17012 = vst [vmem:[#allocation14_spill] sm:$0xff] %v15215_v59  ;;  %v8278_v20 = vcombine.high %v15212_v32, %v15212_v32  ;;  %v8020_v51 = vrot.slane %v15215_v59, %v12883_v7  ;;  %v15235_v42 = vrot.slane %v8294_v33, %v12881_v6  ;;  %v15238_v23 = vrot.slane %v8718_v12, %v12881_v6 }
 0x21f   : > { %v7984_v56 = vrot.slane %v7854_v49, %v12883_v7  ;;  %v8702_v52 = vcombine.high %v15222_v44, %v15222_v44  ;;  %v8974_v36 = vadd.f32 %v8942_v24, %v8550_v4  ;;  %v9126_v27 = vcombine.high %v15227_v53, %v15227_v53 }
 0x220   : > { %17013 = vst [vmem:[#allocation15_spill] sm:$0xff] %v15235_v42  ;;  %17014 = vst [vmem:[#allocation16_spill] sm:$0xff] %v15238_v23  ;;  %v8408_v63 = vrot.slane %v8278_v20, %v12883_v7  ;;  %v8093_v2 = vmul.f32 %v8020_v51, %v15160_v35  ;;  %v8444_v50 = vrot.slane %v15235_v42, %v12883_v7 }
 0x221   : > { %v8084_v62 = vmul.f32 %v7984_v56, %v14984_v39  ;;  %v8832_v29 = vrot.slane %v8702_v52, %v12883_v7  ;;  %v8868_v33 = vrot.slane %v15238_v23, %v12883_v7  ;;  %v9398_v12 = vadd.f32 %v9366_v34, %v8974_v36 }
 0x222   : > { %v8508_v21 = vmul.f32 %v8408_v63, %v14987_v61  ;;  %v9256_v41 = vrot.slane %v9126_v27, %v12883_v7  ;;  %v15253_v0 = vrot.slane %v9142_v54, %v12881_v6  ;;  %v8517_v16 = vmul.f32 %v8444_v50, %v15170_v31 }
 0x223   : > { %v8932_v8 = vmul.f32 %v8832_v29, %v14993_v3  ;;  %v8941_v45 = vmul.f32 %v8868_v33, %v15172_v26  ;;  %v15259_v46 = vrot.slane %v7814_v48, %v12881_v6  ;;  %9430 = vst.msk [vmem:[#allocation2 + $0x258] sm:$0xff] %vm3520_vm0, %v9398_v12  ;;  %v15266_v54 = vrot.slane %v8238_v28, %v12881_v6 }
 0x224   : > { %17015 = vst [vmem:[#allocation8_spill] sm:$0xff] %v15253_v0  ;;  %v8540_v24 = vadd.f32 %v8508_v21, %v8084_v62  ;;  %v9356_v34 = vmul.f32 %v9256_v41, %v14998_v14  ;;  %v9292_v49 = vrot.slane %v15253_v0, %v12883_v7  ;;  %v8549_v4 = vadd.f32 %v8517_v16, %v8093_v2 }
 0x225   : > { %v7852_v20 = vcombine.high %v15259_v46, %v15259_v46  ;;  %v15271_v51 = vrot.slane %v8662_v17, %v12881_v6  ;;  %v15274_v48 = vrot.slane %v9086_v15, %v12881_v6  ;;  %v8276_v36 = vcombine.high %v15266_v54, %v15266_v54 }
 0x226   : > { %v8964_v56 = vadd.f32 %v8932_v8, %v8540_v24  ;;  %v9365_v52 = vmul.f32 %v9292_v49, %v15181_v40  ;;  %v7863_v28 = vrot.slane %v15105_v47, %v12881_v6  ;;  %v8973_v63 = vadd.f32 %v8941_v45, %v8549_v4 }
 0x227   : > { %v7980_v27 = vrot.slane %v7852_v20, %v12883_v7  ;;  %v8700_v2 = vcombine.high %v15271_v51, %v15271_v51  ;;  %v9124_v17 = vcombine.high %v15274_v48, %v15274_v48  ;;  %v8404_v62 = vrot.slane %v8276_v36, %v12883_v7 }
 0x228   : > { %v9388_v15 = vadd.f32 %v9356_v34, %v8964_v56  ;;  %v7871_v29 = vcombine.high %v7863_v28, %v7863_v28  ;;  %v8287_v50 = vrot.slane %v15107_v5, %v12881_v6  ;;  %v9397_v33 = vadd.f32 %v9365_v52, %v8973_v63 }
 0x229   : > { %v8083_v12 = vmul.f32 %v7980_v27, %v14984_v39  ;;  %v8828_v47 = vrot.slane %v8700_v2, %v12883_v7  ;;  %v9252_v21 = vrot.slane %v9124_v17, %v12883_v7  ;;  %v8507_v41 = vmul.f32 %v8404_v62, %v14987_v61 }
 0x22a   : > { %9420 = vst.msk [vmem:[#allocation2 + $0x1a8] sm:$0xff] %vm3520_vm0, %v9388_v15  ;;  %v15295_v8 = vrot.slane %v7871_v29, %v12881_v6  ;;  %v8295_v16 = vcombine.high %v8287_v50, %v8287_v50  ;;  %v8711_v45 = vrot.slane %v15109_v1, %v12881_v6  ;;  %v12036_v24 = vld [vmem:[#allocation2 + $0x258] sm:$0xff]  ;;  %9429 = vst.msk [vmem:[#allocation2 + $0x250] sm:$0xff] %vm3520_vm0, %v9397_v33 }
 0x22b   : > { %v8931_v5 = vmul.f32 %v8828_v47, %v14993_v3  ;;  %v9355_v34 = vmul.f32 %v9252_v21, %v14998_v14  ;;  %v9135_v49 = vrot.slane %v15113_v22, %v12881_v6  ;;  %v7976_v4 = vrot.slane %v15208_v30, %v12883_v7  ;;  %12265 = vmatpush1.msra.mxu1 %v12036_v24 }
 0x22c   : > { %v8539_v20 = vadd.f32 %v8507_v41, %v8083_v12  ;;  %v7903_v56 = vcombine.high %v15295_v8, %v15295_v8  ;;  %v15309_v1 = vrot.slane %v8295_v16, %v12881_v6  ;;  %v8719_v52 = vcombine.high %v8711_v45, %v8711_v45  ;;  %12266 = vmatprep.subr.mxu1 %v16954_v37 }
 0x22d   : > { %v9143_v36 = vcombine.high %v9135_v49, %v9135_v49  ;;  %v8082_v63 = vmul.f32 %v7976_v4, %v14984_v39  ;;  %v8400_v22 = vrot.slane %v15212_v32, %v12883_v7  ;;  %v8824_v30 = vrot.slane %v15222_v44, %v12883_v7 }
 0x22e   : > { %v8963_v27 = vadd.f32 %v8931_v5, %v8539_v20  ;;  %v8016_v2 = vrot.slane %v7903_v56, %v12883_v7  ;;  %v8327_v17 = vcombine.high %v15309_v1, %v15309_v1  ;;  %v15321_v15 = vrot.slane %v8719_v52, %v12881_v6 }
 0x22f   : > { %v15324_v62 = vrot.slane %v9143_v36, %v12881_v6  ;;  %v8506_v29 = vmul.f32 %v8400_v22, %v14987_v61  ;;  %v8930_v33 = vmul.f32 %v8824_v30, %v14993_v3  ;;  %v9248_v32 = vrot.slane %v15227_v53, %v12883_v7 }
 0x230   : > { %v9387_v44 = vadd.f32 %v9355_v34, %v8963_v27  ;;  %v8092_v12 = vmul.f32 %v8016_v2, %v15160_v35  ;;  %v8440_v47 = vrot.slane %v8327_v17, %v12883_v7  ;;  %v8751_v21 = vcombine.high %v15321_v15, %v15321_v15 }
 0x231   : > { %v12014_v41 = vld [vmem:[#allocation2 + $0x1a8] sm:$0xff]  ;;  %v9175_v16 = vcombine.high %v15324_v62, %v15324_v62  ;;  %v8538_v24 = vadd.f32 %v8506_v29, %v8082_v63  ;;  %v9354_v5 = vmul.f32 %v9248_v32, %v14998_v14  ;;  %v15338_v4 = vrot.slane %v7863_v28, %v12881_v6  ;;  %v12035_v53 = vld [vmem:[#allocation2 + $0x250] sm:$0xff] }
 0x232   : > { %12196 = vmatpush1.msra.mxu0 %v12014_v41  ;;  %9419 = vst.msk [vmem:[#allocation2 + $0x1a0] sm:$0xff] %vm3520_vm0, %v9387_v44  ;;  %v8516_v34 = vmul.f32 %v8440_v47, %v15170_v31  ;;  %v8864_v20 = vrot.slane %v8751_v21, %v12883_v7  ;;  %v15344_v56 = vrot.slane %v8287_v50, %v12881_v6 }
 0x233   : > { %v15347_v52 = vrot.slane %v8711_v45, %v12881_v6  ;;  %12267 = vmatpush1.msra.mxu1 %v12035_v53  ;;  %12197 = vmatprep.subr.mxu0 %v16954_v37  ;;  %v9288_v28 = vrot.slane %v9175_v16, %v12883_v7  ;;  %v8962_v36 = vadd.f32 %v8930_v33, %v8538_v24 }
 0x234   : > { %v7901_v63 = vcombine.high %v15338_v4, %v15338_v4  ;;  %12268 = vmatprep.subr.mxu1 %v16954_v37  ;;  %v8548_v22 = vadd.f32 %v8516_v34, %v8092_v12  ;;  %v8940_v30 = vmul.f32 %v8864_v20, %v15172_v26  ;;  %v8325_v50 = vcombine.high %v15344_v56, %v15344_v56 }
 0x235   : > { %v8749_v45 = vcombine.high %v15347_v52, %v15347_v52  ;;  %v9364_v27 = vmul.f32 %v9288_v28, %v15181_v40  ;;  %v9386_v2 = vadd.f32 %v9354_v5, %v8962_v36  ;;  %v15362_v29 = vrot.slane %v9135_v49, %v12881_v6 }
 0x236   : > { %v8012_v17 = vrot.slane %v7901_v63, %v12883_v7  ;;  %v8972_v33 = vadd.f32 %v8940_v30, %v8548_v22  ;;  %v8436_v32 = vrot.slane %v8325_v50, %v12883_v7  ;;  %v7972_v12 = vrot.slane %v15259_v46, %v12883_v7  ;;  %v12572_v30 = vld.sshfl [vmem:[%s12879_s28 + $0x120] sm:$0x33 pattern:$0x75316420] }
 0x237   : > { %v8860_v44 = vrot.slane %v8749_v45, %v12883_v7  ;;  %9418 = vst.msk [vmem:[#allocation2 + $0x198] sm:$0xff] %vm3520_vm0, %v9386_v2  ;;  %v9173_v21 = vcombine.high %v15362_v29, %v15362_v29  ;;  %v8396_v41 = vrot.slane %v15266_v54, %v12883_v7  ;;  %v8820_v49 = vrot.slane %v15271_v51, %v12883_v7  ;;  %v12576_v2 = vld.sshfl [vmem:[%s12879_s28 + $0x128] sm:$0x33 pattern:$0x75316420] }
 0x238   : > { %v8091_v47 = vmul.f32 %v8012_v17, %v15160_v35  ;;  %v9396_v16 = vadd.f32 %v9364_v27, %v8972_v33  ;;  %v8515_v24 = vmul.f32 %v8436_v32, %v15170_v31  ;;  %v8081_v46 = vmul.f32 %v7972_v12, %v14984_v39 }
 0x239   : > { %v8939_v5 = vmul.f32 %v8860_v44, %v15172_v26  ;;  %v12013_v53 = vld [vmem:[#allocation2 + $0x1a0] sm:$0xff]  ;;  %v9284_v34 = vrot.slane %v9173_v21, %v12883_v7  ;;  %v8505_v20 = vmul.f32 %v8396_v41, %v14987_v61  ;;  %v8929_v28 = vmul.f32 %v8820_v49, %v14993_v3 }
 0x23a   : > { %v9244_v54 = vrot.slane %v15274_v48, %v12883_v7  ;;  %12198 = vmatpush1.msra.mxu0 %v12013_v53  ;;  %9428 = vst.msk [vmem:[#allocation2 + $0x248] sm:$0xff] %vm3520_vm0, %v9396_v16  ;;  %v8547_v51 = vadd.f32 %v8515_v24, %v8091_v47  ;;  %v8008_v36 = vrot.slane %v15295_v8, %v12883_v7 }
 0x23b   : > { %v8432_v63 = vrot.slane %v15309_v1, %v12883_v7  ;;  %v8856_v22 = vrot.slane %v15321_v15, %v12883_v7  ;;  %12199 = vmatprep.subr.mxu0 %v16954_v37  ;;  %v9363_v50 = vmul.f32 %v9284_v34, %v15181_v40  ;;  %v8537_v45 = vadd.f32 %v8505_v20, %v8081_v46 }
 0x23c   : > { %v9353_v48 = vmul.f32 %v9244_v54, %v14998_v14  ;;  %v9280_v27 = vrot.slane %v15324_v62, %v12883_v7  ;;  %v8971_v17 = vadd.f32 %v8939_v5, %v8547_v51  ;;  %v8090_v8 = vmul.f32 %v8008_v36, %v15160_v35  ;;  %v12580_v51 = vld.sshfl [vmem:[%s12879_s28 + $0x124] sm:$0x33 pattern:$0x75316420] }
 0x23d   : > { %v8514_v1 = vmul.f32 %v8432_v63, %v15170_v31  ;;  %v8938_v33 = vmul.f32 %v8856_v22, %v15172_v26  ;;  %v8961_v15 = vadd.f32 %v8929_v28, %v8537_v45  ;;  %v3644_v44 = vcombine.high %v12572_v30, %v12572_v30 }
 0x23e   : > { %v9362_v32 = vmul.f32 %v9280_v27, %v15181_v40  ;;  %v3651_v12 = vrot.slane %v12572_v30, %v12881_v6  ;;  %v12012_v47 = vld [vmem:[#allocation2 + $0x198] sm:$0xff]  ;;  %v9395_v21 = vadd.f32 %v9363_v50, %v8971_v17  ;;  %v3840_v49 = vcombine.high %v12576_v2, %v12576_v2  ;;  %v12584_v50 = vld.sshfl [vmem:[%s12879_s28 + $0x12c] sm:$0x33 pattern:$0x75316420] }
 0x23f   : > { %v8546_v41 = vadd.f32 %v8514_v1, %v8090_v8  ;;  %v3847_v62 = vrot.slane %v12576_v2, %v12881_v6  ;;  %12200 = vmatpush1.msra.mxu0 %v12012_v47  ;;  %v9385_v16 = vadd.f32 %v9353_v48, %v8961_v15  ;;  %v3658_v24 = vrot.slane %v3644_v44, %v12881_v6  ;;  %v12588_v2 = vld.sshfl [vmem:[%s12879_s28 + $0x130] sm:$0x33 pattern:$0x75316420] }
 0x240   : > { %v3659_v5 = vcombine.high %v3651_v12, %v3651_v12  ;;  %v3720_v46 = vrot.slane %v3651_v12, %v12883_v7  ;;  %9427 = vst.msk [vmem:[#allocation2 + $0x240] sm:$0xff] %vm3520_vm0, %v9395_v21  ;;  %12201 = vmatprep.subr.mxu0 %v16954_v37  ;;  %v3854_v34 = vrot.slane %v3840_v49, %v12881_v6 }
 0x241   : > { %v8970_v53 = vadd.f32 %v8938_v33, %v8546_v41  ;;  %v3855_v20 = vcombine.high %v3847_v62, %v3847_v62  ;;  %v3916_v28 = vrot.slane %v3847_v62, %v12883_v7  ;;  %v12034_v54 = vld [vmem:[#allocation2 + $0x248] sm:$0xff]  ;;  %9417 = vst.msk [vmem:[#allocation2 + $0x190] sm:$0xff] %vm3520_vm0, %v9385_v16  ;;  %v3660_v36 = vcombine.high %v3658_v24, %v3658_v24 }
 0x242   : > { %v3724_v63 = vrot.slane %v3658_v24, %v12883_v7  ;;  %v3728_v22 = vrot.slane %v3659_v5, %v12883_v7  ;;  %vm3773_vm15 = vcmp.eq.f32.partialorder %v3720_v46, %v12886_v9  ;;  %12269 = vmatpush1.msra.mxu1 %v12034_v54  ;;  %v3856_v45 = vcombine.high %v3854_v34, %v3854_v34 }
 0x243   : > { %v9394_v30 = vadd.f32 %v9362_v32, %v8970_v53  ;;  %v3920_v48 = vrot.slane %v3854_v34, %v12883_v7  ;;  %v3924_v27 = vrot.slane %v3855_v20, %v12883_v7  ;;  %12270 = vmatprep.subr.mxu1 %v16954_v37  ;;  %v3732_v17 = vrot.slane %v3660_v36, %v12883_v7 }
 0x244   : > { %vm3774_vm1 = vcmp.eq.f32.partialorder %v3724_v63, %v12886_v9  ;;  %vm3775_vm2 = vcmp.eq.f32.partialorder %v3728_v22, %v12886_v9  ;;  %v3928_v8 = vrot.slane %v3856_v45, %v12883_v7  ;;  %v3969_v1 = vsel %vm3773_vm15, %v3916_v28, 0.0 }
 0x245   : > { %9426 = vst.msk [vmem:[#allocation2 + $0x238] sm:$0xff] %vm3520_vm0, %v9394_v30  ;;  %v3970_v33 = vsel %vm3774_vm1, %v3920_v48, 0.0  ;;  %v4036_v15 = vcombine.high %v12580_v51, %v12580_v51  ;;  %v3971_v32 = vsel %vm3775_vm2, %v3924_v27, 0.0  ;;  %v4043_v44 = vrot.slane %v12580_v51, %v12881_v6 }
 0x246   : > { %v4232_v12 = vcombine.high %v12584_v50, %v12584_v50  ;;  %v4239_v47 = vrot.slane %v12584_v50, %v12881_v6  ;;  %vm3776_vm3 = vcmp.eq.f32.partialorder %v3732_v17, %v12886_v9  ;;  %v4444_v41 = vcombine.high %v12588_v2, %v12588_v2  ;;  %v12596_v48 = vld.sshfl [vmem:[%s12879_s28 + $0x134] sm:$0x33 pattern:$0x75316420] }
 0x247   : > { %v4050_v21 = vrot.slane %v4036_v15, %v12881_v6  ;;  %v4451_v49 = vrot.slane %v12588_v2, %v12881_v6  ;;  %v12033_v62 = vld [vmem:[#allocation2 + $0x240] sm:$0xff]  ;;  %v4051_v16 = vcombine.high %v4043_v44, %v4043_v44  ;;  %v4112_v24 = vrot.slane %v4043_v44, %v12883_v7 }
 0x248   : > { %v4246_v5 = vrot.slane %v4232_v12, %v12881_v6  ;;  %v4247_v46 = vcombine.high %v4239_v47, %v4239_v47  ;;  %12271 = vmatpush1.msra.mxu1 %v12033_v62  ;;  %v12011_v53 = vld [vmem:[#allocation2 + $0x190] sm:$0xff]  ;;  %v4308_v28 = vrot.slane %v4239_v47, %v12883_v7  ;;  %v4458_v54 = vrot.slane %v4444_v41, %v12881_v6 }
 0x249   : > { %v4052_v34 = vcombine.high %v4050_v21, %v4050_v21  ;;  %v4116_v20 = vrot.slane %v4050_v21, %v12883_v7  ;;  %12272 = vmatprep.subr.mxu1 %v16954_v37  ;;  %12202 = vmatpush1.msra.mxu0 %v12011_v53  ;;  %v3972_v51 = vsel %vm3776_vm3, %v3928_v8, 0.0  ;;  %v4120_v36 = vrot.slane %v4051_v16, %v12883_v7  ;;  %v12592_v8 = vld.sshfl [vmem:[%s12879_s28 + $0x138] sm:$0x33 pattern:$0x75316420] }
 0x24a   : > { %vm4165_vm4 = vcmp.eq.f32.partialorder %v4112_v24, %v12886_v9  ;;  %v4248_v63 = vcombine.high %v4246_v5, %v4246_v5  ;;  %12203 = vmatprep.subr.mxu0 %v16954_v37  ;;  %v4312_v30 = vrot.slane %v4246_v5, %v12883_v7  ;;  %v4316_v50 = vrot.slane %v4247_v46, %v12883_v7  ;;  %v12600_v53 = vld.sshfl [vmem:[%s12879_s28 + $0x13c] sm:$0x33 pattern:$0x75316420] }
 0x24b   : > { %v4124_v22 = vrot.slane %v4052_v34, %v12883_v7  ;;  %vm4166_vm5 = vcmp.eq.f32.partialorder %v4116_v20, %v12886_v9  ;;  %vm4167_vm6 = vcmp.eq.f32.partialorder %v4120_v36, %v12886_v9  ;;  %v4361_v2 = vsel %vm4165_vm4, %v4308_v28, 0.0 }
 0x24c   : > { %v12032_v45 = vld [vmem:[#allocation2 + $0x238] sm:$0xff]  ;;  %v4320_v27 = vrot.slane %v4248_v63, %v12883_v7  ;;  %v4459_v17 = vcombine.high %v4451_v49, %v4451_v49  ;;  %v4362_v15 = vsel %vm4166_vm5, %v4312_v30, 0.0  ;;  %v4363_v44 = vsel %vm4167_vm6, %v4316_v50, 0.0 }
 0x24d   : > { %12273 = vmatpush1.msra.mxu1 %v12032_v45  ;;  %vm4168_vm7 = vcmp.eq.f32.partialorder %v4124_v22, %v12886_v9  ;;  %v4377_v12 = vadd.f32 %v4361_v2, %v3969_v1  ;;  %v4378_v21 = vadd.f32 %v4362_v15, %v3970_v33  ;;  %v15451_v41 = vadd.f32 %v4363_v44, %v3971_v32 }
 0x24e   : > { %12274 = vmatprep.subr.mxu1 %v16954_v37  ;;  %v4364_v47 = vsel %vm4168_vm7, %v4320_v27, 0.0  ;;  %v4460_v62 = vcombine.high %v4458_v54, %v4458_v54  ;;  %v4520_v24 = vrot.slane %v4451_v49, %v12883_v7  ;;  %v4524_v5 = vrot.slane %v4458_v54, %v12883_v7 }
 0x24f   : > { %v15453_v16 = vadd.f32 %v4364_v47, %v3972_v51  ;;  %v4528_v46 = vrot.slane %v4459_v17, %v12883_v7  ;;  %v4640_v20 = vcombine.high %v12592_v8, %v12592_v8  ;;  %v4647_v1 = vrot.slane %v12592_v8, %v12881_v6 }
 0x250   : > { %v4532_v34 = vrot.slane %v4460_v62, %v12883_v7  ;;  %v4836_v28 = vcombine.high %v12596_v48, %v12596_v48  ;;  %vm4573_vm8 = vcmp.eq.f32.partialorder %v4520_v24, %v12886_v9  ;;  %vm15463_vm9 = vcmp.eq.f32.partialorder %v4524_v5, %v12886_v9 }
 0x251   : > { %vm4575_vm10 = vcmp.eq.f32.partialorder %v4528_v46, %v12886_v9  ;;  %v4843_v32 = vrot.slane %v12596_v48, %v12881_v6  ;;  %v4654_v49 = vrot.slane %v4640_v20, %v12881_v6  ;;  %v4655_v54 = vcombine.high %v4647_v1, %v4647_v1 }
 0x252   : > { %vm4576_vm11 = vcmp.eq.f32.partialorder %v4532_v34, %v12886_v9  ;;  %v4716_v51 = vrot.slane %v4647_v1, %v12883_v7  ;;  %v4850_v36 = vrot.slane %v4836_v28, %v12881_v6  ;;  %v5032_v30 = vcombine.high %v12600_v53, %v12600_v53 }
 0x253   : > { %v4851_v63 = vcombine.high %v4843_v32, %v4843_v32  ;;  %v4912_v22 = vrot.slane %v4843_v32, %v12883_v7  ;;  %v4656_v50 = vcombine.high %v4654_v49, %v4654_v49  ;;  %v4720_v45 = vrot.slane %v4654_v49, %v12883_v7 }
 0x254   : > { %v4724_v27 = vrot.slane %v4655_v54, %v12883_v7  ;;  %v4769_v2 = vsel %vm4573_vm8, %v4716_v51, 0.0  ;;  %v4852_v48 = vcombine.high %v4850_v36, %v4850_v36  ;;  %v4916_v17 = vrot.slane %v4850_v36, %v12883_v7 }
 0x255   : > { %v4920_v8 = vrot.slane %v4851_v63, %v12883_v7  ;;  %vm15479_vm13 = vcmp.eq.f32.partialorder %v4912_v22, %v12886_v9  ;;  %v4728_v44 = vrot.slane %v4656_v50, %v12883_v7  ;;  %v4770_v47 = vsel %vm15463_vm9, %v4720_v45, 0.0 }
 0x256   : > { %v4771_v62 = vsel %vm4575_vm10, %v4724_v27, 0.0  ;;  %v5039_v24 = vrot.slane %v12600_v53, %v12881_v6  ;;  %v4924_v5 = vrot.slane %v4852_v48, %v12883_v7  ;;  %vm15491_vm14 = vcmp.eq.f32.partialorder %v4916_v17, %v12886_v9 }
 0x257   : > { %vm4967_vm15 = vcmp.eq.f32.partialorder %v4920_v8, %v12886_v9  ;;  %v5046_v1 = vrot.slane %v5032_v30, %v12881_v6  ;;  %v4772_v28 = vsel %vm4576_vm11, %v4728_v44, 0.0  ;;  %v5243_v32 = vrot.slane %v4377_v12, %v12881_v6 }
 0x258   : > { %v5047_v33 = vcombine.high %v5039_v24, %v5039_v24  ;;  %v5108_v46 = vrot.slane %v5039_v24, %v12883_v7  ;;  %vm4968_vm1 = vcmp.eq.f32.partialorder %v4924_v5, %v12886_v9  ;;  %v5455_v54 = vrot.slane %v4378_v21, %v12881_v6 }
 0x259   : > { %v5048_v53 = vcombine.high %v5046_v1, %v5046_v1  ;;  %v5112_v49 = vrot.slane %v5046_v1, %v12883_v7  ;;  %v5244_v63 = vcombine.high %v5243_v32, %v5243_v32  ;;  %v5251_v34 = vrot.slane %v5243_v32, %v12881_v6 }
 0x25a   : > { %v5116_v51 = vrot.slane %v5047_v33, %v12883_v7  ;;  %v5161_v36 = vsel %vm15479_vm13, %v5108_v46, 0.0  ;;  %v5456_v50 = vcombine.high %v5455_v54, %v5455_v54  ;;  %v5463_v44 = vrot.slane %v5455_v54, %v12881_v6 }
 0x25b   : > { %v5120_v22 = vrot.slane %v5048_v53, %v12883_v7  ;;  %v5162_v12 = vsel %vm15491_vm14, %v5112_v49, 0.0  ;;  %v5177_v30 = vadd.f32 %v5161_v36, %v4769_v2  ;;  %v5258_v21 = vrot.slane %v5244_v63, %v12881_v6 }
 0x25c   : > { %v5163_v45 = vsel %vm4967_vm15, %v5116_v51, 0.0  ;;  %v15513_v27 = vadd.f32 %v5162_v12, %v4770_v47  ;;  %v5259_v48 = vcombine.high %v5251_v34, %v5251_v34  ;;  %v15522_v24 = vrot.slane %v5456_v50, %v12881_v6 }
 0x25d   : > { %v5164_v17 = vsel %vm4968_vm1, %v5120_v22, 0.0  ;;  %v15518_v15 = vadd.f32 %v5163_v45, %v4771_v62  ;;  %v5260_v20 = vcombine.high %v5258_v21, %v5258_v21  ;;  %v5667_v47 = vrot.slane %v15451_v41, %v12881_v6 }
 0x25e   : > { %v15524_v2 = vadd.f32 %v5164_v17, %v4772_v28  ;;  %v5328_v8 = vrot.slane %v5259_v48, %v12883_v7  ;;  %v5471_v1 = vcombine.high %v5463_v44, %v5463_v44  ;;  %v5472_v5 = vcombine.high %v15522_v24, %v15522_v24 }
 0x25f   : > { %v5879_v62 = vrot.slane %v15453_v16, %v12881_v6  ;;  %v8004_v33 = vrot.slane %v15338_v4, %v12883_v7  ;;  %v5332_v46 = vrot.slane %v5260_v20, %v12883_v7  ;;  %v5668_v32 = vcombine.high %v5667_v47, %v5667_v47 }
 0x260   : > { %v5375_v28 = vmul.f32 %v5328_v8, %v5177_v30  ;;  %v5675_v53 = vrot.slane %v5667_v47, %v12881_v6  ;;  %v5540_v49 = vrot.slane %v5471_v1, %v12883_v7  ;;  %v5544_v41 = vrot.slane %v5472_v5, %v12883_v7 }
 0x261   : > { %v5880_v54 = vcombine.high %v5879_v62, %v5879_v62  ;;  %v5887_v51 = vrot.slane %v5879_v62, %v12881_v6  ;;  %v5376_v36 = vmul.f32 %v5332_v46, %v5177_v30  ;;  %v5682_v63 = vrot.slane %v5668_v32, %v12881_v6 }
 0x262   : > { %v5683_v16 = vcombine.high %v5675_v53, %v5675_v53  ;;  %v8089_v22 = vmul.f32 %v8004_v33, %v15160_v35  ;;  %v5587_v4 = vmul.f32 %v5540_v49, %v15513_v27  ;;  %v5588_v12 = vmul.f32 %v5544_v41, %v15513_v27 }
 0x263   : > { %v5894_v50 = vrot.slane %v5880_v54, %v12881_v6  ;;  %v5895_v45 = vcombine.high %v5887_v51, %v5887_v51  ;;  %v5684_v48 = vcombine.high %v5682_v63, %v5682_v63  ;;  %v8428_v20 = vrot.slane %v15344_v56, %v12883_v7 }
 0x264   : > { %v5752_v17 = vrot.slane %v5683_v16, %v12883_v7  ;;  %v8852_v8 = vrot.slane %v15347_v52, %v12883_v7  ;;  %v5603_v47 = vadd.f32 %v5587_v4, %v5375_v28  ;;  %v5604_v1 = vadd.f32 %v5588_v12, %v5376_v36 }
 0x265   : > { %v5896_v5 = vcombine.high %v5894_v50, %v5894_v50  ;;  %v5964_v62 = vrot.slane %v5895_v45, %v12883_v7  ;;  %v5756_v33 = vrot.slane %v5684_v48, %v12883_v7  ;;  %v8513_v32 = vmul.f32 %v8428_v20, %v15170_v31 }
 0x266   : > { %v5799_v46 = vmul.f32 %v5752_v17, %v15518_v15  ;;  %v8937_v49 = vmul.f32 %v8852_v8, %v15172_v26  ;;  %v9276_v52 = vrot.slane %v15362_v29, %v12883_v7  ;;  %v5320_v28 = vrot.slane %v5251_v34, %v12883_v7  ;;  %v12564_v26 = vld.sshfl [vmem:[%s12879_s28 + $0x114] sm:$0x33 pattern:$0x75316420] }
 0x267   : > { %v5968_v41 = vrot.slane %v5896_v5, %v12883_v7  ;;  %v6011_v56 = vmul.f32 %v5964_v62, %v15524_v2  ;;  %v5800_v54 = vmul.f32 %v5756_v33, %v15518_v15  ;;  %v8545_v16 = vadd.f32 %v8513_v32, %v8089_v22  ;;  %v12573_v62 = vld.sshfl [vmem:[%s12879_s28 + $0x1a0] sm:$0x33 pattern:$0x75316420] }
 0x268   : > { %v5815_v36 = vadd.f32 %v5799_v46, %v5603_v47  ;;  %v5324_v4 = vrot.slane %v5258_v21, %v12883_v7  ;;  %v9361_v45 = vmul.f32 %v9276_v52, %v15181_v40  ;;  %v5373_v48 = vmul.f32 %v5320_v28, %v5177_v30 }
 0x269   : > { %v6012_v12 = vmul.f32 %v5968_v41, %v15524_v2  ;;  %v5532_v17 = vrot.slane %v5463_v44, %v12883_v7  ;;  %v5816_v20 = vadd.f32 %v5800_v54, %v5604_v1  ;;  %v8969_v29 = vadd.f32 %v8937_v49, %v8545_v16  ;;  %v12577_v1 = vld.sshfl [vmem:[%s12879_s28 + $0x1a8] sm:$0x33 pattern:$0x75316420] }
 0x26a   : > { %v6027_v8 = vadd.f32 %v6011_v56, %v5815_v36  ;;  %v5374_v34 = vmul.f32 %v5324_v4, %v5177_v30  ;;  %v5536_v5 = vrot.slane %v15522_v24, %v12883_v7  ;;  %v5744_v21 = vrot.slane %v5675_v53, %v12883_v7  ;;  %v12581_v56 = vld.sshfl [vmem:[%s12879_s28 + $0x1a4] sm:$0x33 pattern:$0x75316420] }
 0x26b   : > { %v5585_v22 = vmul.f32 %v5532_v17, %v15513_v27  ;;  %v5748_v47 = vrot.slane %v5682_v63, %v12883_v7  ;;  %v6028_v33 = vadd.f32 %v6012_v12, %v5816_v20  ;;  %v9393_v46 = vadd.f32 %v9361_v45, %v8969_v29 }
 0x26c   : > { %v5956_v32 = vrot.slane %v5887_v51, %v12883_v7  ;;  %v5960_v44 = vrot.slane %v5894_v50, %v12883_v7  ;;  %v5586_v49 = vmul.f32 %v5536_v5, %v15513_v27  ;;  %v5797_v41 = vmul.f32 %v5744_v21, %v15518_v15  ;;  %v12585_v21 = vld.sshfl [vmem:[%s12879_s28 + $0x1ac] sm:$0x33 pattern:$0x75316420] }
 0x26d   : > { %v5601_v30 = vadd.f32 %v5585_v22, %v5373_v48  ;;  %v5798_v24 = vmul.f32 %v5748_v47, %v15518_v15  ;;  %v6054_v52 = vcombine.low %v6027_v8, %v6028_v33  ;;  %9425 = vst.msk [vmem:[#allocation2 + $0x230] sm:$0xff] %vm3520_vm0, %v9393_v46  ;;  %v3668_v28 = vcombine.high %v12573_v62, %v12573_v62 }
 0x26e   : > { %v6009_v53 = vmul.f32 %v5956_v32, %v15524_v2  ;;  %v6010_v63 = vmul.f32 %v5960_v44, %v15524_v2  ;;  %v5602_v51 = vadd.f32 %v5586_v49, %v5374_v34  ;;  %v3675_v50 = vrot.slane %v12573_v62, %v12881_v6  ;;  %v12589_v49 = vld.sshfl [vmem:[%s12879_s28 + $0x1b0] sm:$0x33 pattern:$0x75316420] }
 0x26f   : > { %v5813_v54 = vadd.f32 %v5797_v41, %v5601_v30  ;;  %v3864_v36 = vcombine.high %v12577_v1, %v12577_v1  ;;  %6070 = vst.msk [vmem:[#allocation2 + $0x188] sm:$0xff] %vm3520_vm0, %v6054_v52  ;;  %v3682_v27 = vrot.slane %v3668_v28, %v12881_v6  ;;  %v3871_v15 = vrot.slane %v12577_v1, %v12881_v6 }
 0x270   : > { %v4060_v16 = vcombine.high %v12581_v56, %v12581_v56  ;;  %v4067_v4 = vrot.slane %v12581_v56, %v12881_v6  ;;  %v5814_v12 = vadd.f32 %v5798_v24, %v5602_v51  ;;  %v3683_v48 = vcombine.high %v3675_v50, %v3675_v50 }
 0x271   : > { %v6025_v45 = vadd.f32 %v6009_v53, %v5813_v54  ;;  %v3736_v2 = vrot.slane %v3675_v50, %v12883_v7  ;;  %v3684_v17 = vcombine.high %v3682_v27, %v3682_v27  ;;  %v3740_v20 = vrot.slane %v3682_v27, %v12883_v7 }
 0x272   : > { %v3878_v8 = vrot.slane %v3864_v36, %v12881_v6  ;;  %v3879_v29 = vcombine.high %v3871_v15, %v3871_v15  ;;  %v6026_v34 = vadd.f32 %v6010_v63, %v5814_v12  ;;  %v3744_v5 = vrot.slane %v3683_v48, %v12883_v7 }
 0x273   : > { %vm3777_vm2 = vcmp.eq.f32.partialorder %v3736_v2, %v12886_v9  ;;  %v3932_v22 = vrot.slane %v3871_v15, %v12883_v7  ;;  %v3748_v47 = vrot.slane %v3684_v17, %v12883_v7  ;;  %vm3778_vm3 = vcmp.eq.f32.partialorder %v3740_v20, %v12886_v9 }
 0x274   : > { %v3880_v62 = vcombine.high %v3878_v8, %v3878_v8  ;;  %v3936_v33 = vrot.slane %v3878_v8, %v12883_v7  ;;  %v12031_v46 = vld [vmem:[#allocation2 + $0x230] sm:$0xff]  ;;  %v6053_v32 = vcombine.low %v6025_v45, %v6026_v34  ;;  %vm3779_vm4 = vcmp.eq.f32.partialorder %v3744_v5, %v12886_v9  ;;  %v12593_v34 = vld.sshfl [vmem:[%s12879_s28 + $0x1b8] sm:$0x33 pattern:$0x75316420] }
 0x275   : > { %v3940_v44 = vrot.slane %v3879_v29, %v12883_v7  ;;  %v3973_v1 = vsel %vm3777_vm2, %v3932_v22, 0.0  ;;  %12275 = vmatpush1.msra.mxu1 %v12031_v46  ;;  %vm3780_vm5 = vcmp.eq.f32.partialorder %v3748_v47, %v12886_v9  ;;  %v4074_v24 = vrot.slane %v4060_v16, %v12881_v6 }
 0x276   : > { %v3944_v30 = vrot.slane %v3880_v62, %v12883_v7  ;;  %v3974_v41 = vsel %vm3778_vm3, %v3936_v33, 0.0  ;;  %v12010_v56 = vld [vmem:[#allocation2 + $0x188] sm:$0xff]  ;;  %12276 = vmatprep.subr.mxu1 %v16954_v37  ;;  %6069 = vst.msk [vmem:[#allocation2 + $0x180] sm:$0xff] %vm3520_vm0, %v6053_v32  ;;  %v4075_v53 = vcombine.high %v4067_v4, %v4067_v4  ;;  %v4128_v63 = vrot.slane %v4067_v4, %v12883_v7 }
 0x277   : > { %v3975_v52 = vsel %vm3779_vm4, %v3940_v44, 0.0  ;;  %v4256_v28 = vcombine.high %v12585_v21, %v12585_v21  ;;  %12204 = vmatpush1.msra.mxu0 %v12010_v56  ;;  %v4076_v54 = vcombine.high %v4074_v24, %v4074_v24  ;;  %v4132_v50 = vrot.slane %v4074_v24, %v12883_v7  ;;  %v12597_v33 = vld.sshfl [vmem:[%s12879_s28 + $0x1b4] sm:$0x33 pattern:$0x75316420] }
 0x278   : > { %v3976_v51 = vsel %vm3780_vm5, %v3944_v30, 0.0  ;;  %v4263_v36 = vrot.slane %v12585_v21, %v12881_v6  ;;  %12205 = vmatprep.subr.mxu0 %v16954_v37  ;;  %v4136_v27 = vrot.slane %v4075_v53, %v12883_v7  ;;  %vm4169_vm6 = vcmp.eq.f32.partialorder %v4128_v63, %v12886_v9  ;;  %v12601_v30 = vld.sshfl [vmem:[%s12879_s28 + $0x1bc] sm:$0x33 pattern:$0x75316420] }
 0x279   : > { %v4270_v15 = vrot.slane %v4256_v28, %v12881_v6  ;;  %v4468_v16 = vcombine.high %v12589_v49, %v12589_v49  ;;  %v4140_v4 = vrot.slane %v4076_v54, %v12883_v7  ;;  %vm4170_vm7 = vcmp.eq.f32.partialorder %v4132_v50, %v12886_v9 }
 0x27a   : > { %v4271_v12 = vcombine.high %v4263_v36, %v4263_v36  ;;  %v4324_v45 = vrot.slane %v4263_v36, %v12883_v7  ;;  %vm4171_vm8 = vcmp.eq.f32.partialorder %v4136_v27, %v12886_v9  ;;  %v4475_v17 = vrot.slane %v12589_v49, %v12881_v6 }
 0x27b   : > { %v4272_v48 = vcombine.high %v4270_v15, %v4270_v15  ;;  %v4328_v2 = vrot.slane %v4270_v15, %v12883_v7  ;;  %vm4172_vm9 = vcmp.eq.f32.partialorder %v4140_v4, %v12886_v9  ;;  %v4482_v29 = vrot.slane %v4468_v16, %v12881_v6 }
 0x27c   : > { %v4332_v20 = vrot.slane %v4271_v12, %v12883_v7  ;;  %v4365_v8 = vsel %vm4169_vm6, %v4324_v45, 0.0  ;;  %v4483_v47 = vcombine.high %v4475_v17, %v4475_v17  ;;  %v4536_v49 = vrot.slane %v4475_v17, %v12883_v7 }
 0x27d   : > { %v4336_v5 = vrot.slane %v4272_v48, %v12883_v7  ;;  %v4366_v22 = vsel %vm4170_vm7, %v4328_v2, 0.0  ;;  %v4381_v21 = vadd.f32 %v4365_v8, %v3973_v1  ;;  %v12009_v62 = vld [vmem:[#allocation2 + $0x180] sm:$0xff]  ;;  %v4484_v44 = vcombine.high %v4482_v29, %v4482_v29 }
 0x27e   : > { %v4367_v46 = vsel %vm4171_vm8, %v4332_v20, 0.0  ;;  %v4382_v32 = vadd.f32 %v4366_v22, %v3974_v41  ;;  %12206 = vmatpush1.msra.mxu0 %v12009_v62  ;;  %v4540_v53 = vrot.slane %v4482_v29, %v12883_v7  ;;  %v4544_v63 = vrot.slane %v4483_v47, %v12883_v7 }
 0x27f   : > { %v4368_v24 = vsel %vm4172_vm9, %v4336_v5, 0.0  ;;  %v4383_v56 = vadd.f32 %v4367_v46, %v3975_v52  ;;  %v4548_v1 = vrot.slane %v4484_v44, %v12883_v7  ;;  %vm15633_vm10 = vcmp.eq.f32.partialorder %v4536_v49, %v12886_v9  ;;  %12207 = vmatprep.subr.mxu0 %v16954_v37 }
 0x280   : > { %v15629_v28 = vadd.f32 %v4368_v24, %v3976_v51  ;;  %v4664_v54 = vcombine.high %v12593_v34, %v12593_v34  ;;  %vm15639_vm11 = vcmp.eq.f32.partialorder %v4540_v53, %v12886_v9  ;;  %vm4579_vm13 = vcmp.eq.f32.partialorder %v4544_v63, %v12886_v9 }
 0x281   : > { %v4671_v52 = vrot.slane %v12593_v34, %v12881_v6  ;;  %v4860_v51 = vcombine.high %v12597_v33, %v12597_v33  ;;  %vm4580_vm14 = vcmp.eq.f32.partialorder %v4548_v1, %v12886_v9  ;;  %v4867_v27 = vrot.slane %v12597_v33, %v12881_v6 }
 0x282   : > { %v4678_v36 = vrot.slane %v4664_v54, %v12881_v6  ;;  %v5056_v15 = vcombine.high %v12601_v30, %v12601_v30  ;;  %v5063_v45 = vrot.slane %v12601_v30, %v12881_v6  ;;  %v5267_v41 = vrot.slane %v4381_v21, %v12881_v6 }
 0x283   : > { %v4679_v16 = vcombine.high %v4671_v52, %v4671_v52  ;;  %v4732_v4 = vrot.slane %v4671_v52, %v12883_v7  ;;  %v4874_v12 = vrot.slane %v4860_v51, %v12881_v6  ;;  %v4875_v17 = vcombine.high %v4867_v27, %v4867_v27 }
 0x284   : > { %v4680_v48 = vcombine.high %v4678_v36, %v4678_v36  ;;  %v4736_v2 = vrot.slane %v4678_v36, %v12883_v7  ;;  %v4928_v20 = vrot.slane %v4867_v27, %v12883_v7  ;;  %v5070_v44 = vrot.slane %v5056_v15, %v12881_v6 }
 0x285   : > { %v4740_v8 = vrot.slane %v4679_v16, %v12883_v7  ;;  %v4773_v29 = vsel %vm15633_vm10, %v4732_v4, 0.0  ;;  %v4876_v34 = vcombine.high %v4874_v12, %v4874_v12  ;;  %v4932_v5 = vrot.slane %v4874_v12, %v12883_v7 }
 0x286   : > { %v4744_v22 = vrot.slane %v4680_v48, %v12883_v7  ;;  %v4774_v47 = vsel %vm15639_vm11, %v4736_v2, 0.0  ;;  %v4936_v62 = vrot.slane %v4875_v17, %v12883_v7  ;;  %vm4969_vm15 = vcmp.eq.f32.partialorder %v4928_v20, %v12886_v9  ;;  %v12540_v2 = vld.sshfl [vmem:[%s12879_s28 + $0x100] sm:$0x33 pattern:$0x75316420] }
 0x287   : > { %v4775_v33 = vsel %vm4579_vm13, %v4740_v8, 0.0  ;;  %v4940_v46 = vrot.slane %v4876_v34, %v12883_v7  ;;  %vm4970_vm1 = vcmp.eq.f32.partialorder %v4932_v5, %v12886_v9  ;;  %v5071_v30 = vcombine.high %v5063_v45, %v5063_v45 }
 0x288   : > { %v4776_v49 = vsel %vm4580_vm14, %v4744_v22, 0.0  ;;  %vm4971_vm2 = vcmp.eq.f32.partialorder %v4936_v62, %v12886_v9  ;;  %v5124_v24 = vrot.slane %v5063_v45, %v12883_v7  ;;  %v5072_v53 = vcombine.high %v5070_v44, %v5070_v44 }
 0x289   : > { %vm4972_vm3 = vcmp.eq.f32.partialorder %v4940_v46, %v12886_v9  ;;  %v5128_v63 = vrot.slane %v5070_v44, %v12883_v7  ;;  %v5132_v54 = vrot.slane %v5071_v30, %v12883_v7  ;;  %v5479_v52 = vrot.slane %v4382_v32, %v12881_v6 }
 0x28a   : > { %v5165_v50 = vsel %vm4969_vm15, %v5124_v24, 0.0  ;;  %v5691_v1 = vrot.slane %v4383_v56, %v12881_v6  ;;  %v5136_v51 = vrot.slane %v5072_v53, %v12883_v7  ;;  %v5268_v15 = vcombine.high %v5267_v41, %v5267_v41 }
 0x28b   : > { %v5166_v36 = vsel %vm4970_vm1, %v5128_v63, 0.0  ;;  %v15678_v27 = vadd.f32 %v5165_v50, %v4773_v29  ;;  %v5167_v16 = vsel %vm4971_vm2, %v5132_v54, 0.0  ;;  %v15683_v12 = vrot.slane %v5267_v41, %v12881_v6 }
 0x28c   : > { %v15680_v4 = vadd.f32 %v5166_v36, %v4774_v47  ;;  %v5480_v21 = vcombine.high %v5479_v52, %v5479_v52  ;;  %v5168_v45 = vsel %vm4972_vm3, %v5136_v51, 0.0  ;;  %v15687_v48 = vadd.f32 %v5167_v16, %v4775_v33 }
 0x28d   : > { %v15690_v32 = vrot.slane %v5268_v15, %v12881_v6  ;;  %v15693_v56 = vrot.slane %v5479_v52, %v12881_v6  ;;  %v15696_v17 = vadd.f32 %v5168_v45, %v4776_v49  ;;  %v5283_v20 = vcombine.high %v15683_v12, %v15683_v12 }
 0x28e   : > { %v15701_v8 = vrot.slane %v5480_v21, %v12881_v6  ;;  %v5692_v29 = vcombine.high %v5691_v1, %v5691_v1  ;;  %v15708_v22 = vrot.slane %v5691_v1, %v12881_v6  ;;  %v5903_v47 = vrot.slane %v15629_v28, %v12881_v6 }
 0x28f   : > { %v5284_v34 = vcombine.high %v15690_v32, %v15690_v32  ;;  %v5495_v5 = vcombine.high %v15693_v56, %v15693_v56  ;;  %v5344_v62 = vrot.slane %v5283_v20, %v12883_v7  ;;  %v283_v44 = vcombine.high %v12540_v2, %v12540_v2 }
 0x290   : > { %v5496_v33 = vcombine.high %v15701_v8, %v15701_v8  ;;  %v15716_v46 = vrot.slane %v5692_v29, %v12881_v6  ;;  %v5707_v24 = vcombine.high %v15708_v22, %v15708_v22  ;;  %v5904_v53 = vcombine.high %v5903_v47, %v5903_v47 }
 0x291   : > { %v5348_v49 = vrot.slane %v5284_v34, %v12883_v7  ;;  %v5556_v30 = vrot.slane %v5495_v5, %v12883_v7  ;;  %v5379_v63 = vmul.f32 %v5344_v62, %v15678_v27  ;;  %v15727_v54 = vrot.slane %v5903_v47, %v12881_v6 }
 0x292   : > { %v5560_v28 = vrot.slane %v5496_v33, %v12883_v7  ;;  %v5708_v41 = vcombine.high %v15716_v46, %v15716_v46  ;;  %v5768_v1 = vrot.slane %v5707_v24, %v12883_v7  ;;  %v15733_v51 = vrot.slane %v5904_v53, %v12881_v6  ;;  %v12544_v33 = vld.sshfl [vmem:[%s12879_s28 + $0x108] sm:$0x33 pattern:$0x75316420] }
 0x293   : > { %v5380_v50 = vmul.f32 %v5348_v49, %v15678_v27  ;;  %v5591_v52 = vmul.f32 %v5556_v30, %v15680_v4  ;;  %v5919_v16 = vcombine.high %v15727_v54, %v15727_v54  ;;  %v290_v21 = vrot.slane %v12540_v2, %v12881_v6 }
 0x294   : > { %v5592_v36 = vmul.f32 %v5560_v28, %v15680_v4  ;;  %v5772_v15 = vrot.slane %v5708_v41, %v12883_v7  ;;  %v5803_v20 = vmul.f32 %v5768_v1, %v15687_v48  ;;  %v5920_v29 = vcombine.high %v15733_v51, %v15733_v51  ;;  %v12548_v41 = vld.sshfl [vmem:[%s12879_s28 + $0x104] sm:$0x33 pattern:$0x75316420] }
 0x295   : > { %v5607_v45 = vadd.f32 %v5591_v52, %v5379_v63  ;;  %v297_v34 = vrot.slane %v283_v44, %v12881_v6  ;;  %v5980_v62 = vrot.slane %v5919_v16, %v12883_v7  ;;  %v298_v49 = vcombine.high %v290_v21, %v290_v21  ;;  %v12552_v1 = vld.sshfl [vmem:[%s12879_s28 + $0x10c] sm:$0x33 pattern:$0x75316420] }
 0x296   : > { %v5608_v5 = vadd.f32 %v5592_v36, %v5380_v50  ;;  %v5804_v47 = vmul.f32 %v5772_v15, %v15687_v48  ;;  %v5984_v2 = vrot.slane %v5920_v29, %v12883_v7  ;;  %v359_v53 = vrot.slane %v290_v21, %v12883_v7 }
 0x297   : > { %v5819_v30 = vadd.f32 %v5803_v20, %v5607_v45  ;;  %v299_v24 = vcombine.high %v297_v34, %v297_v34  ;;  %v6015_v28 = vmul.f32 %v5980_v62, %v15696_v17  ;;  %v363_v44 = vrot.slane %v297_v34, %v12883_v7 }
 0x298   : > { %v5820_v63 = vadd.f32 %v5804_v47, %v5608_v5  ;;  %v367_v50 = vrot.slane %v298_v49, %v12883_v7  ;;  %v6016_v52 = vmul.f32 %v5984_v2, %v15696_v17  ;;  %vm15757_vm4 = vcmp.eq.f32.partialorder %v359_v53, %v12886_v9 }
 0x299   : > { %v371_v36 = vrot.slane %v299_v24, %v12883_v7  ;;  %v479_v16 = vcombine.high %v12544_v33, %v12544_v33  ;;  %v6031_v21 = vadd.f32 %v6015_v28, %v5819_v30  ;;  %vm15762_vm5 = vcmp.eq.f32.partialorder %v363_v44, %v12886_v9 }
 0x29a   : > { %vm414_vm6 = vcmp.eq.f32.partialorder %v367_v50, %v12886_v9  ;;  %v486_v20 = vrot.slane %v12544_v33, %v12881_v6  ;;  %v6032_v29 = vadd.f32 %v6016_v52, %v5820_v63  ;;  %v675_v5 = vcombine.high %v12548_v41, %v12548_v41 }
 0x29b   : > { %vm415_vm7 = vcmp.eq.f32.partialorder %v371_v36, %v12886_v9  ;;  %v493_v34 = vrot.slane %v479_v16, %v12881_v6  ;;  %v682_v49 = vrot.slane %v12548_v41, %v12881_v6  ;;  %v871_v30 = vcombine.high %v12552_v1, %v12552_v1  ;;  %v12556_v16 = vld.sshfl [vmem:[%s12879_s28 + $0x110] sm:$0x33 pattern:$0x75316420] }
 0x29c   : > { %v494_v47 = vcombine.high %v486_v20, %v486_v20  ;;  %v555_v62 = vrot.slane %v486_v20, %v12883_v7  ;;  %v6056_v2 = vcombine.low %v6031_v21, %v6032_v29  ;;  %v689_v33 = vrot.slane %v675_v5, %v12881_v6 }
 0x29d   : > { %v495_v24 = vcombine.high %v493_v34, %v493_v34  ;;  %v559_v53 = vrot.slane %v493_v34, %v12883_v7  ;;  %v690_v44 = vcombine.high %v682_v49, %v682_v49  ;;  %v751_v52 = vrot.slane %v682_v49, %v12883_v7 }
 0x29e   : > { %v563_v63 = vrot.slane %v494_v47, %v12883_v7  ;;  %v608_v28 = vsel %vm15757_vm4, %v555_v62, 0.0  ;;  %6072 = vst.msk [vmem:[#allocation2 + $0x228] sm:$0xff] %vm3520_vm0, %v6056_v2  ;;  %v691_v20 = vcombine.high %v689_v33, %v689_v33  ;;  %v755_v29 = vrot.slane %v689_v33, %v12883_v7  ;;  %v12560_v62 = vld.sshfl [vmem:[%s12879_s28 + $0x118] sm:$0x33 pattern:$0x75316420] }
 0x29f   : > { %v567_v41 = vrot.slane %v495_v24, %v12883_v7  ;;  %v609_v21 = vsel %vm15762_vm5, %v559_v53, 0.0  ;;  %v759_v15 = vrot.slane %v690_v44, %v12883_v7  ;;  %vm15788_vm8 = vcmp.eq.f32.partialorder %v751_v52, %v12886_v9 }
 0x2a0   : > { %v610_v34 = vsel %vm414_vm6, %v563_v63, 0.0  ;;  %v878_v47 = vrot.slane %v12552_v1, %v12881_v6  ;;  %v763_v49 = vrot.slane %v691_v20, %v12883_v7  ;;  %vm805_vm9 = vcmp.eq.f32.partialorder %v755_v29, %v12886_v9 }
 0x2a1   : > { %v611_v45 = vsel %vm415_vm7, %v567_v41, 0.0  ;;  %v885_v50 = vrot.slane %v871_v30, %v12881_v6  ;;  %vm806_vm10 = vcmp.eq.f32.partialorder %v759_v15, %v12886_v9  ;;  %v1083_v53 = vcombine.high %v12556_v16, %v12556_v16 }
 0x2a2   : > { %v886_v2 = vcombine.high %v878_v47, %v878_v47  ;;  %v947_v24 = vrot.slane %v878_v47, %v12883_v7  ;;  %vm807_vm11 = vcmp.eq.f32.partialorder %v763_v49, %v12886_v9  ;;  %v1090_v36 = vrot.slane %v12556_v16, %v12881_v6 }
 0x2a3   : > { %v887_v1 = vcombine.high %v885_v50, %v885_v50  ;;  %v951_v33 = vrot.slane %v885_v50, %v12883_v7  ;;  %v1097_v30 = vrot.slane %v1083_v53, %v12881_v6  ;;  %v1279_v52 = vcombine.high %v12560_v62, %v12560_v62 }
 0x2a4   : > { %v955_v63 = vrot.slane %v886_v2, %v12883_v7  ;;  %v1000_v44 = vsel %vm15788_vm8, %v947_v24, 0.0  ;;  %v1098_v47 = vcombine.high %v1090_v36, %v1090_v36  ;;  %v1159_v5 = vrot.slane %v1090_v36, %v12883_v7 }
 0x2a5   : > { %v959_v41 = vrot.slane %v887_v1, %v12883_v7  ;;  %v1001_v20 = vsel %vm805_vm9, %v951_v33, 0.0  ;;  %v15809_v29 = vadd.f32 %v1000_v44, %v608_v28  ;;  %v12030_v40 = vld [vmem:[#allocation2 + $0x228] sm:$0xff]  ;;  %v1099_v2 = vcombine.high %v1097_v30, %v1097_v30  ;;  %v12568_v33 = vld.sshfl [vmem:[%s12879_s28 + $0x11c] sm:$0x33 pattern:$0x75316420] }
 0x2a6   : > { %v1002_v16 = vsel %vm806_vm10, %v955_v63, 0.0  ;;  %v15814_v50 = vadd.f32 %v1001_v20, %v609_v21  ;;  %12277 = vmatpush1.msra.mxu1 %v12030_v40  ;;  %v1163_v28 = vrot.slane %v1097_v30, %v12883_v7  ;;  %v1167_v1 = vrot.slane %v1098_v47, %v12883_v7 }
 0x2a7   : > { %v1003_v24 = vsel %vm807_vm11, %v959_v41, 0.0  ;;  %v15819_v53 = vadd.f32 %v1002_v16, %v610_v34  ;;  %12278 = vmatprep.subr.mxu1 %v16954_v37  ;;  %v1171_v21 = vrot.slane %v1099_v2, %v12883_v7  ;;  %vm1212_vm13 = vcmp.eq.f32.partialorder %v1159_v5, %v12886_v9 }
 0x2a8   : > { %v15825_v15 = vadd.f32 %v1003_v24, %v611_v45  ;;  %v1286_v40 = vrot.slane %v12560_v62, %v12881_v6  ;;  %vm15831_vm14 = vcmp.eq.f32.partialorder %v1163_v28, %v12886_v9  ;;  %vm1214_vm15 = vcmp.eq.f32.partialorder %v1167_v1, %v12886_v9 }
 0x2a9   : > { %v1293_v34 = vrot.slane %v1279_v52, %v12881_v6  ;;  %v1475_v36 = vcombine.high %v12564_v26, %v12564_v26  ;;  %vm1215_vm1 = vcmp.eq.f32.partialorder %v1171_v21, %v12886_v9  ;;  %v1482_v44 = vrot.slane %v12564_v26, %v12881_v6 }
 0x2aa   : > { %v1294_v45 = vcombine.high %v1286_v40, %v1286_v40  ;;  %v1355_v63 = vrot.slane %v1286_v40, %v12883_v7  ;;  %v1671_v20 = vcombine.high %v12568_v33, %v12568_v33 }
 0x2ab   : > { %v1295_v30 = vcombine.high %v1293_v34, %v1293_v34  ;;  %v1359_v62 = vrot.slane %v1293_v34, %v12883_v7  ;;  %v1489_v41 = vrot.slane %v1475_v36, %v12881_v6  ;;  %v1490_v2 = vcombine.high %v1482_v44, %v1482_v44 }
 0x2ac   : > { %v1363_v47 = vrot.slane %v1294_v45, %v12883_v7  ;;  %v1408_v16 = vsel %vm1212_vm13, %v1355_v63, 0.0  ;;  %v1551_v52 = vrot.slane %v1482_v44, %v12883_v7  ;;  %v1678_v36 = vrot.slane %v12568_v33, %v12881_v6 }
 0x2ad   : > { %v1367_v5 = vrot.slane %v1295_v30, %v12883_v7  ;;  %v1409_v24 = vsel %vm15831_vm14, %v1359_v62, 0.0  ;;  %v1491_v28 = vcombine.high %v1489_v41, %v1489_v41  ;;  %v1555_v26 = vrot.slane %v1489_v41, %v12883_v7 }
 0x2ae   : > { %v1410_v40 = vsel %vm1214_vm15, %v1363_v47, 0.0  ;;  %v1559_v34 = vrot.slane %v1490_v2, %v12883_v7  ;;  %vm1604_vm2 = vcmp.eq.f32.partialorder %v1551_v52, %v12886_v9  ;;  %v1685_v49 = vrot.slane %v1671_v20, %v12881_v6 }
 0x2af   : > { %v1411_v45 = vsel %vm1215_vm1, %v1367_v5, 0.0  ;;  %v1563_v63 = vrot.slane %v1491_v28, %v12883_v7  ;;  %vm1605_vm3 = vcmp.eq.f32.partialorder %v1555_v26, %v12886_v9  ;;  %v1686_v44 = vcombine.high %v1678_v36, %v1678_v36 }
 0x2b0   : > { %vm1606_vm4 = vcmp.eq.f32.partialorder %v1559_v34, %v12886_v9  ;;  %v1747_v1 = vrot.slane %v1678_v36, %v12883_v7  ;;  %v1926_v30 = vcombine.high %v15809_v29, %v15809_v29  ;;  %v1687_v33 = vcombine.high %v1685_v49, %v1685_v49 }
 0x2b1   : > { %vm1607_vm5 = vcmp.eq.f32.partialorder %v1563_v63, %v12886_v9  ;;  %v1751_v21 = vrot.slane %v1685_v49, %v12883_v7  ;;  %v2350_v62 = vcombine.high %v15814_v50, %v15814_v50  ;;  %v1755_v41 = vrot.slane %v1686_v44, %v12883_v7 }
 0x2b2   : > { %v1800_v47 = vsel %vm1604_vm2, %v1747_v1, 0.0  ;;  %v1940_v20 = vrot.slane %v1926_v30, %v12881_v6  ;;  %v2774_v2 = vcombine.high %v15819_v53, %v15819_v53  ;;  %v1759_v52 = vrot.slane %v1687_v33, %v12883_v7 }
 0x2b3   : > { %v1801_v5 = vsel %vm1605_vm3, %v1751_v21, 0.0  ;;  %v15871_v28 = vadd.f32 %v1800_v47, %v1408_v16  ;;  %v2364_v26 = vrot.slane %v2350_v62, %v12881_v6  ;;  %v1802_v36 = vsel %vm1606_vm4, %v1755_v41, 0.0 }
 0x2b4   : > { %v15876_v49 = vadd.f32 %v1801_v5, %v1409_v24  ;;  %v1942_v0 = vcombine.high %v1940_v20, %v1940_v20  ;;  %v2788_v44 = vrot.slane %v2774_v2, %v12881_v6  ;;  %v1803_v1 = vsel %vm1607_vm5, %v1759_v52, 0.0 }
 0x2b5   : > { %v15881_v30 = vadd.f32 %v1802_v36, %v1410_v40  ;;  %v2366_v23 = vcombine.high %v2364_v26, %v2364_v26  ;;  %v3198_v16 = vcombine.high %v15825_v15, %v15825_v15  ;;  %v15885_v33 = vadd.f32 %v1803_v1, %v1411_v45 }
 0x2b6   : > { %v15888_v21 = vrot.slane %v1942_v0, %v12881_v6  ;;  %v2790_v34 = vcombine.high %v2788_v44, %v2788_v44  ;;  %v5336_v24 = vrot.slane %v15683_v12, %v12883_v7  ;;  %v5340_v40 = vrot.slane %v15690_v32, %v12883_v7 }
 0x2b7   : > { %v15893_v62 = vrot.slane %v2366_v23, %v12881_v6  ;;  %v3212_v63 = vrot.slane %v3198_v16, %v12881_v6  ;;  %v5548_v41 = vrot.slane %v15693_v56, %v12883_v7  ;;  %v5552_v23 = vrot.slane %v15701_v8, %v12883_v7 }
 0x2b8   : > { %v1974_v45 = vcombine.high %v15888_v21, %v15888_v21  ;;  %v15903_v0 = vrot.slane %v2790_v34, %v12881_v6  ;;  %v5377_v47 = vmul.f32 %v5336_v24, %v15678_v27  ;;  %v5378_v32 = vmul.f32 %v5340_v40, %v15678_v27 }
 0x2b9   : > { %v2398_v12 = vcombine.high %v15893_v62, %v15893_v62  ;;  %v3214_v2 = vcombine.high %v3212_v63, %v3212_v63  ;;  %v5589_v52 = vmul.f32 %v5548_v41, %v15680_v4  ;;  %v5590_v36 = vmul.f32 %v5552_v23, %v15680_v4 }
 0x2ba   : > { %v2119_v56 = vrot.slane %v1974_v45, %v12883_v7  ;;  %v2822_v5 = vcombine.high %v15903_v0, %v15903_v0  ;;  %v5760_v1 = vrot.slane %v15708_v22, %v12883_v7  ;;  %v5764_v27 = vrot.slane %v15716_v46, %v12883_v7 }
 0x2bb   : > { %v2543_v8 = vrot.slane %v2398_v12, %v12883_v7  ;;  %v15920_v16 = vrot.slane %v3214_v2, %v12881_v6  ;;  %v5605_v34 = vadd.f32 %v5589_v52, %v5377_v47  ;;  %v5606_v41 = vadd.f32 %v5590_v36, %v5378_v32 }
 0x2bc   : > { %v2207_v24 = vmul.f32 %v2119_v56, %v15871_v28  ;;  %v2967_v40 = vrot.slane %v2822_v5, %v12883_v7  ;;  %v5801_v45 = vmul.f32 %v5760_v1, %v15687_v48  ;;  %v5802_v23 = vmul.f32 %v5764_v27, %v15687_v48 }
 0x2bd   : > { %v2631_v4 = vmul.f32 %v2543_v8, %v15876_v49  ;;  %v3246_v22 = vcombine.high %v15920_v16, %v15920_v16  ;;  %v5972_v47 = vrot.slane %v15727_v54, %v12883_v7  ;;  %v5976_v2 = vrot.slane %v15733_v51, %v12883_v7 }
 0x2be   : > { %v3055_v46 = vmul.f32 %v2967_v40, %v15881_v30  ;;  %v5817_v12 = vadd.f32 %v5801_v45, %v5605_v34  ;;  %v15937_v32 = vrot.slane %v1940_v20, %v12881_v6  ;;  %v5818_v5 = vadd.f32 %v5802_v23, %v5606_v41  ;;  %v12541_v20 = vld.sshfl [vmem:[%s12879_s28 + $0x180] sm:$0x33 pattern:$0x75316420] }
 0x2bf   : > { %v2663_v52 = vadd.f32 %v2631_v4, %v2207_v24  ;;  %v3391_v56 = vrot.slane %v3246_v22, %v12883_v7  ;;  %v6013_v36 = vmul.f32 %v5972_v47, %v15696_v17  ;;  %v6014_v48 = vmul.f32 %v5976_v2, %v15696_v17  ;;  %v12545_v4 = vld.sshfl [vmem:[%s12879_s28 + $0x188] sm:$0x33 pattern:$0x75316420] }
 0x2c0   : > { %v1972_v54 = vcombine.high %v15937_v32, %v15937_v32  ;;  %v15945_v1 = vrot.slane %v2364_v26, %v12881_v6  ;;  %v15948_v51 = vrot.slane %v2788_v44, %v12881_v6  ;;  %v15953_v24 = vrot.slane %v3212_v63, %v12881_v6 }
 0x2c1   : > { %v3087_v8 = vadd.f32 %v3055_v46, %v2663_v52  ;;  %v3479_v34 = vmul.f32 %v3391_v56, %v15885_v33  ;;  %v6029_v27 = vadd.f32 %v6013_v36, %v5817_v12  ;;  %v6030_v40 = vadd.f32 %v6014_v48, %v5818_v5 }
 0x2c2   : > { %v2115_v17 = vrot.slane %v1972_v54, %v12883_v7  ;;  %v2396_v41 = vcombine.high %v15945_v1, %v15945_v1  ;;  %v2820_v26 = vcombine.high %v15948_v51, %v15948_v51  ;;  %v3244_v44 = vcombine.high %v15953_v24, %v15953_v24 }
 0x2c3   : > { %v3511_v45 = vadd.f32 %v3479_v34, %v3087_v8  ;;  %v307_v22 = vcombine.high %v12541_v20, %v12541_v20  ;;  %v314_v23 = vrot.slane %v12541_v20, %v12881_v6  ;;  %v6055_v47 = vcombine.low %v6029_v27, %v6030_v40 }
 0x2c4   : > { %v2206_v63 = vmul.f32 %v2115_v17, %v15871_v28  ;;  %v2539_v46 = vrot.slane %v2396_v41, %v12883_v7  ;;  %v2963_v12 = vrot.slane %v2820_v26, %v12883_v7  ;;  %v3387_v2 = vrot.slane %v3244_v44, %v12883_v7  ;;  %v12549_v41 = vld.sshfl [vmem:[%s12879_s28 + $0x184] sm:$0x33 pattern:$0x75316420] }
 0x2c5   : > { %3544 = vst.msk [vmem:[#allocation2 + $0x178] sm:$0xff] %vm3520_vm0, %v3511_v45  ;;  %v321_v52 = vrot.slane %v307_v22, %v12881_v6  ;;  %v322_v56 = vcombine.high %v314_v23, %v314_v23  ;;  %v375_v5 = vrot.slane %v314_v23, %v12883_v7  ;;  %6071 = vst.msk [vmem:[#allocation2 + $0x220] sm:$0xff] %vm3520_vm0, %v6055_v47  ;;  %v12553_v47 = vld.sshfl [vmem:[%s12879_s28 + $0x18c] sm:$0x33 pattern:$0x75316420] }
 0x2c6   : > { %v2630_v36 = vmul.f32 %v2539_v46, %v15876_v49  ;;  %v3054_v48 = vmul.f32 %v2963_v12, %v15881_v30  ;;  %v503_v54 = vcombine.high %v12545_v4, %v12545_v4  ;;  %v510_v20 = vrot.slane %v12545_v4, %v12881_v6 }
 0x2c7   : > { %v3478_v8 = vmul.f32 %v3387_v2, %v15885_v33  ;;  %v323_v34 = vcombine.high %v321_v52, %v321_v52  ;;  %v379_v27 = vrot.slane %v321_v52, %v12883_v7  ;;  %v383_v40 = vrot.slane %v322_v56, %v12883_v7  ;;  %v12557_v2 = vld.sshfl [vmem:[%s12879_s28 + $0x190] sm:$0x33 pattern:$0x75316420] }
 0x2c8   : > { %v2662_v17 = vadd.f32 %v2630_v36, %v2206_v63  ;;  %vm416_vm6 = vcmp.eq.f32.partialorder %v375_v5, %v12886_v9  ;;  %v517_v26 = vrot.slane %v503_v54, %v12881_v6  ;;  %v518_v45 = vcombine.high %v510_v20, %v510_v20 }
 0x2c9   : > { %v387_v44 = vrot.slane %v323_v34, %v12883_v7  ;;  %vm15983_vm7 = vcmp.eq.f32.partialorder %v379_v27, %v12886_v9  ;;  %vm418_vm8 = vcmp.eq.f32.partialorder %v383_v40, %v12886_v9  ;;  %v571_v22 = vrot.slane %v510_v20, %v12883_v7 }
 0x2ca   : > { %v3086_v23 = vadd.f32 %v3054_v48, %v2662_v17  ;;  %v519_v63 = vcombine.high %v517_v26, %v517_v26  ;;  %v575_v46 = vrot.slane %v517_v26, %v12883_v7  ;;  %v579_v12 = vrot.slane %v518_v45, %v12883_v7 }
 0x2cb   : > { %vm419_vm9 = vcmp.eq.f32.partialorder %v387_v44, %v12886_v9  ;;  %v612_v52 = vsel %vm416_vm6, %v571_v22, 0.0  ;;  %v699_v56 = vcombine.high %v12549_v41, %v12549_v41  ;;  %v706_v5 = vrot.slane %v12549_v41, %v12881_v6 }
 0x2cc   : > { %v12008_v36 = vld [vmem:[#allocation2 + $0x178] sm:$0xff]  ;;  %v3510_v54 = vadd.f32 %v3478_v8, %v3086_v23  ;;  %v583_v34 = vrot.slane %v519_v63, %v12883_v7  ;;  %v613_v48 = vsel %vm15983_vm7, %v575_v46, 0.0  ;;  %v614_v20 = vsel %vm418_vm8, %v579_v12, 0.0  ;;  %v12029_v27 = vld [vmem:[#allocation2 + $0x220] sm:$0xff] }
 0x2cd   : > { %12208 = vmatpush1.msra.mxu0 %v12008_v36  ;;  %v713_v17 = vrot.slane %v699_v56, %v12881_v6  ;;  %v714_v26 = vcombine.high %v706_v5, %v706_v5  ;;  %v767_v45 = vrot.slane %v706_v5, %v12883_v7  ;;  %v895_v22 = vcombine.high %v12553_v47, %v12553_v47 }
 0x2ce   : > { %12279 = vmatpush1.msra.mxu1 %v12029_v27  ;;  %12209 = vmatprep.subr.mxu0 %v16954_v37  ;;  %3543 = vst.msk [vmem:[#allocation2 + $0x170] sm:$0xff] %vm3520_vm0, %v3510_v54  ;;  %v615_v8 = vsel %vm419_vm9, %v583_v34, 0.0  ;;  %v902_v41 = vrot.slane %v12553_v47, %v12881_v6  ;;  %v1107_v40 = vcombine.high %v12557_v2, %v12557_v2 }
 0x2cf   : > { %v1114_v4 = vrot.slane %v12557_v2, %v12881_v6  ;;  %12280 = vmatprep.subr.mxu1 %v16954_v37  ;;  %v715_v23 = vcombine.high %v713_v17, %v713_v17  ;;  %v771_v63 = vrot.slane %v713_v17, %v12883_v7  ;;  %v775_v46 = vrot.slane %v714_v26, %v12883_v7  ;;  %v12561_v17 = vld.sshfl [vmem:[%s12879_s28 + $0x198] sm:$0x33 pattern:$0x75316420] }
 0x2d0   : > { %vm808_vm10 = vcmp.eq.f32.partialorder %v767_v45, %v12886_v9  ;;  %v909_v12 = vrot.slane %v895_v22, %v12881_v6  ;;  %v910_v56 = vcombine.high %v902_v41, %v902_v41  ;;  %v963_v44 = vrot.slane %v902_v41, %v12883_v7  ;;  %v12565_v41 = vld.sshfl [vmem:[%s12879_s28 + $0x194] sm:$0x33 pattern:$0x75316420] }
 0x2d1   : > { %v1121_v47 = vrot.slane %v1107_v40, %v12881_v6  ;;  %v779_v2 = vrot.slane %v715_v23, %v12883_v7  ;;  %vm809_vm11 = vcmp.eq.f32.partialorder %v771_v63, %v12886_v9  ;;  %vm810_vm13 = vcmp.eq.f32.partialorder %v775_v46, %v12886_v9 }
 0x2d2   : > { %v1122_v5 = vcombine.high %v1114_v4, %v1114_v4  ;;  %v911_v36 = vcombine.high %v909_v12, %v909_v12  ;;  %v967_v54 = vrot.slane %v909_v12, %v12883_v7  ;;  %v971_v34 = vrot.slane %v910_v56, %v12883_v7  ;;  %v12569_v12 = vld.sshfl [vmem:[%s12879_s28 + $0x19c] sm:$0x33 pattern:$0x75316420] }
 0x2d3   : > { %v1004_v27 = vsel %vm808_vm10, %v963_v44, 0.0  ;;  %vm811_vm14 = vcmp.eq.f32.partialorder %v779_v2, %v12886_v9  ;;  %v1123_v45 = vcombine.high %v1121_v47, %v1121_v47  ;;  %v1175_v22 = vrot.slane %v1114_v4, %v12883_v7 }
 0x2d4   : > { %v16022_v26 = vadd.f32 %v1004_v27, %v612_v52  ;;  %v975_v40 = vrot.slane %v911_v36, %v12883_v7  ;;  %v1005_v23 = vsel %vm809_vm11, %v967_v54, 0.0  ;;  %v1006_v63 = vsel %vm810_vm13, %v971_v34, 0.0 }
 0x2d5   : > { %v1179_v46 = vrot.slane %v1121_v47, %v12883_v7  ;;  %v12007_v42 = vld [vmem:[#allocation2 + $0x170] sm:$0xff]  ;;  %v16029_v59 = vadd.f32 %v1005_v23, %v613_v48  ;;  %v16031_v56 = vadd.f32 %v1006_v63, %v614_v20  ;;  %v1183_v44 = vrot.slane %v1122_v5, %v12883_v7 }
 0x2d6   : > { %v1187_v52 = vrot.slane %v1123_v45, %v12883_v7  ;;  %12210 = vmatpush1.msra.mxu0 %v12007_v42  ;;  %v1007_v4 = vsel %vm811_vm14, %v975_v40, 0.0  ;;  %vm16038_vm15 = vcmp.eq.f32.partialorder %v1175_v22, %v12886_v9  ;;  %v1303_v48 = vcombine.high %v12561_v17, %v12561_v17 }
 0x2d7   : > { %vm16043_vm1 = vcmp.eq.f32.partialorder %v1179_v46, %v12886_v9  ;;  %v16047_v20 = vadd.f32 %v1007_v4, %v615_v8  ;;  %vm1218_vm2 = vcmp.eq.f32.partialorder %v1183_v44, %v12886_v9  ;;  %v1310_v42 = vrot.slane %v12561_v17, %v12881_v6  ;;  %12211 = vmatprep.subr.mxu0 %v16954_v37 }
 0x2d8   : > { %vm1219_vm3 = vcmp.eq.f32.partialorder %v1187_v52, %v12886_v9  ;;  %v1317_v2 = vrot.slane %v1303_v48, %v12881_v6  ;;  %v1499_v5 = vcombine.high %v12565_v41, %v12565_v41  ;;  %v1506_v54 = vrot.slane %v12565_v41, %v12881_v6 }
 0x2d9   : > { %v1695_v34 = vcombine.high %v12569_v12, %v12569_v12  ;;  %v1318_v27 = vcombine.high %v1310_v42, %v1310_v42  ;;  %v1371_v45 = vrot.slane %v1310_v42, %v12883_v7  ;;  %v1702_v8 = vrot.slane %v12569_v12, %v12881_v6 }
 0x2da   : > { %v1975_v22 = vcombine.high %v16022_v26, %v16022_v26  ;;  %v1319_v40 = vcombine.high %v1317_v2, %v1317_v2  ;;  %v1375_v23 = vrot.slane %v1317_v2, %v12883_v7  ;;  %v1513_v17 = vrot.slane %v1499_v5, %v12881_v6 }
 0x2db   : > { %v1514_v63 = vcombine.high %v1506_v54, %v1506_v54  ;;  %v1379_v46 = vrot.slane %v1318_v27, %v12883_v7  ;;  %v1412_v41 = vsel %vm16038_vm15, %v1371_v45, 0.0  ;;  %v1567_v4 = vrot.slane %v1506_v54, %v12883_v7 }
 0x2dc   : > { %v1709_v48 = vrot.slane %v1695_v34, %v12881_v6  ;;  %v1383_v12 = vrot.slane %v1319_v40, %v12883_v7  ;;  %v1413_v42 = vsel %vm16043_vm1, %v1375_v23, 0.0  ;;  %v1515_v13 = vcombine.high %v1513_v17, %v1513_v17 }
 0x2dd   : > { %v1571_v2 = vrot.slane %v1513_v17, %v12883_v7  ;;  %v1414_v5 = vsel %vm1218_vm2, %v1379_v46, 0.0  ;;  %v1575_v27 = vrot.slane %v1514_v63, %v12883_v7  ;;  %vm1608_vm4 = vcmp.eq.f32.partialorder %v1567_v4, %v12886_v9 }
 0x2de   : > { %v1710_v36 = vcombine.high %v1702_v8, %v1702_v8  ;;  %v1415_v54 = vsel %vm1219_vm3, %v1383_v12, 0.0  ;;  %v1579_v34 = vrot.slane %v1515_v13, %v12883_v7  ;;  %v1711_v47 = vcombine.high %v1709_v48, %v1709_v48 }
 0x2df   : > { %vm1609_vm5 = vcmp.eq.f32.partialorder %v1571_v2, %v12886_v9  ;;  %vm1610_vm6 = vcmp.eq.f32.partialorder %v1575_v27, %v12886_v9  ;;  %v1763_v45 = vrot.slane %v1702_v8, %v12883_v7  ;;  %v1767_v44 = vrot.slane %v1709_v48, %v12883_v7 }
 0x2e0   : > { %v1771_v40 = vrot.slane %v1710_v36, %v12883_v7  ;;  %vm1611_vm7 = vcmp.eq.f32.partialorder %v1579_v34, %v12886_v9  ;;  %v1775_v23 = vrot.slane %v1711_v47, %v12883_v7  ;;  %v1989_v52 = vrot.slane %v1975_v22, %v12881_v6 }
 0x2e1   : > { %v2399_v13 = vcombine.high %v16029_v59, %v16029_v59  ;;  %v1804_v17 = vsel %vm1608_vm4, %v1763_v45, 0.0  ;;  %v1805_v63 = vsel %vm1609_vm5, %v1767_v44, 0.0  ;;  %v2823_v4 = vcombine.high %v16031_v56, %v16031_v56 }
 0x2e2   : > { %v1806_v46 = vsel %vm1610_vm6, %v1771_v40, 0.0  ;;  %v1807_v8 = vsel %vm1611_vm7, %v1775_v23, 0.0  ;;  %v16089_v12 = vadd.f32 %v1804_v17, %v1412_v41  ;;  %v16091_v48 = vadd.f32 %v1805_v63, %v1413_v42 }
 0x2e3   : > { %v16093_v2 = vadd.f32 %v1806_v46, %v1414_v5  ;;  %v16095_v27 = vadd.f32 %v1807_v8, %v1415_v54  ;;  %v1991_v36 = vcombine.high %v1989_v52, %v1989_v52  ;;  %v2413_v22 = vrot.slane %v2399_v13, %v12881_v6 }
 0x2e4   : > { %v2837_v34 = vrot.slane %v2823_v4, %v12881_v6  ;;  %v3247_v47 = vcombine.high %v16047_v20, %v16047_v20  ;;  %v2111_v45 = vrot.slane %v15888_v21, %v12883_v7  ;;  %v2535_v41 = vrot.slane %v15893_v62, %v12883_v7 }
 0x2e5   : > { %v2959_v42 = vrot.slane %v15903_v0, %v12883_v7  ;;  %v2019_v5 = vrot.slane %v1991_v36, %v12881_v6  ;;  %v2415_v54 = vcombine.high %v2413_v22, %v2413_v22  ;;  %v3383_v40 = vrot.slane %v15920_v16, %v12883_v7 }
 0x2e6   : > { %v2839_v44 = vcombine.high %v2837_v34, %v2837_v34  ;;  %v3261_v23 = vrot.slane %v3247_v47, %v12881_v6  ;;  %v2205_v13 = vmul.f32 %v2111_v45, %v15871_v28  ;;  %v2629_v17 = vmul.f32 %v2535_v41, %v15876_v49 }
 0x2e7   : > { %v3053_v21 = vmul.f32 %v2959_v42, %v15881_v30  ;;  %v2023_v63 = vcombine.high %v2019_v5, %v2019_v5  ;;  %v2443_v62 = vrot.slane %v2415_v54, %v12881_v6  ;;  %v3477_v46 = vmul.f32 %v3383_v40, %v15885_v33 }
 0x2e8   : > { %v16116_v0 = vrot.slane %v2839_v44, %v12881_v6  ;;  %v3263_v4 = vcombine.high %v3261_v23, %v3261_v23  ;;  %v2661_v8 = vadd.f32 %v2629_v17, %v2205_v13  ;;  %v16120_v16 = vrot.slane %v1989_v52, %v12881_v6 }
 0x2e9   : > { %v16123_v36 = vrot.slane %v2413_v22, %v12881_v6  ;;  %v2151_v47 = vrot.slane %v2023_v63, %v12883_v7  ;;  %v2447_v45 = vcombine.high %v2443_v62, %v2443_v62  ;;  %v16129_v42 = vrot.slane %v2837_v34, %v12881_v6 }
 0x2ea   : > { %v2871_v41 = vcombine.high %v16116_v0, %v16116_v0  ;;  %v3291_v54 = vrot.slane %v3263_v4, %v12881_v6  ;;  %v3085_v44 = vadd.f32 %v3053_v21, %v2661_v8  ;;  %v2021_v40 = vcombine.high %v16120_v16, %v16120_v16 }
 0x2eb   : > { %v2445_v52 = vcombine.high %v16123_v36, %v16123_v36  ;;  %v2215_v22 = vmul.f32 %v2151_v47, %v16089_v12  ;;  %v2575_v13 = vrot.slane %v2447_v45, %v12883_v7  ;;  %v2869_v63 = vcombine.high %v16129_v42, %v16129_v42 }
 0x2ec   : > { %v2999_v17 = vrot.slane %v2871_v41, %v12883_v7  ;;  %v3295_v34 = vcombine.high %v3291_v54, %v3291_v54  ;;  %v3509_v31 = vadd.f32 %v3477_v46, %v3085_v44  ;;  %v2147_v4 = vrot.slane %v2021_v40, %v12883_v7 }
 0x2ed   : > { %v2571_v21 = vrot.slane %v2445_v52, %v12883_v7  ;;  %v2639_v8 = vmul.f32 %v2575_v13, %v16091_v48  ;;  %v2995_v57 = vrot.slane %v2869_v63, %v12883_v7  ;;  %v16147_v47 = vrot.slane %v3261_v23, %v12881_v6 }
 0x2ee   : > { %v3063_v35 = vmul.f32 %v2999_v17, %v16093_v2  ;;  %v3423_v45 = vrot.slane %v3295_v34, %v12883_v7  ;;  %3542 = vst.msk [vmem:[#allocation2 + $0x168] sm:$0xff] %vm3520_vm0, %v3509_v31  ;;  %v2214_v41 = vmul.f32 %v2147_v4, %v16089_v12  ;;  %v2107_v44 = vrot.slane %v15937_v32, %v12883_v7 }
 0x2ef   : > { %v2638_v46 = vmul.f32 %v2571_v21, %v16091_v48  ;;  %v2671_v40 = vadd.f32 %v2639_v8, %v2215_v22  ;;  %v3062_v52 = vmul.f32 %v2995_v57, %v16093_v2  ;;  %v3293_v13 = vcombine.high %v16147_v47, %v16147_v47 }
 0x2f0   : > { %v2531_v23 = vrot.slane %v15945_v1, %v12883_v7  ;;  %v3487_v17 = vmul.f32 %v3423_v45, %v16095_v27  ;;  %v2204_v31 = vmul.f32 %v2107_v44, %v15871_v28  ;;  %v2955_v34 = vrot.slane %v15948_v51, %v12883_v7 }
 0x2f1   : > { %v2670_v63 = vadd.f32 %v2638_v46, %v2214_v41  ;;  %v3095_v4 = vadd.f32 %v3063_v35, %v2671_v40  ;;  %v3419_v32 = vrot.slane %v3293_v13, %v12883_v7  ;;  %v3379_v57 = vrot.slane %v15953_v24, %v12883_v7 }
 0x2f2   : > { %v2628_v22 = vmul.f32 %v2531_v23, %v15876_v49  ;;  %v3052_v8 = vmul.f32 %v2955_v34, %v15881_v30  ;;  %v2143_v1 = vrot.slane %v2019_v5, %v12883_v7  ;;  %v2567_v45 = vrot.slane %v2443_v62, %v12883_v7 }
 0x2f3   : > { %v3094_v21 = vadd.f32 %v3062_v52, %v2670_v63  ;;  %v3519_v41 = vadd.f32 %v3487_v17, %v3095_v4  ;;  %v3486_v46 = vmul.f32 %v3419_v32, %v16095_v27  ;;  %v3476_v35 = vmul.f32 %v3379_v57, %v15885_v33 }
 0x2f4   : > { %v2660_v44 = vadd.f32 %v2628_v22, %v2204_v31  ;;  %v2213_v51 = vmul.f32 %v2143_v1, %v16089_v12  ;;  %v2637_v40 = vmul.f32 %v2567_v45, %v16091_v48  ;;  %v2991_v24 = vrot.slane %v16116_v0, %v12883_v7 }
 0x2f5   : > { %v3415_v52 = vrot.slane %v3291_v54, %v12883_v7  ;;  %3552 = vst.msk [vmem:[#allocation2 + $0x218] sm:$0xff] %vm3520_vm0, %v3519_v41  ;;  %v12006_v5 = vld [vmem:[#allocation2 + $0x168] sm:$0xff]  ;;  %v3518_v13 = vadd.f32 %v3486_v46, %v3094_v21  ;;  %v1933_v23 = vrot.slane %v15809_v29, %v12881_v6  ;;  %v2357_v17 = vrot.slane %v15814_v50, %v12881_v6 }
 0x2f6   : > { %v3084_v62 = vadd.f32 %v3052_v8, %v2660_v44  ;;  %12212 = vmatpush1.msra.mxu0 %v12006_v5  ;;  %v2669_v63 = vadd.f32 %v2637_v40, %v2213_v51  ;;  %v3061_v31 = vmul.f32 %v2991_v24, %v16093_v2  ;;  %v2781_v0 = vrot.slane %v15819_v53, %v12881_v6 }
 0x2f7   : > { %v3485_v34 = vmul.f32 %v3415_v52, %v16095_v27  ;;  %3551 = vst.msk [vmem:[#allocation2 + $0x210] sm:$0xff] %vm3520_vm0, %v3518_v13  ;;  %12213 = vmatprep.subr.mxu0 %v16954_v37  ;;  %v1941_v4 = vcombine.high %v1933_v23, %v1933_v23  ;;  %v2365_v32 = vcombine.high %v2357_v17, %v2357_v17 }
 0x2f8   : > { %v3508_v54 = vadd.f32 %v3476_v35, %v3084_v62  ;;  %v3205_v29 = vrot.slane %v15825_v15, %v12881_v6  ;;  %v3093_v50 = vadd.f32 %v3061_v31, %v2669_v63  ;;  %v2789_v22 = vcombine.high %v2781_v0, %v2781_v0 }
 0x2f9   : > { %v2139_v57 = vrot.slane %v16120_v16, %v12883_v7  ;;  %v2563_v21 = vrot.slane %v16123_v36, %v12883_v7  ;;  %v16197_v53 = vrot.slane %v1941_v4, %v12881_v6  ;;  %v16200_v8 = vrot.slane %v2365_v32, %v12881_v6 }
 0x2fa   : > { %3541 = vst.msk [vmem:[#allocation2 + $0x160] sm:$0xff] %vm3520_vm0, %v3508_v54  ;;  %v3213_v1 = vcombine.high %v3205_v29, %v3205_v29  ;;  %v2987_v15 = vrot.slane %v16129_v42, %v12883_v7  ;;  %v3517_v45 = vadd.f32 %v3485_v34, %v3093_v50  ;;  %v16205_v41 = vrot.slane %v2789_v22, %v12881_v6 }
 0x2fb   : > { %v2212_v16 = vmul.f32 %v2139_v57, %v16089_v12  ;;  %v2636_v36 = vmul.f32 %v2563_v21, %v16091_v48  ;;  %v1973_v46 = vcombine.high %v16197_v53, %v16197_v53  ;;  %v2397_v44 = vcombine.high %v16200_v8, %v16200_v8 }
 0x2fc   : > { %v16214_v35 = vrot.slane %v3213_v1, %v12881_v6  ;;  %v3060_v51 = vmul.f32 %v2987_v15, %v16093_v2  ;;  %v12028_v42 = vld [vmem:[#allocation2 + $0x218] sm:$0xff]  ;;  %3550 = vst.msk [vmem:[#allocation2 + $0x208] sm:$0xff] %vm3520_vm0, %v3517_v45  ;;  %v2821_v40 = vcombine.high %v16205_v41, %v16205_v41  ;;  %v3411_v52 = vrot.slane %v16147_v47, %v12883_v7 }
 0x2fd   : > { %v2668_v24 = vadd.f32 %v2636_v36, %v2212_v16  ;;  %v16223_v5 = vrot.slane %v1933_v23, %v12881_v6  ;;  %12281 = vmatpush1.msra.mxu1 %v12028_v42  ;;  %v2103_v13 = vrot.slane %v1973_v46, %v12883_v7  ;;  %v2527_v62 = vrot.slane %v2397_v44, %v12883_v7 }
 0x2fe   : > { %v3245_v63 = vcombine.high %v16214_v35, %v16214_v35  ;;  %v16230_v31 = vrot.slane %v2357_v17, %v12881_v6  ;;  %12282 = vmatprep.subr.mxu1 %v16954_v37  ;;  %v12027_v34 = vld [vmem:[#allocation2 + $0x210] sm:$0xff]  ;;  %v2951_v54 = vrot.slane %v2821_v40, %v12883_v7  ;;  %v3484_v23 = vmul.f32 %v3411_v52, %v16095_v27 }
 0x2ff   : > { %v3092_v47 = vadd.f32 %v3060_v51, %v2668_v24  ;;  %v1971_v4 = vcombine.high %v16223_v5, %v16223_v5  ;;  %12283 = vmatpush1.msra.mxu1 %v12027_v34  ;;  %v2203_v32 = vmul.f32 %v2103_v13, %v15871_v28  ;;  %v2627_v50 = vmul.f32 %v2527_v62, %v15876_v49 }
 0x300   : > { %v3375_v22 = vrot.slane %v3245_v63, %v12883_v7  ;;  %v2395_v17 = vcombine.high %v16230_v31, %v16230_v31  ;;  %12284 = vmatprep.subr.mxu1 %v16954_v37  ;;  %v3051_v21 = vmul.f32 %v2951_v54, %v15881_v30  ;;  %v16246_v45 = vrot.slane %v2781_v0, %v12881_v6 }
 0x301   : > { %v12005_v57 = vld [vmem:[#allocation2 + $0x160] sm:$0xff]  ;;  %v3516_v1 = vadd.f32 %v3484_v23, %v3092_v47  ;;  %v2099_v15 = vrot.slane %v1971_v4, %v12883_v7  ;;  %v2659_v16 = vadd.f32 %v2627_v50, %v2203_v32  ;;  %v16251_v44 = vrot.slane %v3205_v29, %v12881_v6 }
 0x302   : > { %12214 = vmatpush1.msra.mxu0 %v12005_v57  ;;  %v3475_v36 = vmul.f32 %v3375_v22, %v15885_v33  ;;  %v2523_v46 = vrot.slane %v2395_v17, %v12883_v7  ;;  %v2819_v42 = vcombine.high %v16246_v45, %v16246_v45  ;;  %v1982_v0 = vrot.slane %v16022_v26, %v12881_v6 }
 0x303   : > { %12215 = vmatprep.subr.mxu0 %v16954_v37  ;;  %3549 = vst.msk [vmem:[#allocation2 + $0x200] sm:$0xff] %vm3520_vm0, %v3516_v1  ;;  %v2202_v51 = vmul.f32 %v2099_v15, %v15871_v28  ;;  %v2406_v40 = vrot.slane %v16029_v59, %v12881_v6  ;;  %v12026_v24 = vld [vmem:[#allocation2 + $0x208] sm:$0xff]  ;;  %v3083_v52 = vadd.f32 %v3051_v21, %v2659_v16 }
 0x304   : > { %v2626_v29 = vmul.f32 %v2523_v46, %v15876_v49  ;;  %v3243_v13 = vcombine.high %v16251_v44, %v16251_v44  ;;  %v2830_v62 = vrot.slane %v16031_v56, %v12881_v6  ;;  %12285 = vmatpush1.msra.mxu1 %v12026_v24  ;;  %v2947_v63 = vrot.slane %v2819_v42, %v12883_v7 }
 0x305   : > { %v1990_v34 = vcombine.high %v1982_v0, %v1982_v0  ;;  %v2414_v54 = vcombine.high %v2406_v40, %v2406_v40  ;;  %v3254_v26 = vrot.slane %v16047_v20, %v12881_v6  ;;  %12286 = vmatprep.subr.mxu1 %v16954_v37  ;;  %v3507_v59 = vadd.f32 %v3475_v36, %v3083_v52 }
 0x306   : > { %v2658_v47 = vadd.f32 %v2626_v29, %v2202_v51  ;;  %v3371_v23 = vrot.slane %v3243_v13, %v12883_v7  ;;  %v2838_v4 = vcombine.high %v2830_v62, %v2830_v62  ;;  %v3050_v32 = vmul.f32 %v2947_v63, %v15881_v30 }
 0x307   : > { %v16274_v50 = vrot.slane %v1990_v34, %v12881_v6  ;;  %v16277_v56 = vrot.slane %v2414_v54, %v12881_v6  ;;  %v3262_v22 = vcombine.high %v3254_v26, %v3254_v26  ;;  %3540 = vst.msk [vmem:[#allocation2 + $0x158] sm:$0xff] %vm3520_vm0, %v3507_v59  ;;  %v2095_v57 = vrot.slane %v16197_v53, %v12883_v7 }
 0x308   : > { %v3474_v20 = vmul.f32 %v3371_v23, %v15885_v33  ;;  %v16282_v17 = vrot.slane %v2838_v4, %v12881_v6  ;;  %v2519_v21 = vrot.slane %v16200_v8, %v12883_v7  ;;  %v3082_v1 = vadd.f32 %v3050_v32, %v2658_v47 }
 0x309   : > { %v2022_v15 = vcombine.high %v16274_v50, %v16274_v50  ;;  %v2446_v16 = vcombine.high %v16277_v56, %v16277_v56  ;;  %v16293_v36 = vrot.slane %v3262_v22, %v12881_v6  ;;  %v2201_v42 = vmul.f32 %v2095_v57, %v15871_v28 }
 0x30a   : > { %v12025_v46 = vld [vmem:[#allocation2 + $0x200] sm:$0xff]  ;;  %v2870_v51 = vcombine.high %v16282_v17, %v16282_v17  ;;  %v2625_v53 = vmul.f32 %v2519_v21, %v15876_v49  ;;  %v2943_v8 = vrot.slane %v16205_v41, %v12883_v7  ;;  %v3506_v24 = vadd.f32 %v3474_v20, %v3082_v1 }
 0x30b   : > { %12287 = vmatpush1.msra.mxu1 %v12025_v46  ;;  %v2135_v52 = vrot.slane %v2022_v15, %v12883_v7  ;;  %v2559_v29 = vrot.slane %v2446_v16, %v12883_v7  ;;  %v3294_v13 = vcombine.high %v16293_v36, %v16293_v36  ;;  %v3367_v41 = vrot.slane %v16214_v35, %v12883_v7  ;;  %v11958_v35 = vld [vmem:[%s14475_s5 + $0x28] sm:$0xff] }
 0x30c   : > { %12288 = vmatprep.subr.mxu1 %v16954_v37  ;;  %v2983_v63 = vrot.slane %v2870_v51, %v12883_v7  ;;  %v2657_v34 = vadd.f32 %v2625_v53, %v2201_v42  ;;  %v3049_v54 = vmul.f32 %v2943_v8, %v15881_v30  ;;  %3539 = vst.msk [vmem:[#allocation2 + $0x150] sm:$0xff] %vm3520_vm0, %v3506_v24 }
 0x30d   : > { %v2211_v59 = vmul.f32 %v2135_v52, %v16089_v12  ;;  %v2635_v47 = vmul.f32 %v2559_v29, %v16091_v48  ;;  %v3407_v23 = vrot.slane %v3294_v13, %v12883_v7  ;;  %v16315_v4 = vrot.slane %v1982_v0, %v12881_v6  ;;  %12668 = vmatprep.mubr.msk.f32.mxu0 %vm12041_vm12, %v11958_v35 }
 0x30e   : > { %v3059_v32 = vmul.f32 %v2983_v63, %v16093_v2  ;;  %v3081_v22 = vadd.f32 %v3049_v54, %v2657_v34  ;;  %v3473_v20 = vmul.f32 %v3367_v41, %v15885_v33  ;;  %v16320_v57 = vrot.slane %v2406_v40, %v12881_v6  ;;  %v12004_v21 = vld [vmem:[#allocation2 + $0x158] sm:$0xff] }
 0x30f   : > { %v2667_v1 = vadd.f32 %v2635_v47, %v2211_v59  ;;  %v3483_v15 = vmul.f32 %v3407_v23, %v16095_v27  ;;  %v2020_v16 = vcombine.high %v16315_v4, %v16315_v4  ;;  %v16327_v46 = vrot.slane %v2830_v62, %v12881_v6  ;;  %12216 = vmatpush1.msra.mxu0 %v12004_v21 }
 0x310   : > { %v3505_v0 = vadd.f32 %v3473_v20, %v3081_v22  ;;  %v2444_v51 = vcombine.high %v16320_v57, %v16320_v57  ;;  %v16333_v40 = vrot.slane %v3254_v26, %v12881_v6  ;;  %v2091_v42 = vrot.slane %v16223_v5, %v12883_v7  ;;  %12217 = vmatprep.subr.mxu0 %v16954_v37  ;;  %v12636_v22 = vld.sshfl [vmem:[%s12879_s28 + $0x160] sm:$0x33 pattern:$0x75316420]  ;;  %v11960_v20 = vld [vmem:[%s14475_s5 + $0x38] sm:$0xff] }
 0x311   : > { %v3091_v53 = vadd.f32 %v3059_v32, %v2667_v1  ;;  %v2131_v8 = vrot.slane %v2020_v16, %v12883_v7  ;;  %v2868_v62 = vcombine.high %v16327_v46, %v16327_v46  ;;  %v2515_v24 = vrot.slane %v16230_v31, %v12883_v7  ;;  %v12640_v1 = vld.sshfl [vmem:[%s12879_s28 + $0x168] sm:$0x33 pattern:$0x75316420]  ;;  %12669 = vmatprep.mubr.msk.f32.mxu1 %vm12041_vm12, %v11960_v20 }
 0x312   : > { %3538 = vst.msk [vmem:[#allocation2 + $0x148] sm:$0xff] %vm3520_vm0, %v3505_v0  ;;  %v2555_v52 = vrot.slane %v2444_v51, %v12883_v7  ;;  %v3292_v26 = vcombine.high %v16333_v40, %v16333_v40  ;;  %v2200_v5 = vmul.f32 %v2091_v42, %v15871_v28  ;;  %v2939_v29 = vrot.slane %v16246_v45, %v12883_v7  ;;  %v12111_v0 = vpop.f32.mrf.mxu0  ;;  %v12184_v51 = vpop.f32.mrf.mxu1  ;;  %v12648_v20 = vld.sshfl [vmem:[%s12879_s28 + $0x16c] sm:$0x33 pattern:$0x75316420] }
 0x313   : > { %v3515_v13 = vadd.f32 %v3483_v15, %v3091_v53  ;;  %v2210_v63 = vmul.f32 %v2131_v8, %v16089_v12  ;;  %v2979_v34 = vrot.slane %v2868_v62, %v12883_v7  ;;  %v2624_v31 = vmul.f32 %v2515_v24, %v15876_v49  ;;  %v12003_v54 = vld [vmem:[#allocation2 + $0x150] sm:$0xff]  ;;  %12338 = vxpose.xlu0.b32.start [1/4] (short) (narrow) %v12111_v0, 8 }
 0x314   : > { %v2634_v41 = vmul.f32 %v2555_v52, %v16091_v48  ;;  %v3403_v59 = vrot.slane %v3292_v26, %v12883_v7  ;;  %v3048_v28 = vmul.f32 %v2939_v29, %v15881_v30  ;;  %v3363_v45 = vrot.slane %v16251_v44, %v12883_v7  ;;  %12218 = vmatpush1.msra.mxu0 %v12003_v54  ;;  %v12113_v29 = vpop.f32.mrf.mxu0 }
 0x315   : > { %3548 = vst.msk [vmem:[#allocation2 + $0x1f8] sm:$0xff] %vm3520_vm0, %v3515_v13  ;;  %v3058_v47 = vmul.f32 %v2979_v34, %v16093_v2  ;;  %v2656_v23 = vadd.f32 %v2624_v31, %v2200_v5  ;;  %v2127_v49 = vrot.slane %v16274_v50, %v12883_v7  ;;  %v2551_v32 = vrot.slane %v16277_v56, %v12883_v7 }
 0x316   : > { %12219 = vmatprep.subr.mxu0 %v16954_v37  ;;  %v2666_v30 = vadd.f32 %v2634_v41, %v2210_v63  ;;  %v3482_v44 = vmul.f32 %v3403_v59, %v16095_v27  ;;  %v3472_v35 = vmul.f32 %v3363_v45, %v15885_v33  ;;  %v2975_v21 = vrot.slane %v16282_v17, %v12883_v7  ;;  %v12644_v33 = vld.sshfl [vmem:[%s12879_s28 + $0x164] sm:$0x33 pattern:$0x75316420] }
 0x317   : > { %v3080_v15 = vadd.f32 %v3048_v28, %v2656_v23  ;;  %v2209_v50 = vmul.f32 %v2127_v49, %v16089_v12  ;;  %v2633_v16 = vmul.f32 %v2551_v32, %v16091_v48  ;;  %v3399_v56 = vrot.slane %v16293_v36, %v12883_v7  ;;  %v12186_v36 = vpop.f32.mrf.mxu1  ;;  %12339 = vxpose.xlu0.b32.cont [2/4] (short) (narrow) %v12184_v51, 8 }
 0x318   : > { %v3090_v42 = vadd.f32 %v3058_v47, %v2666_v30  ;;  %v3057_v53 = vmul.f32 %v2975_v21, %v16093_v2  ;;  %v9524_v8 = vcombine.high %v12636_v22, %v12636_v22  ;;  %v9531_v17 = vrot.slane %v12636_v22, %v12881_v6 }
 0x319   : > { %v12002_v62 = vld [vmem:[#allocation2 + $0x148] sm:$0xff]  ;;  %v3504_v24 = vadd.f32 %v3472_v35, %v3080_v15  ;;  %v2665_v52 = vadd.f32 %v2633_v16, %v2209_v50  ;;  %v3481_v26 = vmul.f32 %v3399_v56, %v16095_v27  ;;  %v9720_v5 = vcombine.high %v12640_v1, %v12640_v1  ;;  %v12652_v56 = vld.sshfl [vmem:[%s12879_s28 + $0x170] sm:$0x33 pattern:$0x75316420] }
 0x31a   : > { %12220 = vmatpush1.msra.mxu0 %v12002_v62  ;;  %v3514_v13 = vadd.f32 %v3482_v44, %v3090_v42  ;;  %v9538_v63 = vrot.slane %v9524_v8, %v12881_v6  ;;  %v9539_v34 = vcombine.high %v9531_v17, %v9531_v17  ;;  %v9600_v31 = vrot.slane %v9531_v17, %v12883_v7 }
 0x31b   : > { %12221 = vmatprep.subr.mxu0 %v16954_v37  ;;  %3537 = vst.msk [vmem:[#allocation2 + $0x140] sm:$0xff] %vm3520_vm0, %v3504_v24  ;;  %v3089_v54 = vadd.f32 %v3057_v53, %v2665_v52  ;;  %v9727_v41 = vrot.slane %v12640_v1, %v12881_v6  ;;  %v9734_v59 = vrot.slane %v9720_v5, %v12881_v6 }
 0x31c   : > { %v9916_v28 = vcombine.high %v12644_v33, %v12644_v33  ;;  %v12024_v45 = vld [vmem:[#allocation2 + $0x1f8] sm:$0xff]  ;;  %3547 = vst.msk [vmem:[#allocation2 + $0x1f0] sm:$0xff] %vm3520_vm0, %v3514_v13  ;;  %v9540_v47 = vcombine.high %v9538_v63, %v9538_v63  ;;  %v9604_v23 = vrot.slane %v9538_v63, %v12883_v7  ;;  %v9608_v49 = vrot.slane %v9539_v34, %v12883_v7 }
 0x31d   : > { %vm16391_vm8 = vcmp.eq.f32.partialorder %v9600_v31, %v12886_v9  ;;  %12289 = vmatpush1.msra.mxu1 %v12024_v45  ;;  %v3513_v22 = vadd.f32 %v3481_v26, %v3089_v54  ;;  %v9735_v30 = vcombine.high %v9727_v41, %v9727_v41  ;;  %v9736_v44 = vcombine.high %v9734_v59, %v9734_v59 }
 0x31e   : > { %v9796_v35 = vrot.slane %v9727_v41, %v12883_v7  ;;  %12290 = vmatprep.subr.mxu1 %v16954_v37  ;;  %v9612_v21 = vrot.slane %v9540_v47, %v12883_v7  ;;  %vm9654_vm9 = vcmp.eq.f32.partialorder %v9604_v23, %v12886_v9  ;;  %vm9655_vm10 = vcmp.eq.f32.partialorder %v9608_v49, %v12886_v9 }
 0x31f   : > { %v9800_v1 = vrot.slane %v9734_v59, %v12883_v7  ;;  %3546 = vst.msk [vmem:[#allocation2 + $0x1e8] sm:$0xff] %vm3520_vm0, %v3513_v22  ;;  %v9804_v15 = vrot.slane %v9735_v30, %v12883_v7  ;;  %v9808_v50 = vrot.slane %v9736_v44, %v12883_v7  ;;  %v9923_v16 = vrot.slane %v12644_v33, %v12881_v6 }
 0x320   : > { %vm9656_vm11 = vcmp.eq.f32.partialorder %v9612_v21, %v12886_v9  ;;  %v9849_v0 = vsel %vm16391_vm8, %v9796_v35, 0.0  ;;  %v9930_v51 = vrot.slane %v9916_v28, %v12881_v6  ;;  %v10112_v42 = vcombine.high %v12648_v20, %v12648_v20 }
 0x321   : > { %v9850_v53 = vsel %vm9654_vm9, %v9800_v1, 0.0  ;;  %v9851_v8 = vsel %vm9655_vm10, %v9804_v15, 0.0  ;;  %v9931_v17 = vcombine.high %v9923_v16, %v9923_v16  ;;  %v9992_v62 = vrot.slane %v9923_v16, %v12883_v7  ;;  %v12660_v1 = vld.sshfl [vmem:[%s12879_s28 + $0x174] sm:$0x33 pattern:$0x75316420] }
 0x322   : > { %v12001_v24 = vld [vmem:[#allocation2 + $0x140] sm:$0xff]  ;;  %v9932_v52 = vcombine.high %v9930_v51, %v9930_v51  ;;  %v9996_v26 = vrot.slane %v9930_v51, %v12883_v7  ;;  %v10119_v33 = vrot.slane %v12648_v20, %v12881_v6  ;;  %v10126_v5 = vrot.slane %v10112_v42, %v12881_v6  ;;  %v12656_v20 = vld.sshfl [vmem:[%s12879_s28 + $0x178] sm:$0x33 pattern:$0x75316420] }
 0x323   : > { %v12023_v29 = vld [vmem:[#allocation2 + $0x1f0] sm:$0xff]  ;;  %12222 = vmatpush1.msra.mxu0 %v12001_v24  ;;  %v10000_v36 = vrot.slane %v9931_v17, %v12883_v7  ;;  %vm16417_vm13 = vcmp.eq.f32.partialorder %v9992_v62, %v12886_v9  ;;  %v10324_v63 = vcombine.high %v12652_v56, %v12652_v56  ;;  %v10331_v34 = vrot.slane %v12652_v56, %v12881_v6  ;;  %v12664_v51 = vld.sshfl [vmem:[%s12879_s28 + $0x17c] sm:$0x33 pattern:$0x75316420] }
 0x324   : > { %12291 = vmatpush1.msra.mxu1 %v12023_v29  ;;  %12247 = vmatprep.subr.mxu0 %v16954_v37  ;;  %v9852_v31 = vsel %vm9656_vm11, %v9808_v50, 0.0  ;;  %v10004_v54 = vrot.slane %v9932_v52, %v12883_v7  ;;  %vm16427_vm14 = vcmp.eq.f32.partialorder %v9996_v26, %v12886_v9  ;;  %v10127_v59 = vcombine.high %v10119_v33, %v10119_v33 }
 0x325   : > { %12292 = vmatprep.subr.mxu1 %v16954_v37  ;;  %vm10047_vm15 = vcmp.eq.f32.partialorder %v10000_v36, %v12886_v9  ;;  %v10128_v28 = vcombine.high %v10126_v5, %v10126_v5  ;;  %v10188_v45 = vrot.slane %v10119_v33, %v12883_v7  ;;  %v10192_v47 = vrot.slane %v10126_v5, %v12883_v7 }
 0x326   : > { %v12022_v23 = vld [vmem:[#allocation2 + $0x1e8] sm:$0xff]  ;;  %vm10048_vm1 = vcmp.eq.f32.partialorder %v10004_v54, %v12886_v9  ;;  %v10196_v49 = vrot.slane %v10127_v59, %v12883_v7  ;;  %v10338_v32 = vrot.slane %v10324_v63, %v12881_v6  ;;  %v10339_v22 = vcombine.high %v10331_v34, %v10331_v34 }
 0x327   : > { %12293 = vmatpush1.msra.mxu1 %v12022_v23  ;;  %v10200_v30 = vrot.slane %v10128_v28, %v12883_v7  ;;  %v10241_v44 = vsel %vm16417_vm13, %v10188_v45, 0.0  ;;  %v10242_v35 = vsel %vm16427_vm14, %v10192_v47, 0.0  ;;  %v10400_v21 = vrot.slane %v10331_v34, %v12883_v7 }
 0x328   : > { %12294 = vmatprep.subr.mxu1 %v16954_v37  ;;  %v10243_v15 = vsel %vm10047_vm15, %v10196_v49, 0.0  ;;  %v10257_v50 = vadd.f32 %v10241_v44, %v9849_v0  ;;  %v10258_v16 = vadd.f32 %v10242_v35, %v9850_v53  ;;  %v10340_v56 = vcombine.high %v10338_v32, %v10338_v32 }
 0x329   : > { %v10244_v42 = vsel %vm10048_vm1, %v10200_v30, 0.0  ;;  %v10259_v17 = vadd.f32 %v10243_v15, %v9851_v8  ;;  %v10404_v62 = vrot.slane %v10338_v32, %v12883_v7  ;;  %v10408_v24 = vrot.slane %v10339_v22, %v12883_v7 }
 0x32a   : > { %v16454_v52 = vadd.f32 %v10244_v42, %v9852_v31  ;;  %v10412_v26 = vrot.slane %v10340_v56, %v12883_v7  ;;  %vm16458_vm2 = vcmp.eq.f32.partialorder %v10400_v21, %v12886_v9  ;;  %v10520_v0 = vcombine.high %v12656_v20, %v12656_v20 }
 0x32b   : > { %vm16463_vm3 = vcmp.eq.f32.partialorder %v10404_v62, %v12886_v9  ;;  %vm10455_vm4 = vcmp.eq.f32.partialorder %v10408_v24, %v12886_v9  ;;  %v10527_v8 = vrot.slane %v12656_v20, %v12881_v6  ;;  %v10716_v5 = vcombine.high %v12660_v1, %v12660_v1 }
 0x32c   : > { %vm10456_vm5 = vcmp.eq.f32.partialorder %v10412_v26, %v12886_v9  ;;  %v10534_v29 = vrot.slane %v10520_v0, %v12881_v6  ;;  %v10723_v36 = vrot.slane %v12660_v1, %v12881_v6  ;;  %v10912_v13 = vcombine.high %v12664_v51, %v12664_v51 }
 0x32d   : > { %v10535_v63 = vcombine.high %v10527_v8, %v10527_v8  ;;  %v10596_v34 = vrot.slane %v10527_v8, %v12883_v7  ;;  %v10730_v31 = vrot.slane %v10716_v5, %v12881_v6  ;;  %v10919_v54 = vrot.slane %v12664_v51, %v12881_v6 }
 0x32e   : > { %v10536_v41 = vcombine.high %v10534_v29, %v10534_v29  ;;  %v10600_v59 = vrot.slane %v10534_v29, %v12883_v7  ;;  %v10731_v28 = vcombine.high %v10723_v36, %v10723_v36  ;;  %v10792_v45 = vrot.slane %v10723_v36, %v12883_v7 }
 0x32f   : > { %v10604_v47 = vrot.slane %v10535_v63, %v12883_v7  ;;  %v10649_v23 = vsel %vm16458_vm2, %v10596_v34, 0.0  ;;  %v10732_v49 = vcombine.high %v10730_v31, %v10730_v31  ;;  %v10796_v32 = vrot.slane %v10730_v31, %v12883_v7 }
 0x330   : > { %v10608_v22 = vrot.slane %v10536_v41, %v12883_v7  ;;  %v10650_v20 = vsel %vm16463_vm3, %v10600_v59, 0.0  ;;  %v10800_v30 = vrot.slane %v10731_v28, %v12883_v7  ;;  %vm10845_vm6 = vcmp.eq.f32.partialorder %v10792_v45, %v12886_v9 }
 0x331   : > { %v10651_v44 = vsel %vm10455_vm4, %v10604_v47, 0.0  ;;  %v10804_v35 = vrot.slane %v10732_v49, %v12883_v7  ;;  %vm10846_vm7 = vcmp.eq.f32.partialorder %v10796_v32, %v12886_v9  ;;  %v10926_v21 = vrot.slane %v10912_v13, %v12881_v6 }
 0x332   : > { %v10652_v1 = vsel %vm10456_vm5, %v10608_v22, 0.0  ;;  %vm10847_vm8 = vcmp.eq.f32.partialorder %v10800_v30, %v12886_v9  ;;  %v10927_v15 = vcombine.high %v10919_v54, %v10919_v54  ;;  %v10988_v56 = vrot.slane %v10919_v54, %v12883_v7 }
 0x333   : > { %vm10848_vm9 = vcmp.eq.f32.partialorder %v10804_v35, %v12886_v9  ;;  %v10928_v51 = vcombine.high %v10926_v21, %v10926_v21  ;;  %v10992_v42 = vrot.slane %v10926_v21, %v12883_v7  ;;  %v11123_v62 = vrot.slane %v10257_v50, %v12881_v6 }
 0x334   : > { %v10996_v24 = vrot.slane %v10927_v15, %v12883_v7  ;;  %v11041_v33 = vsel %vm10845_vm6, %v10988_v56, 0.0  ;;  %v11335_v0 = vrot.slane %v10258_v16, %v12881_v6  ;;  %v11547_v26 = vrot.slane %v10259_v17, %v12881_v6 }
 0x335   : > { %v11000_v53 = vrot.slane %v10928_v51, %v12883_v7  ;;  %v11042_v8 = vsel %vm10846_vm7, %v10992_v42, 0.0  ;;  %v16502_v5 = vadd.f32 %v11041_v33, %v10649_v23  ;;  %v11124_v29 = vcombine.high %v11123_v62, %v11123_v62 }
 0x336   : > { %v11043_v36 = vsel %vm10847_vm8, %v10996_v24, 0.0  ;;  %v16504_v13 = vadd.f32 %v11042_v8, %v10650_v20  ;;  %v11131_v63 = vrot.slane %v11123_v62, %v12881_v6  ;;  %v11336_v34 = vcombine.high %v11335_v0, %v11335_v0 }
 0x337   : > { %v11044_v50 = vsel %vm10848_vm9, %v11000_v53, 0.0  ;;  %v16509_v31 = vadd.f32 %v11043_v36, %v10651_v44  ;;  %v11138_v16 = vrot.slane %v11124_v29, %v12881_v6  ;;  %v11343_v17 = vrot.slane %v11335_v0, %v12881_v6 }
 0x338   : > { %v16513_v54 = vadd.f32 %v11044_v50, %v10652_v1  ;;  %v11139_v41 = vcombine.high %v11131_v63, %v11131_v63  ;;  %v11350_v59 = vrot.slane %v11336_v34, %v12881_v6  ;;  %v11548_v28 = vcombine.high %v11547_v26, %v11547_v26 }
 0x339   : > { %v11140_v45 = vcombine.high %v11138_v16, %v11138_v16  ;;  %v11351_v47 = vcombine.high %v11343_v17, %v11343_v17  ;;  %v11555_v23 = vrot.slane %v11547_v26, %v12881_v6  ;;  %v11759_v49 = vrot.slane %v16454_v52, %v12881_v6 }
 0x33a   : > { %v11208_v32 = vrot.slane %v11139_v41, %v12883_v7  ;;  %v11352_v22 = vcombine.high %v11350_v59, %v11350_v59  ;;  %v11562_v20 = vrot.slane %v11548_v28, %v12881_v6  ;;  %v2123_v30 = vrot.slane %v16315_v4, %v12883_v7 }
 0x33b   : > { %v11212_v44 = vrot.slane %v11140_v45, %v12883_v7  ;;  %v11420_v35 = vrot.slane %v11351_v47, %v12883_v7  ;;  %v11563_v21 = vcombine.high %v11555_v23, %v11555_v23  ;;  %v11760_v1 = vcombine.high %v11759_v49, %v11759_v49 }
 0x33c   : > { %v11255_v15 = vmul.f32 %v11208_v32, %v16502_v5  ;;  %v11424_v56 = vrot.slane %v11352_v22, %v12883_v7  ;;  %v11564_v51 = vcombine.high %v11562_v20, %v11562_v20  ;;  %v11767_v52 = vrot.slane %v11759_v49, %v12881_v6 }
 0x33d   : > { %v11256_v42 = vmul.f32 %v11212_v44, %v16502_v5  ;;  %v11467_v62 = vmul.f32 %v11420_v35, %v16504_v13  ;;  %v11632_v24 = vrot.slane %v11563_v21, %v12883_v7  ;;  %v11774_v4 = vrot.slane %v11760_v1, %v12881_v6 }
 0x33e   : > { %v11468_v33 = vmul.f32 %v11424_v56, %v16504_v13  ;;  %v11636_v0 = vrot.slane %v11564_v51, %v12883_v7  ;;  %v11775_v26 = vcombine.high %v11767_v52, %v11767_v52  ;;  %v2208_v53 = vmul.f32 %v2123_v30, %v16089_v12 }
 0x33f   : > { %v11483_v8 = vadd.f32 %v11467_v62, %v11255_v15  ;;  %v11679_v29 = vmul.f32 %v11632_v24, %v16509_v31  ;;  %v11776_v36 = vcombine.high %v11774_v4, %v11774_v4  ;;  %v2547_v34 = vrot.slane %v16320_v57, %v12883_v7  ;;  %v12637_v62 = vld.sshfl [vmem:[%s12879_s28 + $0x1e0] sm:$0x33 pattern:$0x75316420] }
 0x340   : > { %v11484_v50 = vadd.f32 %v11468_v33, %v11256_v42  ;;  %v11680_v41 = vmul.f32 %v11636_v0, %v16509_v31  ;;  %v11844_v28 = vrot.slane %v11775_v26, %v12883_v7  ;;  %v2971_v45 = vrot.slane %v16327_v46, %v12883_v7  ;;  %v12641_v0 = vld.sshfl [vmem:[%s12879_s28 + $0x1e8] sm:$0x33 pattern:$0x75316420] }
 0x341   : > { %v11695_v47 = vadd.f32 %v11679_v29, %v11483_v8  ;;  %v11848_v49 = vrot.slane %v11776_v36, %v12883_v7  ;;  %v2632_v12 = vmul.f32 %v2547_v34, %v16091_v48  ;;  %v3395_v32 = vrot.slane %v16333_v40, %v12883_v7  ;;  %v12645_v8 = vld.sshfl [vmem:[%s12879_s28 + $0x1e4] sm:$0x33 pattern:$0x75316420] }
 0x342   : > { %v11696_v22 = vadd.f32 %v11680_v41, %v11484_v50  ;;  %v11891_v57 = vmul.f32 %v11844_v28, %v16513_v54  ;;  %v3056_v30 = vmul.f32 %v2971_v45, %v16093_v2  ;;  %v11200_v44 = vrot.slane %v11131_v63, %v12883_v7 }
 0x343   : > { %v11892_v35 = vmul.f32 %v11848_v49, %v16513_v54  ;;  %v2664_v21 = vadd.f32 %v2632_v12, %v2208_v53  ;;  %v3480_v46 = vmul.f32 %v3395_v32, %v16095_v27  ;;  %v11204_v1 = vrot.slane %v11138_v16, %v12883_v7 }
 0x344   : > { %v11907_v48 = vadd.f32 %v11891_v57, %v11695_v47  ;;  %v11253_v15 = vmul.f32 %v11200_v44, %v16502_v5  ;;  %v11412_v40 = vrot.slane %v11343_v17, %v12883_v7  ;;  %v11416_v56 = vrot.slane %v11350_v59, %v12883_v7 }
 0x345   : > { %v11908_v51 = vadd.f32 %v11892_v35, %v11696_v22  ;;  %v3088_v2 = vadd.f32 %v3056_v30, %v2664_v21  ;;  %v11254_v63 = vmul.f32 %v11204_v1, %v16502_v5  ;;  %v11624_v42 = vrot.slane %v11555_v23, %v12883_v7  ;;  %v12649_v21 = vld.sshfl [vmem:[%s12879_s28 + $0x1ec] sm:$0x33 pattern:$0x75316420] }
 0x346   : > { %v11465_v24 = vmul.f32 %v11412_v40, %v16504_v13  ;;  %v11466_v27 = vmul.f32 %v11416_v56, %v16504_v13  ;;  %v11628_v16 = vrot.slane %v11562_v20, %v12883_v7  ;;  %v11836_v33 = vrot.slane %v11767_v52, %v12883_v7 }
 0x347   : > { %v11934_v17 = vcombine.low %v11907_v48, %v11908_v51  ;;  %v3512_v26 = vadd.f32 %v3480_v46, %v3088_v2  ;;  %v11677_v59 = vmul.f32 %v11624_v42, %v16509_v31  ;;  %v11840_v53 = vrot.slane %v11774_v4, %v12883_v7 }
 0x348   : > { %v11481_v5 = vadd.f32 %v11465_v24, %v11253_v15  ;;  %v11482_v29 = vadd.f32 %v11466_v27, %v11254_v63  ;;  %v11678_v23 = vmul.f32 %v11628_v16, %v16509_v31  ;;  %v11889_v36 = vmul.f32 %v11836_v33, %v16513_v54  ;;  %v12653_v15 = vld.sshfl [vmem:[%s12879_s28 + $0x1f0] sm:$0x33 pattern:$0x75316420] }
 0x349   : > { %11950 = vst.msk [vmem:[#allocation2 + $0x1d8] sm:$0xff] %vm3520_vm0, %v11934_v17  ;;  %3545 = vst.msk [vmem:[#allocation2 + $0x1e0] sm:$0xff] %vm3520_vm0, %v3512_v26  ;;  %v11890_v13 = vmul.f32 %v11840_v53, %v16513_v54  ;;  %v9548_v20 = vcombine.high %v12637_v62, %v12637_v62  ;;  %v9555_v52 = vrot.slane %v12637_v62, %v12881_v6 }
 0x34a   : > { %v9744_v34 = vcombine.high %v12641_v0, %v12641_v0  ;;  %v11693_v50 = vadd.f32 %v11677_v59, %v11481_v5  ;;  %v11694_v41 = vadd.f32 %v11678_v23, %v11482_v29  ;;  %v9751_v4 = vrot.slane %v12641_v0, %v12881_v6 }
 0x34b   : > { %v9940_v28 = vcombine.high %v12645_v8, %v12645_v8  ;;  %v9562_v31 = vrot.slane %v9548_v20, %v12881_v6  ;;  %v9563_v45 = vcombine.high %v9555_v52, %v9555_v52  ;;  %v9616_v47 = vrot.slane %v9555_v52, %v12883_v7 }
 0x34c   : > { %v9758_v49 = vrot.slane %v9744_v34, %v12881_v6  ;;  %v11905_v12 = vadd.f32 %v11889_v36, %v11693_v50  ;;  %v11906_v54 = vadd.f32 %v11890_v13, %v11694_v41  ;;  %v9759_v32 = vcombine.high %v9751_v4, %v9751_v4  ;;  %v12657_v34 = vld.sshfl [vmem:[%s12879_s28 + $0x1f8] sm:$0x33 pattern:$0x75316420] }
 0x34d   : > { %v9812_v22 = vrot.slane %v9751_v4, %v12883_v7  ;;  %v9564_v57 = vcombine.high %v9562_v31, %v9562_v31  ;;  %v9620_v30 = vrot.slane %v9562_v31, %v12883_v7  ;;  %v9624_v44 = vrot.slane %v9563_v45, %v12883_v7 }
 0x34e   : > { %vm9657_vm10 = vcmp.eq.f32.partialorder %v9616_v47, %v12886_v9  ;;  %v11933_v35 = vcombine.low %v11905_v12, %v11906_v54  ;;  %v9760_v46 = vcombine.high %v9758_v49, %v9758_v49  ;;  %v9816_v1 = vrot.slane %v9758_v49, %v12883_v7  ;;  %v12661_v49 = vld.sshfl [vmem:[%s12879_s28 + $0x1f4] sm:$0x33 pattern:$0x75316420] }
 0x34f   : > { %v9820_v48 = vrot.slane %v9759_v32, %v12883_v7  ;;  %v9628_v40 = vrot.slane %v9564_v57, %v12883_v7  ;;  %vm9658_vm11 = vcmp.eq.f32.partialorder %v9620_v30, %v12886_v9  ;;  %vm9659_vm13 = vcmp.eq.f32.partialorder %v9624_v44, %v12886_v9 }
 0x350   : > { %v12020_v56 = vld [vmem:[#allocation2 + $0x1d8] sm:$0xff]  ;;  %v12021_v51 = vld [vmem:[#allocation2 + $0x1e0] sm:$0xff]  ;;  %11949 = vst.msk [vmem:[#allocation2 + $0x1d0] sm:$0xff] %vm3520_vm0, %v11933_v35  ;;  %v9824_v2 = vrot.slane %v9760_v46, %v12883_v7  ;;  %v9853_v63 = vsel %vm9657_vm10, %v9812_v22, 0.0  ;;  %v9854_v42 = vsel %vm9658_vm11, %v9816_v1, 0.0  ;;  %v9947_v62 = vrot.slane %v12645_v8, %v12881_v6 }
 0x351   : > { %12248 = vmatpush2.msra.mxu0 %v12020_v56  ;;  %12295 = vmatpush1.msra.mxu1 %v12021_v51  ;;  %vm9660_vm14 = vcmp.eq.f32.partialorder %v9628_v40, %v12886_v9  ;;  %v9855_v24 = vsel %vm9659_vm13, %v9820_v48, 0.0  ;;  %v9954_v27 = vrot.slane %v9940_v28, %v12881_v6  ;;  %v10136_v16 = vcombine.high %v12649_v21, %v12649_v21 }
 0x352   : > { %12249 = vmatprep.subr.mxu0 %v16954_v37  ;;  %12320 = vmatprep.subr.mxu1 %v16954_v37  ;;  %v9856_v33 = vsel %vm9660_vm14, %v9824_v2, 0.0  ;;  %v9955_v0 = vcombine.high %v9947_v62, %v9947_v62  ;;  %v10008_v17 = vrot.slane %v9947_v62, %v12883_v7  ;;  %v10143_v26 = vrot.slane %v12649_v21, %v12881_v6 }
 0x353   : > { %v9956_v59 = vcombine.high %v9954_v27, %v9954_v27  ;;  %v10012_v53 = vrot.slane %v9954_v27, %v12883_v7  ;;  %v10150_v8 = vrot.slane %v10136_v16, %v12881_v6  ;;  %v10348_v5 = vcombine.high %v12653_v15, %v12653_v15  ;;  %v12665_v16 = vld.sshfl [vmem:[%s12879_s28 + $0x1fc] sm:$0x33 pattern:$0x75316420] }
 0x354   : > { %v10016_v29 = vrot.slane %v9955_v0, %v12883_v7  ;;  %vm10049_vm15 = vcmp.eq.f32.partialorder %v10008_v17, %v12886_v9  ;;  %v10151_v23 = vcombine.high %v10143_v26, %v10143_v26  ;;  %v10204_v36 = vrot.slane %v10143_v26, %v12883_v7 }
 0x355   : > { %v10020_v13 = vrot.slane %v9956_v59, %v12883_v7  ;;  %vm10050_vm1 = vcmp.eq.f32.partialorder %v10012_v53, %v12886_v9  ;;  %v10152_v20 = vcombine.high %v10150_v8, %v10150_v8  ;;  %v10208_v52 = vrot.slane %v10150_v8, %v12883_v7 }
 0x356   : > { %vm10051_vm2 = vcmp.eq.f32.partialorder %v10016_v29, %v12886_v9  ;;  %v10212_v50 = vrot.slane %v10151_v23, %v12883_v7  ;;  %v10245_v41 = vsel %vm10049_vm15, %v10204_v36, 0.0  ;;  %v10355_v4 = vrot.slane %v12653_v15, %v12881_v6 }
 0x357   : > { %v12019_v28 = vld [vmem:[#allocation2 + $0x1d0] sm:$0xff]  ;;  %vm10052_vm3 = vcmp.eq.f32.partialorder %v10020_v13, %v12886_v9  ;;  %v10216_v31 = vrot.slane %v10152_v20, %v12883_v7  ;;  %v10246_v45 = vsel %vm10050_vm1, %v10208_v52, 0.0  ;;  %v10261_v47 = vadd.f32 %v10245_v41, %v9853_v63 }
 0x358   : > { %12250 = vmatpush2.msra.mxu0 %v12019_v28  ;;  %v10247_v12 = vsel %vm10051_vm2, %v10212_v50, 0.0  ;;  %v10262_v54 = vadd.f32 %v10246_v45, %v9854_v42  ;;  %v10362_v32 = vrot.slane %v10348_v5, %v12881_v6  ;;  %v10363_v22 = vcombine.high %v10355_v4, %v10355_v4 }
 0x359   : > { %v10248_v57 = vsel %vm10052_vm3, %v10216_v31, 0.0  ;;  %v10263_v30 = vadd.f32 %v10247_v12, %v9855_v24  ;;  %v10416_v44 = vrot.slane %v10355_v4, %v12883_v7  ;;  %v10544_v35 = vcombine.high %v12657_v34, %v12657_v34  ;;  %12251 = vmatprep.subr.mxu0 %v16954_v37 }
 0x35a   : > { %v16614_v21 = vadd.f32 %v10248_v57, %v9856_v33  ;;  %v10364_v46 = vcombine.high %v10362_v32, %v10362_v32  ;;  %v10420_v1 = vrot.slane %v10362_v32, %v12883_v7  ;;  %v10424_v48 = vrot.slane %v10363_v22, %v12883_v7 }
 0x35b   : > { %vm16619_vm4 = vcmp.eq.f32.partialorder %v10416_v44, %v12886_v9  ;;  %v10551_v40 = vrot.slane %v12657_v34, %v12881_v6  ;;  %v10558_v56 = vrot.slane %v10544_v35, %v12881_v6  ;;  %v10740_v51 = vcombine.high %v12661_v49, %v12661_v49 }
 0x35c   : > { %v10428_v2 = vrot.slane %v10364_v46, %v12883_v7  ;;  %vm10458_vm5 = vcmp.eq.f32.partialorder %v10420_v1, %v12886_v9  ;;  %vm10459_vm6 = vcmp.eq.f32.partialorder %v10424_v48, %v12886_v9  ;;  %v10747_v63 = vrot.slane %v12661_v49, %v12881_v6 }
 0x35d   : > { %v10559_v42 = vcombine.high %v10551_v40, %v10551_v40  ;;  %v10560_v62 = vcombine.high %v10558_v56, %v10558_v56  ;;  %v10612_v24 = vrot.slane %v10551_v40, %v12883_v7  ;;  %v10616_v27 = vrot.slane %v10558_v56, %v12883_v7 }
 0x35e   : > { %vm10460_vm7 = vcmp.eq.f32.partialorder %v10428_v2, %v12886_v9  ;;  %v10754_v33 = vrot.slane %v10740_v51, %v12881_v6  ;;  %v10755_v0 = vcombine.high %v10747_v63, %v10747_v63  ;;  %v10808_v17 = vrot.slane %v10747_v63, %v12883_v7 }
 0x35f   : > { %v10620_v26 = vrot.slane %v10559_v42, %v12883_v7  ;;  %v10624_v59 = vrot.slane %v10560_v62, %v12883_v7  ;;  %v10653_v53 = vsel %vm16619_vm4, %v10612_v24, 0.0  ;;  %v10654_v8 = vsel %vm10458_vm5, %v10616_v27, 0.0 }
 0x360   : > { %v10756_v5 = vcombine.high %v10754_v33, %v10754_v33  ;;  %v10812_v29 = vrot.slane %v10754_v33, %v12883_v7  ;;  %v10816_v23 = vrot.slane %v10755_v0, %v12883_v7  ;;  %vm16642_vm8 = vcmp.eq.f32.partialorder %v10808_v17, %v12886_v9 }
 0x361   : > { %v10655_v13 = vsel %vm10459_vm6, %v10620_v26, 0.0  ;;  %v10656_v20 = vsel %vm10460_vm7, %v10624_v59, 0.0  ;;  %v10936_v52 = vcombine.high %v12665_v16, %v12665_v16  ;;  %v10943_v34 = vrot.slane %v12665_v16, %v12881_v6 }
 0x362   : > { %v10820_v50 = vrot.slane %v10756_v5, %v12883_v7  ;;  %vm16651_vm9 = vcmp.eq.f32.partialorder %v10812_v29, %v12886_v9  ;;  %vm10851_vm10 = vcmp.eq.f32.partialorder %v10816_v23, %v12886_v9  ;;  %v11147_v4 = vrot.slane %v10261_v47, %v12881_v6 }
 0x363   : > { %v10950_v28 = vrot.slane %v10936_v52, %v12881_v6  ;;  %v10951_v31 = vcombine.high %v10943_v34, %v10943_v34  ;;  %v11004_v45 = vrot.slane %v10943_v34, %v12883_v7  ;;  %v11359_v49 = vrot.slane %v10262_v54, %v12881_v6 }
 0x364   : > { %vm10852_vm11 = vcmp.eq.f32.partialorder %v10820_v50, %v12886_v9  ;;  %v11148_v12 = vcombine.high %v11147_v4, %v11147_v4  ;;  %v16662_v32 = vrot.slane %v11147_v4, %v12881_v6  ;;  %v11571_v22 = vrot.slane %v10263_v30, %v12881_v6 }
 0x365   : > { %v10952_v57 = vcombine.high %v10950_v28, %v10950_v28  ;;  %v11008_v44 = vrot.slane %v10950_v28, %v12883_v7  ;;  %v11012_v47 = vrot.slane %v10951_v31, %v12883_v7  ;;  %v11045_v35 = vsel %vm16642_vm8, %v11004_v45, 0.0 }
 0x366   : > { %v16669_v46 = vadd.f32 %v11045_v35, %v10653_v53  ;;  %v16672_v54 = vrot.slane %v11148_v12, %v12881_v6  ;;  %v11163_v1 = vcombine.high %v16662_v32, %v16662_v32  ;;  %v11360_v48 = vcombine.high %v11359_v49, %v11359_v49 }
 0x367   : > { %v11016_v15 = vrot.slane %v10952_v57, %v12883_v7  ;;  %v11046_v30 = vsel %vm16651_vm9, %v11008_v44, 0.0  ;;  %v11047_v40 = vsel %vm10851_vm10, %v11012_v47, 0.0  ;;  %v11367_v56 = vrot.slane %v11359_v49, %v12881_v6 }
 0x368   : > { %v11062_v51 = vadd.f32 %v11046_v30, %v10654_v8  ;;  %v16682_v2 = vadd.f32 %v11047_v40, %v10655_v13  ;;  %v11164_v63 = vcombine.high %v16672_v54, %v16672_v54  ;;  %v11224_v42 = vrot.slane %v11163_v1, %v12883_v7 }
 0x369   : > { %v11048_v62 = vsel %vm10852_vm11, %v11016_v15, 0.0  ;;  %v11374_v24 = vrot.slane %v11360_v48, %v12881_v6  ;;  %v11375_v27 = vcombine.high %v11367_v56, %v11367_v56  ;;  %v11572_v16 = vcombine.high %v11571_v22, %v11571_v22 }
 0x36a   : > { %v16690_v33 = vadd.f32 %v11048_v62, %v10656_v20  ;;  %v11228_v0 = vrot.slane %v11164_v63, %v12883_v7  ;;  %v11259_v17 = vmul.f32 %v11224_v42, %v16669_v46  ;;  %v11579_v26 = vrot.slane %v11571_v22, %v12881_v6 }
 0x36b   : > { %v11376_v59 = vcombine.high %v11374_v24, %v11374_v24  ;;  %v11436_v53 = vrot.slane %v11375_v27, %v12883_v7  ;;  %v11586_v8 = vrot.slane %v11572_v16, %v12881_v6  ;;  %v11783_v9 = vrot.slane %v16614_v21, %v12881_v6 }
 0x36c   : > { %v11260_v5 = vmul.f32 %v11228_v0, %v16669_v46  ;;  %v11587_v29 = vcombine.high %v11579_v26, %v11579_v26  ;;  %v7855_v23 = vcombine.high %v15004_v60, %v15004_v60  ;;  %v8279_v36 = vcombine.high %v15014_v25, %v15014_v25 }
 0x36d   : > { %v11440_v13 = vrot.slane %v11376_v59, %v12883_v7  ;;  %v11471_v20 = vmul.f32 %v11436_v53, %v11062_v51  ;;  %v11588_v52 = vcombine.high %v11586_v8, %v11586_v8  ;;  %v11784_v34 = vcombine.high %v11783_v9, %v11783_v9 }
 0x36e   : > { %v11648_v50 = vrot.slane %v11587_v29, %v12883_v7  ;;  %v11791_v41 = vrot.slane %v11783_v9, %v12881_v6  ;;  %v8000_v21 = vrot.slane %v7855_v23, %v12883_v7  ;;  %v8424_v4 = vrot.slane %v8279_v36, %v12883_v7 }
 0x36f   : > { %v11472_v28 = vmul.f32 %v11440_v13, %v11062_v51  ;;  %v11487_v31 = vadd.f32 %v11471_v20, %v11259_v17  ;;  %v11652_v60 = vrot.slane %v11588_v52, %v12883_v7  ;;  %v11798_v45 = vrot.slane %v11784_v34, %v12881_v6 }
 0x370   : > { %v11683_v25 = vmul.f32 %v11648_v50, %v16682_v2  ;;  %v11799_v49 = vcombine.high %v11791_v41, %v11791_v41  ;;  %v8088_v12 = vmul.f32 %v8000_v21, %v14984_v39  ;;  %v8512_v22 = vmul.f32 %v8424_v4, %v14987_v61 }
 0x371   : > { %v11488_v57 = vadd.f32 %v11472_v28, %v11260_v5  ;;  %v11684_v44 = vmul.f32 %v11652_v60, %v16682_v2  ;;  %v11800_v47 = vcombine.high %v11798_v45, %v11798_v45  ;;  %v8703_v35 = vcombine.high %v15017_v11, %v15017_v11 }
 0x372   : > { %v11699_v1 = vadd.f32 %v11683_v25, %v11487_v31  ;;  %v11860_v48 = vrot.slane %v11799_v49, %v12883_v7  ;;  %v8544_v15 = vadd.f32 %v8512_v22, %v8088_v12  ;;  %v9127_v6 = vcombine.high %v15038_v55, %v15038_v55 }
 0x373   : > { %v11700_v30 = vadd.f32 %v11684_v44, %v11488_v57  ;;  %v11864_v40 = vrot.slane %v11800_v47, %v12883_v7  ;;  %v8848_v63 = vrot.slane %v8703_v35, %v12883_v7  ;;  %v11216_v42 = vrot.slane %v16662_v32, %v12883_v7  ;;  %v17056_v44 = vld [vmem:[#allocation7_spill] sm:$0xff] }
 0x374   : > { %v11895_v62 = vmul.f32 %v11860_v48, %v16690_v33  ;;  %v9272_v27 = vrot.slane %v9127_v6, %v12883_v7  ;;  %v11220_v11 = vrot.slane %v16672_v54, %v12883_v7  ;;  %v11428_v16 = vrot.slane %v11367_v56, %v12883_v7 }
 0x375   : > { %v11896_v0 = vmul.f32 %v11864_v40, %v16690_v33  ;;  %v8936_v55 = vmul.f32 %v8848_v63, %v14993_v3  ;;  %v11257_v17 = vmul.f32 %v11216_v42, %v16669_v46  ;;  %v11432_v59 = vrot.slane %v11374_v24, %v12883_v7  ;;  %v17060_v42 = vld [vmem:[#allocation14_spill] sm:$0xff] }
 0x376   : > { %v11911_v53 = vadd.f32 %v11895_v62, %v11699_v1  ;;  %v9360_v32 = vmul.f32 %v9272_v27, %v14998_v14  ;;  %v11258_v9 = vmul.f32 %v11220_v11, %v16669_v46  ;;  %v11469_v5 = vmul.f32 %v11428_v16, %v11062_v51  ;;  %v17057_v1 = vld [vmem:[#allocation10_spill] sm:$0xff] }
 0x377   : > { %v11912_v29 = vadd.f32 %v11896_v0, %v11700_v30  ;;  %v8968_v23 = vadd.f32 %v8936_v55, %v8544_v15  ;;  %v11470_v36 = vmul.f32 %v11432_v59, %v11062_v51  ;;  %v11640_v54 = vrot.slane %v11579_v26, %v12883_v7  ;;  %v17058_v15 = vld [vmem:[#allocation11_spill] sm:$0xff]  ;;  %v17059_v30 = vld [vmem:[#allocation13_spill] sm:$0xff]  ;;  %v17062_v0 = vld [vmem:[#allocation16_spill] sm:$0xff] }
 0x378   : > { %v11485_v56 = vadd.f32 %v11469_v5, %v11257_v17  ;;  %v11644_v13 = vrot.slane %v11586_v8, %v12883_v7  ;;  %v11852_v20 = vrot.slane %v11791_v41, %v12883_v7  ;;  %v11856_v52 = vrot.slane %v11798_v45, %v12883_v7  ;;  %v17063_v17 = vld [vmem:[#allocation8_spill] sm:$0xff] }
 0x379   : > { %v11936_v34 = vcombine.low %v11911_v53, %v11912_v29  ;;  %v9392_v24 = vadd.f32 %v9360_v32, %v8968_v23  ;;  %v11486_v50 = vadd.f32 %v11470_v36, %v11258_v9  ;;  %v11681_v21 = vmul.f32 %v11640_v54, %v16682_v2  ;;  %v17064_v32 = vld [vmem:[#allocation12_spill] sm:$0xff]  ;;  %v17065_v29 = vld [vmem:[#allocation6_spill] sm:$0xff] }
 0x37a   : > { %v11682_v46 = vmul.f32 %v11644_v13, %v16682_v2  ;;  %v11893_v4 = vmul.f32 %v11852_v20, %v16690_v33  ;;  %v11894_v51 = vmul.f32 %v11856_v52, %v16690_v33  ;;  %v7853_v26 = vcombine.high %v15001_v43, %v15001_v43 }
 0x37b   : > { %11952 = vst.msk [vmem:[#allocation2 + $0x278] sm:$0xff] %vm3520_vm0, %v11936_v34  ;;  %9424 = vst.msk [vmem:[#allocation2 + $0x1c8] sm:$0xff] %vm3520_vm0, %v9392_v24  ;;  %v11697_v8 = vadd.f32 %v11681_v21, %v11485_v56  ;;  %v8277_v41 = vcombine.high %v15008_v10, %v15008_v10  ;;  %v8701_v28 = vcombine.high %v15011_v19, %v15011_v19 }
 0x37c   : > { %v9125_v2 = vcombine.high %v15033_v18, %v15033_v18  ;;  %v11698_v31 = vadd.f32 %v11682_v46, %v11486_v50  ;;  %v7996_v33 = vrot.slane %v7853_v26, %v12883_v7  ;;  %v7904_v43 = vcombine.high %v15175_v38, %v15175_v38 }
 0x37d   : > { %v8328_v60 = vcombine.high %v15186_v58, %v15186_v58  ;;  %v11909_v45 = vadd.f32 %v11893_v4, %v11697_v8  ;;  %v8420_v25 = vrot.slane %v8277_v41, %v12883_v7  ;;  %v8844_v10 = vrot.slane %v8701_v28, %v12883_v7  ;;  %v11959_v28 = vld [vmem:[%s14475_s5 + $0x30] sm:$0xff] }
 0x37e   : > { %v9268_v49 = vrot.slane %v9125_v2, %v12883_v7  ;;  %v11910_v19 = vadd.f32 %v11894_v51, %v11698_v31  ;;  %v8087_v12 = vmul.f32 %v7996_v33, %v14984_v39  ;;  %v8032_v18 = vrot.slane %v7904_v43, %v12883_v7  ;;  %v12337_v31 = vld [vmem:[%s16870_s2 + $0x18] sm:$0xff]  ;;  %v12336_v33 = vld [vmem:[%s16870_s2 + $0x10] sm:$0xff]  ;;  %v12335_v43 = vld [vmem:[%s16870_s2 + $0x8] sm:$0xff] }
 0x37f   : > { %v8456_v22 = vrot.slane %v8328_v60, %v12883_v7  ;;  %v8511_v57 = vmul.f32 %v8420_v25, %v14987_v61  ;;  %v8935_v38 = vmul.f32 %v8844_v10, %v14993_v3  ;;  %v8752_v47 = vcombine.high %v17056_v44, %v17056_v44  ;;  %v17061_v3 = vld [vmem:[#allocation15_spill] sm:$0xff]  ;;  %v12334_v60 = vld [vmem:[%s16870_s2] sm:$0xff] }
 0x380   : > { %v9359_v58 = vmul.f32 %v9268_v49, %v14998_v14  ;;  %v11935_v35 = vcombine.low %v11909_v45, %v11910_v19  ;;  %v8096_v48 = vmul.f32 %v8032_v18, %v17057_v1  ;;  %v9176_v39 = vcombine.high %v17059_v30, %v17059_v30 }
 0x381   : > { %v8520_v6 = vmul.f32 %v8456_v22, %v17058_v15  ;;  %v8543_v40 = vadd.f32 %v8511_v57, %v8087_v12  ;;  %v8880_v63 = vrot.slane %v8752_v47, %v12883_v7  ;;  %v7902_v61 = vcombine.high %v17060_v42, %v17060_v42 }
 0x382   : > { %v8326_v14 = vcombine.high %v17061_v3, %v17061_v3  ;;  %v12040_v62 = vld [vmem:[#allocation2 + $0x278] sm:$0xff]  ;;  %v12018_v27 = vld [vmem:[#allocation2 + $0x1c8] sm:$0xff]  ;;  %11951 = vst.msk [vmem:[#allocation2 + $0x270] sm:$0xff] %vm3520_vm0, %v11935_v35  ;;  %v9304_v16 = vrot.slane %v9176_v39, %v12883_v7  ;;  %v8750_v55 = vcombine.high %v17062_v0, %v17062_v0  ;;  %v9174_v59 = vcombine.high %v17063_v17, %v17063_v17 }
 0x383   : > { %v8552_v11 = vadd.f32 %v8520_v6, %v8096_v48  ;;  %12321 = vmatpush2.msra.mxu1 %v12040_v62  ;;  %12252 = vmatpush2.msra.mxu0 %v12018_v27  ;;  %v8967_v53 = vadd.f32 %v8935_v38, %v8543_v40  ;;  %v8944_v9 = vmul.f32 %v8880_v63, %v17064_v32 }
 0x384   : > { %v8028_v5 = vrot.slane %v7902_v61, %v12883_v7  ;;  %12322 = vmatprep.subr.mxu1 %v16954_v37  ;;  %12253 = vmatprep.subr.mxu0 %v16954_v37  ;;  %v9368_v23 = vmul.f32 %v9304_v16, %v17065_v29  ;;  %v8452_v36 = vrot.slane %v8326_v14, %v12883_v7 }
 0x385   : > { %v8876_v54 = vrot.slane %v8750_v55, %v12883_v7  ;;  %v9391_v56 = vadd.f32 %v9359_v58, %v8967_v53  ;;  %v8976_v13 = vadd.f32 %v8944_v9, %v8552_v11  ;;  %v9300_v52 = vrot.slane %v9174_v59, %v12883_v7  ;;  %v11957_v7 = vld [vmem:[%s14475_s5 + $0x20] sm:$0xff]  ;;  %s12735_s5 = scalar_lea.vmem %s16828_s27, 128 }
 0x386   : > { %v8095_v20 = vmul.f32 %v8028_v5, %v17057_v1  ;;  %v8519_v34 = vmul.f32 %v8452_v36, %v17058_v15  ;;  %p12736_p11 = scmp.ne.s32.totalorder %s16828_s27, %s12735_s5  ;;  %p12743_p1 = scmp.lt.s32.totalorder %s12741_s7, %s12735_s5 }
 0x387   : > { %v8943_v24 = vmul.f32 %v8876_v54, %v17064_v32  ;;  %9423 = vst.msk [vmem:[#allocation2 + $0x1c0] sm:$0xff] %vm3520_vm0, %v9391_v56  ;;  %v9400_v50 = vadd.f32 %v9368_v23, %v8976_v13  ;;  %v9367_v46 = vmul.f32 %v9300_v52, %v17065_v29 }
 0x388   : > { %v8551_v21 = vadd.f32 %v8519_v34, %v8095_v20  ;;  %p12737_p12 = pnand %p12736_p11, %p12859_p5  ;;  %p12744_p2 = por %p12743_p1, %p12742_p0 }
 0x389   : > { %v12039_v4 = vld [vmem:[#allocation2 + $0x270] sm:$0xff]  ;;  %9432 = vst.msk [vmem:[#allocation2 + $0x268] sm:$0xff] %vm3520_vm0, %v9400_v50 }
 0x38a   : > { %12323 = vmatpush2.msra.mxu1 %v12039_v4  ;;  %v8975_v51 = vadd.f32 %v8943_v24, %v8551_v21  ;;  %p12738_p13 = pneg %p12737_p12 }
 0x38b   : > { %12324 = vmatprep.subr.mxu1 %v16954_v37 }
 0x38c   : > { %v9399_v26 = vadd.f32 %v9367_v46, %v8975_v51  ;;  %p12745_p3 = pnand %p12744_p2, %p12738_p13 }
 0x38e   : > { %v12017_v8 = vld [vmem:[#allocation2 + $0x1c0] sm:$0xff]  ;;  %9431 = vst.msk [vmem:[#allocation2 + $0x260] sm:$0xff] %vm3520_vm0, %v9399_v26  ;;  %vm12799_vm0 = vmmov 0  }
 0x38f   : > { %12254 = vmatpush2.msra.mxu0 %v12017_v8 }
 0x390   : > { %v12038_v41 = vld [vmem:[#allocation2 + $0x268] sm:$0xff]  ;;  %12256 = vmatmul.mubr.f32.vlgmr.msra.gmra.mxu0 %v11957_v7  ;;  %12682 = vmatprep.subr.mxu0 %v16954_v37 }
 0x391   : > { %12325 = vmatpush2.msra.mxu1 %v12038_v41  ;;  %12683 = vmatpush3.msra.mxu0 %v12337_v31 }
 0x392   : > { %12326 = vmatprep.subr.mxu1 %v16954_v37  ;;  %12690 = vmatprep.mubr.msk.f32.mxu0 %vm12799_vm0, %v16954_v37 }
 0x393   : > { %12684 = vmatprep.subr.mxu0 %v16954_v37 }
 0x394   : > { %12685 = vmatpush3.msra.mxu0 %v12336_v33 }
 0x395   : > { %v12037_v2 = vld [vmem:[#allocation2 + $0x260] sm:$0xff]  ;;  %12686 = vmatprep.subr.mxu0 %v16954_v37 }
 0x396   : > { %12327 = vmatpush2.msra.mxu1 %v12037_v2  ;;  %12687 = vmatpush3.msra.mxu0 %v12335_v43 }
 0x397   : > { %12329 = vmatmul.mubr.f32.vlgmr.msra.gmra.mxu1 %v11959_v28  ;;  %12688 = vmatprep.subr.mxu0 %v16954_v37 }
 0x398   : > { %12689 = vmatpush3.msra.mxu0 %v12334_v60 }
 0x450   : > { %v12257_v45 = vpop.f32.mrf.mxu0 }
 0x451   : > { %12340 = vxpose.xlu0.b32.cont [3/4] (short) (narrow) %v12257_v45, 8 }
 0x452   : > { %v12259_v25 = vpop.f32.mrf.mxu0 }
 0x457   : > { %v12330_v10 = vpop.f32.mrf.mxu1 }
 0x458   : > { %12341 = vxpose.xlu0.b32.end [4/4] (short) (narrow) %v12330_v10, 8 }
 0x459   : > { %v12332_v49 = vpop.f32.mrf.mxu1 }
 0x4c8   : > { %v12354_v19 = vpop.trf.xlu0 }
 0x4c9   : > { %12691 = vmatmul.mubr.msk.f32.vlgmr.msra.gmra.mxu0 %vm12041_vm12, %v12354_v19 }
 0x589   : > { %v12439_v37 = vpop.f32.mrf.mxu0 }
 0x58a   : > { %12443 = vst.msk [vmem:[%s178_s26] sm:$0xff] %vm12041_vm12, %v12439_v37 }
 0x58b   : > { %v12692_v12 = vpop.f32.mrf.mxu0 }
 0x58c   : > { %12748 = shalt.err (!%p12745_p3)
}
 0x58d   : > { %s12749_s8 = scalar_lea.hbm %s16826_s30, 128  ;;  %s12753_s11 = scalar_lea.hbm %s16871_s3, 256 }
 0x58e   : > { %p12750_p4 = scmp.ne.s32.totalorder %s16826_s30, %s12749_s8  ;;  %p12754_p9 = scmp.lt.s32.totalorder %s16826_s30, %s16871_s3 }
 0x58f   : > { %p12755_p10 = scmp.lt.s32.totalorder %s12753_s11, %s12749_s8 }
 0x590   : > { %p12751_p7 = pnand %p12750_p4, %p12859_p5 }
 0x591   : > { %p12756_p11 = por %p12755_p10, %p12754_p9 }
 0x592   : > { %p12752_p8 = pneg %p12751_p7 }
 0x594   : > { %p12757_p12 = pnand %p12756_p11, %p12752_p8 }
 0x596   : > { %12760 = shalt.err (!%p12757_p12)
}
 0x597   : > { %12693 = dma.vmem_to_hbm [thread:$0]  (%p12859_p5), %s16828_s27, 128, %s16826_s30, %s12445_s4  }
 0x598 PF: > { %p12699_p13 = scmp.ge.s32.totalorder %s12795_s15, 2  ;;  %s12470_s20 = sand.u32 1, %s12783_s12  }
 0x599   : > { %s12471_s24 = scalar_lea.sflag [#allocation4], %s12470_s20 }
 0x59a   : > { %p12696_p0 = pnand %p12699_p13, %p12863_p6 }
 0x59c   : > { %p12697_p1 = pneg %p12696_p0 }
 0x59e   : > { %12778 = dma.done.wait (%p12697_p1), %s12471_s24, 128  }
 0x59f   : > { %12780 = vsyncadd (%p12697_p1), %s12471_s24, 4294967168  ;;  %p13_p2 = scmp.ge.s32.totalorder %s12846_s18, 4   ;;  %s17066_s12 = smov %s12787_s13 }
 0x5a0   : > { %s17067_s13 = smov %s12791_s14  ;;  %s17068_s14 = smov %s12857_s21 }
 0x5a1   : > { %s17069_s15 = smov %s12846_s18  ;;  %15 = sbr.rel (!%p13_p2) target bundleno = 3 (0x3), region = 70 }
 0x5a6   :  { %12476 = vsyncpa [#allocation4], 1 }
 0x5a7   :  { %12478 = vsyncpa [#allocation4 + $0x1], 1 }

</bundles_post_ra>
